<compile_context>
chip_gen: v5e
topology: v5e:2x2
jax: 0.10.0
libtpu: 0.0.40
codegen_flags: <defaults>
</compile_context>

<pallas_src>
import functools

import jax
import jax.numpy as jnp
from jax.experimental import pallas as pl
from jax.experimental.pallas import tpu as pltpu

EPS = 1e-5
K = 4          # ConvTranspose2d kernel size
STRIDE = 2
PAD = 1
CP = 128       # channel padding -> lane-dense matmuls and stores
VMEM_LIMIT = 32 * 1024 * 1024


# ------------------------------ kernel helpers ------------------------------ #

def _bn_rows(y):
    """Train-mode BatchNorm over rows (biased var), gamma=1, beta=0, f32 math."""
    n = y.shape[0]
    mean = jnp.sum(y, axis=0, keepdims=True) * (1.0 / n)
    meansq = jnp.sum(y * y, axis=0, keepdims=True) * (1.0 / n)
    var = jnp.maximum(meansq - mean * mean, 0.0)      # one-pass, clamp fp error
    scale = jax.lax.rsqrt(var + EPS)
    return (y - mean) * scale


# ----------------------------- Pallas kernels ------------------------------- #

def _fc_kernel(x_ref, w1_ref, b1_ref, w2_ref, b2_ref, o_ref):
    """Linear -> BN1d(train) -> ReLU -> Linear -> BN1d -> ReLU (fused)."""
    x = x_ref[...].astype(jnp.bfloat16)
    h = jnp.dot(x, w1_ref[...], preferred_element_type=jnp.float32) + b1_ref[...]
    h = jnp.maximum(_bn_rows(h), 0.0)
    h2 = jnp.dot(h.astype(jnp.bfloat16), w2_ref[...],
                 preferred_element_type=jnp.float32) + b2_ref[...]
    o_ref[...] = jnp.maximum(_bn_rows(h2), 0.0)


def _deconv_bn_relu_kernel(u_ref, w_ref, b_ref, o_ref, *, oh, ow):
    """ConvTranspose2d (16 in-kernel shifted matmuls) -> BN2d(train) -> ReLU."""
    b = u_ref.shape[0]
    rows = b * oh * ow
    acc = jnp.zeros((rows, CP), jnp.float32)
    for kh in range(K):
        for kw in range(K):
            patch = u_ref[:, pl.ds(kh, oh), pl.ds(kw, ow), :].reshape(rows, CP)
            acc = acc + jnp.dot(patch.astype(jnp.bfloat16), w_ref[kh * K + kw],
                                preferred_element_type=jnp.float32)
    acc = acc + b_ref[...]
    o_ref[...] = jnp.maximum(_bn_rows(acc), 0.0)


def _deconv_tanh_kernel(u_ref, w_ref, b_ref, o_ref, *, oh, ow):
    """ConvTranspose2d (16 in-kernel shifted matmuls) -> Tanh.  One batch/step."""
    rows = oh * ow
    acc = jnp.zeros((rows, CP), jnp.float32)
    for kh in range(K):
        for kw in range(K):
            patch = u_ref[:, pl.ds(kh, oh), pl.ds(kw, ow), :].reshape(rows, CP)
            acc = acc + jnp.dot(patch.astype(jnp.bfloat16), w_ref[kh * K + kw],
                                preferred_element_type=jnp.float32)
    o_ref[...] = jnp.tanh(acc + b_ref[...])


# --------------------------- JAX-side glue helpers --------------------------- #

def _upsample_pad(x_nhwc):
    """Zero-upsample (stride 2) + pad so ConvT(4,2,1) becomes a regular conv."""
    B, H, W, C = x_nhwc.shape
    uh, uw = STRIDE * (H - 1) + 1, STRIDE * (W - 1) + 1
    u = jnp.zeros((B, uh, uw, C), x_nhwc.dtype)
    u = u.at[:, ::STRIDE, ::STRIDE, :].set(x_nhwc)
    pp = K - 1 - PAD
    u = jnp.pad(u, ((0, 0), (pp, pp), (pp, pp), (0, 0)))
    oh = (H - 1) * STRIDE - 2 * PAD + K
    return u, oh


def _convT_weight_shifts(wt, cin_pad, cout_pad):
    """PyTorch ConvTranspose2d weight (Cin, Cout, k, k) -> (k*k, cin_pad, cout_pad)
    bf16 per-shift matrices of the flipped kernel (regular-conv formulation)."""
    Cin, Cout, k, _ = wt.shape
    wf = wt[:, :, ::-1, ::-1]                            # flip kernel
    w = jnp.transpose(wf, (2, 3, 0, 1)).reshape(k * k, Cin, Cout)
    w = jnp.pad(w, ((0, 0), (0, cin_pad - Cin), (0, cout_pad - Cout)))
    return w.astype(jnp.bfloat16)


# --------------------------------- Model ------------------------------------ #

class Generator:
    def __init__(self, latent_dim, n_class, img_shape, key):
        self.latent_dim = latent_dim
        self.n_class = n_class
        self.img_shape = img_shape
        C, img_size = img_shape[0], img_shape[1]
        self.C = C
        self.img_size = img_size
        s4 = img_size // 4
        self.s4 = s4
        f2 = 128 * s4 * s4
        self.f2 = f2
        self.k_in = latent_dim + n_class
        self.k_pad = max(128, ((self.k_in + 127) // 128) * 128)

        ks = jax.random.split(key, 5)
        # nn.Embedding default init: N(0, 1)
        self.emb_w = jax.random.normal(ks[0], (n_class, n_class), jnp.float32)
        # Linear / ConvTranspose2d weights: N(0, 0.02); biases zero.
        w1 = 0.02 * jax.random.normal(ks[1], (self.k_in, 1024), jnp.float32)
        # Zero-pad the contraction dim to 128 (lane/sublane aligned, same math).
        self.w1 = jnp.pad(w1, ((0, self.k_pad - self.k_in), (0, 0))).astype(jnp.bfloat16)
        self.b1 = jnp.zeros((1, 1024), jnp.float32)

        w2 = 0.02 * jax.random.normal(ks[2], (1024, f2), jnp.float32)
        # Fold the NCHW view(-1,128,s4,s4) -> NHWC layout change into w2's
        # columns: output feature order becomes (h, w, c).  BN1d is per-feature
        # with identity affine params, so the permutation is exact.
        w2 = w2.reshape(1024, 128, s4, s4).transpose(0, 2, 3, 1).reshape(1024, f2)
        self.w2 = w2.astype(jnp.bfloat16)
        self.b2 = jnp.zeros((1, f2), jnp.float32)

        wd1 = 0.02 * jax.random.normal(ks[3], (128, 64, K, K), jnp.float32)
        wd2 = 0.02 * jax.random.normal(ks[4], (64, C, K, K), jnp.float32)
        # Per-shift flipped-kernel matrices, channel-padded to 128 lanes.
        # Padded output channels stay exactly 0 through BN/ReLU and contribute
        # nothing downstream (matching zero weight rows in the next stage).
        self.wd1 = _convT_weight_shifts(wd1, 128, CP)    # (16, 128, 128) bf16
        self.bd1 = jnp.zeros((1, CP), jnp.float32)
        self.wd2 = _convT_weight_shifts(wd2, CP, CP)     # (16, 128, 128) bf16
        self.bd2 = jnp.zeros((1, CP), jnp.float32)

    def __call__(self, z, label):
        B = z.shape[0]
        cparams = pltpu.CompilerParams(vmem_limit_bytes=VMEM_LIMIT)

        # Embedding lookup + concat + lane padding (thin JAX glue).
        emb = self.emb_w[label]                                   # (B, n_class)
        x = jnp.concatenate([z, emb], axis=1)                     # (B, k_in)
        x = jnp.pad(x, ((0, 0), (0, self.k_pad - self.k_in)))     # (B, 128)

        # fc stack: fused Linear+BN1d+ReLU x2.  BN needs whole-batch statistics,
        # so the (tiny) batch stays resident in VMEM.
        fc_out = pl.pallas_call(
            _fc_kernel,
            out_shape=jax.ShapeDtypeStruct((B, self.f2), jnp.float32),
            in_specs=[pl.BlockSpec(memory_space=pltpu.MemorySpace.VMEM)] * 5,
            out_specs=pl.BlockSpec(memory_space=pltpu.MemorySpace.VMEM),
            compiler_params=cparams,
        )(x, self.w1, self.b1, self.w2, self.b2)

        # Already NHWC thanks to the pre-permuted w2 columns (no transpose).
        feat = fc_out.reshape(B, self.s4, self.s4, 128)

        # Stage 1: ConvT(128->64,4,2,1) + BN2d + ReLU.  ConvT fused in-kernel as
        # 16 shifted matmuls over the zero-upsampled map (no HBM im2col).
        # TODO(synk): at large B*H*W, row-tile this stage and add a cross-tile
        # sum/sum-sq reduction for the BatchNorm statistics.
        u1, oh1 = _upsample_pad(feat)
        h1 = pl.pallas_call(
            functools.partial(_deconv_bn_relu_kernel, oh=oh1, ow=oh1),
            out_shape=jax.ShapeDtypeStruct((B * oh1 * oh1, CP), jnp.float32),
            in_specs=[pl.BlockSpec(memory_space=pltpu.MemorySpace.VMEM)] * 3,
            out_specs=pl.BlockSpec(memory_space=pltpu.MemorySpace.VMEM),
            compiler_params=cparams,
        )(u1, self.wd1, self.bd1)
        feat1 = h1.reshape(B, oh1, oh1, CP)          # channels 64..127 are zero

        # Stage 2: ConvT(64->C,4,2,1) + Tanh.  No BN -> batch-tiled grid is
        # exact; "parallel" axis lets the two v7x TensorCores split batches,
        # BlockSpec double-buffers the per-batch feature-map DMA.  Cout padded
        # to 128 so the matmul and stores are lane-dense; real channel sliced
        # outside.
        u2, oh2 = _upsample_pad(feat1)
        UH2 = u2.shape[1]
        h2 = pl.pallas_call(
            functools.partial(_deconv_tanh_kernel, oh=oh2, ow=oh2),
            out_shape=jax.ShapeDtypeStruct((B * oh2 * oh2, CP), jnp.float32),
            grid=(B,),
            in_specs=[
                pl.BlockSpec((1, UH2, UH2, CP), lambda i: (i, 0, 0, 0)),
                pl.BlockSpec((K * K, CP, CP), lambda i: (0, 0, 0)),
                pl.BlockSpec((1, CP), lambda i: (0, 0)),
            ],
            out_specs=pl.BlockSpec((oh2 * oh2, CP), lambda i: (i, 0)),
            compiler_params=pltpu.CompilerParams(
                dimension_semantics=("parallel",),
                vmem_limit_bytes=VMEM_LIMIT),
        )(u2, self.wd2, self.bd2)

        out = h2[:, :self.C].reshape(B, oh2, oh2, self.C)
        return out.transpose(0, 3, 1, 2)                           # NCHW


if __name__ == "__main__":
    latent_dim, n_class = 16, 4
    C, img_size = 1, 16
    B = 4

    key = jax.random.PRNGKey(0)
    k_params, k_z, k_lbl = jax.random.split(key, 3)

    gen = Generator(latent_dim, n_class, (C, img_size, img_size), k_params)
    z = jax.random.normal(k_z, (B, latent_dim), jnp.float32)
    label = jax.random.randint(k_lbl, (B,), 0, n_class)

    out = gen(z, label)
    jax.block_until_ready(out)

    assert out.shape == (B, C, img_size, img_size), out.shape
    assert bool(jnp.all(jnp.isfinite(out)))
    assert bool(jnp.all(jnp.abs(out) <= 1.0 + 1e-6))   # tanh output range
    print("KERNEL_OK")
</pallas_src>

<mosaic_0001>
module attributes {stable_mosaic.version = 11 : i64} {
  func.func @_fc_kernel(%arg0: memref<4x128xf32, #tpu.memory_space<vmem>>, %arg1: memref<128x1024xbf16, #tpu.memory_space<vmem>>, %arg2: memref<1x1024xf32, #tpu.memory_space<vmem>>, %arg3: memref<1024x2048xbf16, #tpu.memory_space<vmem>>, %arg4: memref<1x2048xf32, #tpu.memory_space<vmem>>, %arg5: memref<4x2048xf32, #tpu.memory_space<vmem>>) attributes {dimension_semantics = [], scalar_prefetch = 0 : i64, scratch_operands = 0 : i64, tpu.core_type = #tpu.core_type<tc>} {
    %c0 = arith.constant 0 : index
    %c0_0 = arith.constant 0 : index
    %0 = vector.load %arg0[%c0, %c0_0] : memref<4x128xf32, #tpu.memory_space<vmem>>, vector<4x128xf32>
    %1 = arith.truncf %0 : vector<4x128xf32> to vector<4x128xbf16>
    %c0_1 = arith.constant 0 : index
    %c0_2 = arith.constant 0 : index
    %2 = vector.load %arg1[%c0_1, %c0_2] : memref<128x1024xbf16, #tpu.memory_space<vmem>>, vector<128x1024xbf16>
    %cst = arith.constant dense<0.000000e+00> : vector<4x1024xf32>
    %3 = tpu.matmul %1, %2, %cst {dimension_numbers = #tpu.dot_dimension_numbers<[1], [0], [0], [1], [0, 0, 1, 1], [], []>} : vector<4x128xbf16>, vector<128x1024xbf16>, vector<4x1024xf32> -> vector<4x1024xf32>
    %c0_3 = arith.constant 0 : index
    %c0_4 = arith.constant 0 : index
    %4 = vector.load %arg2[%c0_3, %c0_4] : memref<1x1024xf32, #tpu.memory_space<vmem>>, vector<1x1024xf32>
    %5 = vector.broadcast %4 : vector<1x1024xf32> to vector<4x1024xf32>
    %6 = arith.addf %3, %5 : vector<4x1024xf32>
    %cst_5 = arith.constant dense<0.000000e+00> : vector<1024xf32>
    %7 = vector.multi_reduction <add>, %6, %cst_5 [0] : vector<4x1024xf32> to vector<1024xf32>
    %8 = vector.shape_cast %7 : vector<1024xf32> to vector<1x1024xf32>
    %cst_6 = arith.constant 2.500000e-01 : f32
    %9 = vector.broadcast %cst_6 : f32 to vector<1x1024xf32>
    %10 = arith.mulf %8, %9 : vector<1x1024xf32>
    %11 = arith.mulf %6, %6 : vector<4x1024xf32>
    %cst_7 = arith.constant dense<0.000000e+00> : vector<1024xf32>
    %12 = vector.multi_reduction <add>, %11, %cst_7 [0] : vector<4x1024xf32> to vector<1024xf32>
    %13 = vector.shape_cast %12 : vector<1024xf32> to vector<1x1024xf32>
    %cst_8 = arith.constant 2.500000e-01 : f32
    %14 = vector.broadcast %cst_8 : f32 to vector<1x1024xf32>
    %15 = arith.mulf %13, %14 : vector<1x1024xf32>
    %16 = arith.mulf %10, %10 : vector<1x1024xf32>
    %17 = arith.subf %15, %16 : vector<1x1024xf32>
    %cst_9 = arith.constant 0.000000e+00 : f32
    %18 = vector.broadcast %cst_9 : f32 to vector<1x1024xf32>
    %19 = arith.maximumf %17, %18 : vector<1x1024xf32>
    %cst_10 = arith.constant 9.99999974E-6 : f32
    %20 = vector.broadcast %cst_10 : f32 to vector<1x1024xf32>
    %21 = arith.addf %19, %20 : vector<1x1024xf32>
    %22 = math.rsqrt %21 : vector<1x1024xf32>
    %23 = vector.broadcast %10 : vector<1x1024xf32> to vector<4x1024xf32>
    %24 = arith.subf %6, %23 : vector<4x1024xf32>
    %25 = vector.broadcast %22 : vector<1x1024xf32> to vector<4x1024xf32>
    %26 = arith.mulf %24, %25 : vector<4x1024xf32>
    %cst_11 = arith.constant 0.000000e+00 : f32
    %27 = vector.broadcast %cst_11 : f32 to vector<4x1024xf32>
    %28 = arith.maximumf %26, %27 : vector<4x1024xf32>
    %29 = arith.truncf %28 : vector<4x1024xf32> to vector<4x1024xbf16>
    %c0_12 = arith.constant 0 : index
    %c0_13 = arith.constant 0 : index
    %30 = vector.load %arg3[%c0_12, %c0_13] : memref<1024x2048xbf16, #tpu.memory_space<vmem>>, vector<1024x2048xbf16>
    %cst_14 = arith.constant dense<0.000000e+00> : vector<4x2048xf32>
    %31 = tpu.matmul %29, %30, %cst_14 {dimension_numbers = #tpu.dot_dimension_numbers<[1], [0], [0], [1], [0, 0, 1, 1], [], []>} : vector<4x1024xbf16>, vector<1024x2048xbf16>, vector<4x2048xf32> -> vector<4x2048xf32>
    %c0_15 = arith.constant 0 : index
    %c0_16 = arith.constant 0 : index
    %32 = vector.load %arg4[%c0_15, %c0_16] : memref<1x2048xf32, #tpu.memory_space<vmem>>, vector<1x2048xf32>
    %33 = vector.broadcast %32 : vector<1x2048xf32> to vector<4x2048xf32>
    %34 = arith.addf %31, %33 : vector<4x2048xf32>
    %cst_17 = arith.constant dense<0.000000e+00> : vector<2048xf32>
    %35 = vector.multi_reduction <add>, %34, %cst_17 [0] : vector<4x2048xf32> to vector<2048xf32>
    %36 = vector.shape_cast %35 : vector<2048xf32> to vector<1x2048xf32>
    %cst_18 = arith.constant 2.500000e-01 : f32
    %37 = vector.broadcast %cst_18 : f32 to vector<1x2048xf32>
    %38 = arith.mulf %36, %37 : vector<1x2048xf32>
    %39 = arith.mulf %34, %34 : vector<4x2048xf32>
    %cst_19 = arith.constant dense<0.000000e+00> : vector<2048xf32>
    %40 = vector.multi_reduction <add>, %39, %cst_19 [0] : vector<4x2048xf32> to vector<2048xf32>
    %41 = vector.shape_cast %40 : vector<2048xf32> to vector<1x2048xf32>
    %cst_20 = arith.constant 2.500000e-01 : f32
    %42 = vector.broadcast %cst_20 : f32 to vector<1x2048xf32>
    %43 = arith.mulf %41, %42 : vector<1x2048xf32>
    %44 = arith.mulf %38, %38 : vector<1x2048xf32>
    %45 = arith.subf %43, %44 : vector<1x2048xf32>
    %cst_21 = arith.constant 0.000000e+00 : f32
    %46 = vector.broadcast %cst_21 : f32 to vector<1x2048xf32>
    %47 = arith.maximumf %45, %46 : vector<1x2048xf32>
    %cst_22 = arith.constant 9.99999974E-6 : f32
    %48 = vector.broadcast %cst_22 : f32 to vector<1x2048xf32>
    %49 = arith.addf %47, %48 : vector<1x2048xf32>
    %50 = math.rsqrt %49 : vector<1x2048xf32>
    %51 = vector.broadcast %38 : vector<1x2048xf32> to vector<4x2048xf32>
    %52 = arith.subf %34, %51 : vector<4x2048xf32>
    %53 = vector.broadcast %50 : vector<1x2048xf32> to vector<4x2048xf32>
    %54 = arith.mulf %52, %53 : vector<4x2048xf32>
    %cst_23 = arith.constant 0.000000e+00 : f32
    %55 = vector.broadcast %cst_23 : f32 to vector<4x2048xf32>
    %56 = arith.maximumf %54, %55 : vector<4x2048xf32>
    %c0_24 = arith.constant 0 : index
    %c0_25 = arith.constant 0 : index
    %57 = vector.load %arg5[%c0_24, %c0_25] : memref<4x2048xf32, #tpu.memory_space<vmem>>, vector<4x2048xf32>
    tpu.vector_store %arg5[%c0_24, %c0_25], %56 {strides = array<i32>} : memref<4x2048xf32, #tpu.memory_space<vmem>>, vector<4x2048xf32>,
    return
  }
}

</mosaic_0001>

<bundles_post_ra>
// kernel: tpu_custom_call.1
= control target key start
LH: loop header
LB: loop body
LE: loop exit
PB: predicated region body
PF: predicated region fallthrough
CT: control target
= control target key end

     0   :  { %10 = vsyncpa [#allocation3], 0  ;;  %s16017_s0 = inlined_call_operand.hbm [shape: f32[4,128], index: 0, kind: input, shape index: {}]   ;;  %s16018_s1 = inlined_call_operand.hbm [shape: bf16[128,1024], index: 1, kind: input, shape index: {}]   ;;  %s16019_s2 = inlined_call_operand.hbm [shape: f32[1,1024], index: 2, kind: input, shape index: {}]   ;;  %s16020_s3 = inlined_call_operand.hbm [shape: bf16[1024,2048], index: 3, kind: input, shape index: {}]   ;;  %s16021_s4 = inlined_call_operand.hbm [shape: f32[1,2048], index: 4, kind: input, shape index: {}]   ;;  %s16022_s5 = inlined_call_operand.hbm [shape: f32[4,2048], index: 5, kind: output, shape index: {}]  }
   0x1   :  { %11 = vsyncpa [#allocation6], 0 }
   0x2   :  { %12 = vsyncpa [#allocation9], 0  ;;  %s29_s20 = sshll.u32 %s16018_s1, 4  ;;  %s30_s20 = int_to_ptr.hbm [resolvable:$true] %s29_s20 }
   0x3   :  { %13 = vsyncpa [#allocation4], 0  ;;  %s14993_s21 = smov [#allocation5]   ;;  %s53_s25 = sshll.u32 %s16020_s3, 4  ;;  %s54_s25 = int_to_ptr.hbm [resolvable:$true] %s53_s25 }
   0x4   :  { %s31_s22 = sshll.u32 %s14993_s21, 4  ;;  %s14994_s26 = smov 512   ;;  %s32_s22 = int_to_ptr.vmem [resolvable:$true] %s31_s22 }
   0x5   :  { %s14995_s27 = smov 32   ;;  %s14996_s28 = smov [#allocation8]  }
   0x6   :  { %37 = dma.hbm_to_vmem [thread:$0]  %s30_s20, 8192, %s32_s22, [#allocation6], %s14994_s26, %s14994_s26, %s14995_s27  }
   0x7   :  { %s55_s29 = sshll.u32 %s14996_s28, 4  ;;  %s14997_s30 = smov 1024   ;;  %s56_s29 = int_to_ptr.vmem [resolvable:$true] %s55_s29 }
   0x8   :  { %s14998_s6 = smov 64   ;;  %s19_s8 = sshll.u32 %s16017_s0, 4  ;;  %s20_s8 = int_to_ptr.hbm [resolvable:$true] %s19_s8 }
   0x9   :  { %61 = dma.hbm_to_vmem [thread:$0]  %s54_s25, 131072, %s56_s29, [#allocation9], %s14997_s30, %s14997_s30, %s14998_s6  }
   0xa   :  { %s14999_s9 = smov [#allocation2]   ;;  %s43_s12 = sshll.u32 %s16019_s2, 4  ;;  %s44_s12 = int_to_ptr.hbm [resolvable:$true] %s43_s12 }
   0xb   :  { %s21_s10 = sshll.u32 %s14999_s9, 4  ;;  %s15000_s13 = smov [#allocation7]   ;;  %s22_s10 = int_to_ptr.vmem [resolvable:$true] %s21_s10 }
   0xc   :  { %24 = dma.hbm_to_vmem [thread:$0]  %s20_s8, 64, %s22_s10, [#allocation3]  }
   0xd   :  { %s45_s14 = sshll.u32 %s15000_s13, 4  ;;  %s67_s17 = sshll.u32 %s16021_s4, 4  ;;  %s46_s14 = int_to_ptr.vmem [resolvable:$true] %s45_s14  ;;  %s68_s17 = int_to_ptr.hbm [resolvable:$true] %s67_s17 }
   0xe   :  { %48 = dma.hbm_to_vmem [thread:$0]  %s44_s12, 128, %s46_s14, [#allocation6]  }
   0xf   :  { %s15001_s0 = smov [#allocation10]  }
  0x10   :  { %s69_s18 = sshll.u32 %s15001_s0, 4  ;;  %s70_s18 = int_to_ptr.vmem [resolvable:$true] %s69_s18 }
  0x11   :  { %72 = dma.hbm_to_vmem [thread:$0]  %s68_s17, 256, %s70_s18, [#allocation9]  }
  0x12   :  { %14985 = dma.done.wait [#allocation3], 64  }
  0x13   :  { %14986 = vsyncadd [#allocation3], 4294967232 }
  0x14   :  { %14987 = dma.done.wait [#allocation6], 8320  }
  0x15   :  { %14988 = vsyncadd [#allocation6], 4294958976 }
  0x16   :  { %14989 = dma.done.wait [#allocation9], 131328  }
  0x17   :  { %14990 = vsyncadd [#allocation9], 4294835968  ;;  %v9563_v0 = vld [vmem:[#allocation5 + $0x1c0] sm:$0xf]  ;;  %v13745_v2 = vld [vmem:[#allocation5 + $0x1c4] sm:$0xf] }
  0x18   :  { %v13749_v1 = vld [vmem:[#allocation5 + $0x1dc] sm:$0xf0]  ;;  %v9565_v4 = vld [vmem:[#allocation5 + $0x1e0] sm:$0xf0]  ;;  %v9571_v5 = vld [vmem:[#allocation5 + $0x1c8] sm:$0xf] }
  0x19   :  { %v9564_v3 = vor.u32 %v13749_v1, %v9563_v0  ;;  %v13750_v6 = vld [vmem:[#allocation5 + $0x1e4] sm:$0xf0]  ;;  %v9568_v7 = vor.u32 %v13745_v2, %v9565_v4  ;;  %v13746_v9 = vld [vmem:[#allocation5 + $0x1cc] sm:$0xf]  ;;  %v9531_v11 = vld [vmem:[#allocation5 + $0x180] sm:$0xf] }
  0x1a   :  { %v9572_v8 = vor.u32 %v13750_v6, %v9571_v5  ;;  %v9573_v10 = vld [vmem:[#allocation5 + $0x1e8] sm:$0xf0]  ;;  %v13741_v13 = vld [vmem:[#allocation5 + $0x19c] sm:$0xf0]  ;;  %v13737_v14 = vld [vmem:[#allocation5 + $0x184] sm:$0xf] }
  0x1b   :  { %497 = vmatpush.bf16.msra.mxu0 %v9564_v3  ;;  %v9576_v12 = vor.u32 %v13746_v9, %v9573_v10  ;;  %v9533_v15 = vld [vmem:[#allocation5 + $0x1a0] sm:$0xf0]  ;;  %510 = vmatpush.bf16.msra.mxu1 %v9568_v7  ;;  %v9532_v16 = vor.u32 %v13741_v13, %v9531_v11  ;;  %v9539_v18 = vld [vmem:[#allocation5 + $0x188] sm:$0xf]  ;;  %v13738_v20 = vld [vmem:[#allocation5 + $0x18c] sm:$0xf] }
  0x1c   :  { %523 = vmatpush.bf16.msra.mxu2 %v9572_v8  ;;  %v9536_v17 = vor.u32 %v13737_v14, %v9533_v15  ;;  %v13742_v19 = vld [vmem:[#allocation5 + $0x1a4] sm:$0xf0]  ;;  %v9541_v22 = vld [vmem:[#allocation5 + $0x1a8] sm:$0xf0]  ;;  %v9499_v23 = vld [vmem:[#allocation5 + $0x140] sm:$0xf] }
  0x1d   :  { %536 = vmatpush.bf16.msra.mxu3 %v9576_v12  ;;  %v9540_v21 = vor.u32 %v13742_v19, %v9539_v18  ;;  %v13733_v24 = vld [vmem:[#allocation5 + $0x15c] sm:$0xf0]  ;;  %v9544_v25 = vor.u32 %v13738_v20, %v9541_v22  ;;  %v13729_v26 = vld [vmem:[#allocation5 + $0x144] sm:$0xf]  ;;  %v9507_v28 = vld [vmem:[#allocation5 + $0x148] sm:$0xf] }
  0x1e   :  { %v9501_v27 = vld [vmem:[#allocation5 + $0x160] sm:$0xf0]  ;;  %v9500_v29 = vor.u32 %v13733_v24, %v9499_v23  ;;  %v13734_v30 = vld [vmem:[#allocation5 + $0x164] sm:$0xf0]  ;;  %v13730_v31 = vld [vmem:[#allocation5 + $0x14c] sm:$0xf] }
  0x1f   :  { %498 = vmatpush.bf16.msra.mxu0 %v9532_v16  ;;  %v9509_v32 = vld [vmem:[#allocation5 + $0x168] sm:$0xf0]  ;;  %511 = vmatpush.bf16.msra.mxu1 %v9536_v17  ;;  %v9504_v33 = vor.u32 %v13729_v26, %v9501_v27  ;;  %v9508_v34 = vor.u32 %v13734_v30, %v9507_v28  ;;  %v9467_v35 = vld [vmem:[#allocation5 + $0x100] sm:$0xf]  ;;  %v13721_v37 = vld [vmem:[#allocation5 + $0x104] sm:$0xf] }
  0x20   :  { %524 = vmatpush.bf16.msra.mxu2 %v9540_v21  ;;  %v13725_v36 = vld [vmem:[#allocation5 + $0x11c] sm:$0xf0]  ;;  %v9512_v38 = vor.u32 %v13730_v31, %v9509_v32  ;;  %v9469_v39 = vld [vmem:[#allocation5 + $0x120] sm:$0xf0]  ;;  %v9475_v40 = vld [vmem:[#allocation5 + $0x108] sm:$0xf] }
  0x21   :  { %537 = vmatpush.bf16.msra.mxu3 %v9544_v25  ;;  %v13726_v41 = vld [vmem:[#allocation5 + $0x124] sm:$0xf0]  ;;  %v13722_v42 = vld [vmem:[#allocation5 + $0x10c] sm:$0xf]  ;;  %v9468_v44 = vor.u32 %v13725_v36, %v9467_v35  ;;  %v9472_v45 = vor.u32 %v13721_v37, %v9469_v39  ;;  %v9435_v47 = vld [vmem:[#allocation5 + $0xc0] sm:$0xf] }
  0x22   :  { %v9477_v43 = vld [vmem:[#allocation5 + $0x128] sm:$0xf0]  ;;  %v9476_v46 = vor.u32 %v13726_v41, %v9475_v40  ;;  %v13717_v48 = vld [vmem:[#allocation5 + $0xdc] sm:$0xf0]  ;;  %v13713_v49 = vld [vmem:[#allocation5 + $0xc4] sm:$0xf] }
  0x23   :  { %499 = vmatpush.bf16.msra.mxu0 %v9500_v29  ;;  %512 = vmatpush.bf16.msra.mxu1 %v9504_v33  ;;  %v9480_v50 = vor.u32 %v13722_v42, %v9477_v43  ;;  %v9437_v51 = vld [vmem:[#allocation5 + $0xe0] sm:$0xf0]  ;;  %v9443_v52 = vld [vmem:[#allocation5 + $0xc8] sm:$0xf]  ;;  %v13714_v54 = vld [vmem:[#allocation5 + $0xcc] sm:$0xf]  ;;  %v9436_v56 = vor.u32 %v13717_v48, %v9435_v47 }
  0x24   :  { %525 = vmatpush.bf16.msra.mxu2 %v9508_v34  ;;  %v13718_v53 = vld [vmem:[#allocation5 + $0xe4] sm:$0xf0]  ;;  %v9445_v55 = vld [vmem:[#allocation5 + $0xe8] sm:$0xf0]  ;;  %v9440_v57 = vor.u32 %v13713_v49, %v9437_v51  ;;  %v9403_v59 = vld [vmem:[#allocation5 + $0x80] sm:$0xf] }
  0x25   :  { %538 = vmatpush.bf16.msra.mxu3 %v9512_v38  ;;  %v9444_v58 = vor.u32 %v13718_v53, %v9443_v52  ;;  %v13709_v60 = vld [vmem:[#allocation5 + $0x9c] sm:$0xf0]  ;;  %v13705_v61 = vld [vmem:[#allocation5 + $0x84] sm:$0xf]  ;;  %v9448_v62 = vor.u32 %v13714_v54, %v9445_v55  ;;  %v9411_v0 = vld [vmem:[#allocation5 + $0x88] sm:$0xf] }
  0x26   :  { %v9405_v63 = vld [vmem:[#allocation5 + $0xa0] sm:$0xf0]  ;;  %v13710_v1 = vld [vmem:[#allocation5 + $0xa4] sm:$0xf0]  ;;  %v13706_v2 = vld [vmem:[#allocation5 + $0x8c] sm:$0xf]  ;;  %v9404_v4 = vor.u32 %v13709_v60, %v9403_v59 }
  0x27   :  { %500 = vmatpush.bf16.msra.mxu0 %v9468_v44  ;;  %513 = vmatpush.bf16.msra.mxu1 %v9472_v45  ;;  %v9413_v3 = vld [vmem:[#allocation5 + $0xa8] sm:$0xf0]  ;;  %v9408_v5 = vor.u32 %v13705_v61, %v9405_v63  ;;  %v9412_v6 = vor.u32 %v13710_v1, %v9411_v0  ;;  %v9371_v7 = vld [vmem:[#allocation5 + $0x40] sm:$0xf]  ;;  %v13697_v9 = vld [vmem:[#allocation5 + $0x44] sm:$0xf] }
  0x28   :  { %526 = vmatpush.bf16.msra.mxu2 %v9476_v46  ;;  %v13701_v8 = vld [vmem:[#allocation5 + $0x5c] sm:$0xf0]  ;;  %v9416_v10 = vor.u32 %v13706_v2, %v9413_v3  ;;  %v9373_v11 = vld [vmem:[#allocation5 + $0x60] sm:$0xf0]  ;;  %v9379_v12 = vld [vmem:[#allocation5 + $0x48] sm:$0xf] }
  0x29   :  { %539 = vmatpush.bf16.msra.mxu3 %v9480_v50  ;;  %v13702_v13 = vld [vmem:[#allocation5 + $0x64] sm:$0xf0]  ;;  %v13698_v14 = vld [vmem:[#allocation5 + $0x4c] sm:$0xf]  ;;  %v9372_v16 = vor.u32 %v13701_v8, %v9371_v7  ;;  %v9339_v17 = vld [vmem:[#allocation5] sm:$0xf]  ;;  %v9376_v19 = vor.u32 %v13697_v9, %v9373_v11 }
  0x2a   :  { %v9381_v15 = vld [vmem:[#allocation5 + $0x68] sm:$0xf0]  ;;  %v13693_v18 = vld [vmem:[#allocation5 + $0x1c] sm:$0xf0]  ;;  %v9380_v20 = vor.u32 %v13702_v13, %v9379_v12  ;;  %v13689_v21 = vld [vmem:[#allocation5 + $0x4] sm:$0xf] }
  0x2b   :  { %501 = vmatpush.bf16.msra.mxu0 %v9436_v56  ;;  %514 = vmatpush.bf16.msra.mxu1 %v9440_v57  ;;  %v9341_v22 = vld [vmem:[#allocation5 + $0x20] sm:$0xf0]  ;;  %v9347_v23 = vld [vmem:[#allocation5 + $0x8] sm:$0xf]  ;;  %v9384_v24 = vor.u32 %v13698_v14, %v9381_v15  ;;  %v13690_v26 = vld [vmem:[#allocation5 + $0xc] sm:$0xf]  ;;  %v9340_v31 = vor.u32 %v13693_v18, %v9339_v17 }
  0x2c   :  { %527 = vmatpush.bf16.msra.mxu2 %v9444_v58  ;;  %v13694_v25 = vld [vmem:[#allocation5 + $0x24] sm:$0xf0]  ;;  %v9349_v27 = vld [vmem:[#allocation5 + $0x28] sm:$0xf0]  ;;  %v9579_v28 = vld [vmem:[#allocation5 + $0x1d0] sm:$0xf]  ;;  %v9344_v35 = vor.u32 %v13689_v21, %v9341_v22 }
  0x2d   :  { %540 = vmatpush.bf16.msra.mxu3 %v9448_v62  ;;  %v13751_v29 = vld [vmem:[#allocation5 + $0x1ec] sm:$0xf0]  ;;  %v13747_v30 = vld [vmem:[#allocation5 + $0x1d4] sm:$0xf]  ;;  %v9587_v33 = vld [vmem:[#allocation5 + $0x1d8] sm:$0xf]  ;;  %v9348_v36 = vor.u32 %v13694_v25, %v9347_v23  ;;  %v9352_v40 = vor.u32 %v13690_v26, %v9349_v27 }
  0x2e   :  { %v9581_v32 = vld [vmem:[#allocation5 + $0x1f0] sm:$0xf0]  ;;  %v13752_v34 = vld [vmem:[#allocation5 + $0x1f4] sm:$0xf0]  ;;  %v13748_v37 = vld [vmem:[#allocation5 + $0x1dc] sm:$0xf]  ;;  %v9580_v41 = vor.u32 %v13751_v29, %v9579_v28 }
  0x2f   :  { %502 = vmatpush.bf16.msra.mxu0 %v9404_v4  ;;  %515 = vmatpush.bf16.msra.mxu1 %v9408_v5  ;;  %v9589_v38 = vld [vmem:[#allocation5 + $0x1f8] sm:$0xf0]  ;;  %v9584_v42 = vor.u32 %v13747_v30, %v9581_v32  ;;  %v9588_v43 = vor.u32 %v13752_v34, %v9587_v33  ;;  %v9547_v44 = vld [vmem:[#allocation5 + $0x190] sm:$0xf]  ;;  %v13739_v46 = vld [vmem:[#allocation5 + $0x194] sm:$0xf] }
  0x30   :  { %528 = vmatpush.bf16.msra.mxu2 %v9412_v6  ;;  %v93_v39 = vld [vmem:[#allocation2] sm:$0xf]  ;;  %v13743_v45 = vld [vmem:[#allocation5 + $0x1ac] sm:$0xf0]  ;;  %v9592_v47 = vor.u32 %v13748_v37, %v9589_v38  ;;  %v9549_v49 = vld [vmem:[#allocation5 + $0x1b0] sm:$0xf0] }
  0x31   :  { %541 = vmatpush.bf16.msra.mxu3 %v9416_v10  ;;  %v15048_v48 = vpack.c.bf16 %v93_v39, %v93_v39  ;;  %v9555_v50 = vld [vmem:[#allocation5 + $0x198] sm:$0xf]  ;;  %v13740_v52 = vld [vmem:[#allocation5 + $0x19c] sm:$0xf]  ;;  %v9548_v54 = vor.u32 %v13743_v45, %v9547_v44  ;;  %v9552_v55 = vor.u32 %v13739_v46, %v9549_v49  ;;  %v9515_v57 = vld [vmem:[#allocation5 + $0x150] sm:$0xf] }
  0x32   :  { %v13744_v51 = vld [vmem:[#allocation5 + $0x1b4] sm:$0xf0]  ;;  %v9557_v53 = vld [vmem:[#allocation5 + $0x1b8] sm:$0xf0]  ;;  %v13735_v58 = vld [vmem:[#allocation5 + $0x16c] sm:$0xf0] }
  0x33   :  { %503 = vmatpush.bf16.msra.mxu0 %v9372_v16  ;;  %516 = vmatpush.bf16.msra.mxu1 %v9376_v19  ;;  %v9556_v56 = vor.u32 %v13744_v51, %v9555_v50  ;;  %v13731_v59 = vld [vmem:[#allocation5 + $0x154] sm:$0xf]  ;;  %v9560_v60 = vor.u32 %v13740_v52, %v9557_v53  ;;  %v9523_v62 = vld [vmem:[#allocation5 + $0x158] sm:$0xf]  ;;  %v13732_v0 = vld [vmem:[#allocation5 + $0x15c] sm:$0xf]  ;;  %v9516_v2 = vor.u32 %v13735_v58, %v9515_v57 }
  0x34   :  { %529 = vmatpush.bf16.msra.mxu2 %v9380_v20  ;;  %v9517_v61 = vld [vmem:[#allocation5 + $0x170] sm:$0xf0]  ;;  %v13736_v63 = vld [vmem:[#allocation5 + $0x174] sm:$0xf0]  ;;  %v9525_v1 = vld [vmem:[#allocation5 + $0x178] sm:$0xf0] }
  0x35   :  { %542 = vmatpush.bf16.msra.mxu3 %v9384_v24  ;;  %v9520_v3 = vor.u32 %v13731_v59, %v9517_v61  ;;  %v9524_v4 = vor.u32 %v13736_v63, %v9523_v62  ;;  %v9483_v5 = vld [vmem:[#allocation5 + $0x110] sm:$0xf]  ;;  %v13723_v7 = vld [vmem:[#allocation5 + $0x114] sm:$0xf]  ;;  %v9528_v8 = vor.u32 %v13732_v0, %v9525_v1  ;;  %v9491_v10 = vld [vmem:[#allocation5 + $0x118] sm:$0xf] }
  0x36   :  { %v13727_v6 = vld [vmem:[#allocation5 + $0x12c] sm:$0xf0]  ;;  %v9485_v9 = vld [vmem:[#allocation5 + $0x130] sm:$0xf0]  ;;  %v13728_v11 = vld [vmem:[#allocation5 + $0x134] sm:$0xf0] }
  0x37   :  { %504 = vmatpush.bf16.msra.mxu0 %v9340_v31  ;;  %517 = vmatpush.bf16.msra.mxu1 %v9344_v35  ;;  %v13724_v12 = vld [vmem:[#allocation5 + $0x11c] sm:$0xf]  ;;  %v9484_v14 = vor.u32 %v13727_v6, %v9483_v5  ;;  %v9488_v15 = vor.u32 %v13723_v7, %v9485_v9  ;;  %v9492_v16 = vor.u32 %v13728_v11, %v9491_v10  ;;  %v9451_v17 = vld [vmem:[#allocation5 + $0xd0] sm:$0xf]  ;;  %v13715_v19 = vld [vmem:[#allocation5 + $0xd4] sm:$0xf] }
  0x38   :  { %530 = vmatpush.bf16.msra.mxu2 %v9348_v36  ;;  %v9493_v13 = vld [vmem:[#allocation5 + $0x138] sm:$0xf0]  ;;  %v13719_v18 = vld [vmem:[#allocation5 + $0xec] sm:$0xf0]  ;;  %v9453_v21 = vld [vmem:[#allocation5 + $0xf0] sm:$0xf0] }
  0x39   :  { %543 = vmatpush.bf16.msra.mxu3 %v9352_v40  ;;  %v9496_v20 = vor.u32 %v13724_v12, %v9493_v13  ;;  %v9459_v22 = vld [vmem:[#allocation5 + $0xd8] sm:$0xf]  ;;  %v13716_v24 = vld [vmem:[#allocation5 + $0xdc] sm:$0xf]  ;;  %v9452_v26 = vor.u32 %v13719_v18, %v9451_v17  ;;  %v9456_v27 = vor.u32 %v13715_v19, %v9453_v21  ;;  %v9419_v29 = vld [vmem:[#allocation5 + $0x90] sm:$0xf] }
  0x3a   :  { %505 = vmatmul.bf16.vlgmr.msra.gmra.mxu0 %v15048_v48  ;;  %518 = vmatmul.bf16.vlgmr.msra.gmra.mxu1 %v15048_v48  ;;  %v13720_v23 = vld [vmem:[#allocation5 + $0xf4] sm:$0xf0]  ;;  %v9461_v25 = vld [vmem:[#allocation5 + $0xf8] sm:$0xf0]  ;;  %v13711_v30 = vld [vmem:[#allocation5 + $0xac] sm:$0xf0] }
  0x3b   :  { %549 = vmatpush.bf16.msrb.mxu0 %v9580_v41  ;;  %562 = vmatpush.bf16.msrb.mxu1 %v9584_v42  ;;  %v9460_v28 = vor.u32 %v13720_v23, %v9459_v22  ;;  %v13707_v31 = vld [vmem:[#allocation5 + $0x94] sm:$0xf]  ;;  %v9464_v32 = vor.u32 %v13716_v24, %v9461_v25  ;;  %v9427_v34 = vld [vmem:[#allocation5 + $0x98] sm:$0xf]  ;;  %v13708_v36 = vld [vmem:[#allocation5 + $0x9c] sm:$0xf]  ;;  %v9420_v38 = vor.u32 %v13711_v30, %v9419_v29 }
  0x3c   :  { %575 = vmatpush.bf16.msrb.mxu2 %v9588_v43  ;;  %544 = vmatmul.bf16.vlgmr.msra.gmra.mxu3 %v15048_v48  ;;  %v9421_v33 = vld [vmem:[#allocation5 + $0xb0] sm:$0xf0]  ;;  %v13712_v35 = vld [vmem:[#allocation5 + $0xb4] sm:$0xf0]  ;;  %v9429_v37 = vld [vmem:[#allocation5 + $0xb8] sm:$0xf0] }
  0x3d   :  { %588 = vmatpush.bf16.msrb.mxu3 %v9592_v47  ;;  %531 = vmatmul.bf16.vlgmr.msra.gmra.mxu2 %v15048_v48  ;;  %v9424_v39 = vor.u32 %v13707_v31, %v9421_v33  ;;  %v9428_v40 = vor.u32 %v13712_v35, %v9427_v34  ;;  %v9387_v41 = vld [vmem:[#allocation5 + $0x50] sm:$0xf]  ;;  %v13699_v43 = vld [vmem:[#allocation5 + $0x54] sm:$0xf]  ;;  %v9432_v44 = vor.u32 %v13708_v36, %v9429_v37  ;;  %v9395_v46 = vld [vmem:[#allocation5 + $0x58] sm:$0xf] }
  0x3e   :  { %v13703_v42 = vld [vmem:[#allocation5 + $0x6c] sm:$0xf0]  ;;  %v9389_v45 = vld [vmem:[#allocation5 + $0x70] sm:$0xf0]  ;;  %v13704_v47 = vld [vmem:[#allocation5 + $0x74] sm:$0xf0] }
  0x3f   :  { %550 = vmatpush.bf16.msrb.mxu0 %v9548_v54  ;;  %563 = vmatpush.bf16.msrb.mxu1 %v9552_v55  ;;  %v13700_v49 = vld [vmem:[#allocation5 + $0x5c] sm:$0xf]  ;;  %v9388_v51 = vor.u32 %v13703_v42, %v9387_v41  ;;  %v9355_v52 = vld [vmem:[#allocation5 + $0x10] sm:$0xf]  ;;  %v9392_v53 = vor.u32 %v13699_v43, %v9389_v45  ;;  %v9396_v54 = vor.u32 %v13704_v47, %v9395_v46  ;;  %v9357_v57 = vld [vmem:[#allocation5 + $0x30] sm:$0xf0] }
  0x40   :  { %576 = vmatpush.bf16.msrb.mxu2 %v9556_v56  ;;  %v9397_v50 = vld [vmem:[#allocation5 + $0x78] sm:$0xf0]  ;;  %v13695_v55 = vld [vmem:[#allocation5 + $0x2c] sm:$0xf0]  ;;  %v13691_v56 = vld [vmem:[#allocation5 + $0x14] sm:$0xf] }
  0x41   :  { %589 = vmatpush.bf16.msrb.mxu3 %v9560_v60  ;;  %v9400_v58 = vor.u32 %v13700_v49, %v9397_v50  ;;  %v9363_v59 = vld [vmem:[#allocation5 + $0x18] sm:$0xf]  ;;  %v13692_v61 = vld [vmem:[#allocation5 + $0x1c] sm:$0xf]  ;;  %v10043_v63 = vld [vmem:[#allocation8 + $0x380] sm:$0xf]  ;;  %v9356_v1 = vor.u32 %v13695_v55, %v9355_v52 }
  0x42   :  { %v13696_v60 = vld [vmem:[#allocation5 + $0x34] sm:$0xf0]  ;;  %v9365_v62 = vld [vmem:[#allocation5 + $0x38] sm:$0xf0]  ;;  %v13873_v0 = vld [vmem:[#allocation8 + $0x3bc] sm:$0xf0] }
  0x43   :  { %551 = vmatpush.bf16.msrb.mxu0 %v9516_v2  ;;  %564 = vmatpush.bf16.msrb.mxu1 %v9520_v3  ;;  %v10555_v2 = vld [vmem:[#allocation8 + $0x780] sm:$0xf]  ;;  %v9364_v5 = vor.u32 %v13696_v60, %v9363_v59  ;;  %v9368_v6 = vor.u32 %v13692_v61, %v9365_v62  ;;  %v10044_v7 = vor.u32 %v13873_v0, %v10043_v63  ;;  %vm601_vm0 = vcmask 1043456   ;;  %s15002_s2 = smov [#allocation11]   ;;  %s9325_s21 = sshll.u32 %s16022_s5, 4  ;;  %s9326_s21 = int_to_ptr.hbm [resolvable:$true] %s9325_s21 }
  0x44   :  { %577 = vmatpush.bf16.msrb.mxu2 %v9524_v4  ;;  %v14001_v3 = vld [vmem:[#allocation8 + $0x7bc] sm:$0xf0]  ;;  %v9360_v4 = vor.u32 %v13691_v56, %v9357_v57  ;;  %s9323_s4 = sshll.u32 %s15002_s2, 4  ;;  %s9324_s4 = int_to_ptr.vmem [resolvable:$true] %s9323_s4 }
  0x45   :  { %590 = vmatpush.bf16.msrb.mxu3 %v9528_v8  ;;  %v9979_v8 = vld [vmem:[#allocation8 + $0x300] sm:$0xf]  ;;  %v10556_v11 = vor.u32 %v14001_v3, %v10555_v2  ;;  %v15058_v2 = vld [vmem:[#allocation7] sm:$0xff] }
  0x46   :  { %v11067_v9 = vld [vmem:[#allocation8 + $0xb80] sm:$0xf] }
  0x47   :  { %552 = vmatpush.bf16.msrb.mxu0 %v9484_v14  ;;  %565 = vmatpush.bf16.msrb.mxu1 %v9488_v15  ;;  %v14129_v10 = vld [vmem:[#allocation8 + $0xbbc] sm:$0xf0] }
  0x48   :  { %578 = vmatpush.bf16.msrb.mxu2 %v9492_v16  ;;  %v13857_v12 = vld [vmem:[#allocation8 + $0x33c] sm:$0xf0]  ;;  %v11068_v17 = vor.u32 %v14129_v10, %v11067_v9 }
  0x49   :  { %591 = vmatpush.bf16.msrb.mxu3 %v9496_v20  ;;  %v11579_v13 = vld [vmem:[#allocation8 + $0xf80] sm:$0xf]  ;;  %v9980_v18 = vor.u32 %v13857_v12, %v9979_v8 }
  0x4a   :  { %v14257_v14 = vld [vmem:[#allocation8 + $0xfbc] sm:$0xf0] }
  0x4b   :  { %553 = vmatpush.bf16.msrb.mxu0 %v9452_v26  ;;  %566 = vmatpush.bf16.msrb.mxu1 %v9456_v27  ;;  %v10491_v15 = vld [vmem:[#allocation8 + $0x700] sm:$0xf]  ;;  %v11580_v19 = vor.u32 %v14257_v14, %v11579_v13 }
  0x4c   :  { %579 = vmatpush.bf16.msrb.mxu2 %v9460_v28  ;;  %v13985_v16 = vld [vmem:[#allocation8 + $0x73c] sm:$0xf0] }
  0x4d   :  { %592 = vmatpush.bf16.msrb.mxu3 %v9464_v32  ;;  %v10492_v20 = vor.u32 %v13985_v16, %v10491_v15  ;;  %v9915_v21 = vld [vmem:[#allocation8 + $0x280] sm:$0xf]  ;;  %v161_v15 = vperm.slane %v15058_v2, 0  ;;  %v162_v16 = vperm.slane %v15058_v2, 1 }
  0x4e   :  { %v13841_v22 = vld [vmem:[#allocation8 + $0x2bc] sm:$0xf0] }
  0x4f   :  { %554 = vmatpush.bf16.msrb.mxu0 %v9420_v38  ;;  %567 = vmatpush.bf16.msrb.mxu1 %v9424_v39  ;;  %v10427_v23 = vld [vmem:[#allocation8 + $0x680] sm:$0xf]  ;;  %v9916_v24 = vor.u32 %v13841_v22, %v9915_v21 }
  0x50   :  { %580 = vmatpush.bf16.msrb.mxu2 %v9428_v40  ;;  %v13969_v25 = vld [vmem:[#allocation8 + $0x6bc] sm:$0xf0] }
  0x51   :  { %593 = vmatpush.bf16.msrb.mxu3 %v9432_v44  ;;  %v10428_v26 = vor.u32 %v13969_v25, %v10427_v23  ;;  %v11003_v27 = vld [vmem:[#allocation8 + $0xb00] sm:$0xf] }
  0x52   :  { %v14113_v28 = vld [vmem:[#allocation8 + $0xb3c] sm:$0xf0] }
  0x53   :  { %555 = vmatpush.bf16.msrb.mxu0 %v9388_v51  ;;  %568 = vmatpush.bf16.msrb.mxu1 %v9392_v53  ;;  %v11004_v29 = vor.u32 %v14113_v28, %v11003_v27  ;;  %v11515_v30 = vld [vmem:[#allocation8 + $0xf00] sm:$0xf] }
  0x54   :  { %581 = vmatpush.bf16.msrb.mxu2 %v9396_v54  ;;  %v14241_v31 = vld [vmem:[#allocation8 + $0xf3c] sm:$0xf0] }
  0x55   :  { %594 = vmatpush.bf16.msrb.mxu3 %v9400_v58  ;;  %v11516_v32 = vor.u32 %v14241_v31, %v11515_v30  ;;  %v9851_v33 = vld [vmem:[#allocation8 + $0x200] sm:$0xf] }
  0x56   :  { %v10363_v34 = vld [vmem:[#allocation8 + $0x600] sm:$0xf] }
  0x57   :  { %556 = vmatpush.bf16.msrb.mxu0 %v9356_v1  ;;  %569 = vmatpush.bf16.msrb.mxu1 %v9360_v4  ;;  %v13953_v36 = vld [vmem:[#allocation8 + $0x63c] sm:$0xf0] }
  0x58   :  { %582 = vmatpush.bf16.msrb.mxu2 %v9364_v5  ;;  %v10364_v37 = vor.u32 %v13953_v36, %v10363_v34  ;;  %v10939_v38 = vld [vmem:[#allocation8 + $0xa80] sm:$0xf] }
  0x59   :  { %595 = vmatpush.bf16.msrb.mxu3 %v9368_v6  ;;  %v14097_v39 = vld [vmem:[#allocation8 + $0xabc] sm:$0xf0] }
  0x5a   :  { %557 = vmatmul.bf16.vlgmr.msrb.gmra.mxu0 %v15048_v48  ;;  %570 = vmatmul.bf16.vlgmr.msrb.gmra.mxu1 %v15048_v48  ;;  %v11451_v40 = vld [vmem:[#allocation8 + $0xe80] sm:$0xf]  ;;  %v10940_v41 = vor.u32 %v14097_v39, %v10939_v38 }
  0x5b   :  { %7062 = vmatpush.bf16.msra.mxu0 %v10044_v7  ;;  %7075 = vmatpush.bf16.msra.mxu1 %v10556_v11  ;;  %v14225_v42 = vld [vmem:[#allocation8 + $0xebc] sm:$0xf0] }
  0x5c   :  { %583 = vmatmul.bf16.vlgmr.msrb.gmra.mxu2 %v15048_v48  ;;  %596 = vmatmul.bf16.vlgmr.msrb.gmra.mxu3 %v15048_v48  ;;  %v13825_v48 = vld [vmem:[#allocation8 + $0x23c] sm:$0xf0]  ;;  %v11452_v43 = vor.u32 %v14225_v42, %v11451_v40 }
  0x5d   :  { %7088 = vmatpush.bf16.msra.mxu2 %v11068_v17  ;;  %7101 = vmatpush.bf16.msra.mxu3 %v11580_v19  ;;  %v9852_v35 = vor.u32 %v13825_v48, %v9851_v33  ;;  %v9787_v44 = vld [vmem:[#allocation8 + $0x180] sm:$0xf] }
  0x5e   :  { %v13809_v45 = vld [vmem:[#allocation8 + $0x1bc] sm:$0xf0] }
  0x5f   :  { %7063 = vmatpush.bf16.msra.mxu0 %v9980_v18  ;;  %7076 = vmatpush.bf16.msra.mxu1 %v10492_v20  ;;  %v10299_v46 = vld [vmem:[#allocation8 + $0x580] sm:$0xf]  ;;  %v9788_v47 = vor.u32 %v13809_v45, %v9787_v44 }
  0x60   :  { %v13937_v49 = vld [vmem:[#allocation8 + $0x5bc] sm:$0xf0] }
  0x61   :  { %7089 = vmatpush.bf16.msra.mxu2 %v11004_v29  ;;  %7102 = vmatpush.bf16.msra.mxu3 %v11516_v32  ;;  %v10300_v50 = vor.u32 %v13937_v49, %v10299_v46  ;;  %v10875_v51 = vld [vmem:[#allocation8 + $0xa00] sm:$0xf] }
  0x62   :  { %v14081_v52 = vld [vmem:[#allocation8 + $0xa3c] sm:$0xf0] }
  0x63   :  { %7064 = vmatpush.bf16.msra.mxu0 %v9916_v24  ;;  %7077 = vmatpush.bf16.msra.mxu1 %v10428_v26  ;;  %v11387_v53 = vld [vmem:[#allocation8 + $0xe00] sm:$0xf]  ;;  %v10876_v54 = vor.u32 %v14081_v52, %v10875_v51 }
  0x64   :  { %v14209_v55 = vld [vmem:[#allocation8 + $0xe3c] sm:$0xf0] }
  0x65   :  { %7090 = vmatpush.bf16.msra.mxu2 %v10940_v41  ;;  %7103 = vmatpush.bf16.msra.mxu3 %v11452_v43  ;;  %v11388_v56 = vor.u32 %v14209_v55, %v11387_v53  ;;  %v9723_v57 = vld [vmem:[#allocation8 + $0x100] sm:$0xf] }
  0x66   :  { %v13793_v58 = vld [vmem:[#allocation8 + $0x13c] sm:$0xf0] }
  0x67   :  { %7065 = vmatpush.bf16.msra.mxu0 %v9852_v35  ;;  %7078 = vmatpush.bf16.msra.mxu1 %v10364_v37  ;;  %v10235_v59 = vld [vmem:[#allocation8 + $0x500] sm:$0xf]  ;;  %v9724_v60 = vor.u32 %v13793_v58, %v9723_v57  ;;  %v163_v35 = vperm.slane %v15058_v2, 2  ;;  %v164_v57 = vperm.slane %v15058_v2, 3 }
  0x68   :  { %v13921_v61 = vld [vmem:[#allocation8 + $0x53c] sm:$0xf0] }
  0x69   :  { %7091 = vmatpush.bf16.msra.mxu2 %v10876_v54  ;;  %7104 = vmatpush.bf16.msra.mxu3 %v11388_v56  ;;  %v10236_v62 = vor.u32 %v13921_v61, %v10235_v59  ;;  %v10811_v63 = vld [vmem:[#allocation8 + $0x980] sm:$0xf] }
  0x6a   :  { %v14065_v0 = vld [vmem:[#allocation8 + $0x9bc] sm:$0xf0] }
  0x6b   :  { %7066 = vmatpush.bf16.msra.mxu0 %v9788_v47  ;;  %7079 = vmatpush.bf16.msra.mxu1 %v10300_v50  ;;  %v11323_v1 = vld [vmem:[#allocation8 + $0xd80] sm:$0xf]  ;;  %v10812_v3 = vor.u32 %v14065_v0, %v10811_v63 }
  0x6c   :  { %v14193_v4 = vld [vmem:[#allocation8 + $0xdbc] sm:$0xf0] }
  0x6d   :  { %v11324_v5 = vor.u32 %v14193_v4, %v11323_v1  ;;  %v9659_v6 = vld [vmem:[#allocation8 + $0x80] sm:$0xf]  ;;  %7092 = vmatpush.bf16.msra.mxu2 %v10812_v3 }
  0x6e   :  { %v13777_v7 = vld [vmem:[#allocation8 + $0xbc] sm:$0xf0] }
  0x6f   :  { %7067 = vmatpush.bf16.msra.mxu0 %v9724_v60  ;;  %7080 = vmatpush.bf16.msra.mxu1 %v10236_v62  ;;  %v10171_v8 = vld [vmem:[#allocation8 + $0x480] sm:$0xf]  ;;  %v9660_v9 = vor.u32 %v13777_v7, %v9659_v6 }
  0x70   :  { %v13905_v10 = vld [vmem:[#allocation8 + $0x4bc] sm:$0xf0]  ;;  %7105 = vmatpush.bf16.msra.mxu3 %v11324_v5 }
  0x71   :  { %v10172_v11 = vor.u32 %v13905_v10, %v10171_v8  ;;  %v10747_v12 = vld [vmem:[#allocation8 + $0x900] sm:$0xf] }
  0x72   :  { %v14049_v13 = vld [vmem:[#allocation8 + $0x93c] sm:$0xf0] }
  0x73   :  { %v11259_v14 = vld [vmem:[#allocation8 + $0xd00] sm:$0xf]  ;;  %7068 = vmatpush.bf16.msra.mxu0 %v9660_v9  ;;  %v10748_v17 = vor.u32 %v14049_v13, %v10747_v12  ;;  %7081 = vmatpush.bf16.msra.mxu1 %v10172_v11 }
  0x74   :  { %v14177_v18 = vld [vmem:[#allocation8 + $0xd3c] sm:$0xf0] }
  0x75   :  { %v11260_v19 = vor.u32 %v14177_v18, %v11259_v14  ;;  %v9595_v20 = vld [vmem:[#allocation8] sm:$0xf]  ;;  %7093 = vmatpush.bf16.msra.mxu2 %v10748_v17 }
  0x76   :  { %v13761_v21 = vld [vmem:[#allocation8 + $0x3c] sm:$0xf0] }
  0x77   :  { %v10107_v22 = vld [vmem:[#allocation8 + $0x400] sm:$0xf]  ;;  %v9596_v23 = vor.u32 %v13761_v21, %v9595_v20  ;;  %7106 = vmatpush.bf16.msra.mxu3 %v11260_v19 }
  0x78   :  { %v13889_v24 = vld [vmem:[#allocation8 + $0x43c] sm:$0xf0] }
  0x79   :  { %v12091_v25 = vld [vmem:[#allocation8 + $0x1380] sm:$0xf]  ;;  %v10108_v27 = vor.u32 %v13889_v24, %v10107_v22  ;;  %7069 = vmatpush.bf16.msra.mxu0 %v9596_v23 }
  0x7a   :  { %v14385_v26 = vld [vmem:[#allocation8 + $0x13bc] sm:$0xf0] }
  0x7b   :  { %v12092_v28 = vor.u32 %v14385_v26, %v12091_v25  ;;  %v12603_v29 = vld [vmem:[#allocation8 + $0x1780] sm:$0xf]  ;;  %7082 = vmatpush.bf16.msra.mxu1 %v10108_v27 }
  0x7c   :  { %v14513_v30 = vld [vmem:[#allocation8 + $0x17bc] sm:$0xf0] }
  0x7d   :  { %v10683_v31 = vld [vmem:[#allocation8 + $0x880] sm:$0xf]  ;;  %v12604_v32 = vor.u32 %v14513_v30, %v12603_v29  ;;  %7114 = vmatpush.bf16.msrb.mxu0 %v12092_v28 }
  0x7e   :  { %v14033_v33 = vld [vmem:[#allocation8 + $0x8bc] sm:$0xf0] }
  0x7f   :  { %v11195_v48 = vld [vmem:[#allocation8 + $0xc80] sm:$0xf]  ;;  %v10684_v36 = vor.u32 %v14033_v33, %v10683_v31  ;;  %7127 = vmatpush.bf16.msrb.mxu1 %v12604_v32 }
  0x80   :  { %v14161_v34 = vld [vmem:[#allocation8 + $0xcbc] sm:$0xf0] }
  0x81   :  { %v11196_v37 = vor.u32 %v14161_v34, %v11195_v48  ;;  %v12027_v39 = vld [vmem:[#allocation8 + $0x1300] sm:$0xf]  ;;  %7094 = vmatpush.bf16.msra.mxu2 %v10684_v36 }
  0x82   :  { %v14369_v40 = vld [vmem:[#allocation8 + $0x133c] sm:$0xf0] }
  0x83   :  { %v12539_v41 = vld [vmem:[#allocation8 + $0x1700] sm:$0xf]  ;;  %7107 = vmatpush.bf16.msra.mxu3 %v11196_v37  ;;  %v12028_v44 = vor.u32 %v14369_v40, %v12027_v39 }
  0x84   :  { %v14497_v45 = vld [vmem:[#allocation8 + $0x173c] sm:$0xf0] }
  0x85   :  { %v10619_v46 = vld [vmem:[#allocation8 + $0x800] sm:$0xf]  ;;  %v12540_v50 = vor.u32 %v14497_v45, %v12539_v41  ;;  %7115 = vmatpush.bf16.msrb.mxu0 %v12028_v44 }
  0x86   :  { %v14017_v47 = vld [vmem:[#allocation8 + $0x83c] sm:$0xf0] }
  0x87   :  { %v10620_v51 = vor.u32 %v14017_v47, %v10619_v46  ;;  %v11131_v52 = vld [vmem:[#allocation8 + $0xc00] sm:$0xf]  ;;  %7128 = vmatpush.bf16.msrb.mxu1 %v12540_v50 }
  0x88   :  { %v14145_v53 = vld [vmem:[#allocation8 + $0xc3c] sm:$0xf0] }
  0x89   :  { %v13115_v54 = vld [vmem:[#allocation8 + $0x1b80] sm:$0xf]  ;;  %v11132_v58 = vor.u32 %v14145_v53, %v11131_v52  ;;  %7095 = vmatpush.bf16.msra.mxu2 %v10620_v51 }
  0x8a   :  { %v14641_v59 = vld [vmem:[#allocation8 + $0x1bbc] sm:$0xf0] }
  0x8b   :  { %v13627_v60 = vld [vmem:[#allocation8 + $0x1f80] sm:$0xf]  ;;  %v13116_v0 = vor.u32 %v14641_v59, %v13115_v54  ;;  %7108 = vmatpush.bf16.msra.mxu3 %v11132_v58 }
  0x8c   :  { %v14769_v1 = vld [vmem:[#allocation8 + $0x1fbc] sm:$0xf0] }
  0x8d   :  { %v11963_v3 = vld [vmem:[#allocation8 + $0x1280] sm:$0xf]  ;;  %v13628_v6 = vor.u32 %v14769_v1, %v13627_v60  ;;  %7140 = vmatpush.bf16.msrb.mxu2 %v13116_v0 }
  0x8e   :  { %v14353_v7 = vld [vmem:[#allocation8 + $0x12bc] sm:$0xf0] }
  0x8f   :  { %v12475_v8 = vld [vmem:[#allocation8 + $0x1680] sm:$0xf]  ;;  %7153 = vmatpush.bf16.msrb.mxu3 %v13628_v6 }
  0x90   :  { %v14481_v12 = vld [vmem:[#allocation8 + $0x16bc] sm:$0xf0] }
  0x91   :  { %v13051_v17 = vld [vmem:[#allocation8 + $0x1b00] sm:$0xf]  ;;  %v12476_v24 = vor.u32 %v14481_v12, %v12475_v8 }
  0x92   :  { %v14625_v18 = vld [vmem:[#allocation8 + $0x1b3c] sm:$0xf0] }
  0x93   :  { %v13052_v29 = vor.u32 %v14625_v18, %v13051_v17  ;;  %7129 = vmatpush.bf16.msrb.mxu1 %v12476_v24  ;;  %v11899_v8 = vld [vmem:[#allocation8 + $0x1200] sm:$0xf] }
  0x94   :  { %v12411_v17 = vld [vmem:[#allocation8 + $0x1600] sm:$0xf] }
  0x95   :  { %7141 = vmatpush.bf16.msrb.mxu2 %v13052_v29  ;;  %v14465_v18 = vld [vmem:[#allocation8 + $0x163c] sm:$0xf0] }
  0xb7   :  { %v506_v38 = vpop.f32.mrf.mxu0  ;;  %v519_v43 = vpop.f32.mrf.mxu1 }
  0xb8   :  { %v15063_v42 = vadd.f32 %v506_v38, %v161_v15  ;;  %v15065_v49 = vadd.f32 %v519_v43, %v162_v16  ;;  %v11964_v16 = vor.u32 %v14353_v7, %v11963_v3  ;;  %v13563_v3 = vld [vmem:[#allocation8 + $0x1f00] sm:$0xf] }
  0xba   :  { %v602_v55 = vsel %vm601_vm0, %v15063_v42, 0.0  ;;  %v666_v56 = vmul.f32 %v15063_v42, %v15063_v42  ;;  %v609_v62 = vsel %vm601_vm0, %v15065_v49, 0.0  ;;  %v667_v63 = vmul.f32 %v15065_v49, %v15065_v49  ;;  %7116 = vmatpush.bf16.msrb.mxu0 %v11964_v16 }
  0xbb   :  { %v603_v61 = vrot.slane %v602_v55, 4  ;;  %v610_v5 = vrot.slane %v609_v62, 4 }
  0xbc   :  { %v674_v4 = vsel %vm601_vm0, %v666_v56, 0.0  ;;  %v681_v11 = vsel %vm601_vm0, %v667_v63, 0.0 }
  0xbd   :  { %v604_v9 = vadd.f32 %v603_v61, %v602_v55  ;;  %v675_v10 = vrot.slane %v674_v4, 4  ;;  %v611_v13 = vadd.f32 %v610_v5, %v609_v62  ;;  %v682_v14 = vrot.slane %v681_v11, 4 }
  0xbf   :  { %v605_v19 = vrot.slane %v604_v9, 2  ;;  %v676_v20 = vadd.f32 %v675_v10, %v674_v4  ;;  %v545_v22 = vpop.f32.mrf.mxu3  ;;  %v508_v23 = vpop.f32.mrf.mxu0  ;;  %v612_v25 = vrot.slane %v611_v13, 2  ;;  %v683_v26 = vadd.f32 %v682_v14, %v681_v11  ;;  %v14753_v4 = vld [vmem:[#allocation8 + $0x1f3c] sm:$0xf0] }
  0xc0   :  { %v532_v15 = vpop.f32.mrf.mxu2  ;;  %v15080_v27 = vadd.f32 %v545_v22, %v164_v57  ;;  %v521_v28 = vpop.f32.mrf.mxu1  ;;  %v13564_v22 = vor.u32 %v14753_v4, %v13563_v3 }
  0xc1   :  { %v15078_v21 = vadd.f32 %v532_v15, %v163_v35  ;;  %v606_v30 = vadd.f32 %v605_v19, %v604_v9  ;;  %v677_v31 = vrot.slane %v676_v20, 2  ;;  %v613_v48 = vadd.f32 %v612_v25, %v611_v13  ;;  %v14337_v9 = vld [vmem:[#allocation8 + $0x123c] sm:$0xf0] }
  0xc2   :  { %v684_v34 = vrot.slane %v683_v26, 2  ;;  %v623_v36 = vsel %vm601_vm0, %v15080_v27, 0.0  ;;  %v669_v51 = vmul.f32 %v15080_v27, %v15080_v27  ;;  %v11900_v23 = vor.u32 %v14337_v9, %v11899_v8  ;;  %7154 = vmatpush.bf16.msrb.mxu3 %v13564_v22  ;;  %v12859_v22 = vld [vmem:[#allocation8 + $0x1980] sm:$0xf] }
  0xc3   :  { %v616_v32 = vsel %vm601_vm0, %v15078_v21, 0.0  ;;  %v668_v33 = vmul.f32 %v15078_v21, %v15078_v21  ;;  %v607_v37 = vrot.slane %v606_v30, 1  ;;  %v678_v38 = vadd.f32 %v677_v31, %v676_v20 }
  0xc4   :  { %v617_v35 = vrot.slane %v616_v32, 4  ;;  %v624_v40 = vrot.slane %v623_v36, 4  ;;  %v614_v41 = vrot.slane %v613_v48, 1  ;;  %v685_v43 = vadd.f32 %v684_v34, %v683_v26  ;;  %7117 = vmatpush.bf16.msrb.mxu0 %v11900_v23  ;;  %v14737_v34 = vld [vmem:[#allocation8 + $0x1ebc] sm:$0xf0] }
  0xc5   :  { %v688_v39 = vsel %vm601_vm0, %v668_v33, 0.0  ;;  %v608_v46 = vadd.f32 %v607_v37, %v606_v30  ;;  %v679_v47 = vrot.slane %v678_v38, 1  ;;  %v695_v60 = vsel %vm601_vm0, %v669_v51, 0.0  ;;  %v14609_v33 = vld [vmem:[#allocation8 + $0x1abc] sm:$0xf0] }
  0xc6   :  { %v618_v44 = vadd.f32 %v617_v35, %v616_v32  ;;  %v689_v45 = vrot.slane %v688_v39, 4  ;;  %v625_v50 = vadd.f32 %v624_v40, %v623_v36  ;;  %v615_v52 = vadd.f32 %v614_v41, %v613_v48  ;;  %v12987_v32 = vld [vmem:[#allocation8 + $0x1a80] sm:$0xf] }
  0xc7   :  { %v686_v53 = vrot.slane %v685_v43, 1  ;;  %v15091_v57 = vmul.f32 0.25, %v608_v46  ;;  %v680_v58 = vadd.f32 %v679_v47, %v678_v38  ;;  %v547_v61 = vpop.f32.mrf.mxu3  ;;  %v696_v16 = vrot.slane %v695_v60, 4  ;;  %v13499_v48 = vld [vmem:[#allocation8 + $0x1e80] sm:$0xf] }
  0xc8   :  { %v619_v54 = vrot.slane %v618_v44, 2  ;;  %v690_v55 = vadd.f32 %v689_v45, %v688_v39  ;;  %v534_v56 = vpop.f32.mrf.mxu2  ;;  %v626_v59 = vrot.slane %v625_v50, 2  ;;  %v15094_v62 = vmul.f32 0.25, %v615_v52  ;;  %v11835_v39 = vld [vmem:[#allocation8 + $0x1180] sm:$0xf] }
  0xc9   :  { %v687_v63 = vadd.f32 %v686_v53, %v685_v43  ;;  %v730_v5 = vmul.f32 0.25, %v680_v58  ;;  %v738_v6 = vmul.f32 %v15091_v57, %v15091_v57  ;;  %v697_v28 = vadd.f32 %v696_v16, %v695_v60  ;;  %v14321_v40 = vld [vmem:[#allocation8 + $0x11bc] sm:$0xf0] }
  0xca   :  { %v620_v0 = vadd.f32 %v619_v54, %v618_v44  ;;  %v691_v1 = vrot.slane %v690_v55, 2  ;;  %v627_v7 = vadd.f32 %v626_v59, %v625_v50  ;;  %v739_v11 = vmul.f32 %v15094_v62, %v15094_v62  ;;  %v12347_v41 = vld [vmem:[#allocation8 + $0x1580] sm:$0xf] }
  0xcb   :  { %v731_v10 = vmul.f32 0.25, %v687_v63  ;;  %v746_v13 = vsub.f32 %v730_v5, %v738_v6  ;;  %v12412_v31 = vor.u32 %v14465_v18, %v12411_v17  ;;  %v698_v37 = vrot.slane %v697_v28, 2  ;;  %v14449_v43 = vld [vmem:[#allocation8 + $0x15bc] sm:$0xf0] }
  0xcc   :  { %v621_v12 = vrot.slane %v620_v0, 1  ;;  %v692_v14 = vadd.f32 %v691_v1, %v690_v55  ;;  %v628_v15 = vrot.slane %v627_v7, 1  ;;  %v165_v38 = vperm.slane %v15058_v2, 4  ;;  %v12923_v50 = vld [vmem:[#allocation8 + $0x1a00] sm:$0xf] }
  0xcd   :  { %v747_v19 = vsub.f32 %v731_v10, %v739_v11  ;;  %v754_v24 = vmax.f32 %v746_v13, 0.0  ;;  %v166_v47 = vperm.slane %v15058_v2, 5  ;;  %7130 = vmatpush.bf16.msrb.mxu1 %v12412_v31  ;;  %v699_v52 = vadd.f32 %v698_v37, %v697_v28  ;;  %v14593_v54 = vld [vmem:[#allocation8 + $0x1a3c] sm:$0xf0] }
  0xce   :  { %v622_v20 = vadd.f32 %v621_v12, %v620_v0  ;;  %v693_v25 = vrot.slane %v692_v14, 1  ;;  %v629_v26 = vadd.f32 %v628_v15, %v627_v7  ;;  %v167_v53 = vperm.slane %v15058_v2, 6  ;;  %v13435_v55 = vld [vmem:[#allocation8 + $0x1e00] sm:$0xf] }
  0xcf   :  { %v755_v29 = vmax.f32 %v747_v19, 0.0  ;;  %v15102_v35 = vadd.f32 1e-05, %v754_v24  ;;  %v850_v56 = vsub.f32 %v15063_v42, %v15091_v57  ;;  %v851_v58 = vsub.f32 %v15065_v49, %v15094_v62  ;;  %v14721_v60 = vld [vmem:[#allocation8 + $0x1e3c] sm:$0xf0] }
  0xd0   :  { %v15100_v30 = vmul.f32 0.25, %v622_v20  ;;  %v694_v36 = vadd.f32 %v693_v25, %v692_v14  ;;  %v15109_v46 = vmul.f32 0.25, %v629_v26  ;;  %v11771_v61 = vld [vmem:[#allocation8 + $0x1100] sm:$0xf]  ;;  %v700_v1 = vrot.slane %v699_v52, 1 }
  0xd1   :  { %v15105_v44 = vadd.f32 1e-05, %v755_v29  ;;  %14787 = vrsqrt.f32 %v15102_v35  ;;  %v14305_v63 = vld [vmem:[#allocation8 + $0x113c] sm:$0xf0]  ;;  %v12988_v3 = vor.u32 %v14609_v33, %v12987_v32  ;;  %v13500_v4 = vor.u32 %v14737_v34, %v13499_v48 }
  0xd2   :  { %v740_v45 = vmul.f32 %v15100_v30, %v15100_v30  ;;  %v732_v51 = vmul.f32 0.25, %v694_v36  ;;  %v852_v59 = vsub.f32 %v15078_v21, %v15100_v30  ;;  %v12283_v5 = vld [vmem:[#allocation8 + $0x1500] sm:$0xf]  ;;  %v741_v7 = vmul.f32 %v15109_v46, %v15109_v46 }
  0xd3   :  { %14789 = vrsqrt.f32 %v15105_v44  ;;  %v14433_v6 = vld [vmem:[#allocation8 + $0x153c] sm:$0xf0]  ;;  %v11836_v9 = vor.u32 %v14321_v40, %v11835_v39  ;;  %v12348_v10 = vor.u32 %v14449_v43, %v12347_v41  ;;  %v12924_v11 = vor.u32 %v14593_v54, %v12923_v50  ;;  %7142 = vmatpush.bf16.msrb.mxu2 %v12988_v3  ;;  %7155 = vmatpush.bf16.msrb.mxu3 %v13500_v4 }
  0xd4   :  { %v748_v0 = vsub.f32 %v732_v51, %v740_v45  ;;  %v701_v13 = vadd.f32 %v700_v1, %v699_v52  ;;  %v13436_v16 = vor.u32 %v14721_v60, %v13435_v55  ;;  %v168_v18 = vperm.slane %v15058_v2, 7  ;;  %v14577_v23 = vld [vmem:[#allocation8 + $0x19bc] sm:$0xf0] }
  0xd5   :  { %7118 = vmatpush.bf16.msrb.mxu0 %v11836_v9  ;;  %7131 = vmatpush.bf16.msrb.mxu1 %v12348_v10  ;;  %v11772_v19 = vor.u32 %v14305_v63, %v11771_v61  ;;  %v12284_v20 = vor.u32 %v14433_v6, %v12283_v5  ;;  %vm776_vm1 = vweird.f32 %v15102_v35  ;;  %vm786_vm3 = vweird.f32 %v15105_v44 }
  0xd6   :  { %v756_v12 = vmax.f32 %v748_v0, 0.0  ;;  %v733_v26 = vmul.f32 0.25, %v701_v13  ;;  %v12860_v36 = vor.u32 %v14577_v23, %v12859_v22 }
  0xd7   :  { %v558_v8 = vpop.f32.mrf.mxu0  ;;  %v571_v15 = vpop.f32.mrf.mxu1  ;;  %7143 = vmatpush.bf16.msrb.mxu2 %v12924_v11  ;;  %7156 = vmatpush.bf16.msrb.mxu3 %v13436_v16 }
  0xd8   :  { %v15123_v14 = vadd.f32 %v558_v8, %v165_v38  ;;  %v15125_v17 = vadd.f32 %v571_v15, %v166_v47  ;;  %v15128_v24 = vpop.eup %14787  ;;  %v15130_v25 = vadd.f32 1e-05, %v756_v12  ;;  %v749_v38 = vsub.f32 %v733_v26, %v741_v7 }
  0xd9   :  { %v15136_v31 = vpop.eup %14789  ;;  %v771_v32 = vmul.f32 %v15128_v24, %v15102_v35  ;;  %vm777_vm2 = vweird.f32 %v15128_v24  ;;  %7119 = vmatpush.bf16.msrb.mxu0 %v11772_v19  ;;  %7132 = vmatpush.bf16.msrb.mxu1 %v12284_v20 }
  0xda   :  { %v630_v28 = vsel %vm601_vm0, %v15123_v14, 0.0  ;;  %v670_v29 = vmul.f32 %v15123_v14, %v15123_v14  ;;  %v637_v48 = vsel %vm601_vm0, %v15125_v17, 0.0  ;;  %v781_v34 = vmul.f32 %v15136_v31, %v15105_v44  ;;  %vm778_vm5 = vmor %vm776_vm1, %vm777_vm2 }
  0xdb   :  { %v631_v33 = vrot.slane %v630_v28, 4  ;;  %14791 = vrsqrt.f32 %v15130_v25  ;;  %v772_v37 = vmul.f32 %v15128_v24, %v771_v32  ;;  %v638_v45 = vrot.slane %v637_v48, 4  ;;  %7144 = vmatpush.bf16.msrb.mxu2 %v12860_v36 }
  0xdc   :  { %v702_v40 = vsel %vm601_vm0, %v670_v29, 0.0  ;;  %v782_v41 = vmul.f32 %v15136_v31, %v781_v34  ;;  %v671_v47 = vmul.f32 %v15125_v17, %v15125_v17  ;;  %v757_v52 = vmax.f32 %v749_v38, 0.0 }
  0xdd   :  { %v632_v39 = vadd.f32 %v631_v33, %v630_v28  ;;  %v703_v43 = vrot.slane %v702_v40, 4  ;;  %v773_v51 = vmul.f32 0.5, %v772_v37  ;;  %v639_v1 = vadd.f32 %v638_v45, %v637_v48 }
  0xde   :  { %v783_v63 = vmul.f32 0.5, %v782_v41  ;;  %v709_v3 = vsel %vm601_vm0, %v671_v47, 0.0  ;;  %v15160_v6 = vadd.f32 1e-05, %v757_v52  ;;  %vm787_vm4 = vweird.f32 %v15136_v31 }
  0xdf   :  { %v584_v50 = vpop.f32.mrf.mxu2  ;;  %v633_v54 = vrot.slane %v632_v39, 2  ;;  %v15157_v60 = vpop.f32.mrf.mxu3  ;;  %v704_v0 = vadd.f32 %v703_v43, %v702_v40  ;;  %v774_v5 = vsub.f32 1.5, %v773_v51  ;;  %v710_v8 = vrot.slane %v709_v3, 4  ;;  %vm788_vm7 = vmor %vm786_vm3, %vm787_vm4 }
  0xe0   :  { %v15155_v55 = vadd.f32 %v584_v50, %v167_v53  ;;  %v560_v61 = vpop.f32.mrf.mxu0  ;;  %v573_v4 = vpop.f32.mrf.mxu1  ;;  %v784_v10 = vsub.f32 1.5, %v783_v63  ;;  %v640_v11 = vrot.slane %v639_v1, 2  ;;  %14793 = vrsqrt.f32 %v15160_v6 }
  0xe1   :  { %v634_v7 = vadd.f32 %v633_v54, %v632_v39  ;;  %v14792_v9 = vpop.eup %14791  ;;  %v705_v53 = vrot.slane %v704_v0, 2  ;;  %v775_v12 = vmul.f32 %v15128_v24, %v774_v5  ;;  %v711_v28 = vadd.f32 %v710_v8, %v709_v3 }
  0xe2   :  { %v791_v13 = vmul.f32 %v14792_v9, %v15130_v25  ;;  %v644_v15 = vsel %vm601_vm0, %v15155_v55, 0.0  ;;  %v785_v16 = vmul.f32 %v15136_v31, %v784_v10  ;;  %vm797_vm6 = vweird.f32 %v14792_v9 }
  0xe3   :  { %v635_v19 = vrot.slane %v634_v7, 1  ;;  %v706_v20 = vadd.f32 %v705_v53, %v704_v0  ;;  %v779_v22 = vsel %vm778_vm5, %v15128_v24, %v775_v12  ;;  %v641_v26 = vadd.f32 %v640_v11, %v639_v1 }
  0xe4   :  { %v792_v23 = vmul.f32 %v14792_v9, %v791_v13  ;;  %v858_v29 = vmul.f32 %v850_v56, %v779_v22  ;;  %v789_v35 = vsel %vm788_vm7, %v15136_v31, %v785_v16  ;;  %v712_v44 = vrot.slane %v711_v28, 2 }
  0xe5   :  { %v636_v32 = vadd.f32 %v635_v19, %v634_v7  ;;  %v707_v33 = vrot.slane %v706_v20, 1  ;;  %v859_v34 = vmul.f32 %v851_v58, %v789_v35  ;;  %v642_v36 = vrot.slane %v641_v26, 1  ;;  %v13371_v19 = vld [vmem:[#allocation8 + $0x1d80] sm:$0xf] }
  0xe6   :  { %v793_v24 = vmul.f32 0.5, %v792_v23  ;;  %v866_v38 = vmax.f32 %v858_v29, 0.0  ;;  %v645_v41 = vrot.slane %v644_v15, 4  ;;  %v14794_v42 = vpop.eup %14793  ;;  %v713_v43 = vadd.f32 %v712_v44, %v711_v28  ;;  %v11707_v28 = vld [vmem:[#allocation8 + $0x1080] sm:$0xf] }
  0xe7   :  { %v586_v48 = vpop.f32.mrf.mxu2  ;;  %v599_v37 = vpop.f32.mrf.mxu3  ;;  %v15183_v39 = vmul.f32 0.25, %v636_v32  ;;  %v708_v40 = vadd.f32 %v707_v33, %v706_v20  ;;  %v867_v57 = vmax.f32 %v859_v34, 0.0  ;;  %v643_v31 = vadd.f32 %v642_v36, %v641_v26  ;;  %v14705_v20 = vld [vmem:[#allocation8 + $0x1dbc] sm:$0xf0] }
  0xe8   :  { %v794_v56 = vsub.f32 1.5, %v793_v24  ;;  %v15185_v45 = vpack.c.bf16 %v866_v38, %v866_v38  ;;  %vm796_vm8 = vweird.f32 %v15130_v25  ;;  %v801_v49 = vmul.f32 %v14794_v42, %v15160_v6  ;;  %v14289_v29 = vld [vmem:[#allocation8 + $0x10bc] sm:$0xf0] }
  0xe9   :  { %v734_v62 = vmul.f32 0.25, %v708_v40  ;;  %v15189_v58 = vpack.c.bf16 %v867_v57, %v867_v57  ;;  %vm806_vm9 = vweird.f32 %v15160_v6  ;;  %v742_v50 = vmul.f32 %v15183_v39, %v15183_v39  ;;  %vm798_vm10 = vmor %vm796_vm8, %vm797_vm6  ;;  %v12219_v44 = vld [vmem:[#allocation8 + $0x1480] sm:$0xf] }
  0xea   :  { %v795_v47 = vmul.f32 %v14792_v9, %v794_v56  ;;  %v802_v51 = vmul.f32 %v14794_v42, %v801_v49  ;;  %v15195_v52 = vmul.f32 0.25, %v643_v31  ;;  %v714_v54 = vrot.slane %v713_v43, 1  ;;  %7070 = vmatmul.bf16.vlgmr.msra.gmra.mxu0 %v15185_v45  ;;  %v14417_v37 = vld [vmem:[#allocation8 + $0x14bc] sm:$0xf0] }
  0xeb   :  { %v646_v61 = vadd.f32 %v645_v41, %v644_v15  ;;  %v750_v63 = vsub.f32 %v734_v62, %v742_v50  ;;  %v672_v0 = vmul.f32 %v15155_v55, %v15155_v55  ;;  %v15203_v1 = vadd.f32 %v15157_v60, %v168_v18  ;;  %7083 = vmatmul.bf16.vlgmr.msra.gmra.mxu1 %v15189_v58  ;;  %v12795_v41 = vld [vmem:[#allocation8 + $0x1900] sm:$0xf] }
  0xec   :  { %v799_v25 = vsel %vm798_vm10, %v14792_v9, %v795_v47  ;;  %v803_v4 = vmul.f32 0.5, %v802_v51  ;;  %v715_v5 = vadd.f32 %v714_v54, %v713_v43  ;;  %v743_v7 = vmul.f32 %v15195_v52, %v15195_v52  ;;  %v14561_v57 = vld [vmem:[#allocation8 + $0x193c] sm:$0xf0] }
  0xed   :  { %v860_v3 = vmul.f32 %v852_v59, %v799_v25  ;;  %vm807_vm11 = vweird.f32 %v14794_v42  ;;  %v758_v8 = vmax.f32 %v750_v63, 0.0  ;;  %v647_v9 = vrot.slane %v646_v61, 2  ;;  %v14689_v56 = vld [vmem:[#allocation8 + $0x1d3c] sm:$0xf0] }
  0xee   :  { %v716_v10 = vsel %vm601_vm0, %v672_v0, 0.0  ;;  %v804_v53 = vsub.f32 1.5, %v803_v4  ;;  %v735_v18 = vmul.f32 0.25, %v715_v5  ;;  %v651_v21 = vsel %vm601_vm0, %v15203_v1, 0.0  ;;  %vm808_vm12 = vmor %vm806_vm9, %vm807_vm11  ;;  %v11643_v31 = vld [vmem:[#allocation8 + $0x1000] sm:$0xf] }
  0xef   :  { %v868_v2 = vmax.f32 %v860_v3, 0.0  ;;  %v717_v60 = vrot.slane %v716_v10, 4  ;;  %v15212_v11 = vadd.f32 1e-05, %v758_v8  ;;  %v648_v12 = vadd.f32 %v647_v9, %v646_v61  ;;  %v14273_v50 = vld [vmem:[#allocation8 + $0x103c] sm:$0xf0] }
  0xf0   :  { %v673_v30 = vmul.f32 %v15203_v1, %v15203_v1  ;;  %v805_v13 = vmul.f32 %v14794_v42, %v804_v53  ;;  %v751_v15 = vsub.f32 %v735_v18, %v743_v7  ;;  %v853_v22 = vsub.f32 %v15080_v27, %v15109_v46  ;;  %v12155_v61 = vld [vmem:[#allocation8 + $0x1400] sm:$0xf]  ;;  %v13865_v4 = vld [vmem:[#allocation8 + $0x384] sm:$0xf] }
  0xf1   :  { %v15218_v59 = vpack.c.bf16 %v868_v2, %v868_v2  ;;  %v718_v16 = vadd.f32 %v717_v60, %v716_v10  ;;  %14795 = vrsqrt.f32 %v15212_v11  ;;  %v649_v23 = vrot.slane %v648_v12, 1  ;;  %v14401_v25 = vld [vmem:[#allocation8 + $0x143c] sm:$0xf0]  ;;  %v10045_v5 = vld [vmem:[#allocation8 + $0x3c0] sm:$0xf0] }
  0xf2   :  { %v652_v26 = vrot.slane %v651_v21, 4  ;;  %v809_v35 = vsel %vm808_vm12, %v14794_v42, %v805_v13  ;;  %v759_v32 = vmax.f32 %v751_v15, 0.0  ;;  %v723_v48 = vsel %vm601_vm0, %v673_v30, 0.0  ;;  %v13307_v42 = vld [vmem:[#allocation8 + $0x1d00] sm:$0xf] }
  0xf3   :  { %v719_v33 = vrot.slane %v718_v16, 2  ;;  %7096 = vmatmul.bf16.vlgmr.msra.gmra.mxu2 %v15218_v59  ;;  %v861_v34 = vmul.f32 %v853_v22, %v809_v35  ;;  %v650_v24 = vadd.f32 %v649_v23, %v648_v12  ;;  %v724_v36 = vrot.slane %v723_v48, 4  ;;  %v13993_v7 = vld [vmem:[#allocation8 + $0x784] sm:$0xf]  ;;  %v12731_v18 = vld [vmem:[#allocation8 + $0x1880] sm:$0xf] }
  0xf4   :  { %v653_v6 = vadd.f32 %v652_v26, %v651_v21  ;;  %v15228_v27 = vadd.f32 1e-05, %v759_v32  ;;  %v13372_v38 = vor.u32 %v14705_v20, %v13371_v19  ;;  %v11708_v40 = vor.u32 %v14289_v29, %v11707_v28  ;;  %v10557_v53 = vld [vmem:[#allocation8 + $0x7c0] sm:$0xf0]  ;;  %v14545_v13 = vld [vmem:[#allocation8 + $0x18bc] sm:$0xf0] }
  0xf5   :  { %v720_v46 = vadd.f32 %v719_v33, %v718_v16  ;;  %v869_v43 = vmax.f32 %v861_v34, 0.0  ;;  %v15230_v49 = vmul.f32 0.25, %v650_v24  ;;  %v725_v47 = vadd.f32 %v724_v36, %v723_v48  ;;  %v13243_v15 = vld [vmem:[#allocation8 + $0x1c80] sm:$0xf]  ;;  %v13849_v26 = vld [vmem:[#allocation8 + $0x304] sm:$0xf] }
  0xf6   :  { %v654_v62 = vrot.slane %v653_v6, 2  ;;  %14797 = vrsqrt.f32 %v15228_v27  ;;  %7157 = vmatpush.bf16.msrb.mxu3 %v13372_v38  ;;  %7120 = vmatpush.bf16.msrb.mxu0 %v11708_v40  ;;  %v12220_v54 = vor.u32 %v14417_v37, %v12219_v44  ;;  %v12796_v12 = vor.u32 %v14561_v57, %v12795_v41  ;;  %v14673_v23 = vld [vmem:[#allocation8 + $0x1cbc] sm:$0xf0]  ;;  %v9981_v32 = vld [vmem:[#allocation8 + $0x340] sm:$0xf0] }
  0xf7   :  { %v721_v51 = vrot.slane %v720_v46, 1  ;;  %v15233_v63 = vpop.eup %14795  ;;  %v15235_v0 = vpack.c.bf16 %v869_v43, %v869_v43  ;;  %v744_v10 = vmul.f32 %v15230_v49, %v15230_v49  ;;  %v726_v2 = vrot.slane %v725_v47, 2  ;;  %v13977_v33 = vld [vmem:[#allocation8 + $0x704] sm:$0xf]  ;;  %v12667_v37 = vld [vmem:[#allocation8 + $0x1800] sm:$0xf] }
  0xf8   :  { %v655_v3 = vadd.f32 %v654_v62, %v653_v6  ;;  %v811_v8 = vmul.f32 %v15233_v63, %v15212_v11  ;;  %7133 = vmatpush.bf16.msrb.mxu1 %v12220_v54  ;;  %v13308_v21 = vor.u32 %v14689_v56, %v13307_v42  ;;  %v11644_v30 = vor.u32 %v14273_v50, %v11643_v31  ;;  %v10493_v48 = vld [vmem:[#allocation8 + $0x740] sm:$0xf0]  ;;  %v13179_v38 = vld [vmem:[#allocation8 + $0x1c00] sm:$0xf] }
  0xf9   :  { %v722_v9 = vadd.f32 %v721_v51, %v720_v46  ;;  %7109 = vmatmul.bf16.vlgmr.msra.gmra.mxu3 %v15235_v0  ;;  %v727_v20 = vadd.f32 %v726_v2, %v725_v47  ;;  %v12156_v22 = vor.u32 %v14401_v25, %v12155_v61  ;;  %7145 = vmatpush.bf16.msrb.mxu2 %v12796_v12  ;;  %v14529_v46 = vld [vmem:[#allocation8 + $0x183c] sm:$0xf0]  ;;  %vm817_vm13 = vweird.f32 %v15233_v63  ;;  %v14121_v56 = vld [vmem:[#allocation8 + $0xb84] sm:$0xf] }
  0xfa   :  { %v656_v60 = vrot.slane %v655_v3, 1  ;;  %v812_v16 = vmul.f32 %v15233_v63, %v811_v8  ;;  %7158 = vmatpush.bf16.msrb.mxu3 %v13308_v21  ;;  %v10048_v29 = vor.u32 %v13865_v4, %v10045_v5  ;;  %v10560_v35 = vor.u32 %v13993_v7, %v10557_v53  ;;  %7121 = vmatpush.bf16.msrb.mxu0 %v11644_v30  ;;  %v14657_v40 = vld [vmem:[#allocation8 + $0x1c3c] sm:$0xf0]  ;;  %v11069_v31 = vld [vmem:[#allocation8 + $0xbc0] sm:$0xf0] }
  0xfb   :  { %v736_v19 = vmul.f32 0.25, %v722_v9  ;;  %v728_v36 = vrot.slane %v727_v20, 1  ;;  %v12732_v44 = vor.u32 %v14545_v13, %v12731_v18  ;;  %v13244_v42 = vor.u32 %v14673_v23, %v13243_v15  ;;  %v14249_v51 = vld [vmem:[#allocation8 + $0xf84] sm:$0xf] }
  0xfc   :  { %v657_v28 = vadd.f32 %v656_v60, %v655_v3  ;;  %v15243_v34 = vpop.eup %14797  ;;  %v813_v24 = vmul.f32 0.5, %v812_v16  ;;  %7134 = vmatpush.bf16.msrb.mxu1 %v12156_v22  ;;  %v9984_v50 = vor.u32 %v13849_v26, %v9981_v32  ;;  %v11581_v54 = vld [vmem:[#allocation8 + $0xfc0] sm:$0xf0]  ;;  %vm816_vm14 = vweird.f32 %v15212_v11 }
  0xfd   :  { %v752_v6 = vsub.f32 %v736_v19, %v744_v10  ;;  %v821_v41 = vmul.f32 %v15243_v34, %v15228_v27  ;;  %v729_v47 = vadd.f32 %v728_v36, %v727_v20  ;;  %v13833_v61 = vld [vmem:[#allocation8 + $0x284] sm:$0xf]  ;;  %v854_v25 = vsub.f32 %v15123_v14, %v15183_v39  ;;  %7146 = vmatpush.bf16.msrb.mxu2 %v12732_v44  ;;  %vm15261_vm15 = vmor %vm816_vm14, %vm817_vm13 }
  0xfe   :  { %v15248_v57 = vmul.f32 0.25, %v657_v28  ;;  %7166 = vmatpush.bf16.msra.mxu0 %v10048_v29  ;;  %v814_v43 = vsub.f32 1.5, %v813_v24  ;;  %7159 = vmatpush.bf16.msrb.mxu3 %v13244_v42  ;;  %v9917_v5 = vld [vmem:[#allocation8 + $0x2c0] sm:$0xf0]  ;;  %v10496_v53 = vor.u32 %v13977_v33, %v10493_v48  ;;  %v12668_v18 = vor.u32 %v14529_v46, %v12667_v37 }
  0xff   :  { %v760_v62 = vmax.f32 %v752_v6, 0.0  ;;  %v822_v3 = vmul.f32 %v15243_v34, %v821_v41  ;;  %v13961_v7 = vld [vmem:[#allocation8 + $0x684] sm:$0xf]  ;;  %v737_v2 = vmul.f32 0.25, %v729_v47  ;;  %v13180_v60 = vor.u32 %v14657_v40, %v13179_v38 }
 0x100   :  { %7179 = vmatpush.bf16.msra.mxu1 %v10560_v35  ;;  %v745_v4 = vmul.f32 %v15248_v57, %v15248_v57  ;;  %v10429_v8 = vld [vmem:[#allocation8 + $0x6c0] sm:$0xf0]  ;;  %v815_v9 = vmul.f32 %v15233_v63, %v814_v43  ;;  %v11072_v12 = vor.u32 %v14121_v56, %v11069_v31  ;;  %vm827_vm1 = vweird.f32 %v15243_v34 }
 0x101   :  { %v15257_v10 = vadd.f32 1e-05, %v760_v62  ;;  %v14105_v11 = vld [vmem:[#allocation8 + $0xb04] sm:$0xf]  ;;  %v823_v39 = vmul.f32 0.5, %v822_v3  ;;  %7147 = vmatpush.bf16.msrb.mxu2 %v12668_v18  ;;  %v11584_v26 = vor.u32 %v14249_v51, %v11581_v54  ;;  %v9920_v28 = vor.u32 %v13833_v61, %v9917_v5 }
 0x102   :  { %7167 = vmatpush.bf16.msra.mxu0 %v9984_v50  ;;  %v11005_v21 = vld [vmem:[#allocation8 + $0xb40] sm:$0xf0]  ;;  %v819_v13 = vsel %vm15261_vm15, %v15233_v63, %v815_v9  ;;  %v753_v15 = vsub.f32 %v737_v2, %v745_v4  ;;  %7160 = vmatpush.bf16.msrb.mxu3 %v13180_v60  ;;  %vm826_vm2 = vweird.f32 %v15228_v27  ;;  %v10432_v32 = vor.u32 %v13961_v7, %v10429_v8 }
 0x103   :  { %v14233_v30 = vld [vmem:[#allocation8 + $0xf04] sm:$0xf]  ;;  %14799 = vrsqrt.f32 %v15257_v10  ;;  %v862_v22 = vmul.f32 %v854_v25, %v819_v13  ;;  %v824_v23 = vsub.f32 1.5, %v823_v39  ;;  %v11008_v33 = vor.u32 %v14105_v11, %v11005_v21  ;;  %vm828_vm3 = vmor %vm826_vm2, %vm827_vm1 }
 0x104   :  { %7180 = vmatpush.bf16.msra.mxu1 %v10496_v53  ;;  %v11517_v16 = vld [vmem:[#allocation8 + $0xf40] sm:$0xf0]  ;;  %v761_v63 = vmax.f32 %v753_v15, 0.0  ;;  %v855_v40 = vsub.f32 %v15125_v17, %v15195_v52  ;;  %vm836_vm5 = vweird.f32 %v15257_v10 }
 0x105   :  { %v13817_v19 = vld [vmem:[#allocation8 + $0x204] sm:$0xf]  ;;  %7192 = vmatpush.bf16.msra.mxu2 %v11072_v12  ;;  %v870_v6 = vmax.f32 %v862_v22, 0.0  ;;  %v825_v36 = vmul.f32 %v15243_v34, %v824_v23  ;;  %v11520_v44 = vor.u32 %v14233_v30, %v11517_v16 }
 0x106   :  { %v9853_v20 = vld [vmem:[#allocation8 + $0x240] sm:$0xf0]  ;;  %7205 = vmatpush.bf16.msra.mxu3 %v11584_v26  ;;  %7168 = vmatpush.bf16.msra.mxu0 %v9920_v28  ;;  %v15278_v41 = vadd.f32 1e-05, %v761_v63 }
 0x107   :  { %v13945_v29 = vld [vmem:[#allocation8 + $0x604] sm:$0xf]  ;;  %v9856_v37 = vor.u32 %v13817_v19, %v9853_v20  ;;  %v15280_v43 = vpack.c.bf16 %v870_v6, %v870_v6  ;;  %v829_v62 = vsel %vm828_vm3, %v15243_v34, %v825_v36 }
 0x108   :  { %v10365_v35 = vld [vmem:[#allocation8 + $0x640] sm:$0xf0]  ;;  %7181 = vmatpush.bf16.msra.mxu1 %v10432_v32  ;;  %v863_v54 = vmul.f32 %v855_v40, %v829_v62  ;;  %14801 = vrsqrt.f32 %v15278_v41  ;;  %vm846_vm8 = vweird.f32 %v15278_v41 }
 0x109   :  { %v14089_v48 = vld [vmem:[#allocation8 + $0xa84] sm:$0xf]  ;;  %v10368_v42 = vor.u32 %v13945_v29, %v10365_v35  ;;  %v15283_v51 = vpop.eup %14799  ;;  %7193 = vmatpush.bf16.msra.mxu2 %v11008_v33  ;;  %7122 = vmatmul.bf16.vlgmr.msrb.gmra.mxu0 %v15280_v43 }
 0x10a   :  { %v10941_v24 = vld [vmem:[#allocation8 + $0xac0] sm:$0xf0]  ;;  %v831_v52 = vmul.f32 %v15283_v51, %v15257_v10  ;;  %7206 = vmatpush.bf16.msra.mxu3 %v11520_v44  ;;  %7169 = vmatpush.bf16.msra.mxu0 %v9856_v37  ;;  %v871_v5 = vmax.f32 %v863_v54, 0.0  ;;  %vm837_vm4 = vweird.f32 %v15283_v51 }
 0x10b   :  { %v14217_v46 = vld [vmem:[#allocation8 + $0xe84] sm:$0xf]  ;;  %v10944_v27 = vor.u32 %v14089_v48, %v10941_v24  ;;  %vm838_vm6 = vmor %vm836_vm5, %vm837_vm4 }
 0x10c   :  { %v11453_v38 = vld [vmem:[#allocation8 + $0xec0] sm:$0xf0]  ;;  %7182 = vmatpush.bf16.msra.mxu1 %v10368_v42  ;;  %v832_v2 = vmul.f32 %v15283_v51, %v831_v52  ;;  %v15290_v14 = vpack.c.bf16 %v871_v5, %v871_v5 }
 0x10d   :  { %v13801_v56 = vld [vmem:[#allocation8 + $0x184] sm:$0xf]  ;;  %v11456_v61 = vor.u32 %v14217_v46, %v11453_v38  ;;  %7194 = vmatpush.bf16.msra.mxu2 %v10944_v27  ;;  %v856_v38 = vsub.f32 %v15155_v55, %v15230_v49 }
 0x10e   :  { %v9789_v31 = vld [vmem:[#allocation8 + $0x1c0] sm:$0xf0]  ;;  %v833_v12 = vmul.f32 0.5, %v832_v2  ;;  %v15292_v16 = vpop.eup %14801  ;;  %7135 = vmatmul.bf16.vlgmr.msrb.gmra.mxu1 %v15290_v14 }
 0x10f   :  { %v13929_v47 = vld [vmem:[#allocation8 + $0x584] sm:$0xf]  ;;  %v9792_v25 = vor.u32 %v13801_v56, %v9789_v31  ;;  %7207 = vmatpush.bf16.msra.mxu3 %v11456_v61  ;;  %v841_v26 = vmul.f32 %v15292_v16, %v15278_v41  ;;  %vm847_vm7 = vweird.f32 %v15292_v16 }
 0x110   :  { %v10301_v50 = vld [vmem:[#allocation8 + $0x5c0] sm:$0xf0]  ;;  %v834_v23 = vsub.f32 1.5, %v833_v12  ;;  %vm848_vm9 = vmor %vm846_vm8, %vm847_vm7 }
 0x111   :  { %v14073_v17 = vld [vmem:[#allocation8 + $0xa04] sm:$0xf]  ;;  %v10304_v7 = vor.u32 %v13929_v47, %v10301_v50  ;;  %7170 = vmatpush.bf16.msra.mxu0 %v9792_v25  ;;  %v842_v6 = vmul.f32 %v15292_v16, %v841_v26 }
 0x112   :  { %v10877_v3 = vld [vmem:[#allocation8 + $0xa40] sm:$0xf0]  ;;  %v835_v24 = vmul.f32 %v15283_v51, %v834_v23 }
 0x113   :  { %v14201_v4 = vld [vmem:[#allocation8 + $0xe04] sm:$0xf]  ;;  %v10880_v39 = vor.u32 %v14073_v17, %v10877_v3  ;;  %7183 = vmatpush.bf16.msra.mxu1 %v10304_v7  ;;  %v843_v31 = vmul.f32 0.5, %v842_v6 }
 0x114   :  { %v11389_v34 = vld [vmem:[#allocation8 + $0xe40] sm:$0xf0]  ;;  %v839_v10 = vsel %vm838_vm6, %v15283_v51, %v835_v24 }
 0x115   :  { %v13785_v8 = vld [vmem:[#allocation8 + $0x104] sm:$0xf]  ;;  %v11392_v21 = vor.u32 %v14201_v4, %v11389_v34  ;;  %7195 = vmatpush.bf16.msra.mxu2 %v10880_v39  ;;  %v864_v50 = vmul.f32 %v856_v38, %v839_v10  ;;  %v844_v52 = vsub.f32 1.5, %v843_v31  ;;  %v857_v39 = vsub.f32 %v15203_v1, %v15248_v57 }
 0x116   :  { %v9725_v9 = vld [vmem:[#allocation8 + $0x140] sm:$0xf0] }
 0x117   :  { %v13913_v53 = vld [vmem:[#allocation8 + $0x504] sm:$0xf]  ;;  %v9728_v30 = vor.u32 %v13785_v8, %v9725_v9  ;;  %7208 = vmatpush.bf16.msra.mxu3 %v11392_v21  ;;  %v872_v3 = vmax.f32 %v864_v50, 0.0  ;;  %v845_v7 = vmul.f32 %v15292_v16, %v844_v52 }
 0x118   :  { %v10237_v11 = vld [vmem:[#allocation8 + $0x540] sm:$0xf0] }
 0x119   :  { %v14057_v18 = vld [vmem:[#allocation8 + $0x984] sm:$0xf]  ;;  %v10240_v19 = vor.u32 %v13913_v53, %v10237_v11  ;;  %7171 = vmatpush.bf16.msra.mxu0 %v9728_v30  ;;  %v15309_v11 = vpack.c.bf16 %v872_v3, %v872_v3  ;;  %v849_v21 = vsel %vm848_vm9, %v15292_v16, %v845_v7 }
 0x11a   :  { %v10813_v60 = vld [vmem:[#allocation8 + $0x9c0] sm:$0xf0] }
 0x11b   :  { %v14185_v13 = vld [vmem:[#allocation8 + $0xd84] sm:$0xf]  ;;  %v10816_v35 = vor.u32 %v14057_v18, %v10813_v60  ;;  %7184 = vmatpush.bf16.msra.mxu1 %v10240_v19  ;;  %v865_v19 = vmul.f32 %v857_v39, %v849_v21  ;;  %7148 = vmatmul.bf16.vlgmr.msrb.gmra.mxu2 %v15309_v11 }
 0x11c   :  { %v11325_v15 = vld [vmem:[#allocation8 + $0xdc0] sm:$0xf0] }
 0x11d   :  { %v13769_v20 = vld [vmem:[#allocation8 + $0x84] sm:$0xf]  ;;  %v11328_v63 = vor.u32 %v14185_v13, %v11325_v15  ;;  %7196 = vmatpush.bf16.msra.mxu2 %v10816_v35 }
 0x11e   :  { %v9661_v22 = vld [vmem:[#allocation8 + $0xc0] sm:$0xf0] }
 0x11f   :  { %v13897_v28 = vld [vmem:[#allocation8 + $0x484] sm:$0xf]  ;;  %v9664_v36 = vor.u32 %v13769_v20, %v9661_v22  ;;  %7209 = vmatpush.bf16.msra.mxu3 %v11328_v63 }
 0x120   :  { %v10173_v29 = vld [vmem:[#allocation8 + $0x4c0] sm:$0xf0] }
 0x121   :  { %v14041_v32 = vld [vmem:[#allocation8 + $0x904] sm:$0xf]  ;;  %v10176_v40 = vor.u32 %v13897_v28, %v10173_v29  ;;  %7172 = vmatpush.bf16.msra.mxu0 %v9664_v36  ;;  %v873_v29 = vmax.f32 %v865_v19, 0.0 }
 0x122   :  { %v10749_v33 = vld [vmem:[#allocation8 + $0x940] sm:$0xf0] }
 0x123   :  { %v14169_v48 = vld [vmem:[#allocation8 + $0xd04] sm:$0xf]  ;;  %v10752_v54 = vor.u32 %v14041_v32, %v10749_v33  ;;  %7185 = vmatpush.bf16.msra.mxu1 %v10176_v40  ;;  %v15318_v24 = vpack.c.bf16 %v873_v29, %v873_v29 }
 0x124   :  { %v11261_v44 = vld [vmem:[#allocation8 + $0xd40] sm:$0xf0] }
 0x125   :  { %v13753_v37 = vld [vmem:[#allocation8 + $0x4] sm:$0xf]  ;;  %v11264_v55 = vor.u32 %v14169_v48, %v11261_v44  ;;  %7197 = vmatpush.bf16.msra.mxu2 %v10752_v54  ;;  %7161 = vmatmul.bf16.vlgmr.msrb.gmra.mxu3 %v15318_v24 }
 0x126   :  { %v9597_v46 = vld [vmem:[#allocation8 + $0x40] sm:$0xf0] }
 0x127   :  { %v13881_v42 = vld [vmem:[#allocation8 + $0x404] sm:$0xf]  ;;  %v9600_v49 = vor.u32 %v13753_v37, %v9597_v46  ;;  %7210 = vmatpush.bf16.msra.mxu3 %v11264_v55 }
 0x128   :  { %v10109_v56 = vld [vmem:[#allocation8 + $0x440] sm:$0xf0] }
 0x129   :  { %v14377_v62 = vld [vmem:[#allocation8 + $0x1384] sm:$0xf]  ;;  %v10112_v51 = vor.u32 %v13881_v42, %v10109_v56  ;;  %7173 = vmatpush.bf16.msra.mxu0 %v9600_v49 }
 0x12a   :  { %v12093_v47 = vld [vmem:[#allocation8 + $0x13c0] sm:$0xf0] }
 0x12b   :  { %v14505_v27 = vld [vmem:[#allocation8 + $0x1784] sm:$0xf]  ;;  %v12096_v4 = vor.u32 %v14377_v62, %v12093_v47  ;;  %7186 = vmatpush.bf16.msra.mxu1 %v10112_v51 }
 0x12c   :  { %v12605_v17 = vld [vmem:[#allocation8 + $0x17c0] sm:$0xf0]  ;;  %7174 = vmatmul.bf16.vlgmr.msra.gmra.mxu0 %v15185_v45 }
 0x12d   :  { %v14025_v61 = vld [vmem:[#allocation8 + $0x884] sm:$0xf]  ;;  %v12608_v8 = vor.u32 %v14505_v27, %v12605_v17  ;;  %7218 = vmatpush.bf16.msrb.mxu0 %v12096_v4 }
 0x12e   :  { %v10685_v25 = vld [vmem:[#allocation8 + $0x8c0] sm:$0xf0]  ;;  %7187 = vmatmul.bf16.vlgmr.msra.gmra.mxu1 %v15189_v58 }
 0x12f   :  { %v14153_v34 = vld [vmem:[#allocation8 + $0xc84] sm:$0xf]  ;;  %v10688_v18 = vor.u32 %v14025_v61, %v10685_v25  ;;  %7231 = vmatpush.bf16.msrb.mxu1 %v12608_v8 }
 0x130   :  { %v11197_v5 = vld [vmem:[#allocation8 + $0xcc0] sm:$0xf0] }
 0x131   :  { %v14361_v9 = vld [vmem:[#allocation8 + $0x1304] sm:$0xf]  ;;  %v11200_v41 = vor.u32 %v14153_v34, %v11197_v5  ;;  %7198 = vmatpush.bf16.msra.mxu2 %v10688_v18 }
 0x132   :  { %v12029_v2 = vld [vmem:[#allocation8 + $0x1340] sm:$0xf0] }
 0x133   :  { %v14489_v53 = vld [vmem:[#allocation8 + $0x1704] sm:$0xf]  ;;  %v12032_v20 = vor.u32 %v14361_v9, %v12029_v2  ;;  %7211 = vmatpush.bf16.msra.mxu3 %v11200_v41 }
 0x134   :  { %v12541_v60 = vld [vmem:[#allocation8 + $0x1740] sm:$0xf0] }
 0x135   :  { %v14009_v12 = vld [vmem:[#allocation8 + $0x804] sm:$0xf]  ;;  %v12544_v1 = vor.u32 %v14489_v53, %v12541_v60  ;;  %7219 = vmatpush.bf16.msrb.mxu0 %v12032_v20 }
 0x136   :  { %v10621_v30 = vld [vmem:[#allocation8 + $0x840] sm:$0xf0] }
 0x137   :  { %v14137_v13 = vld [vmem:[#allocation8 + $0xc04] sm:$0xf]  ;;  %v10624_v35 = vor.u32 %v14009_v12, %v10621_v30  ;;  %7232 = vmatpush.bf16.msrb.mxu1 %v12544_v1 }
 0x138   :  { %v11133_v15 = vld [vmem:[#allocation8 + $0xc40] sm:$0xf0] }
 0x139   :  { %v14633_v22 = vld [vmem:[#allocation8 + $0x1b84] sm:$0xf]  ;;  %v11136_v33 = vor.u32 %v14137_v13, %v11133_v15  ;;  %7199 = vmatpush.bf16.msra.mxu2 %v10624_v35 }
 0x13a   :  { %v13117_v23 = vld [vmem:[#allocation8 + $0x1bc0] sm:$0xf0] }
 0x13b   :  { %v14761_v26 = vld [vmem:[#allocation8 + $0x1f84] sm:$0xf]  ;;  %v13120_v48 = vor.u32 %v14633_v22, %v13117_v23  ;;  %7212 = vmatpush.bf16.msra.mxu3 %v11136_v33 }
 0x13c   :  { %v13629_v57 = vld [vmem:[#allocation8 + $0x1fc0] sm:$0xf0]  ;;  %7200 = vmatmul.bf16.vlgmr.msra.gmra.mxu2 %v15218_v59 }
 0x13d   :  { %v14345_v28 = vld [vmem:[#allocation8 + $0x1284] sm:$0xf]  ;;  %v13632_v6 = vor.u32 %v14761_v26, %v13629_v57  ;;  %7244 = vmatpush.bf16.msrb.mxu2 %v13120_v48 }
 0x13e   :  { %v11965_v16 = vld [vmem:[#allocation8 + $0x12c0] sm:$0xf0]  ;;  %7213 = vmatmul.bf16.vlgmr.msra.gmra.mxu3 %v15235_v0 }
 0x13f   :  { %v14473_v63 = vld [vmem:[#allocation8 + $0x1684] sm:$0xf]  ;;  %v11968_v36 = vor.u32 %v14345_v28, %v11965_v16  ;;  %7257 = vmatpush.bf16.msrb.mxu3 %v13632_v6 }
 0x140   :  { %v12477_v32 = vld [vmem:[#allocation8 + $0x16c0] sm:$0xf0] }
 0x141   :  { %v14617_v44 = vld [vmem:[#allocation8 + $0x1b04] sm:$0xf]  ;;  %v12480_v38 = vor.u32 %v14473_v63, %v12477_v32  ;;  %7220 = vmatpush.bf16.msrb.mxu0 %v11968_v36 }
 0x142   :  { %v13053_v37 = vld [vmem:[#allocation8 + $0x1b40] sm:$0xf0] }
 0x143   :  { %v14745_v46 = vld [vmem:[#allocation8 + $0x1f04] sm:$0xf]  ;;  %v13056_v62 = vor.u32 %v14617_v44, %v13053_v37  ;;  %7233 = vmatpush.bf16.msrb.mxu1 %v12480_v38  ;;  %v10051_v37 = vld [vmem:[#allocation8 + $0x388] sm:$0xf] }
 0x144   :  { %v13565_v40 = vld [vmem:[#allocation8 + $0x1f40] sm:$0xf0] }
 0x145   :  { %v14329_v42 = vld [vmem:[#allocation8 + $0x1204] sm:$0xf]  ;;  %v13568_v47 = vor.u32 %v14745_v46, %v13565_v40  ;;  %7245 = vmatpush.bf16.msrb.mxu2 %v13056_v62  ;;  %v13874_v46 = vld [vmem:[#allocation8 + $0x3c4] sm:$0xf0] }
 0x146   :  { %v11901_v56 = vld [vmem:[#allocation8 + $0x1240] sm:$0xf0]  ;;  %v10563_v40 = vld [vmem:[#allocation8 + $0x788] sm:$0xf] }
 0x147   :  { %v14457_v10 = vld [vmem:[#allocation8 + $0x1604] sm:$0xf]  ;;  %v11904_v50 = vor.u32 %v14329_v42, %v11901_v56  ;;  %7258 = vmatpush.bf16.msrb.mxu3 %v13568_v47  ;;  %v14002_v42 = vld [vmem:[#allocation8 + $0x7c4] sm:$0xf0] }
 0x148   :  { %v12413_v31 = vld [vmem:[#allocation8 + $0x1640] sm:$0xf0] }
 0x149   :  { %v14601_v54 = vld [vmem:[#allocation8 + $0x1a84] sm:$0xf]  ;;  %v12416_v52 = vor.u32 %v14457_v10, %v12413_v31  ;;  %7221 = vmatpush.bf16.msrb.mxu0 %v11904_v50  ;;  %v10052_v50 = vor.u32 %v13874_v46, %v10051_v37  ;;  %v9795_v37 = vld [vmem:[#allocation8 + $0x188] sm:$0xf] }
 0x14a   :  { %v12989_v27 = vld [vmem:[#allocation8 + $0x1ac0] sm:$0xf0]  ;;  %v13810_v46 = vld [vmem:[#allocation8 + $0x1c4] sm:$0xf0] }
 0x14b   :  { %v14729_v17 = vld [vmem:[#allocation8 + $0x1e84] sm:$0xf]  ;;  %v12992_v51 = vor.u32 %v14601_v54, %v12989_v27  ;;  %7234 = vmatpush.bf16.msrb.mxu1 %v12416_v52  ;;  %v9987_v52 = vld [vmem:[#allocation8 + $0x308] sm:$0xf] }
 0x14c   :  { %v13501_v55 = vld [vmem:[#allocation8 + $0x1ec0] sm:$0xf0] }
 0x14d   :  { %v14313_v49 = vld [vmem:[#allocation8 + $0x1184] sm:$0xf]  ;;  %v13504_v4 = vor.u32 %v14729_v17, %v13501_v55  ;;  %7246 = vmatpush.bf16.msrb.mxu2 %v12992_v51  ;;  %v10564_v17 = vor.u32 %v14002_v42, %v10563_v40  ;;  %v13858_v55 = vld [vmem:[#allocation8 + $0x344] sm:$0xf0] }
 0x14e   :  { %v11837_v61 = vld [vmem:[#allocation8 + $0x11c0] sm:$0xf0]  ;;  %v13938_v40 = vld [vmem:[#allocation8 + $0x5c4] sm:$0xf0] }
 0x14f   :  { %v14441_v25 = vld [vmem:[#allocation8 + $0x1584] sm:$0xf]  ;;  %v11840_v34 = vor.u32 %v14313_v49, %v11837_v61  ;;  %7259 = vmatpush.bf16.msrb.mxu3 %v13504_v4  ;;  %v10499_v61 = vld [vmem:[#allocation8 + $0x708] sm:$0xf] }
 0x150   :  { %v12349_v3 = vld [vmem:[#allocation8 + $0x15c0] sm:$0xf0] }
 0x151   :  { %v14585_v5 = vld [vmem:[#allocation8 + $0x1a04] sm:$0xf]  ;;  %v12352_v9 = vor.u32 %v14441_v25, %v12349_v3  ;;  %7222 = vmatpush.bf16.msrb.mxu0 %v11840_v34  ;;  %v13986_v25 = vld [vmem:[#allocation8 + $0x744] sm:$0xf0] }
 0x152   :  { %v12925_v7 = vld [vmem:[#allocation8 + $0x1a40] sm:$0xf0] }
 0x153   :  { %v14713_v8 = vld [vmem:[#allocation8 + $0x1e04] sm:$0xf]  ;;  %v12928_v12 = vor.u32 %v14585_v5, %v12925_v7  ;;  %7235 = vmatpush.bf16.msrb.mxu1 %v12352_v9  ;;  %v9988_v7 = vor.u32 %v13858_v55, %v9987_v52  ;;  %v14130_v9 = vld [vmem:[#allocation8 + $0xbc4] sm:$0xf0] }
 0x154   :  { %v13437_v2 = vld [vmem:[#allocation8 + $0x1e40] sm:$0xf0]  ;;  %v10243_v52 = vld [vmem:[#allocation8 + $0x508] sm:$0xf] }
 0x155   :  { %v14297_v53 = vld [vmem:[#allocation8 + $0x1104] sm:$0xf]  ;;  %v13440_v21 = vor.u32 %v14713_v8, %v13437_v2  ;;  %7247 = vmatpush.bf16.msrb.mxu2 %v12928_v12  ;;  %v11075_v8 = vld [vmem:[#allocation8 + $0xb88] sm:$0xf] }
 0x156   :  { %v11773_v39 = vld [vmem:[#allocation8 + $0x1140] sm:$0xf0]  ;;  %v11587_v2 = vld [vmem:[#allocation8 + $0xf88] sm:$0xf] }
 0x157   :  { %v14425_v18 = vld [vmem:[#allocation8 + $0x1504] sm:$0xf]  ;;  %v11776_v41 = vor.u32 %v14297_v53, %v11773_v39  ;;  %7260 = vmatpush.bf16.msrb.mxu3 %v13440_v21  ;;  %v10500_v53 = vor.u32 %v13986_v25, %v10499_v61  ;;  %v14258_v39 = vld [vmem:[#allocation8 + $0xfc4] sm:$0xf0] }
 0x158   :  { %v12285_v60 = vld [vmem:[#allocation8 + $0x1540] sm:$0xf0]  ;;  %v10435_v21 = vld [vmem:[#allocation8 + $0x688] sm:$0xf] }
 0x159   :  { %v14569_v30 = vld [vmem:[#allocation8 + $0x1984] sm:$0xf]  ;;  %v12288_v19 = vor.u32 %v14425_v18, %v12285_v60  ;;  %7223 = vmatpush.bf16.msrb.mxu0 %v11776_v41  ;;  %v9923_v18 = vld [vmem:[#allocation8 + $0x288] sm:$0xf] }
 0x15a   :  { %v12861_v13 = vld [vmem:[#allocation8 + $0x19c0] sm:$0xf0]  ;;  %v13842_v60 = vld [vmem:[#allocation8 + $0x2c4] sm:$0xf0] }
 0x15b   :  { %v14697_v15 = vld [vmem:[#allocation8 + $0x1d84] sm:$0xf]  ;;  %v12864_v57 = vor.u32 %v14569_v30, %v12861_v13  ;;  %7236 = vmatpush.bf16.msrb.mxu1 %v12288_v19  ;;  %v13970_v41 = vld [vmem:[#allocation8 + $0x6c4] sm:$0xf0]  ;;  %v11076_v13 = vor.u32 %v14130_v9, %v11075_v8  ;;  %v9924_v19 = vor.u32 %v13842_v60, %v9923_v18 }
 0x15c   :  { %v13373_v20 = vld [vmem:[#allocation8 + $0x1dc0] sm:$0xf0]  ;;  %v13922_v55 = vld [vmem:[#allocation8 + $0x544] sm:$0xf0] }
 0x15d   :  { %v14281_v22 = vld [vmem:[#allocation8 + $0x1084] sm:$0xf]  ;;  %v13376_v16 = vor.u32 %v14697_v15, %v13373_v20  ;;  %7248 = vmatpush.bf16.msrb.mxu2 %v12864_v57  ;;  %v11588_v15 = vor.u32 %v14258_v39, %v11587_v2  ;;  %v11011_v20 = vld [vmem:[#allocation8 + $0xb08] sm:$0xf] }
 0x15e   :  { %v11709_v23 = vld [vmem:[#allocation8 + $0x10c0] sm:$0xf0]  ;;  %v9859_v57 = vld [vmem:[#allocation8 + $0x208] sm:$0xf] }
 0x15f   :  { %v14409_v26 = vld [vmem:[#allocation8 + $0x1484] sm:$0xf]  ;;  %v11712_v29 = vor.u32 %v14281_v22, %v11709_v23  ;;  %7261 = vmatpush.bf16.msrb.mxu3 %v13376_v16  ;;  %v14114_v22 = vld [vmem:[#allocation8 + $0xb44] sm:$0xf0] }
 0x160   :  { %v12221_v1 = vld [vmem:[#allocation8 + $0x14c0] sm:$0xf0]  ;;  %v11523_v23 = vld [vmem:[#allocation8 + $0xf08] sm:$0xf] }
 0x161   :  { %v14553_v28 = vld [vmem:[#allocation8 + $0x1904] sm:$0xf]  ;;  %v12224_v33 = vor.u32 %v14409_v26, %v12221_v1  ;;  %7224 = vmatpush.bf16.msrb.mxu0 %v11712_v29  ;;  %v10436_v26 = vor.u32 %v13970_v41, %v10435_v21  ;;  %v14242_v1 = vld [vmem:[#allocation8 + $0xf44] sm:$0xf0] }
 0x162   :  { %v12797_v35 = vld [vmem:[#allocation8 + $0x1940] sm:$0xf0]  ;;  %v10371_v16 = vld [vmem:[#allocation8 + $0x608] sm:$0xf] }
 0x163   :  { %v14681_v63 = vld [vmem:[#allocation8 + $0x1d04] sm:$0xf]  ;;  %v12800_v38 = vor.u32 %v14553_v28, %v12797_v35  ;;  %7237 = vmatpush.bf16.msrb.mxu1 %v12224_v33  ;;  %v13826_v28 = vld [vmem:[#allocation8 + $0x244] sm:$0xf0]  ;;  %v11012_v35 = vor.u32 %v14114_v22, %v11011_v20 }
 0x164   :  { %v13309_v32 = vld [vmem:[#allocation8 + $0x1d40] sm:$0xf0]  ;;  %v13954_v29 = vld [vmem:[#allocation8 + $0x644] sm:$0xf0] }
 0x165   :  { %v14265_v48 = vld [vmem:[#allocation8 + $0x1004] sm:$0xf]  ;;  %v13312_v56 = vor.u32 %v14681_v63, %v13309_v32  ;;  %7249 = vmatpush.bf16.msrb.mxu2 %v12800_v38  ;;  %v11524_v63 = vor.u32 %v14242_v1, %v11523_v23  ;;  %v9860_v32 = vor.u32 %v13826_v28, %v9859_v57  ;;  %v10947_v33 = vld [vmem:[#allocation8 + $0xa88] sm:$0xf] }
 0x166   :  { %v11645_v6 = vld [vmem:[#allocation8 + $0x1040] sm:$0xf0]  ;;  %v10307_v38 = vld [vmem:[#allocation8 + $0x588] sm:$0xf] }
 0x167   :  { %v14393_v36 = vld [vmem:[#allocation8 + $0x1404] sm:$0xf]  ;;  %v11648_v10 = vor.u32 %v14265_v48, %v11645_v6  ;;  %7262 = vmatpush.bf16.msrb.mxu3 %v13312_v56  ;;  %v14098_v48 = vld [vmem:[#allocation8 + $0xac4] sm:$0xf0] }
 0x168   :  { %v12157_v44 = vld [vmem:[#allocation8 + $0x1440] sm:$0xf0]  ;;  %v11459_v6 = vld [vmem:[#allocation8 + $0xe88] sm:$0xf]  ;;  %v10948_v42 = vor.u32 %v14098_v48, %v10947_v33 }
 0x169   :  { %v14537_v31 = vld [vmem:[#allocation8 + $0x1884] sm:$0xf]  ;;  %v12160_v47 = vor.u32 %v14393_v36, %v12157_v44  ;;  %7225 = vmatpush.bf16.msrb.mxu0 %v11648_v10  ;;  %v10372_v36 = vor.u32 %v13954_v29, %v10371_v16  ;;  %v14226_v44 = vld [vmem:[#allocation8 + $0xec4] sm:$0xf0]  ;;  %v9796_v10 = vor.u32 %v13810_v46, %v9795_v37 }
 0x16a   :  { %v12733_v62 = vld [vmem:[#allocation8 + $0x18c0] sm:$0xf0]  ;;  %v11460_v56 = vor.u32 %v14226_v44, %v11459_v6  ;;  %v13778_v8 = vld [vmem:[#allocation8 + $0xc4] sm:$0xf0] }
 0x16b   :  { %v14665_v54 = vld [vmem:[#allocation8 + $0x1c84] sm:$0xf]  ;;  %v12736_v49 = vor.u32 %v14537_v31, %v12733_v62  ;;  %7238 = vmatpush.bf16.msrb.mxu1 %v12160_v47  ;;  %v10883_v31 = vld [vmem:[#allocation8 + $0xa08] sm:$0xf] }
 0x16c   :  { %v13245_v27 = vld [vmem:[#allocation8 + $0x1cc0] sm:$0xf0]  ;;  %7226 = vmatmul.bf16.vlgmr.msrb.gmra.mxu0 %v15280_v43  ;;  %v14082_v62 = vld [vmem:[#allocation8 + $0xa44] sm:$0xf0] }
 0x16d   :  { %v14521_v3 = vld [vmem:[#allocation8 + $0x1804] sm:$0xf]  ;;  %v13248_v51 = vor.u32 %v14665_v54, %v13245_v27  ;;  %7270 = vmatpush.bf16.msra.mxu0 %v10052_v50  ;;  %7250 = vmatpush.bf16.msrb.mxu2 %v12736_v49  ;;  %v11395_v47 = vld [vmem:[#allocation8 + $0xe08] sm:$0xf]  ;;  %v10308_v50 = vor.u32 %v13938_v40, %v10307_v38  ;;  %v10884_v49 = vor.u32 %v14082_v62, %v10883_v31 }
 0x16e   :  { %v12669_v4 = vld [vmem:[#allocation8 + $0x1840] sm:$0xf0]  ;;  %7239 = vmatmul.bf16.vlgmr.msrb.gmra.mxu1 %v15290_v14  ;;  %v14210_v54 = vld [vmem:[#allocation8 + $0xe44] sm:$0xf0] }
 0x16f   :  { %v14649_v34 = vld [vmem:[#allocation8 + $0x1c04] sm:$0xf]  ;;  %7283 = vmatpush.bf16.msra.mxu1 %v10564_v17  ;;  %v12672_v12 = vor.u32 %v14521_v3, %v12669_v4  ;;  %7263 = vmatpush.bf16.msrb.mxu3 %v13248_v51  ;;  %v9731_v27 = vld [vmem:[#allocation8 + $0x108] sm:$0xf]  ;;  %v11396_v61 = vor.u32 %v14210_v54, %v11395_v47 }
 0x170   :  { %v13181_v5 = vld [vmem:[#allocation8 + $0x1c40] sm:$0xf0]  ;;  %v13794_v17 = vld [vmem:[#allocation8 + $0x144] sm:$0xf0] }
 0x171   :  { %v13184_v30 = vor.u32 %v14649_v34, %v13181_v5  ;;  %7271 = vmatpush.bf16.msra.mxu0 %v9988_v7  ;;  %7251 = vmatpush.bf16.msrb.mxu2 %v12672_v12  ;;  %v9732_v25 = vor.u32 %v13794_v17, %v9731_v27  ;;  %v10819_v3 = vld [vmem:[#allocation8 + $0x988] sm:$0xf]  ;;  %v10244_v34 = vor.u32 %v13922_v55, %v10243_v52 }
 0x172   :  { %v14066_v51 = vld [vmem:[#allocation8 + $0x9c4] sm:$0xf0] }
 0x173   :  { %7284 = vmatpush.bf16.msra.mxu1 %v10500_v53  ;;  %7264 = vmatpush.bf16.msrb.mxu3 %v13184_v30  ;;  %v11331_v4 = vld [vmem:[#allocation8 + $0xd88] sm:$0xf]  ;;  %v10820_v53 = vor.u32 %v14066_v51, %v10819_v3 }
 0x174   :  { %7252 = vmatmul.bf16.vlgmr.msrb.gmra.mxu2 %v15309_v11  ;;  %v14194_v5 = vld [vmem:[#allocation8 + $0xdc4] sm:$0xf0] }
 0x175   :  { %7296 = vmatpush.bf16.msra.mxu2 %v11076_v13  ;;  %7272 = vmatpush.bf16.msra.mxu0 %v9924_v19  ;;  %v9667_v7 = vld [vmem:[#allocation8 + $0x88] sm:$0xf]  ;;  %v11332_v18 = vor.u32 %v14194_v5, %v11331_v4 }
 0x176   :  { %7265 = vmatmul.bf16.vlgmr.msrb.gmra.mxu3 %v15318_v24  ;;  %v10179_v9 = vld [vmem:[#allocation8 + $0x488] sm:$0xf]  ;;  %v9668_v60 = vor.u32 %v13778_v8, %v9667_v7 }
 0x177   :  { %7309 = vmatpush.bf16.msra.mxu3 %v11588_v15  ;;  %7285 = vmatpush.bf16.msra.mxu1 %v10436_v26  ;;  %v13906_v2 = vld [vmem:[#allocation8 + $0x4c4] sm:$0xf0] }
 0x178   :  { %v10755_v39 = vld [vmem:[#allocation8 + $0x908] sm:$0xf]  ;;  %v10180_v30 = vor.u32 %v13906_v2, %v10179_v9 }
 0x179   :  { %7297 = vmatpush.bf16.msra.mxu2 %v11012_v35  ;;  %7273 = vmatpush.bf16.msra.mxu0 %v9860_v32  ;;  %v14050_v12 = vld [vmem:[#allocation8 + $0x944] sm:$0xf0] }
 0x17a   :  { %v11267_v21 = vld [vmem:[#allocation8 + $0xd08] sm:$0xf]  ;;  %v10756_v26 = vor.u32 %v14050_v12, %v10755_v39 }
 0x17b   :  { %7310 = vmatpush.bf16.msra.mxu3 %v11524_v63  ;;  %7286 = vmatpush.bf16.msra.mxu1 %v10372_v36  ;;  %v14178_v41 = vld [vmem:[#allocation8 + $0xd44] sm:$0xf0] }
 0x17c   :  { %v9603_v13 = vld [vmem:[#allocation8 + $0x8] sm:$0xf]  ;;  %v11268_v28 = vor.u32 %v14178_v41, %v11267_v21 }
 0x17d   :  { %7298 = vmatpush.bf16.msra.mxu2 %v10948_v42  ;;  %7274 = vmatpush.bf16.msra.mxu0 %v9796_v10  ;;  %v13762_v15 = vld [vmem:[#allocation8 + $0x44] sm:$0xf0] }
 0x17e   :  { %v10115_v19 = vld [vmem:[#allocation8 + $0x408] sm:$0xf]  ;;  %v9604_v16 = vor.u32 %v13762_v15, %v9603_v13 }
 0x17f   :  { %7311 = vmatpush.bf16.msra.mxu3 %v11460_v56  ;;  %7287 = vmatpush.bf16.msra.mxu1 %v10308_v50  ;;  %v13890_v20 = vld [vmem:[#allocation8 + $0x444] sm:$0xf0] }
 0x180   :  { %v12099_v22 = vld [vmem:[#allocation8 + $0x1388] sm:$0xf]  ;;  %v10116_v63 = vor.u32 %v13890_v20, %v10115_v19 }
 0x181   :  { %7299 = vmatpush.bf16.msra.mxu2 %v10884_v49  ;;  %7275 = vmatpush.bf16.msra.mxu0 %v9732_v25  ;;  %v14386_v23 = vld [vmem:[#allocation8 + $0x13c4] sm:$0xf0] }
 0x182   :  { %v12611_v1 = vld [vmem:[#allocation8 + $0x1788] sm:$0xf]  ;;  %v12100_v32 = vor.u32 %v14386_v23, %v12099_v22 }
 0x183   :  { %7312 = vmatpush.bf16.msra.mxu3 %v11396_v61  ;;  %7288 = vmatpush.bf16.msra.mxu1 %v10244_v34  ;;  %v14514_v57 = vld [vmem:[#allocation8 + $0x17c4] sm:$0xf0] }
 0x184   :  { %v10691_v29 = vld [vmem:[#allocation8 + $0x888] sm:$0xf]  ;;  %v12612_v6 = vor.u32 %v14514_v57, %v12611_v1 }
 0x185   :  { %7300 = vmatpush.bf16.msra.mxu2 %v10820_v53  ;;  %7276 = vmatpush.bf16.msra.mxu0 %v9668_v60  ;;  %v14034_v35 = vld [vmem:[#allocation8 + $0x8c4] sm:$0xf0] }
 0x186   :  { %v11203_v33 = vld [vmem:[#allocation8 + $0xc88] sm:$0xf]  ;;  %v10692_v37 = vor.u32 %v14034_v35, %v10691_v29 }
 0x187   :  { %7313 = vmatpush.bf16.msra.mxu3 %v11332_v18  ;;  %7289 = vmatpush.bf16.msra.mxu1 %v10180_v30  ;;  %v14162_v48 = vld [vmem:[#allocation8 + $0xcc4] sm:$0xf0] }
 0x188   :  { %v12035_v36 = vld [vmem:[#allocation8 + $0x1308] sm:$0xf]  ;;  %v11204_v42 = vor.u32 %v14162_v48, %v11203_v33 }
 0x189   :  { %v14370_v44 = vld [vmem:[#allocation8 + $0x1344] sm:$0xf0]  ;;  %7301 = vmatpush.bf16.msra.mxu2 %v10756_v26  ;;  %7277 = vmatpush.bf16.msra.mxu0 %v9604_v16 }
 0x18a   :  { %v12547_v46 = vld [vmem:[#allocation8 + $0x1708] sm:$0xf]  ;;  %v12036_v62 = vor.u32 %v14370_v44, %v12035_v36  ;;  %v15332_v36 = vld [vmem:[#allocation10] sm:$0xff] }
 0x18b   :  { %v14498_v38 = vld [vmem:[#allocation8 + $0x1744] sm:$0xf0]  ;;  %7314 = vmatpush.bf16.msra.mxu3 %v11268_v28  ;;  %7290 = vmatpush.bf16.msra.mxu1 %v10116_v63 }
 0x18c   :  { %v10627_v40 = vld [vmem:[#allocation8 + $0x808] sm:$0xf]  ;;  %v12548_v27 = vor.u32 %v14498_v38, %v12547_v46  ;;  %7278 = vmatmul.bf16.vlgmr.msra.gmra.mxu0 %v15185_v45 }
 0x18d   :  { %v14018_v56 = vld [vmem:[#allocation8 + $0x844] sm:$0xf0]  ;;  %7322 = vmatpush.bf16.msrb.mxu0 %v12100_v32  ;;  %7302 = vmatpush.bf16.msra.mxu2 %v10692_v37 }
 0x18e   :  { %v11139_v10 = vld [vmem:[#allocation8 + $0xc08] sm:$0xf]  ;;  %v10628_v49 = vor.u32 %v14018_v56, %v10627_v40  ;;  %7291 = vmatmul.bf16.vlgmr.msra.gmra.mxu1 %v15189_v58 }
 0x18f   :  { %v14146_v31 = vld [vmem:[#allocation8 + $0xc44] sm:$0xf0]  ;;  %7335 = vmatpush.bf16.msrb.mxu1 %v12612_v6  ;;  %7315 = vmatpush.bf16.msra.mxu3 %v11204_v42 }
 0x190   :  { %v13123_v47 = vld [vmem:[#allocation8 + $0x1b88] sm:$0xf]  ;;  %v11140_v3 = vor.u32 %v14146_v31, %v11139_v10  ;;  %v1910_v31 = vperm.slane %v15332_v36, 0 }
 0x191   :  { %v14642_v50 = vld [vmem:[#allocation8 + $0x1bc4] sm:$0xf0]  ;;  %7323 = vmatpush.bf16.msrb.mxu0 %v12036_v62  ;;  %7303 = vmatpush.bf16.msra.mxu2 %v10628_v49  ;;  %v7071_v49 = vpop.f32.mrf.mxu0 }
 0x192   :  { %v13635_v54 = vld [vmem:[#allocation8 + $0x1f88] sm:$0xf]  ;;  %v13124_v51 = vor.u32 %v14642_v50, %v13123_v47 }
 0x193   :  { %v14770_v17 = vld [vmem:[#allocation8 + $0x1fc4] sm:$0xf0]  ;;  %7336 = vmatpush.bf16.msrb.mxu1 %v12548_v27  ;;  %7316 = vmatpush.bf16.msra.mxu3 %v11140_v3 }
 0x194   :  { %v11971_v52 = vld [vmem:[#allocation8 + $0x1288] sm:$0xf]  ;;  %v13636_v4 = vor.u32 %v14770_v17, %v13635_v54  ;;  %7304 = vmatmul.bf16.vlgmr.msra.gmra.mxu2 %v15218_v59 }
 0x195   :  { %v14354_v55 = vld [vmem:[#allocation8 + $0x12c4] sm:$0xf0]  ;;  %7348 = vmatpush.bf16.msrb.mxu2 %v13124_v51 }
 0x196   :  { %v12483_v61 = vld [vmem:[#allocation8 + $0x1688] sm:$0xf]  ;;  %v11972_v34 = vor.u32 %v14354_v55, %v11971_v52  ;;  %7317 = vmatmul.bf16.vlgmr.msra.gmra.mxu3 %v15235_v0 }
 0x197   :  { %v14482_v25 = vld [vmem:[#allocation8 + $0x16c4] sm:$0xf0]  ;;  %7361 = vmatpush.bf16.msrb.mxu3 %v13636_v4 }
 0x198   :  { %v13059_v5 = vld [vmem:[#allocation8 + $0x1b08] sm:$0xf]  ;;  %v12484_v9 = vor.u32 %v14482_v25, %v12483_v61  ;;  %7324 = vmatpush.bf16.msrb.mxu0 %v11972_v34  ;;  %v7072_v34 = vadd.f32 %v7071_v49, %v1910_v31  ;;  %v13834_v31 = vld [vmem:[#allocation8 + $0x28c] sm:$0xf] }
 0x199   :  { %v14626_v7 = vld [vmem:[#allocation8 + $0x1b44] sm:$0xf0]  ;;  %v14106_v49 = vld [vmem:[#allocation8 + $0xb0c] sm:$0xf] }
 0x19a   :  { %v13571_v8 = vld [vmem:[#allocation8 + $0x1f08] sm:$0xf]  ;;  %v13060_v12 = vor.u32 %v14626_v7, %v13059_v5  ;;  %7337 = vmatpush.bf16.msrb.mxu1 %v12484_v9  ;;  %v7084_v5 = vpop.f32.mrf.mxu1 }
 0x19b   :  { %v14754_v2 = vld [vmem:[#allocation8 + $0x1f44] sm:$0xf0] }
 0x19c   :  { %v11907_v53 = vld [vmem:[#allocation8 + $0x1208] sm:$0xf]  ;;  %v13572_v21 = vor.u32 %v14754_v2, %v13571_v8  ;;  %7349 = vmatpush.bf16.msrb.mxu2 %v13060_v12 }
 0x19d   :  { %v14338_v39 = vld [vmem:[#allocation8 + $0x1244] sm:$0xf0] }
 0x19e   :  { %v12419_v18 = vld [vmem:[#allocation8 + $0x1608] sm:$0xf]  ;;  %v11908_v41 = vor.u32 %v14338_v39, %v11907_v53  ;;  %7362 = vmatpush.bf16.msrb.mxu3 %v13572_v21  ;;  %v13866_v39 = vld [vmem:[#allocation8 + $0x38c] sm:$0xf] }
 0x19f   :  { %v14466_v60 = vld [vmem:[#allocation8 + $0x1644] sm:$0xf0]  ;;  %v13994_v21 = vld [vmem:[#allocation8 + $0x78c] sm:$0xf] }
 0x1a0   :  { %v12995_v30 = vld [vmem:[#allocation8 + $0x1a88] sm:$0xf]  ;;  %v12420_v19 = vor.u32 %v14466_v60, %v12419_v18  ;;  %7325 = vmatpush.bf16.msrb.mxu0 %v11908_v41  ;;  %v10053_v18 = vld [vmem:[#allocation8 + $0x3c8] sm:$0xf0]  ;;  %v15335_v60 = vadd.f32 %v7084_v5, %v7072_v34 }
 0x1a1   :  { %v14610_v13 = vld [vmem:[#allocation8 + $0x1ac4] sm:$0xf0]  ;;  %v10565_v41 = vld [vmem:[#allocation8 + $0x7c8] sm:$0xf0] }
 0x1a2   :  { %v13507_v15 = vld [vmem:[#allocation8 + $0x1e88] sm:$0xf]  ;;  %v12996_v57 = vor.u32 %v14610_v13, %v12995_v30  ;;  %7338 = vmatpush.bf16.msrb.mxu1 %v12420_v19  ;;  %v13818_v34 = vld [vmem:[#allocation8 + $0x20c] sm:$0xf] }
 0x1a3   :  { %v14738_v20 = vld [vmem:[#allocation8 + $0x1ec4] sm:$0xf0]  ;;  %v9861_v5 = vld [vmem:[#allocation8 + $0x248] sm:$0xf0] }
 0x1a4   :  { %v11843_v22 = vld [vmem:[#allocation8 + $0x1188] sm:$0xf]  ;;  %v13508_v16 = vor.u32 %v14738_v20, %v13507_v15  ;;  %7350 = vmatpush.bf16.msrb.mxu2 %v12996_v57  ;;  %v13850_v57 = vld [vmem:[#allocation8 + $0x30c] sm:$0xf] }
 0x1a5   :  { %v14322_v23 = vld [vmem:[#allocation8 + $0x11c4] sm:$0xf0] }
 0x1a6   :  { %v12355_v26 = vld [vmem:[#allocation8 + $0x1588] sm:$0xf]  ;;  %v11844_v29 = vor.u32 %v14322_v23, %v11843_v22  ;;  %7363 = vmatpush.bf16.msrb.mxu3 %v13508_v16  ;;  %v10056_v22 = vor.u32 %v13866_v39, %v10053_v18  ;;  %v9864_v39 = vor.u32 %v13818_v34, %v9861_v5  ;;  %v14090_v18 = vld [vmem:[#allocation8 + $0xa8c] sm:$0xf] }
 0x1a7   :  { %v14450_v1 = vld [vmem:[#allocation8 + $0x15c4] sm:$0xf0]  ;;  %v13882_v34 = vld [vmem:[#allocation8 + $0x40c] sm:$0xf] }
 0x1a8   :  { %v12931_v28 = vld [vmem:[#allocation8 + $0x1a08] sm:$0xf]  ;;  %v12356_v33 = vor.u32 %v14450_v1, %v12355_v26  ;;  %7326 = vmatpush.bf16.msrb.mxu0 %v11844_v29  ;;  %v10568_v1 = vor.u32 %v13994_v21, %v10565_v41  ;;  %v13978_v29 = vld [vmem:[#allocation8 + $0x70c] sm:$0xf] }
 0x1a9   :  { %v14594_v35 = vld [vmem:[#allocation8 + $0x1a44] sm:$0xf0]  ;;  %v14218_v21 = vld [vmem:[#allocation8 + $0xe8c] sm:$0xf] }
 0x1aa   :  { %v13443_v63 = vld [vmem:[#allocation8 + $0x1e08] sm:$0xf]  ;;  %v12932_v46 = vor.u32 %v14594_v35, %v12931_v28  ;;  %7339 = vmatpush.bf16.msrb.mxu1 %v12356_v33  ;;  %v9989_v28 = vld [vmem:[#allocation8 + $0x348] sm:$0xf0] }
 0x1ab   :  { %v14722_v32 = vld [vmem:[#allocation8 + $0x1e44] sm:$0xf0]  ;;  %v10501_v35 = vld [vmem:[#allocation8 + $0x748] sm:$0xf0] }
 0x1ac   :  { %v11779_v48 = vld [vmem:[#allocation8 + $0x1108] sm:$0xf]  ;;  %v13444_v40 = vor.u32 %v14722_v32, %v13443_v63  ;;  %7351 = vmatpush.bf16.msrb.mxu2 %v12932_v46  ;;  %v7073_v32 = vpop.f32.mrf.mxu0  ;;  %v9992_v46 = vor.u32 %v13850_v57, %v9989_v28  ;;  %v10885_v57 = vld [vmem:[#allocation8 + $0xa48] sm:$0xf0] }
 0x1ad   :  { %v14306_v6 = vld [vmem:[#allocation8 + $0x1144] sm:$0xf0]  ;;  %v14202_v28 = vld [vmem:[#allocation8 + $0xe0c] sm:$0xf] }
 0x1ae   :  { %v12291_v44 = vld [vmem:[#allocation8 + $0x1508] sm:$0xf]  ;;  %v11780_v42 = vor.u32 %v14306_v6, %v11779_v48  ;;  %7364 = vmatpush.bf16.msrb.mxu3 %v13444_v40  ;;  %v11077_v40 = vld [vmem:[#allocation8 + $0xbc8] sm:$0xf0] }
 0x1af   :  { %v14434_v37 = vld [vmem:[#allocation8 + $0x1544] sm:$0xf0]  ;;  %v13786_v32 = vld [vmem:[#allocation8 + $0x10c] sm:$0xf] }
 0x1b0   :  { %v12867_v38 = vld [vmem:[#allocation8 + $0x1988] sm:$0xf]  ;;  %v12292_v62 = vor.u32 %v14434_v37, %v12291_v44  ;;  %7327 = vmatpush.bf16.msrb.mxu0 %v11780_v42  ;;  %v7086_v37 = vpop.f32.mrf.mxu1  ;;  %v14250_v42 = vld [vmem:[#allocation8 + $0xf8c] sm:$0xf] }
 0x1b1   :  { %v14578_v56 = vld [vmem:[#allocation8 + $0x19c4] sm:$0xf0]  ;;  %v10117_v5 = vld [vmem:[#allocation8 + $0x448] sm:$0xf0] }
 0x1b2   :  { %v13379_v10 = vld [vmem:[#allocation8 + $0x1d88] sm:$0xf]  ;;  %v12868_v52 = vor.u32 %v14578_v56, %v12867_v38  ;;  %7340 = vmatpush.bf16.msrb.mxu1 %v12292_v62  ;;  %v14122_v38 = vld [vmem:[#allocation8 + $0xb8c] sm:$0xf]  ;;  %v10504_v56 = vor.u32 %v13978_v29, %v10501_v35 }
 0x1b3   :  { %v14706_v47 = vld [vmem:[#allocation8 + $0x1dc4] sm:$0xf0]  ;;  %v9925_v62 = vld [vmem:[#allocation8 + $0x2c8] sm:$0xf0] }
 0x1b4   :  { %v11715_v50 = vld [vmem:[#allocation8 + $0x1088] sm:$0xf]  ;;  %v13380_v61 = vor.u32 %v14706_v47, %v13379_v10  ;;  %7352 = vmatpush.bf16.msrb.mxu2 %v12868_v52  ;;  %v11589_v10 = vld [vmem:[#allocation8 + $0xfc8] sm:$0xf0] }
 0x1b5   :  { %v14290_v54 = vld [vmem:[#allocation8 + $0x10c4] sm:$0xf0]  ;;  %v11592_v52 = vor.u32 %v14250_v42, %v11589_v10  ;;  %v14186_v42 = vld [vmem:[#allocation8 + $0xd8c] sm:$0xf] }
 0x1b6   :  { %v12227_v27 = vld [vmem:[#allocation8 + $0x1488] sm:$0xf]  ;;  %v11716_v25 = vor.u32 %v14290_v54, %v11715_v50  ;;  %7365 = vmatpush.bf16.msrb.mxu3 %v13380_v61  ;;  %v13962_v50 = vld [vmem:[#allocation8 + $0x68c] sm:$0xf] }
 0x1b7   :  { %v14418_v17 = vld [vmem:[#allocation8 + $0x14c4] sm:$0xf0]  ;;  %v10437_v54 = vld [vmem:[#allocation8 + $0x6c8] sm:$0xf0] }
 0x1b8   :  { %v12803_v55 = vld [vmem:[#allocation8 + $0x1908] sm:$0xf]  ;;  %v12228_v7 = vor.u32 %v14418_v17, %v12227_v27  ;;  %7328 = vmatpush.bf16.msrb.mxu0 %v11716_v25  ;;  %v11080_v17 = vor.u32 %v14122_v38, %v11077_v40  ;;  %v11013_v61 = vld [vmem:[#allocation8 + $0xb48] sm:$0xf0] }
 0x1b9   :  { %v14562_v3 = vld [vmem:[#allocation8 + $0x1944] sm:$0xf0]  ;;  %v14234_v25 = vld [vmem:[#allocation8 + $0xf0c] sm:$0xf] }
 0x1ba   :  { %v13315_v51 = vld [vmem:[#allocation8 + $0x1d08] sm:$0xf]  ;;  %v12804_v12 = vor.u32 %v14562_v3, %v12803_v55  ;;  %7341 = vmatpush.bf16.msrb.mxu1 %v12228_v7  ;;  %v9928_v55 = vor.u32 %v13834_v31, %v9925_v62  ;;  %v7097_v3 = vpop.f32.mrf.mxu2  ;;  %v14058_v38 = vld [vmem:[#allocation8 + $0x98c] sm:$0xf] }
 0x1bb   :  { %v14690_v4 = vld [vmem:[#allocation8 + $0x1d44] sm:$0xf0]  ;;  %v7098_v7 = vadd.f32 %v7097_v3, %v15335_v60  ;;  %v9797_v60 = vld [vmem:[#allocation8 + $0x1c8] sm:$0xf0] }
 0x1bc   :  { %v11651_v8 = vld [vmem:[#allocation8 + $0x1008] sm:$0xf]  ;;  %v13316_v30 = vor.u32 %v14690_v4, %v13315_v51  ;;  %7353 = vmatpush.bf16.msrb.mxu2 %v12804_v12  ;;  %v10440_v51 = vor.u32 %v13962_v50, %v10437_v54  ;;  %v11525_v4 = vld [vmem:[#allocation8 + $0xf48] sm:$0xf0] }
 0x1bd   :  { %v14274_v9 = vld [vmem:[#allocation8 + $0x1044] sm:$0xf0]  ;;  %v10949_v12 = vld [vmem:[#allocation8 + $0xac8] sm:$0xf0] }
 0x1be   :  { %v12163_v2 = vld [vmem:[#allocation8 + $0x1408] sm:$0xf]  ;;  %v11652_v13 = vor.u32 %v14274_v9, %v11651_v8  ;;  %7366 = vmatpush.bf16.msrb.mxu3 %v13316_v30  ;;  %v13946_v8 = vld [vmem:[#allocation8 + $0x60c] sm:$0xf] }
 0x1bf   :  { %v14402_v53 = vld [vmem:[#allocation8 + $0x1444] sm:$0xf0]  ;;  %v10373_v9 = vld [vmem:[#allocation8 + $0x648] sm:$0xf0] }
 0x1c0   :  { %v12739_v15 = vld [vmem:[#allocation8 + $0x1888] sm:$0xf]  ;;  %v12164_v20 = vor.u32 %v14402_v53, %v12163_v2  ;;  %7329 = vmatpush.bf16.msrb.mxu0 %v11652_v13  ;;  %v11016_v2 = vor.u32 %v14106_v49, %v11013_v61  ;;  %v11528_v53 = vor.u32 %v14234_v25, %v11525_v4  ;;  %v10376_v41 = vor.u32 %v13946_v8, %v10373_v9  ;;  %v11461_v30 = vld [vmem:[#allocation8 + $0xec8] sm:$0xf0]  ;;  %v15344_v9 = vpop.f32.mrf.mxu0 }
 0x1c1   :  { %v14546_v19 = vld [vmem:[#allocation8 + $0x18c4] sm:$0xf0]  ;;  %v13802_v13 = vld [vmem:[#allocation8 + $0x18c] sm:$0xf] }
 0x1c2   :  { %v13251_v23 = vld [vmem:[#allocation8 + $0x1c88] sm:$0xf]  ;;  %v12740_v16 = vor.u32 %v14546_v19, %v12739_v15  ;;  %7342 = vmatpush.bf16.msrb.mxu1 %v12164_v20  ;;  %v13930_v15 = vld [vmem:[#allocation8 + $0x58c] sm:$0xf]  ;;  %v10952_v20 = vor.u32 %v14090_v18, %v10949_v12  ;;  %v7099_v29 = vpop.f32.mrf.mxu2 }
 0x1c3   :  { %v14674_v26 = vld [vmem:[#allocation8 + $0x1cc4] sm:$0xf0]  ;;  %7330 = vmatmul.bf16.vlgmr.msrb.gmra.mxu0 %v15280_v43  ;;  %v10309_v19 = vld [vmem:[#allocation8 + $0x5c8] sm:$0xf0] }
 0x1c4   :  { %v12675_v63 = vld [vmem:[#allocation8 + $0x1808] sm:$0xf]  ;;  %v13252_v33 = vor.u32 %v14674_v26, %v13251_v23  ;;  %7374 = vmatpush.bf16.msra.mxu0 %v10056_v22  ;;  %7354 = vmatpush.bf16.msrb.mxu2 %v12740_v16  ;;  %v7110_v22 = vpop.f32.mrf.mxu3  ;;  %v11464_v23 = vor.u32 %v14218_v21, %v11461_v30  ;;  %v9800_v26 = vor.u32 %v13802_v13, %v9797_v60  ;;  %v10821_v40 = vld [vmem:[#allocation8 + $0x9c8] sm:$0xf0] }
 0x1c5   :  { %v14530_v48 = vld [vmem:[#allocation8 + $0x1844] sm:$0xf0]  ;;  %7343 = vmatmul.bf16.vlgmr.msrb.gmra.mxu1 %v15290_v14  ;;  %v15342_v16 = vadd.f32 %v7110_v22, %v7098_v7  ;;  %v10312_v35 = vor.u32 %v13930_v15, %v10309_v19  ;;  %v11333_v10 = vld [vmem:[#allocation8 + $0xdc8] sm:$0xf0]  ;;  %v10824_v54 = vor.u32 %v14058_v38, %v10821_v40  ;;  %v10120_v30 = vor.u32 %v13882_v34, %v10117_v5 }
 0x1c6   :  { %v13187_v6 = vld [vmem:[#allocation8 + $0x1c08] sm:$0xf]  ;;  %7387 = vmatpush.bf16.msra.mxu1 %v10568_v1  ;;  %v12676_v47 = vor.u32 %v14530_v48, %v12675_v63  ;;  %7367 = vmatpush.bf16.msrb.mxu3 %v13252_v33  ;;  %v14074_v1 = vld [vmem:[#allocation8 + $0xa0c] sm:$0xf] }
 0x1c7   :  { %v14658_v44 = vld [vmem:[#allocation8 + $0x1c44] sm:$0xf0]  ;;  %v11397_v63 = vld [vmem:[#allocation8 + $0xe48] sm:$0xf0] }
 0x1c8   :  { %v13188_v27 = vor.u32 %v14658_v44, %v13187_v6  ;;  %7375 = vmatpush.bf16.msra.mxu0 %v9992_v46  ;;  %7355 = vmatpush.bf16.msrb.mxu2 %v12676_v47  ;;  %v9733_v33 = vld [vmem:[#allocation8 + $0x148] sm:$0xf0]  ;;  %v10888_v44 = vor.u32 %v14074_v1, %v10885_v57  ;;  %v11400_v37 = vor.u32 %v14202_v28, %v11397_v63  ;;  %v15346_v28 = vpop.f32.mrf.mxu1 }
 0x1c9   :  { %v13914_v48 = vld [vmem:[#allocation8 + $0x50c] sm:$0xf]  ;;  %v9736_v46 = vor.u32 %v13786_v32, %v9733_v33 }
 0x1ca   :  { %7388 = vmatpush.bf16.msra.mxu1 %v10504_v56  ;;  %7368 = vmatpush.bf16.msrb.mxu3 %v13188_v27  ;;  %v10245_v6 = vld [vmem:[#allocation8 + $0x548] sm:$0xf0] }
 0x1cb   :  { %7356 = vmatmul.bf16.vlgmr.msrb.gmra.mxu2 %v15309_v11  ;;  %v10248_v56 = vor.u32 %v13914_v48, %v10245_v6  ;;  %v13770_v31 = vld [vmem:[#allocation8 + $0x8c] sm:$0xf] }
 0x1cc   :  { %7400 = vmatpush.bf16.msra.mxu2 %v11080_v17  ;;  %7376 = vmatpush.bf16.msra.mxu0 %v9928_v55  ;;  %v9669_v62 = vld [vmem:[#allocation8 + $0xc8] sm:$0xf0]  ;;  %v7112_v17 = vpop.f32.mrf.mxu3 }
 0x1cd   :  { %7369 = vmatmul.bf16.vlgmr.msrb.gmra.mxu3 %v15318_v24  ;;  %v13898_v47 = vld [vmem:[#allocation8 + $0x48c] sm:$0xf]  ;;  %v9672_v55 = vor.u32 %v13770_v31, %v9669_v62 }
 0x1ce   :  { %7413 = vmatpush.bf16.msra.mxu3 %v11592_v52  ;;  %7389 = vmatpush.bf16.msra.mxu1 %v10440_v51  ;;  %v10181_v50 = vld [vmem:[#allocation8 + $0x4c8] sm:$0xf0]  ;;  %v11336_v52 = vor.u32 %v14186_v42, %v11333_v10  ;;  %v7125_v42 = vpop.f32.mrf.mxu0 }
 0x1cf   :  { %v14042_v27 = vld [vmem:[#allocation8 + $0x90c] sm:$0xf]  ;;  %v10184_v3 = vor.u32 %v13898_v47, %v10181_v50 }
 0x1d0   :  { %7401 = vmatpush.bf16.msra.mxu2 %v11016_v2  ;;  %7377 = vmatpush.bf16.msra.mxu0 %v9864_v39  ;;  %v10757_v49 = vld [vmem:[#allocation8 + $0x948] sm:$0xf0] }
 0x1d1   :  { %v14170_v61 = vld [vmem:[#allocation8 + $0xd0c] sm:$0xf]  ;;  %v10760_v2 = vor.u32 %v14042_v27, %v10757_v49 }
 0x1d2   :  { %7414 = vmatpush.bf16.msra.mxu3 %v11528_v53  ;;  %7390 = vmatpush.bf16.msra.mxu1 %v10376_v41  ;;  %v11269_v25 = vld [vmem:[#allocation8 + $0xd48] sm:$0xf0] }
 0x1d3   :  { %v13754_v51 = vld [vmem:[#allocation8 + $0xc] sm:$0xf]  ;;  %v11272_v18 = vor.u32 %v14170_v61, %v11269_v25 }
 0x1d4   :  { %7402 = vmatpush.bf16.msra.mxu2 %v10952_v20  ;;  %7378 = vmatpush.bf16.msra.mxu0 %v9800_v26  ;;  %v9605_v4 = vld [vmem:[#allocation8 + $0x48] sm:$0xf0] }
 0x1d5   :  { %v14378_v7 = vld [vmem:[#allocation8 + $0x138c] sm:$0xf]  ;;  %v9608_v12 = vor.u32 %v13754_v51, %v9605_v4  ;;  %v7138_v4 = vpop.f32.mrf.mxu1 }
 0x1d6   :  { %7415 = vmatpush.bf16.msra.mxu3 %v11464_v23  ;;  %7391 = vmatpush.bf16.msra.mxu1 %v10312_v35  ;;  %v12101_v8 = vld [vmem:[#allocation8 + $0x13c8] sm:$0xf0] }
 0x1d7   :  { %v14506_v53 = vld [vmem:[#allocation8 + $0x178c] sm:$0xf]  ;;  %v12104_v13 = vor.u32 %v14378_v7, %v12101_v8 }
 0x1d8   :  { %7403 = vmatpush.bf16.msra.mxu2 %v10888_v44  ;;  %7379 = vmatpush.bf16.msra.mxu0 %v9736_v46  ;;  %v12613_v39 = vld [vmem:[#allocation8 + $0x17c8] sm:$0xf0] }
 0x1d9   :  { %v14026_v21 = vld [vmem:[#allocation8 + $0x88c] sm:$0xf]  ;;  %v12616_v19 = vor.u32 %v14506_v53, %v12613_v39 }
 0x1da   :  { %7416 = vmatpush.bf16.msra.mxu3 %v11400_v37  ;;  %7392 = vmatpush.bf16.msra.mxu1 %v10248_v56  ;;  %v10693_v41 = vld [vmem:[#allocation8 + $0x8c8] sm:$0xf0] }
 0x1db   :  { %v14154_v60 = vld [vmem:[#allocation8 + $0xc8c] sm:$0xf]  ;;  %v10696_v23 = vor.u32 %v14026_v21, %v10693_v41 }
 0x1dc   :  { %7404 = vmatpush.bf16.msra.mxu2 %v10824_v54  ;;  %7380 = vmatpush.bf16.msra.mxu0 %v9672_v55  ;;  %v11205_v15 = vld [vmem:[#allocation8 + $0xcc8] sm:$0xf0] }
 0x1dd   :  { %v14362_v20 = vld [vmem:[#allocation8 + $0x130c] sm:$0xf]  ;;  %v11208_v29 = vor.u32 %v14154_v60, %v11205_v15  ;;  %v15352_v60 = vpop.f32.mrf.mxu0  ;;  %v7124_v15 = vadd.f32 %v15344_v9, %v15342_v16 }
 0x1de   :  { %7417 = vmatpush.bf16.msra.mxu3 %v11336_v52  ;;  %7393 = vmatpush.bf16.msra.mxu1 %v10184_v3  ;;  %v12037_v22 = vld [vmem:[#allocation8 + $0x1348] sm:$0xf0] }
 0x1df   :  { %v14490_v26 = vld [vmem:[#allocation8 + $0x170c] sm:$0xf]  ;;  %v12040_v33 = vor.u32 %v14362_v20, %v12037_v22 }
 0x1e0   :  { %7405 = vmatpush.bf16.msra.mxu2 %v10760_v2  ;;  %v12549_v1 = vld [vmem:[#allocation8 + $0x1748] sm:$0xf0]  ;;  %7381 = vmatpush.bf16.msra.mxu0 %v9608_v12 }
 0x1e1   :  { %v14010_v57 = vld [vmem:[#allocation8 + $0x80c] sm:$0xf]  ;;  %v12552_v37 = vor.u32 %v14490_v26, %v12549_v1 }
 0x1e2   :  { %7418 = vmatpush.bf16.msra.mxu3 %v11272_v18  ;;  %v10629_v35 = vld [vmem:[#allocation8 + $0x848] sm:$0xf0]  ;;  %7394 = vmatpush.bf16.msra.mxu1 %v10120_v30 }
 0x1e3   :  { %v14138_v63 = vld [vmem:[#allocation8 + $0xc0c] sm:$0xf]  ;;  %7382 = vmatmul.bf16.vlgmr.msra.gmra.mxu0 %v15185_v45  ;;  %v10632_v56 = vor.u32 %v14010_v57, %v10629_v35 }
 0x1e4   :  { %v11141_v32 = vld [vmem:[#allocation8 + $0xc48] sm:$0xf0]  ;;  %7426 = vmatpush.bf16.msrb.mxu0 %v12104_v13  ;;  %7406 = vmatpush.bf16.msra.mxu2 %v10696_v23 }
 0x1e5   :  { %v14634_v48 = vld [vmem:[#allocation8 + $0x1b8c] sm:$0xf]  ;;  %7395 = vmatmul.bf16.vlgmr.msra.gmra.mxu1 %v15189_v58  ;;  %v11144_v62 = vor.u32 %v14138_v63, %v11141_v32 }
 0x1e6   :  { %v13125_v6 = vld [vmem:[#allocation8 + $0x1bc8] sm:$0xf0]  ;;  %7439 = vmatpush.bf16.msrb.mxu1 %v12616_v19  ;;  %7419 = vmatpush.bf16.msra.mxu3 %v11208_v29 }
 0x1e7   :  { %v14762_v44 = vld [vmem:[#allocation8 + $0x1f8c] sm:$0xf]  ;;  %v13128_v47 = vor.u32 %v14634_v48, %v13125_v6  ;;  %v7137_v48 = vadd.f32 %v15346_v28, %v7124_v15  ;;  %v7149_v6 = vpop.f32.mrf.mxu2 }
 0x1e8   :  { %v13637_v46 = vld [vmem:[#allocation8 + $0x1fc8] sm:$0xf0]  ;;  %7427 = vmatpush.bf16.msrb.mxu0 %v12040_v33  ;;  %7407 = vmatpush.bf16.msra.mxu2 %v10632_v56 }
 0x1e9   :  { %v14346_v38 = vld [vmem:[#allocation8 + $0x128c] sm:$0xf]  ;;  %v13640_v50 = vor.u32 %v14762_v44, %v13637_v46 }
 0x1ea   :  { %v11973_v40 = vld [vmem:[#allocation8 + $0x12c8] sm:$0xf0]  ;;  %7440 = vmatpush.bf16.msrb.mxu1 %v12552_v37  ;;  %7420 = vmatpush.bf16.msra.mxu3 %v11144_v62 }
 0x1eb   :  { %v14474_v10 = vld [vmem:[#allocation8 + $0x168c] sm:$0xf]  ;;  %v11976_v54 = vor.u32 %v14346_v38, %v11973_v40  ;;  %7408 = vmatmul.bf16.vlgmr.msra.gmra.mxu2 %v15218_v59 }
 0x1ec   :  { %v12485_v31 = vld [vmem:[#allocation8 + $0x16c8] sm:$0xf0]  ;;  %7452 = vmatpush.bf16.msrb.mxu2 %v13128_v47 }
 0x1ed   :  { %v14618_v27 = vld [vmem:[#allocation8 + $0x1b0c] sm:$0xf]  ;;  %v12488_v55 = vor.u32 %v14474_v10, %v12485_v31  ;;  %7428 = vmatpush.bf16.msrb.mxu0 %v11976_v54  ;;  %7421 = vmatmul.bf16.vlgmr.msra.gmra.mxu3 %v15235_v0  ;;  %v7150_v10 = vadd.f32 %v7149_v6, %v7137_v48 }
 0x1ee   :  { %v13061_v17 = vld [vmem:[#allocation8 + $0x1b48] sm:$0xf0]  ;;  %7465 = vmatpush.bf16.msrb.mxu3 %v13640_v50  ;;  %v15357_v50 = vpop.f32.mrf.mxu1 }
 0x1ef   :  { %v14746_v52 = vld [vmem:[#allocation8 + $0x1f0c] sm:$0xf]  ;;  %v13064_v34 = vor.u32 %v14618_v27, %v13061_v17  ;;  %7441 = vmatpush.bf16.msrb.mxu1 %v12488_v55  ;;  %v7177_v27 = vpop.f32.mrf.mxu0  ;;  %v7151_v15 = vpop.f32.mrf.mxu2 }
 0x1f0   :  { %v13573_v49 = vld [vmem:[#allocation8 + $0x1f48] sm:$0xf0]  ;;  %v14259_v27 = vld [vmem:[#allocation8 + $0xfcc] sm:$0xf0] }
 0x1f1   :  { %v14330_v61 = vld [vmem:[#allocation8 + $0x120c] sm:$0xf]  ;;  %v13576_v5 = vor.u32 %v14746_v52, %v13573_v49  ;;  %7453 = vmatpush.bf16.msrb.mxu2 %v13064_v34 }
 0x1f2   :  { %v11909_v25 = vld [vmem:[#allocation8 + $0x1248] sm:$0xf0] }
 0x1f3   :  { %v14458_v3 = vld [vmem:[#allocation8 + $0x160c] sm:$0xf]  ;;  %v11912_v7 = vor.u32 %v14330_v61, %v11909_v25  ;;  %7466 = vmatpush.bf16.msrb.mxu3 %v13576_v5  ;;  %v7162_v25 = vpop.f32.mrf.mxu3 }
 0x1f4   :  { %v12421_v51 = vld [vmem:[#allocation8 + $0x1648] sm:$0xf0]  ;;  %v15359_v5 = vadd.f32 %v7162_v25, %v7150_v10  ;;  %v1911_v10 = vperm.slane %v15332_v36, 1 }
 0x1f5   :  { %v14602_v8 = vld [vmem:[#allocation8 + $0x1a8c] sm:$0xf]  ;;  %v12424_v39 = vor.u32 %v14458_v3, %v12421_v51  ;;  %7429 = vmatpush.bf16.msrb.mxu0 %v11912_v7  ;;  %v10059_v7 = vld [vmem:[#allocation8 + $0x390] sm:$0xf] }
 0x1f6   :  { %v12997_v2 = vld [vmem:[#allocation8 + $0x1ac8] sm:$0xf0] }
 0x1f7   :  { %v14730_v53 = vld [vmem:[#allocation8 + $0x1e8c] sm:$0xf]  ;;  %v13000_v13 = vor.u32 %v14602_v8, %v12997_v2  ;;  %7442 = vmatpush.bf16.msrb.mxu1 %v12424_v39  ;;  %v13875_v8 = vld [vmem:[#allocation8 + $0x3cc] sm:$0xf0] }
 0x1f8   :  { %v13509_v18 = vld [vmem:[#allocation8 + $0x1ec8] sm:$0xf0]  ;;  %v10571_v2 = vld [vmem:[#allocation8 + $0x790] sm:$0xf] }
 0x1f9   :  { %v14314_v12 = vld [vmem:[#allocation8 + $0x118c] sm:$0xf]  ;;  %v13512_v19 = vor.u32 %v14730_v53, %v13509_v18  ;;  %7454 = vmatpush.bf16.msrb.mxu2 %v13000_v13  ;;  %v14003_v39 = vld [vmem:[#allocation8 + $0x7cc] sm:$0xf0] }
 0x1fa   :  { %v11845_v21 = vld [vmem:[#allocation8 + $0x11c8] sm:$0xf0] }
 0x1fb   :  { %v14442_v41 = vld [vmem:[#allocation8 + $0x158c] sm:$0xf]  ;;  %v11848_v20 = vor.u32 %v14314_v12, %v11845_v21  ;;  %7467 = vmatpush.bf16.msrb.mxu3 %v13512_v19  ;;  %v8726_v21 = vsel %vm601_vm0, %v15359_v5, 0.0 }
 0x1fc   :  { %v12357_v30 = vld [vmem:[#allocation8 + $0x15c8] sm:$0xf0] }
 0x1fd   :  { %v14586_v22 = vld [vmem:[#allocation8 + $0x1a0c] sm:$0xf]  ;;  %v12360_v1 = vor.u32 %v14442_v41, %v12357_v30  ;;  %7430 = vmatpush.bf16.msrb.mxu0 %v11848_v20  ;;  %v8854_v41 = vmul.f32 %v15359_v5, %v15359_v5 }
 0x1fe   :  { %v12933_v23 = vld [vmem:[#allocation8 + $0x1a48] sm:$0xf0] }
 0x1ff   :  { %v14714_v26 = vld [vmem:[#allocation8 + $0x1e0c] sm:$0xf]  ;;  %v12936_v33 = vor.u32 %v14586_v22, %v12933_v23  ;;  %7443 = vmatpush.bf16.msrb.mxu1 %v12360_v1  ;;  %v8727_v22 = vrot.slane %v8726_v21, 4  ;;  %v9995_v1 = vld [vmem:[#allocation8 + $0x310] sm:$0xf] }
 0x200   :  { %v13445_v57 = vld [vmem:[#allocation8 + $0x1e48] sm:$0xf0] }
 0x201   :  { %v14298_v29 = vld [vmem:[#allocation8 + $0x110c] sm:$0xf]  ;;  %v13448_v16 = vor.u32 %v14714_v26, %v13445_v57  ;;  %7455 = vmatpush.bf16.msrb.mxu2 %v12936_v33  ;;  %v10060_v26 = vor.u32 %v13875_v8, %v10059_v7  ;;  %v13859_v57 = vld [vmem:[#allocation8 + $0x34c] sm:$0xf0]  ;;  %v8728_v33 = vadd.f32 %v8727_v22, %v8726_v21 }
 0x202   :  { %v11781_v35 = vld [vmem:[#allocation8 + $0x1148] sm:$0xf0]  ;;  %v11019_v8 = vld [vmem:[#allocation8 + $0xb10] sm:$0xf] }
 0x203   :  { %v14426_v63 = vld [vmem:[#allocation8 + $0x150c] sm:$0xf]  ;;  %v11784_v9 = vor.u32 %v14298_v29, %v11781_v35  ;;  %7468 = vmatpush.bf16.msrb.mxu3 %v13448_v16  ;;  %v8870_v29 = vsel %vm601_vm0, %v8854_v41, 0.0  ;;  %v10572_v35 = vor.u32 %v14003_v39, %v10571_v2  ;;  %v14115_v2 = vld [vmem:[#allocation8 + $0xb4c] sm:$0xf0]  ;;  %v7176_v39 = vadd.f32 %v15352_v60, %v1911_v10 }
 0x204   :  { %v12293_v32 = vld [vmem:[#allocation8 + $0x1548] sm:$0xf0]  ;;  %v8871_v48 = vrot.slane %v8870_v29, 4  ;;  %v9867_v21 = vld [vmem:[#allocation8 + $0x210] sm:$0xf] }
 0x205   :  { %v14570_v44 = vld [vmem:[#allocation8 + $0x198c] sm:$0xf]  ;;  %v12296_v38 = vor.u32 %v14426_v63, %v12293_v32  ;;  %7431 = vmatpush.bf16.msrb.mxu0 %v11784_v9  ;;  %v10507_v63 = vld [vmem:[#allocation8 + $0x710] sm:$0xf]  ;;  %v7190_v9 = vpop.f32.mrf.mxu1 }
 0x206   :  { %v12869_v37 = vld [vmem:[#allocation8 + $0x19c8] sm:$0xf0]  ;;  %v13987_v32 = vld [vmem:[#allocation8 + $0x74c] sm:$0xf0] }
 0x207   :  { %v14698_v46 = vld [vmem:[#allocation8 + $0x1d8c] sm:$0xf]  ;;  %v12872_v47 = vor.u32 %v14570_v44, %v12869_v37  ;;  %7444 = vmatpush.bf16.msrb.mxu1 %v12296_v38  ;;  %v13827_v41 = vld [vmem:[#allocation8 + $0x24c] sm:$0xf0] }
 0x208   :  { %v13381_v40 = vld [vmem:[#allocation8 + $0x1dc8] sm:$0xf0]  ;;  %v14099_v60 = vld [vmem:[#allocation8 + $0xacc] sm:$0xf0] }
 0x209   :  { %v14282_v42 = vld [vmem:[#allocation8 + $0x108c] sm:$0xf]  ;;  %v13384_v17 = vor.u32 %v14698_v46, %v13381_v40  ;;  %7456 = vmatpush.bf16.msrb.mxu2 %v12872_v47  ;;  %v11083_v40 = vld [vmem:[#allocation8 + $0xb90] sm:$0xf] }
 0x20a   :  { %v11717_v56 = vld [vmem:[#allocation8 + $0x10c8] sm:$0xf0]  ;;  %v14131_v47 = vld [vmem:[#allocation8 + $0xbcc] sm:$0xf0] }
 0x20b   :  { %v14410_v31 = vld [vmem:[#allocation8 + $0x148c] sm:$0xf]  ;;  %v11720_v52 = vor.u32 %v14282_v42, %v11717_v56  ;;  %7469 = vmatpush.bf16.msrb.mxu3 %v13384_v17  ;;  %v8729_v42 = vrot.slane %v8728_v33, 2  ;;  %v8872_v56 = vadd.f32 %v8871_v48, %v8870_v29  ;;  %v9931_v17 = vld [vmem:[#allocation8 + $0x290] sm:$0xf]  ;;  %v7189_v29 = vadd.f32 %v15357_v50, %v7176_v39 }
 0x20c   :  { %v12229_v62 = vld [vmem:[#allocation8 + $0x14c8] sm:$0xf0]  ;;  %v10315_v48 = vld [vmem:[#allocation8 + $0x590] sm:$0xf] }
 0x20d   :  { %v14554_v28 = vld [vmem:[#allocation8 + $0x190c] sm:$0xf]  ;;  %v12232_v3 = vor.u32 %v14410_v31, %v12229_v62  ;;  %7432 = vmatpush.bf16.msrb.mxu0 %v11720_v52  ;;  %v7164_v31 = vpop.f32.mrf.mxu3  ;;  %v9996_v62 = vor.u32 %v13859_v57, %v9995_v1  ;;  %v13843_v52 = vld [vmem:[#allocation8 + $0x2cc] sm:$0xf0]  ;;  %v8730_v25 = vadd.f32 %v8729_v42, %v8728_v33  ;;  %v7240_v50 = vpop.f32.mrf.mxu1 }
 0x20e   :  { %v12805_v54 = vld [vmem:[#allocation8 + $0x1948] sm:$0xf0]  ;;  %v9932_v7 = vor.u32 %v13843_v52, %v9931_v17  ;;  %v10955_v1 = vld [vmem:[#allocation8 + $0xa90] sm:$0xf] }
 0x20f   :  { %v14682_v55 = vld [vmem:[#allocation8 + $0x1d0c] sm:$0xf]  ;;  %v12808_v53 = vor.u32 %v14554_v28, %v12805_v54  ;;  %7445 = vmatpush.bf16.msrb.mxu1 %v12232_v3  ;;  %v11595_v28 = vld [vmem:[#allocation8 + $0xf90] sm:$0xf]  ;;  %v10508_v54 = vor.u32 %v13987_v32, %v10507_v63  ;;  %v8873_v3 = vrot.slane %v8872_v56, 2  ;;  %v8731_v15 = vrot.slane %v8730_v25, 1 }
 0x210   :  { %v13317_v49 = vld [vmem:[#allocation8 + $0x1d48] sm:$0xf0]  ;;  %v11467_v57 = vld [vmem:[#allocation8 + $0xe90] sm:$0xf] }
 0x211   :  { %v14266_v61 = vld [vmem:[#allocation8 + $0x100c] sm:$0xf]  ;;  %v13320_v30 = vor.u32 %v14682_v55, %v13317_v49  ;;  %7457 = vmatpush.bf16.msrb.mxu2 %v12808_v53  ;;  %v10443_v49 = vld [vmem:[#allocation8 + $0x690] sm:$0xf]  ;;  %v8732_v9 = vadd.f32 %v8731_v15, %v8730_v25 }
 0x212   :  { %v11653_v51 = vld [vmem:[#allocation8 + $0x1048] sm:$0xf0]  ;;  %v11531_v53 = vld [vmem:[#allocation8 + $0xf10] sm:$0xf] }
 0x213   :  { %v14394_v4 = vld [vmem:[#allocation8 + $0x140c] sm:$0xf]  ;;  %v11656_v13 = vor.u32 %v14266_v61, %v11653_v51  ;;  %7470 = vmatpush.bf16.msrb.mxu3 %v13320_v30  ;;  %v13971_v61 = vld [vmem:[#allocation8 + $0x6cc] sm:$0xf0]  ;;  %v11084_v51 = vor.u32 %v14131_v47, %v11083_v40  ;;  %v15373_v52 = vmul.f32 0.25, %v8732_v9 }
 0x214   :  { %v12165_v34 = vld [vmem:[#allocation8 + $0x1448] sm:$0xf0]  ;;  %v10379_v30 = vld [vmem:[#allocation8 + $0x610] sm:$0xf] }
 0x215   :  { %v14538_v18 = vld [vmem:[#allocation8 + $0x188c] sm:$0xf]  ;;  %v12168_v23 = vor.u32 %v14394_v4, %v12165_v34  ;;  %7433 = vmatpush.bf16.msrb.mxu0 %v11656_v13  ;;  %v7201_v4 = vpop.f32.mrf.mxu2  ;;  %v11596_v34 = vor.u32 %v14259_v27, %v11595_v28  ;;  %v13955_v13 = vld [vmem:[#allocation8 + $0x64c] sm:$0xf0]  ;;  %v7214_v22 = vpop.f32.mrf.mxu3 }
 0x216   :  { %v12741_v12 = vld [vmem:[#allocation8 + $0x18c8] sm:$0xf0]  ;;  %v14227_v63 = vld [vmem:[#allocation8 + $0xecc] sm:$0xf0] }
 0x217   :  { %v14666_v19 = vld [vmem:[#allocation8 + $0x1c8c] sm:$0xf]  ;;  %v12744_v16 = vor.u32 %v14538_v18, %v12741_v12  ;;  %7446 = vmatpush.bf16.msrb.mxu1 %v12168_v23  ;;  %v10444_v18 = vor.u32 %v13971_v61, %v10443_v49  ;;  %v14243_v12 = vld [vmem:[#allocation8 + $0xf4c] sm:$0xf0]  ;;  %v11468_v40 = vor.u32 %v14227_v63, %v11467_v57 }
 0x218   :  { %v13253_v20 = vld [vmem:[#allocation8 + $0x1cc8] sm:$0xf0]  ;;  %7434 = vmatmul.bf16.vlgmr.msrb.gmra.mxu0 %v15280_v43  ;;  %v11532_v23 = vor.u32 %v14243_v12, %v11531_v53  ;;  %v9803_v32 = vld [vmem:[#allocation8 + $0x190] sm:$0xf] }
 0x219   :  { %v14522_v6 = vld [vmem:[#allocation8 + $0x180c] sm:$0xf]  ;;  %v13256_v37 = vor.u32 %v14666_v19, %v13253_v20  ;;  %7478 = vmatpush.bf16.msra.mxu0 %v10060_v26  ;;  %7458 = vmatpush.bf16.msrb.mxu2 %v12744_v16  ;;  %v8874_v19 = vadd.f32 %v8873_v3, %v8872_v56  ;;  %v11020_v20 = vor.u32 %v14115_v2, %v11019_v8  ;;  %v13811_v33 = vld [vmem:[#allocation8 + $0x1cc] sm:$0xf0] }
 0x21a   :  { %v12677_v44 = vld [vmem:[#allocation8 + $0x1848] sm:$0xf0]  ;;  %7447 = vmatmul.bf16.vlgmr.msrb.gmra.mxu1 %v15290_v14  ;;  %v9868_v26 = vor.u32 %v13827_v41, %v9867_v21  ;;  %v13939_v16 = vld [vmem:[#allocation8 + $0x5cc] sm:$0xf0]  ;;  %v9804_v42 = vor.u32 %v13811_v33, %v9803_v32  ;;  %v8998_v21 = vmul.f32 %v15373_v52, %v15373_v52 }
 0x21b   :  { %v14650_v46 = vld [vmem:[#allocation8 + $0x1c0c] sm:$0xf]  ;;  %7491 = vmatpush.bf16.msra.mxu1 %v10572_v35  ;;  %v12680_v55 = vor.u32 %v14522_v6, %v12677_v44  ;;  %7471 = vmatpush.bf16.msrb.mxu3 %v13256_v37  ;;  %v10380_v35 = vor.u32 %v13955_v13, %v10379_v30  ;;  %v8875_v6 = vrot.slane %v8874_v19, 1  ;;  %v7202_v44 = vadd.f32 %v7201_v4, %v7189_v29  ;;  %v7227_v37 = vpop.f32.mrf.mxu0  ;;  %v10891_v56 = vld [vmem:[#allocation8 + $0xa10] sm:$0xf] }
 0x21c   :  { %v13189_v38 = vld [vmem:[#allocation8 + $0x1c48] sm:$0xf0]  ;;  %v14083_v10 = vld [vmem:[#allocation8 + $0xa4c] sm:$0xf0] }
 0x21d   :  { %v13192_v36 = vor.u32 %v14650_v46, %v13189_v38  ;;  %7479 = vmatpush.bf16.msra.mxu0 %v9996_v62  ;;  %7459 = vmatpush.bf16.msrb.mxu2 %v12680_v55  ;;  %v10956_v46 = vor.u32 %v14099_v60, %v10955_v1  ;;  %v7203_v38 = vpop.f32.mrf.mxu2  ;;  %v11403_v31 = vld [vmem:[#allocation8 + $0xe10] sm:$0xf]  ;;  %v10316_v62 = vor.u32 %v13939_v16, %v10315_v48  ;;  %v7216_v25 = vpop.f32.mrf.mxu3 }
 0x21e   :  { %v14211_v47 = vld [vmem:[#allocation8 + $0xe4c] sm:$0xf0]  ;;  %v8876_v55 = vadd.f32 %v8875_v6, %v8874_v19  ;;  %v7215_v49 = vadd.f32 %v7214_v22, %v7202_v44  ;;  %v10892_v61 = vor.u32 %v14083_v10, %v10891_v56  ;;  %v7242_v19 = vpop.f32.mrf.mxu1 }
 0x21f   :  { %7492 = vmatpush.bf16.msra.mxu1 %v10508_v54  ;;  %7472 = vmatpush.bf16.msrb.mxu3 %v13192_v36  ;;  %v9739_v28 = vld [vmem:[#allocation8 + $0x110] sm:$0xf]  ;;  %v11404_v3 = vor.u32 %v14211_v47, %v11403_v31 }
 0x220   :  { %7460 = vmatmul.bf16.vlgmr.msrb.gmra.mxu2 %v15309_v11  ;;  %v13795_v54 = vld [vmem:[#allocation8 + $0x14c] sm:$0xf0]  ;;  %v8982_v12 = vmul.f32 0.25, %v8876_v55  ;;  %v7228_v41 = vadd.f32 %v7227_v37, %v7215_v49 }
 0x221   :  { %7504 = vmatpush.bf16.msra.mxu2 %v11084_v51  ;;  %7480 = vmatpush.bf16.msra.mxu0 %v9932_v7  ;;  %v10251_v27 = vld [vmem:[#allocation8 + $0x510] sm:$0xf]  ;;  %v9740_v36 = vor.u32 %v13795_v54, %v9739_v28 }
 0x222   :  { %7473 = vmatmul.bf16.vlgmr.msrb.gmra.mxu3 %v15318_v24  ;;  %v13923_v17 = vld [vmem:[#allocation8 + $0x54c] sm:$0xf0]  ;;  %v9014_v48 = vsub.f32 %v8982_v12, %v8998_v21  ;;  %v7241_v16 = vadd.f32 %v7240_v50, %v7228_v41 }
 0x223   :  { %7517 = vmatpush.bf16.msra.mxu3 %v11596_v34  ;;  %7493 = vmatpush.bf16.msra.mxu1 %v10444_v18  ;;  %v10827_v51 = vld [vmem:[#allocation8 + $0x990] sm:$0xf]  ;;  %v10252_v7 = vor.u32 %v13923_v17, %v10251_v27  ;;  %v7229_v30 = vpop.f32.mrf.mxu0 }
 0x224   :  { %v14067_v4 = vld [vmem:[#allocation8 + $0x9cc] sm:$0xf0]  ;;  %v9030_v25 = vmax.f32 %v9014_v48, 0.0 }
 0x225   :  { %7505 = vmatpush.bf16.msra.mxu2 %v11020_v20  ;;  %7481 = vmatpush.bf16.msra.mxu0 %v9868_v26  ;;  %v11339_v34 = vld [vmem:[#allocation8 + $0xd90] sm:$0xf]  ;;  %v10828_v13 = vor.u32 %v14067_v4, %v10827_v51 }
 0x226   :  { %v14195_v8 = vld [vmem:[#allocation8 + $0xdcc] sm:$0xf0]  ;;  %v15383_v19 = vadd.f32 1e-05, %v9030_v25 }
 0x227   :  { %7518 = vmatpush.bf16.msra.mxu3 %v11532_v23  ;;  %7494 = vmatpush.bf16.msra.mxu1 %v10380_v35  ;;  %v9675_v2 = vld [vmem:[#allocation8 + $0x90] sm:$0xf]  ;;  %v11340_v20 = vor.u32 %v14195_v8, %v11339_v34 }
 0x228   :  { %v13779_v53 = vld [vmem:[#allocation8 + $0xcc] sm:$0xf0]  ;;  %14803 = vrsqrt.f32 %v15383_v19  ;;  %vm9068_vm11 = vweird.f32 %v15383_v19 }
 0x229   :  { %7506 = vmatpush.bf16.msra.mxu2 %v10956_v46  ;;  %7482 = vmatpush.bf16.msra.mxu0 %v9804_v42  ;;  %v10187_v39 = vld [vmem:[#allocation8 + $0x490] sm:$0xf]  ;;  %v9676_v22 = vor.u32 %v13779_v53, %v9675_v2  ;;  %v7253_v46 = vpop.f32.mrf.mxu2 }
 0x22a   :  { %v13907_v18 = vld [vmem:[#allocation8 + $0x4cc] sm:$0xf0]  ;;  %v7254_v31 = vadd.f32 %v7253_v46, %v7241_v16 }
 0x22b   :  { %7519 = vmatpush.bf16.msra.mxu3 %v11468_v40  ;;  %7495 = vmatpush.bf16.msra.mxu1 %v10316_v62  ;;  %v10763_v15 = vld [vmem:[#allocation8 + $0x910] sm:$0xf]  ;;  %v10188_v60 = vor.u32 %v13907_v18, %v10187_v39  ;;  %v7266_v62 = vpop.f32.mrf.mxu3 }
 0x22c   :  { %v14051_v23 = vld [vmem:[#allocation8 + $0x94c] sm:$0xf0] }
 0x22d   :  { %7507 = vmatpush.bf16.msra.mxu2 %v10892_v61  ;;  %7483 = vmatpush.bf16.msra.mxu0 %v9740_v36  ;;  %v11275_v26 = vld [vmem:[#allocation8 + $0xd10] sm:$0xf]  ;;  %v10764_v9 = vor.u32 %v14051_v23, %v10763_v15 }
 0x22e   :  { %v14179_v1 = vld [vmem:[#allocation8 + $0xd4c] sm:$0xf0] }
 0x22f   :  { %7520 = vmatpush.bf16.msra.mxu3 %v11404_v3  ;;  %7496 = vmatpush.bf16.msra.mxu1 %v10252_v7  ;;  %v9611_v57 = vld [vmem:[#allocation8 + $0x10] sm:$0xf]  ;;  %v11276_v38 = vor.u32 %v14179_v1, %v11275_v26  ;;  %v15377_v3 = vadd.f32 %v7266_v62, %v7254_v31  ;;  %v15389_v62 = vld [vmem:[#allocation10] sm:$0xff] }
 0x230   :  { %v13763_v29 = vld [vmem:[#allocation8 + $0x4c] sm:$0xf0] }
 0x231   :  { %v10123_v35 = vld [vmem:[#allocation8 + $0x410] sm:$0xf]  ;;  %7508 = vmatpush.bf16.msra.mxu2 %v10828_v13  ;;  %7484 = vmatpush.bf16.msra.mxu0 %v9676_v22  ;;  %v9612_v40 = vor.u32 %v13763_v29, %v9611_v57  ;;  %v8733_v53 = vsel %vm601_vm0, %v15377_v3, 0.0  ;;  %v8855_v39 = vmul.f32 %v15377_v3, %v15377_v3 }
 0x232   :  { %v13891_v63 = vld [vmem:[#allocation8 + $0x44c] sm:$0xf0]  ;;  %v8734_v41 = vrot.slane %v8733_v53, 4 }
 0x233   :  { %v12107_v32 = vld [vmem:[#allocation8 + $0x1390] sm:$0xf]  ;;  %7521 = vmatpush.bf16.msra.mxu3 %v11340_v20  ;;  %7497 = vmatpush.bf16.msra.mxu1 %v10188_v60  ;;  %v10124_v47 = vor.u32 %v13891_v63, %v10123_v35  ;;  %v8877_v20 = vsel %vm601_vm0, %v8855_v39, 0.0  ;;  %v7255_v60 = vpop.f32.mrf.mxu2  ;;  %v7268_v63 = vpop.f32.mrf.mxu3 }
 0x234   :  { %v14387_v33 = vld [vmem:[#allocation8 + $0x13cc] sm:$0xf0]  ;;  %v8735_v26 = vadd.f32 %v8734_v41, %v8733_v53  ;;  %v8878_v1 = vrot.slane %v8877_v20, 4 }
 0x235   :  { %v12619_v6 = vld [vmem:[#allocation8 + $0x1790] sm:$0xf]  ;;  %v12108_v28 = vor.u32 %v14387_v33, %v12107_v32  ;;  %7509 = vmatpush.bf16.msra.mxu2 %v10764_v9  ;;  %7485 = vmatpush.bf16.msra.mxu0 %v9612_v40 }
 0x236   :  { %v14515_v44 = vld [vmem:[#allocation8 + $0x17cc] sm:$0xf0] }
 0x237   :  { %v10699_v37 = vld [vmem:[#allocation8 + $0x890] sm:$0xf]  ;;  %v12620_v17 = vor.u32 %v14515_v44, %v12619_v6  ;;  %7522 = vmatpush.bf16.msra.mxu3 %v11276_v38  ;;  %7498 = vmatpush.bf16.msra.mxu1 %v10124_v47  ;;  %v8736_v6 = vrot.slane %v8735_v26, 2  ;;  %v8879_v44 = vadd.f32 %v8878_v1, %v8877_v20  ;;  %v1912_v47 = vperm.slane %v15389_v62, 2 }
 0x238   :  { %v14035_v42 = vld [vmem:[#allocation8 + $0x8cc] sm:$0xf0]  ;;  %7486 = vmatmul.bf16.vlgmr.msra.gmra.mxu0 %v15185_v45 }
 0x239   :  { %v11211_v56 = vld [vmem:[#allocation8 + $0xc90] sm:$0xf]  ;;  %v10700_v36 = vor.u32 %v14035_v42, %v10699_v37  ;;  %7530 = vmatpush.bf16.msrb.mxu0 %v12108_v28 }
 0x23a   :  { %v14163_v10 = vld [vmem:[#allocation8 + $0xccc] sm:$0xf0]  ;;  %7499 = vmatmul.bf16.vlgmr.msra.gmra.mxu1 %v15189_v58 }
 0x23b   :  { %v12043_v54 = vld [vmem:[#allocation8 + $0x1310] sm:$0xf]  ;;  %v11212_v34 = vor.u32 %v14163_v10, %v11211_v56  ;;  %7543 = vmatpush.bf16.msrb.mxu1 %v12620_v17  ;;  %7510 = vmatpush.bf16.msra.mxu2 %v10700_v36  ;;  %v8737_v56 = vadd.f32 %v8736_v6, %v8735_v26  ;;  %v8880_v10 = vrot.slane %v8879_v44, 2 }
 0x23c   :  { %v14371_v50 = vld [vmem:[#allocation8 + $0x134c] sm:$0xf0] }
 0x23d   :  { %v12555_v27 = vld [vmem:[#allocation8 + $0x1710] sm:$0xf]  ;;  %v12044_v18 = vor.u32 %v14371_v50, %v12043_v54  ;;  %7523 = vmatpush.bf16.msra.mxu3 %v11212_v34 }
 0x23e   :  { %v14499_v55 = vld [vmem:[#allocation8 + $0x174c] sm:$0xf0] }
 0x23f   :  { %v10635_v49 = vld [vmem:[#allocation8 + $0x810] sm:$0xf]  ;;  %v12556_v30 = vor.u32 %v14499_v55, %v12555_v27  ;;  %7531 = vmatpush.bf16.msrb.mxu0 %v12044_v18  ;;  %v15394_v18 = vpop.eup %14803 }
 0x240   :  { %v14019_v61 = vld [vmem:[#allocation8 + $0x84c] sm:$0xf0]  ;;  %v9063_v63 = vmul.f32 %v15394_v18, %v15383_v19  ;;  %vm9069_vm10 = vweird.f32 %v15394_v18 }
 0x241   :  { %v11147_v51 = vld [vmem:[#allocation8 + $0xc10] sm:$0xf]  ;;  %v10636_v22 = vor.u32 %v14019_v61, %v10635_v49  ;;  %7544 = vmatpush.bf16.msrb.mxu1 %v12556_v30  ;;  %v8738_v49 = vrot.slane %v8737_v56, 1  ;;  %v8881_v61 = vadd.f32 %v8880_v10, %v8879_v44  ;;  %vm15420_vm12 = vmor %vm9068_vm11, %vm9069_vm10 }
 0x242   :  { %v14147_v4 = vld [vmem:[#allocation8 + $0xc4c] sm:$0xf0] }
 0x243   :  { %v13131_v7 = vld [vmem:[#allocation8 + $0x1b90] sm:$0xf]  ;;  %v11148_v57 = vor.u32 %v14147_v4, %v11147_v51  ;;  %7511 = vmatpush.bf16.msra.mxu2 %v10636_v22 }
 0x244   :  { %v14643_v8 = vld [vmem:[#allocation8 + $0x1bcc] sm:$0xf0] }
 0x245   :  { %v13643_v2 = vld [vmem:[#allocation8 + $0x1f90] sm:$0xf]  ;;  %v13132_v29 = vor.u32 %v14643_v8, %v13131_v7  ;;  %7524 = vmatpush.bf16.msra.mxu3 %v11148_v57  ;;  %v8739_v7 = vadd.f32 %v8738_v49, %v8737_v56  ;;  %v8882_v8 = vrot.slane %v8881_v61, 1 }
 0x246   :  { %v14771_v12 = vld [vmem:[#allocation8 + $0x1fcc] sm:$0xf0]  ;;  %7512 = vmatmul.bf16.vlgmr.msra.gmra.mxu2 %v15218_v59 }
 0x247   :  { %v11979_v21 = vld [vmem:[#allocation8 + $0x1290] sm:$0xf]  ;;  %v13644_v32 = vor.u32 %v14771_v12, %v13643_v2  ;;  %7556 = vmatpush.bf16.msrb.mxu2 %v13132_v29  ;;  %v7279_v2 = vpop.f32.mrf.mxu0  ;;  %v15396_v22 = vmul.f32 0.25, %v8739_v7 }
 0x248   :  { %v14355_v13 = vld [vmem:[#allocation8 + $0x12cc] sm:$0xf0]  ;;  %7525 = vmatmul.bf16.vlgmr.msra.gmra.mxu3 %v15235_v0  ;;  %v7280_v12 = vadd.f32 %v7279_v2, %v1912_v47  ;;  %v9064_v47 = vmul.f32 %v15394_v18, %v9063_v63 }
 0x249   :  { %v12491_v15 = vld [vmem:[#allocation8 + $0x1690] sm:$0xf]  ;;  %v11980_v33 = vor.u32 %v14355_v13, %v11979_v21  ;;  %7569 = vmatpush.bf16.msrb.mxu3 %v13644_v32  ;;  %v7292_v21 = vpop.f32.mrf.mxu1 }
 0x24a   :  { %v14483_v23 = vld [vmem:[#allocation8 + $0x16cc] sm:$0xf0]  ;;  %v7293_v57 = vadd.f32 %v7292_v21, %v7280_v12  ;;  %v9065_v12 = vmul.f32 0.5, %v9064_v47  ;;  %v14123_v47 = vld [vmem:[#allocation8 + $0xb94] sm:$0xf] }
 0x24b   :  { %v13067_v35 = vld [vmem:[#allocation8 + $0x1b10] sm:$0xf]  ;;  %v12492_v37 = vor.u32 %v14483_v23, %v12491_v15  ;;  %7532 = vmatpush.bf16.msrb.mxu0 %v11980_v33  ;;  %v8883_v23 = vadd.f32 %v8882_v8, %v8881_v61  ;;  %v8999_v33 = vmul.f32 %v15396_v22, %v15396_v22 }
 0x24c   :  { %v14627_v48 = vld [vmem:[#allocation8 + $0x1b4c] sm:$0xf0] }
 0x24d   :  { %v13579_v16 = vld [vmem:[#allocation8 + $0x1f10] sm:$0xf]  ;;  %v13068_v31 = vor.u32 %v14627_v48, %v13067_v35  ;;  %7545 = vmatpush.bf16.msrb.mxu1 %v12492_v37  ;;  %v8983_v32 = vmul.f32 0.25, %v8883_v23 }
 0x24e   :  { %v14755_v9 = vld [vmem:[#allocation8 + $0x1f4c] sm:$0xf0] }
 0x24f   :  { %v11915_v46 = vld [vmem:[#allocation8 + $0x1210] sm:$0xf]  ;;  %v13580_v54 = vor.u32 %v14755_v9, %v13579_v16  ;;  %7557 = vmatpush.bf16.msrb.mxu2 %v13068_v31 }
 0x250   :  { %v14339_v38 = vld [vmem:[#allocation8 + $0x124c] sm:$0xf0] }
 0x251   :  { %v12427_v40 = vld [vmem:[#allocation8 + $0x1610] sm:$0xf]  ;;  %v11916_v50 = vor.u32 %v14339_v38, %v11915_v46  ;;  %7570 = vmatpush.bf16.msrb.mxu3 %v13580_v54  ;;  %v9015_v46 = vsub.f32 %v8983_v32, %v8999_v33  ;;  %v7281_v54 = vpop.f32.mrf.mxu0 }
 0x252   :  { %v14467_v42 = vld [vmem:[#allocation8 + $0x164c] sm:$0xf0]  ;;  %v14251_v54 = vld [vmem:[#allocation8 + $0xf94] sm:$0xf] }
 0x253   :  { %v13003_v28 = vld [vmem:[#allocation8 + $0x1a90] sm:$0xf]  ;;  %v12428_v25 = vor.u32 %v14467_v42, %v12427_v40  ;;  %7533 = vmatpush.bf16.msrb.mxu0 %v11916_v50 }
 0x254   :  { %v14611_v27 = vld [vmem:[#allocation8 + $0x1acc] sm:$0xf0] }
 0x255   :  { %v13515_v17 = vld [vmem:[#allocation8 + $0x1e90] sm:$0xf]  ;;  %v13004_v53 = vor.u32 %v14611_v27, %v13003_v28  ;;  %7546 = vmatpush.bf16.msrb.mxu1 %v12428_v25  ;;  %v9031_v28 = vmax.f32 %v9015_v46, 0.0  ;;  %v10509_v46 = vld [vmem:[#allocation8 + $0x750] sm:$0xf0] }
 0x256   :  { %v14739_v55 = vld [vmem:[#allocation8 + $0x1ecc] sm:$0xf0] }
 0x257   :  { %v11851_v36 = vld [vmem:[#allocation8 + $0x1190] sm:$0xf]  ;;  %v13516_v41 = vor.u32 %v14739_v55, %v13515_v17  ;;  %7558 = vmatpush.bf16.msrb.mxu2 %v13004_v53  ;;  %v7294_v55 = vpop.f32.mrf.mxu1  ;;  %v13867_v53 = vld [vmem:[#allocation8 + $0x394] sm:$0xf] }
 0x258   :  { %v14323_v51 = vld [vmem:[#allocation8 + $0x11cc] sm:$0xf0]  ;;  %v13835_v55 = vld [vmem:[#allocation8 + $0x294] sm:$0xf] }
 0x259   :  { %v12363_v4 = vld [vmem:[#allocation8 + $0x1590] sm:$0xf]  ;;  %v11852_v30 = vor.u32 %v14323_v51, %v11851_v36  ;;  %7571 = vmatpush.bf16.msrb.mxu3 %v13516_v41  ;;  %v13995_v41 = vld [vmem:[#allocation8 + $0x794] sm:$0xf] }
 0x25a   :  { %v14451_v34 = vld [vmem:[#allocation8 + $0x15cc] sm:$0xf0] }
 0x25b   :  { %v12939_v39 = vld [vmem:[#allocation8 + $0x1a10] sm:$0xf]  ;;  %v12364_v26 = vor.u32 %v14451_v34, %v12363_v4  ;;  %7534 = vmatpush.bf16.msrb.mxu0 %v11852_v30  ;;  %v15403_v4 = vadd.f32 1e-05, %v9031_v28  ;;  %v10573_v30 = vld [vmem:[#allocation8 + $0x7d0] sm:$0xf0] }
 0x25c   :  { %v14595_v13 = vld [vmem:[#allocation8 + $0x1a4c] sm:$0xf0]  ;;  %v10576_v33 = vor.u32 %v13995_v41, %v10573_v30  ;;  %v11085_v28 = vld [vmem:[#allocation8 + $0xbd0] sm:$0xf0] }
 0x25d   :  { %v13451_v15 = vld [vmem:[#allocation8 + $0x1e10] sm:$0xf]  ;;  %v12940_v48 = vor.u32 %v14595_v13, %v12939_v39  ;;  %7547 = vmatpush.bf16.msrb.mxu1 %v12364_v26  ;;  %v10061_v39 = vld [vmem:[#allocation8 + $0x3d0] sm:$0xf0]  ;;  %14805 = vrsqrt.f32 %v15403_v4  ;;  %v7305_v13 = vpop.f32.mrf.mxu2  ;;  %vm9078_vm14 = vweird.f32 %v15403_v4 }
 0x25e   :  { %v14723_v20 = vld [vmem:[#allocation8 + $0x1e4c] sm:$0xf0]  ;;  %v11021_v41 = vld [vmem:[#allocation8 + $0xb50] sm:$0xf0] }
 0x25f   :  { %v11787_v1 = vld [vmem:[#allocation8 + $0x1110] sm:$0xf]  ;;  %v13452_v16 = vor.u32 %v14723_v20, %v13451_v15  ;;  %7559 = vmatpush.bf16.msrb.mxu2 %v12940_v48  ;;  %v13851_v48 = vld [vmem:[#allocation8 + $0x314] sm:$0xf] }
 0x260   :  { %v14307_v60 = vld [vmem:[#allocation8 + $0x114c] sm:$0xf0]  ;;  %v14235_v30 = vld [vmem:[#allocation8 + $0xf14] sm:$0xf] }
 0x261   :  { %v12299_v29 = vld [vmem:[#allocation8 + $0x1510] sm:$0xf]  ;;  %v11788_v9 = vor.u32 %v14307_v60, %v11787_v1  ;;  %7572 = vmatpush.bf16.msrb.mxu3 %v13452_v16  ;;  %v7306_v1 = vadd.f32 %v7305_v13, %v7293_v57  ;;  %v7318_v60 = vpop.f32.mrf.mxu3  ;;  %v9997_v16 = vld [vmem:[#allocation8 + $0x350] sm:$0xf0] }
 0x262   :  { %v14435_v35 = vld [vmem:[#allocation8 + $0x154c] sm:$0xf0]  ;;  %v11533_v13 = vld [vmem:[#allocation8 + $0xf50] sm:$0xf0] }
 0x263   :  { %v12875_v6 = vld [vmem:[#allocation8 + $0x1990] sm:$0xf]  ;;  %v12300_v38 = vor.u32 %v14435_v35, %v12299_v29  ;;  %7535 = vmatpush.bf16.msrb.mxu0 %v11788_v9  ;;  %v10064_v35 = vor.u32 %v13867_v53, %v10061_v39  ;;  %v13979_v9 = vld [vmem:[#allocation8 + $0x714] sm:$0xf] }
 0x264   :  { %v14579_v44 = vld [vmem:[#allocation8 + $0x19cc] sm:$0xf0] }
 0x265   :  { %v13387_v37 = vld [vmem:[#allocation8 + $0x1d90] sm:$0xf]  ;;  %v12876_v50 = vor.u32 %v14579_v44, %v12875_v6  ;;  %7548 = vmatpush.bf16.msrb.mxu1 %v12300_v38  ;;  %v9066_v6 = vsub.f32 1.5, %v9065_v12  ;;  %v15406_v44 = vadd.f32 %v7318_v60, %v7306_v1  ;;  %v13947_v1 = vld [vmem:[#allocation8 + $0x614] sm:$0xf] }
 0x266   :  { %v14707_v40 = vld [vmem:[#allocation8 + $0x1dcc] sm:$0xf0]  ;;  %v10381_v60 = vld [vmem:[#allocation8 + $0x650] sm:$0xf0] }
 0x267   :  { %v11723_v42 = vld [vmem:[#allocation8 + $0x1090] sm:$0xf]  ;;  %v13388_v49 = vor.u32 %v14707_v40, %v13387_v37  ;;  %7560 = vmatpush.bf16.msrb.mxu2 %v12876_v50  ;;  %v9067_v53 = vmul.f32 %v15394_v18, %v9066_v6  ;;  %v11469_v6 = vld [vmem:[#allocation8 + $0xed0] sm:$0xf0] }
 0x268   :  { %v14291_v56 = vld [vmem:[#allocation8 + $0x10cc] sm:$0xf0] }
 0x269   :  { %v12235_v10 = vld [vmem:[#allocation8 + $0x1490] sm:$0xf]  ;;  %v11724_v61 = vor.u32 %v14291_v56, %v11723_v42  ;;  %7573 = vmatpush.bf16.msrb.mxu3 %v13388_v49  ;;  %v9933_v49 = vld [vmem:[#allocation8 + $0x2d0] sm:$0xf0]  ;;  %v7320_v39 = vpop.f32.mrf.mxu3  ;;  %v9071_v19 = vsel %vm15420_vm12, %v15394_v18, %v9067_v53 }
 0x26a   :  { %v14419_v31 = vld [vmem:[#allocation8 + $0x14cc] sm:$0xf0]  ;;  %v9805_v18 = vld [vmem:[#allocation8 + $0x1d0] sm:$0xf0] }
 0x26b   :  { %v12811_v27 = vld [vmem:[#allocation8 + $0x1910] sm:$0xf]  ;;  %v12236_v34 = vor.u32 %v14419_v31, %v12235_v10  ;;  %7536 = vmatpush.bf16.msrb.mxu0 %v11724_v61  ;;  %v15408_v10 = vpop.eup %14805  ;;  %v10000_v31 = vor.u32 %v13851_v48, %v9997_v16  ;;  %v10957_v16 = vld [vmem:[#allocation8 + $0xad0] sm:$0xf0] }
 0x26c   :  { %v14563_v17 = vld [vmem:[#allocation8 + $0x194c] sm:$0xf0]  ;;  %v9073_v50 = vmul.f32 %v15408_v10, %v15403_v4  ;;  %vm9079_vm13 = vweird.f32 %v15408_v10  ;;  %v7331_v4 = vpop.f32.mrf.mxu0 }
 0x26d   :  { %v13323_v25 = vld [vmem:[#allocation8 + $0x1d10] sm:$0xf]  ;;  %v12812_v21 = vor.u32 %v14563_v17, %v12811_v27  ;;  %7549 = vmatpush.bf16.msrb.mxu1 %v12236_v34  ;;  %v10512_v27 = vor.u32 %v13979_v9, %v10509_v46  ;;  %v11597_v17 = vld [vmem:[#allocation8 + $0xfd0] sm:$0xf0]  ;;  %v7307_v34 = vpop.f32.mrf.mxu2  ;;  %vm9080_vm15 = vmor %vm9078_vm14, %vm9079_vm13 }
 0x26e   :  { %v14691_v36 = vld [vmem:[#allocation8 + $0x1d4c] sm:$0xf0]  ;;  %v11600_v12 = vor.u32 %v14251_v54, %v11597_v17  ;;  %v14219_v9 = vld [vmem:[#allocation8 + $0xe94] sm:$0xf]  ;;  %v7332_v54 = vadd.f32 %v7331_v4, %v15406_v44 }
 0x26f   :  { %v11659_v51 = vld [vmem:[#allocation8 + $0x1010] sm:$0xf]  ;;  %v13324_v15 = vor.u32 %v14691_v36, %v13323_v25  ;;  %7561 = vmatpush.bf16.msrb.mxu2 %v12812_v21  ;;  %v13963_v25 = vld [vmem:[#allocation8 + $0x694] sm:$0xf]  ;;  %v9936_v21 = vor.u32 %v13835_v55, %v9933_v49 }
 0x270   :  { %v14275_v7 = vld [vmem:[#allocation8 + $0x104c] sm:$0xf0]  ;;  %v10445_v36 = vld [vmem:[#allocation8 + $0x6d0] sm:$0xf0] }
 0x271   :  { %v12171_v8 = vld [vmem:[#allocation8 + $0x1410] sm:$0xf]  ;;  %v11660_v20 = vor.u32 %v14275_v7, %v11659_v51  ;;  %7574 = vmatpush.bf16.msrb.mxu3 %v13324_v15  ;;  %v9074_v51 = vmul.f32 %v15408_v10, %v9073_v50  ;;  %v7344_v50 = vpop.f32.mrf.mxu1  ;;  %v14075_v17 = vld [vmem:[#allocation8 + $0xa14] sm:$0xf] }
 0x272   :  { %v14403_v2 = vld [vmem:[#allocation8 + $0x144c] sm:$0xf0]  ;;  %v11405_v49 = vld [vmem:[#allocation8 + $0xe50] sm:$0xf0] }
 0x273   :  { %v12747_v23 = vld [vmem:[#allocation8 + $0x1890] sm:$0xf]  ;;  %v12172_v29 = vor.u32 %v14403_v2, %v12171_v8  ;;  %7537 = vmatpush.bf16.msrb.mxu0 %v11660_v20  ;;  %v11088_v8 = vor.u32 %v14123_v47, %v11085_v28  ;;  %v14107_v2 = vld [vmem:[#allocation8 + $0xb14] sm:$0xf]  ;;  %v9075_v15 = vmul.f32 0.5, %v9074_v51  ;;  %v10448_v20 = vor.u32 %v13963_v25, %v10445_v36 }
 0x274   :  { %v14547_v26 = vld [vmem:[#allocation8 + $0x18cc] sm:$0xf0]  ;;  %v11472_v47 = vor.u32 %v14219_v9, %v11469_v6  ;;  %v9741_v25 = vld [vmem:[#allocation8 + $0x150] sm:$0xf0]  ;;  %v15440_v36 = vadd.f32 %v7344_v50, %v7332_v54 }
 0x275   :  { %v13259_v63 = vld [vmem:[#allocation8 + $0x1c90] sm:$0xf]  ;;  %v12748_v37 = vor.u32 %v14547_v26, %v12747_v23  ;;  %7550 = vmatpush.bf16.msrb.mxu1 %v12172_v29  ;;  %v13819_v23 = vld [vmem:[#allocation8 + $0x214] sm:$0xf] }
 0x276   :  { %v14675_v32 = vld [vmem:[#allocation8 + $0x1ccc] sm:$0xf0]  ;;  %7538 = vmatmul.bf16.vlgmr.msrb.gmra.mxu0 %v15280_v43  ;;  %v9869_v26 = vld [vmem:[#allocation8 + $0x250] sm:$0xf0] }
 0x277   :  { %v12683_v38 = vld [vmem:[#allocation8 + $0x1810] sm:$0xf]  ;;  %v13260_v57 = vor.u32 %v14675_v32, %v13259_v63  ;;  %7582 = vmatpush.bf16.msra.mxu0 %v10064_v35  ;;  %7562 = vmatpush.bf16.msrb.mxu2 %v12748_v37  ;;  %v9076_v35 = vsub.f32 1.5, %v9075_v15  ;;  %v11024_v63 = vor.u32 %v14107_v2, %v11021_v41  ;;  %v14091_v32 = vld [vmem:[#allocation8 + $0xa94] sm:$0xf]  ;;  %v9872_v48 = vor.u32 %v13819_v23, %v9869_v26 }
 0x278   :  { %v14531_v40 = vld [vmem:[#allocation8 + $0x184c] sm:$0xf0]  ;;  %7551 = vmatmul.bf16.vlgmr.msrb.gmra.mxu1 %v15290_v14  ;;  %v9222_v37 = vsub.f32 %v15359_v5, %v15373_v52  ;;  %v10317_v5 = vld [vmem:[#allocation8 + $0x5d0] sm:$0xf0] }
 0x279   :  { %v13195_v42 = vld [vmem:[#allocation8 + $0x1c10] sm:$0xf]  ;;  %7595 = vmatpush.bf16.msra.mxu1 %v10576_v33  ;;  %v12684_v61 = vor.u32 %v14531_v40, %v12683_v38  ;;  %7575 = vmatpush.bf16.msrb.mxu3 %v13260_v57  ;;  %v11536_v33 = vor.u32 %v14235_v30, %v11533_v13  ;;  %v9077_v46 = vmul.f32 %v15408_v10, %v9076_v35  ;;  %v13803_v57 = vld [vmem:[#allocation8 + $0x194] sm:$0xf]  ;;  %v7346_v35 = vpop.f32.mrf.mxu1 }
 0x27a   :  { %v14659_v56 = vld [vmem:[#allocation8 + $0x1c4c] sm:$0xf0]  ;;  %v10384_v38 = vor.u32 %v13947_v1, %v10381_v60  ;;  %v9223_v40 = vsub.f32 %v15377_v3, %v15396_v22  ;;  %v9238_v52 = vmul.f32 %v9222_v37, %v9071_v19  ;;  %v10893_v3 = vld [vmem:[#allocation8 + $0xa50] sm:$0xf0]  ;;  %v7333_v1 = vpop.f32.mrf.mxu0 }
 0x27b   :  { %v13196_v7 = vor.u32 %v14659_v56, %v13195_v42  ;;  %7583 = vmatpush.bf16.msra.mxu0 %v10000_v31  ;;  %7563 = vmatpush.bf16.msrb.mxu2 %v12684_v61  ;;  %v13931_v42 = vld [vmem:[#allocation8 + $0x594] sm:$0xf]  ;;  %v9081_v56 = vsel %vm9080_vm15, %v15408_v10, %v9077_v46  ;;  %v10960_v31 = vor.u32 %v14091_v32, %v10957_v16 }
 0x27c   :  { %v9239_v28 = vmul.f32 %v9223_v40, %v9081_v56  ;;  %v14203_v22 = vld [vmem:[#allocation8 + $0xe14] sm:$0xf]  ;;  %v10320_v55 = vor.u32 %v13931_v42, %v10317_v5  ;;  %v9254_v44 = vmax.f32 %v9238_v52, 0.0  ;;  %v7357_v5 = vpop.f32.mrf.mxu2 }
 0x27d   :  { %7596 = vmatpush.bf16.msra.mxu1 %v10512_v27  ;;  %7576 = vmatpush.bf16.msrb.mxu3 %v13196_v7  ;;  %v9808_v27 = vor.u32 %v13803_v57, %v9805_v18  ;;  %v13787_v61 = vld [vmem:[#allocation8 + $0x114] sm:$0xf]  ;;  %v10896_v7 = vor.u32 %v14075_v17, %v10893_v3  ;;  %v11408_v53 = vor.u32 %v14203_v22, %v11405_v49 }
 0x27e   :  { %7564 = vmatmul.bf16.vlgmr.msrb.gmra.mxu2 %v15309_v11  ;;  %v9255_v10 = vmax.f32 %v9239_v28, 0.0  ;;  %v13915_v51 = vld [vmem:[#allocation8 + $0x514] sm:$0xf]  ;;  %v9744_v39 = vor.u32 %v13787_v61, %v9741_v25 }
 0x27f   :  { %7608 = vmatpush.bf16.msra.mxu2 %v11088_v8  ;;  %7584 = vmatpush.bf16.msra.mxu0 %v9936_v21  ;;  %v10253_v34 = vld [vmem:[#allocation8 + $0x550] sm:$0xf0] }
 0x280   :  { %7577 = vmatmul.bf16.vlgmr.msrb.gmra.mxu3 %v15318_v24  ;;  %v14059_v8 = vld [vmem:[#allocation8 + $0x994] sm:$0xf]  ;;  %v9286_v2 = vrot.slane %v9255_v10, 4  ;;  %v10256_v41 = vor.u32 %v13915_v51, %v10253_v34 }
 0x281   :  { %7621 = vmatpush.bf16.msra.mxu3 %v11600_v12  ;;  %7597 = vmatpush.bf16.msra.mxu1 %v10448_v20  ;;  %v10829_v12 = vld [vmem:[#allocation8 + $0x9d0] sm:$0xf0] }
 0x282   :  { %v14187_v21 = vld [vmem:[#allocation8 + $0xd94] sm:$0xf]  ;;  %v9294_v20 = vsel %vm601_vm0, %v9254_v44, %v9286_v2  ;;  %v10832_v60 = vor.u32 %v14059_v8, %v10829_v12 }
 0x283   :  { %7609 = vmatpush.bf16.msra.mxu2 %v11024_v63  ;;  %7585 = vmatpush.bf16.msra.mxu0 %v9872_v48  ;;  %v11341_v30 = vld [vmem:[#allocation8 + $0xdd0] sm:$0xf0]  ;;  %9310 = vst [vmem:[#allocation11] sm:$0xff] %v9294_v20 }
 0x284   :  { %v13771_v13 = vld [vmem:[#allocation8 + $0x94] sm:$0xf]  ;;  %v11344_v63 = vor.u32 %v14187_v21, %v11341_v30 }
 0x285   :  { %7622 = vmatpush.bf16.msra.mxu3 %v11536_v33  ;;  %7598 = vmatpush.bf16.msra.mxu1 %v10384_v38  ;;  %v9677_v15 = vld [vmem:[#allocation8 + $0xd0] sm:$0xf0] }
 0x286   :  { %v13899_v23 = vld [vmem:[#allocation8 + $0x494] sm:$0xf]  ;;  %v9680_v32 = vor.u32 %v13771_v13, %v9677_v15 }
 0x287   :  { %7610 = vmatpush.bf16.msra.mxu2 %v10960_v31  ;;  %7586 = vmatpush.bf16.msra.mxu0 %v9808_v27  ;;  %v10189_v26 = vld [vmem:[#allocation8 + $0x4d0] sm:$0xf0] }
 0x288   :  { %v14043_v29 = vld [vmem:[#allocation8 + $0x914] sm:$0xf]  ;;  %v10192_v16 = vor.u32 %v13899_v23, %v10189_v26  ;;  %v7359_v23 = vpop.f32.mrf.mxu2 }
 0x289   :  { %7623 = vmatpush.bf16.msra.mxu3 %v11472_v47  ;;  %7599 = vmatpush.bf16.msra.mxu1 %v10320_v55  ;;  %v10765_v19 = vld [vmem:[#allocation8 + $0x950] sm:$0xf0]  ;;  %v7370_v47 = vpop.f32.mrf.mxu3 }
 0x28a   :  { %v14171_v33 = vld [vmem:[#allocation8 + $0xd14] sm:$0xf]  ;;  %v10768_v18 = vor.u32 %v14043_v29, %v10765_v19 }
 0x28b   :  { %7611 = vmatpush.bf16.msra.mxu2 %v10896_v7  ;;  %7587 = vmatpush.bf16.msra.mxu0 %v9744_v39  ;;  %v11277_v48 = vld [vmem:[#allocation8 + $0xd50] sm:$0xf0]  ;;  %v7358_v39 = vadd.f32 %v7357_v5, %v15440_v36 }
 0x28c   :  { %v13755_v9 = vld [vmem:[#allocation8 + $0x14] sm:$0xf]  ;;  %v11280_v52 = vor.u32 %v14171_v33, %v11277_v48 }
 0x28d   :  { %7624 = vmatpush.bf16.msra.mxu3 %v11408_v53  ;;  %7600 = vmatpush.bf16.msra.mxu1 %v10256_v41  ;;  %v9613_v6 = vld [vmem:[#allocation8 + $0x50] sm:$0xf0]  ;;  %v15446_v19 = vadd.f32 %v7370_v47, %v7358_v39 }
 0x28e   :  { %v13883_v37 = vld [vmem:[#allocation8 + $0x414] sm:$0xf]  ;;  %v9616_v56 = vor.u32 %v13755_v9, %v9613_v6 }
 0x28f   :  { %v10125_v46 = vld [vmem:[#allocation8 + $0x450] sm:$0xf0]  ;;  %7612 = vmatpush.bf16.msra.mxu2 %v10832_v60  ;;  %7588 = vmatpush.bf16.msra.mxu0 %v9680_v32 }
 0x290   :  { %v14379_v38 = vld [vmem:[#allocation8 + $0x1394] sm:$0xf]  ;;  %v10128_v28 = vor.u32 %v13883_v37, %v10125_v46 }
 0x291   :  { %v12109_v57 = vld [vmem:[#allocation8 + $0x13d0] sm:$0xf0]  ;;  %7625 = vmatpush.bf16.msra.mxu3 %v11344_v63  ;;  %7601 = vmatpush.bf16.msra.mxu1 %v10192_v16  ;;  %v7372_v60 = vpop.f32.mrf.mxu3 }
 0x292   :  { %v14507_v40 = vld [vmem:[#allocation8 + $0x1794] sm:$0xf]  ;;  %v12112_v54 = vor.u32 %v14379_v38, %v12109_v57 }
 0x293   :  { %v12621_v42 = vld [vmem:[#allocation8 + $0x17d0] sm:$0xf0]  ;;  %7613 = vmatpush.bf16.msra.mxu2 %v10768_v18  ;;  %7589 = vmatpush.bf16.msra.mxu0 %v9616_v56  ;;  %v8856_v56 = vmul.f32 %v15446_v19, %v15446_v19 }
 0x294   :  { %v14027_v4 = vld [vmem:[#allocation8 + $0x894] sm:$0xf]  ;;  %v12624_v17 = vor.u32 %v14507_v40, %v12621_v42 }
 0x295   :  { %v10701_v31 = vld [vmem:[#allocation8 + $0x8d0] sm:$0xf0]  ;;  %7626 = vmatpush.bf16.msra.mxu3 %v11280_v52  ;;  %7602 = vmatpush.bf16.msra.mxu1 %v10128_v28  ;;  %v8740_v52 = vsel %vm601_vm0, %v15446_v19, 0.0 }
 0x296   :  { %v14155_v50 = vld [vmem:[#allocation8 + $0xc94] sm:$0xf]  ;;  %v10704_v55 = vor.u32 %v14027_v4, %v10701_v31  ;;  %7590 = vmatmul.bf16.vlgmr.msra.gmra.mxu0 %v15185_v45 }
 0x297   :  { %v11213_v27 = vld [vmem:[#allocation8 + $0xcd0] sm:$0xf0]  ;;  %7634 = vmatpush.bf16.msrb.mxu0 %v12112_v54 }
 0x298   :  { %v14363_v3 = vld [vmem:[#allocation8 + $0x1314] sm:$0xf]  ;;  %v11216_v10 = vor.u32 %v14155_v50, %v11213_v27  ;;  %7614 = vmatpush.bf16.msra.mxu2 %v10704_v55  ;;  %7603 = vmatmul.bf16.vlgmr.msra.gmra.mxu1 %v15189_v58  ;;  %v15454_v50 = vpop.f32.mrf.mxu0  ;;  %v15456_v55 = vpop.f32.mrf.mxu1 }
 0x299   :  { %v12045_v22 = vld [vmem:[#allocation8 + $0x1350] sm:$0xf0]  ;;  %7647 = vmatpush.bf16.msrb.mxu1 %v12624_v17 }
 0x29a   :  { %v14491_v49 = vld [vmem:[#allocation8 + $0x1714] sm:$0xf]  ;;  %v12048_v8 = vor.u32 %v14363_v3, %v12045_v22  ;;  %7627 = vmatpush.bf16.msra.mxu3 %v11216_v10  ;;  %v8741_v22 = vrot.slane %v8740_v52, 4 }
 0x29b   :  { %v12557_v61 = vld [vmem:[#allocation8 + $0x1750] sm:$0xf0] }
 0x29c   :  { %v14011_v25 = vld [vmem:[#allocation8 + $0x814] sm:$0xf]  ;;  %v12560_v12 = vor.u32 %v14491_v49, %v12557_v61  ;;  %7635 = vmatpush.bf16.msrb.mxu0 %v12048_v8 }
 0x29d   :  { %v10637_v51 = vld [vmem:[#allocation8 + $0x850] sm:$0xf0] }
 0x29e   :  { %v14139_v34 = vld [vmem:[#allocation8 + $0xc14] sm:$0xf]  ;;  %v10640_v13 = vor.u32 %v14011_v25, %v10637_v51  ;;  %7648 = vmatpush.bf16.msrb.mxu1 %v12560_v12  ;;  %v8884_v51 = vsel %vm601_vm0, %v8856_v56, 0.0  ;;  %v8742_v12 = vadd.f32 %v8741_v22, %v8740_v52  ;;  %v13876_v52 = vld [vmem:[#allocation8 + $0x3d4] sm:$0xf0] }
 0x29f   :  { %v11149_v7 = vld [vmem:[#allocation8 + $0xc50] sm:$0xf0] }
 0x2a0   :  { %v14635_v44 = vld [vmem:[#allocation8 + $0x1b94] sm:$0xf]  ;;  %v11152_v26 = vor.u32 %v14139_v34, %v11149_v7  ;;  %7615 = vmatpush.bf16.msra.mxu2 %v10640_v13 }
 0x2a1   :  { %v13133_v2 = vld [vmem:[#allocation8 + $0x1bd0] sm:$0xf0] }
 0x2a2   :  { %v14763_v53 = vld [vmem:[#allocation8 + $0x1f94] sm:$0xf]  ;;  %v13136_v1 = vor.u32 %v14635_v44, %v13133_v2  ;;  %7628 = vmatpush.bf16.msra.mxu3 %v11152_v26 }
 0x2a3   :  { %v13645_v21 = vld [vmem:[#allocation8 + $0x1fd0] sm:$0xf0]  ;;  %7616 = vmatmul.bf16.vlgmr.msra.gmra.mxu2 %v15218_v59 }
 0x2a4   :  { %v14347_v41 = vld [vmem:[#allocation8 + $0x1294] sm:$0xf]  ;;  %v13648_v36 = vor.u32 %v14763_v53, %v13645_v21  ;;  %7660 = vmatpush.bf16.msrb.mxu2 %v13136_v1  ;;  %v8885_v21 = vrot.slane %v8884_v51, 4 }
 0x2a5   :  { %v11981_v30 = vld [vmem:[#allocation8 + $0x12d0] sm:$0xf0]  ;;  %7629 = vmatmul.bf16.vlgmr.msra.gmra.mxu3 %v15235_v0 }
 0x2a6   :  { %v14475_v15 = vld [vmem:[#allocation8 + $0x1694] sm:$0xf]  ;;  %v11984_v29 = vor.u32 %v14347_v41, %v11981_v30  ;;  %7673 = vmatpush.bf16.msrb.mxu3 %v13648_v36 }
 0x2a7   :  { %v12493_v20 = vld [vmem:[#allocation8 + $0x16d0] sm:$0xf0] }
 0x2a8   :  { %v14619_v35 = vld [vmem:[#allocation8 + $0x1b14] sm:$0xf]  ;;  %v12496_v33 = vor.u32 %v14475_v15, %v12493_v20  ;;  %7636 = vmatpush.bf16.msrb.mxu0 %v11984_v29  ;;  %v7385_v29 = vpop.f32.mrf.mxu0 }
 0x2a9   :  { %v13069_v63 = vld [vmem:[#allocation8 + $0x1b50] sm:$0xf0]  ;;  %v9939_v29 = vld [vmem:[#allocation8 + $0x298] sm:$0xf] }
 0x2aa   :  { %v14747_v32 = vld [vmem:[#allocation8 + $0x1f14] sm:$0xf]  ;;  %v13072_v46 = vor.u32 %v14619_v35, %v13069_v63  ;;  %7649 = vmatpush.bf16.msrb.mxu1 %v12496_v33  ;;  %v8743_v33 = vrot.slane %v8742_v12, 2 }
 0x2ab   :  { %v13581_v48 = vld [vmem:[#allocation8 + $0x1f50] sm:$0xf0] }
 0x2ac   :  { %v14331_v16 = vld [vmem:[#allocation8 + $0x1214] sm:$0xf]  ;;  %v13584_v57 = vor.u32 %v14747_v32, %v13581_v48  ;;  %7661 = vmatpush.bf16.msrb.mxu2 %v13072_v46  ;;  %v8886_v48 = vadd.f32 %v8885_v21, %v8884_v51 }
 0x2ad   :  { %v11917_v9 = vld [vmem:[#allocation8 + $0x1250] sm:$0xf0] }
 0x2ae   :  { %v14459_v6 = vld [vmem:[#allocation8 + $0x1614] sm:$0xf]  ;;  %v11920_v18 = vor.u32 %v14331_v16, %v11917_v9  ;;  %7674 = vmatpush.bf16.msrb.mxu3 %v13584_v57  ;;  %v7398_v16 = vpop.f32.mrf.mxu1 }
 0x2af   :  { %v12429_v37 = vld [vmem:[#allocation8 + $0x1650] sm:$0xf0] }
 0x2b0   :  { %v14603_v38 = vld [vmem:[#allocation8 + $0x1a94] sm:$0xf]  ;;  %v12432_v4 = vor.u32 %v14459_v6, %v12429_v37  ;;  %7637 = vmatpush.bf16.msrb.mxu0 %v11920_v18 }
 0x2b1   :  { %v13005_v40 = vld [vmem:[#allocation8 + $0x1ad0] sm:$0xf0] }
 0x2b2   :  { %v14731_v42 = vld [vmem:[#allocation8 + $0x1e94] sm:$0xf]  ;;  %v13008_v27 = vor.u32 %v14603_v38, %v13005_v40  ;;  %7650 = vmatpush.bf16.msrb.mxu1 %v12432_v4  ;;  %v10579_v4 = vld [vmem:[#allocation8 + $0x798] sm:$0xf] }
 0x2b3   :  { %v13517_v5 = vld [vmem:[#allocation8 + $0x1ed0] sm:$0xf0] }
 0x2b4   :  { %v14315_v31 = vld [vmem:[#allocation8 + $0x1194] sm:$0xf]  ;;  %v13520_v49 = vor.u32 %v14731_v42, %v13517_v5  ;;  %7662 = vmatpush.bf16.msrb.mxu2 %v13008_v27  ;;  %v10067_v5 = vld [vmem:[#allocation8 + $0x398] sm:$0xf] }
 0x2b5   :  { %v11853_v47 = vld [vmem:[#allocation8 + $0x11d0] sm:$0xf0] }
 0x2b6   :  { %v14443_v28 = vld [vmem:[#allocation8 + $0x1594] sm:$0xf]  ;;  %v11856_v61 = vor.u32 %v14315_v31, %v11853_v47  ;;  %7675 = vmatpush.bf16.msrb.mxu3 %v13520_v49  ;;  %v14004_v31 = vld [vmem:[#allocation8 + $0x7d4] sm:$0xf0]  ;;  %v8744_v47 = vadd.f32 %v8743_v33, %v8742_v12  ;;  %v15461_v49 = vpop.f32.mrf.mxu3 }
 0x2b7   :  { %v12365_v54 = vld [vmem:[#allocation8 + $0x15d0] sm:$0xf0]  ;;  %v10451_v33 = vld [vmem:[#allocation8 + $0x698] sm:$0xf] }
 0x2b8   :  { %v14587_v17 = vld [vmem:[#allocation8 + $0x1a14] sm:$0xf]  ;;  %v12368_v34 = vor.u32 %v14443_v28, %v12365_v54  ;;  %7638 = vmatpush.bf16.msrb.mxu0 %v11856_v61  ;;  %v8887_v28 = vrot.slane %v8886_v48, 2  ;;  %v15459_v54 = vpop.f32.mrf.mxu2  ;;  %v8745_v21 = vrot.slane %v8744_v47, 1 }
 0x2b9   :  { %v12941_v3 = vld [vmem:[#allocation8 + $0x1a50] sm:$0xf0] }
 0x2ba   :  { %v14715_v25 = vld [vmem:[#allocation8 + $0x1e14] sm:$0xf]  ;;  %v12944_v53 = vor.u32 %v14587_v17, %v12941_v3  ;;  %7651 = vmatpush.bf16.msrb.mxu1 %v12368_v34  ;;  %v10580_v34 = vor.u32 %v14004_v31, %v10579_v4  ;;  %v8746_v16 = vadd.f32 %v8745_v21, %v8744_v47  ;;  %v13828_v4 = vld [vmem:[#allocation8 + $0x254] sm:$0xf0]  ;;  %v7435_v21 = vpop.f32.mrf.mxu0 }
 0x2bb   :  { %v13453_v10 = vld [vmem:[#allocation8 + $0x1e50] sm:$0xf0]  ;;  %v10387_v31 = vld [vmem:[#allocation8 + $0x618] sm:$0xf] }
 0x2bc   :  { %v14299_v7 = vld [vmem:[#allocation8 + $0x1114] sm:$0xf]  ;;  %v13456_v41 = vor.u32 %v14715_v25, %v13453_v10  ;;  %7663 = vmatpush.bf16.msrb.mxu2 %v12944_v53  ;;  %v10068_v25 = vor.u32 %v13876_v52, %v10067_v5  ;;  %v13988_v53 = vld [vmem:[#allocation8 + $0x754] sm:$0xf0] }
 0x2bd   :  { %v11789_v8 = vld [vmem:[#allocation8 + $0x1150] sm:$0xf0]  ;;  %v14244_v52 = vld [vmem:[#allocation8 + $0xf54] sm:$0xf0] }
 0x2be   :  { %v14427_v44 = vld [vmem:[#allocation8 + $0x1514] sm:$0xf]  ;;  %v11792_v30 = vor.u32 %v14299_v7, %v11789_v8  ;;  %7676 = vmatpush.bf16.msrb.mxu3 %v13456_v41  ;;  %v10003_v7 = vld [vmem:[#allocation8 + $0x318] sm:$0xf]  ;;  %v8888_v41 = vadd.f32 %v8887_v28, %v8886_v48  ;;  %v15466_v28 = vmul.f32 0.25, %v8746_v16 }
 0x2bf   :  { %v12301_v2 = vld [vmem:[#allocation8 + $0x1550] sm:$0xf0]  ;;  %v13860_v8 = vld [vmem:[#allocation8 + $0x354] sm:$0xf0] }
 0x2c0   :  { %v14571_v39 = vld [vmem:[#allocation8 + $0x1994] sm:$0xf]  ;;  %v12304_v20 = vor.u32 %v14427_v44, %v12301_v2  ;;  %7639 = vmatpush.bf16.msrb.mxu0 %v11792_v30  ;;  %v10515_v44 = vld [vmem:[#allocation8 + $0x718] sm:$0xf] }
 0x2c1   :  { %v12877_v13 = vld [vmem:[#allocation8 + $0x19d0] sm:$0xf0]  ;;  %v13972_v48 = vld [vmem:[#allocation8 + $0x6d4] sm:$0xf0] }
 0x2c2   :  { %v14699_v15 = vld [vmem:[#allocation8 + $0x1d94] sm:$0xf]  ;;  %v12880_v35 = vor.u32 %v14571_v39, %v12877_v13  ;;  %7652 = vmatpush.bf16.msrb.mxu1 %v12304_v20  ;;  %v10004_v20 = vor.u32 %v13860_v8, %v10003_v7  ;;  %v10452_v5 = vor.u32 %v13972_v48, %v10451_v33  ;;  %v13956_v47 = vld [vmem:[#allocation8 + $0x654] sm:$0xf0] }
 0x2c3   :  { %v13389_v23 = vld [vmem:[#allocation8 + $0x1dd0] sm:$0xf0]  ;;  %v14228_v7 = vld [vmem:[#allocation8 + $0xed4] sm:$0xf0] }
 0x2c4   :  { %v14283_v26 = vld [vmem:[#allocation8 + $0x1094] sm:$0xf]  ;;  %v13392_v9 = vor.u32 %v14699_v15, %v13389_v23  ;;  %7664 = vmatpush.bf16.msrb.mxu2 %v12880_v35  ;;  %v11091_v23 = vld [vmem:[#allocation8 + $0xb98] sm:$0xf] }
 0x2c5   :  { %v11725_v1 = vld [vmem:[#allocation8 + $0x10d0] sm:$0xf0]  ;;  %v13844_v35 = vld [vmem:[#allocation8 + $0x2d4] sm:$0xf0] }
 0x2c6   :  { %v14411_v60 = vld [vmem:[#allocation8 + $0x1494] sm:$0xf]  ;;  %v11728_v6 = vor.u32 %v14283_v26, %v11725_v1  ;;  %7677 = vmatpush.bf16.msrb.mxu3 %v13392_v9  ;;  %v14132_v26 = vld [vmem:[#allocation8 + $0xbd4] sm:$0xf0]  ;;  %v8889_v9 = vrot.slane %v8888_v41, 1 }
 0x2c7   :  { %v12237_v36 = vld [vmem:[#allocation8 + $0x14d0] sm:$0xf0]  ;;  %v11603_v1 = vld [vmem:[#allocation8 + $0xf98] sm:$0xf] }
 0x2c8   :  { %v14555_v63 = vld [vmem:[#allocation8 + $0x1914] sm:$0xf]  ;;  %v12240_v38 = vor.u32 %v14411_v60, %v12237_v36  ;;  %7640 = vmatpush.bf16.msrb.mxu0 %v11728_v6  ;;  %v10516_v60 = vor.u32 %v13988_v53, %v10515_v44  ;;  %v14260_v36 = vld [vmem:[#allocation8 + $0xfd4] sm:$0xf0]  ;;  %v7411_v6 = vpop.f32.mrf.mxu2 }
 0x2c9   :  { %v12813_v32 = vld [vmem:[#allocation8 + $0x1950] sm:$0xf0]  ;;  %v9811_v8 = vld [vmem:[#allocation8 + $0x198] sm:$0xf] }
 0x2ca   :  { %v14683_v37 = vld [vmem:[#allocation8 + $0x1d14] sm:$0xf]  ;;  %v12816_v56 = vor.u32 %v14555_v63, %v12813_v32  ;;  %7653 = vmatpush.bf16.msrb.mxu1 %v12240_v38  ;;  %v1913_v63 = vperm.slane %v15389_v62, 3  ;;  %v7424_v38 = vpop.f32.mrf.mxu3  ;;  %v14116_v62 = vld [vmem:[#allocation8 + $0xb54] sm:$0xf0] }
 0x2cb   :  { %v13325_v46 = vld [vmem:[#allocation8 + $0x1d50] sm:$0xf0]  ;;  %v13812_v44 = vld [vmem:[#allocation8 + $0x1d4] sm:$0xf0] }
 0x2cc   :  { %v14267_v57 = vld [vmem:[#allocation8 + $0x1014] sm:$0xf]  ;;  %v13328_v27 = vor.u32 %v14683_v37, %v13325_v46  ;;  %7665 = vmatpush.bf16.msrb.mxu2 %v12816_v56  ;;  %v11092_v46 = vor.u32 %v14132_v26, %v11091_v23  ;;  %v9875_v56 = vld [vmem:[#allocation8 + $0x218] sm:$0xf] }
 0x2cd   :  { %v11661_v18 = vld [vmem:[#allocation8 + $0x1050] sm:$0xf0]  ;;  %v14084_v23 = vld [vmem:[#allocation8 + $0xa54] sm:$0xf0] }
 0x2ce   :  { %v14395_v40 = vld [vmem:[#allocation8 + $0x1414] sm:$0xf]  ;;  %v11664_v17 = vor.u32 %v14267_v57, %v11661_v18  ;;  %7678 = vmatpush.bf16.msrb.mxu3 %v13328_v27  ;;  %v11604_v57 = vor.u32 %v14260_v36, %v11603_v1  ;;  %v9940_v18 = vor.u32 %v13844_v35, %v9939_v29  ;;  %v8890_v27 = vadd.f32 %v8889_v9, %v8888_v41  ;;  %v11411_v26 = vld [vmem:[#allocation8 + $0xe18] sm:$0xf] }
 0x2cf   :  { %v12173_v42 = vld [vmem:[#allocation8 + $0x1450] sm:$0xf0]  ;;  %v14212_v36 = vld [vmem:[#allocation8 + $0xe54] sm:$0xf0] }
 0x2d0   :  { %v14539_v3 = vld [vmem:[#allocation8 + $0x1894] sm:$0xf]  ;;  %v12176_v61 = vor.u32 %v14395_v40, %v12173_v42  ;;  %7641 = vmatpush.bf16.msrb.mxu0 %v11664_v17  ;;  %v11027_v40 = vld [vmem:[#allocation8 + $0xb18] sm:$0xf]  ;;  %v7384_v17 = vadd.f32 %v15454_v50, %v1913_v63  ;;  %v8984_v53 = vmul.f32 0.25, %v8890_v27  ;;  %v11412_v48 = vor.u32 %v14212_v36, %v11411_v26 }
 0x2d1   :  { %v12749_v22 = vld [vmem:[#allocation8 + $0x18d0] sm:$0xf0]  ;;  %v11539_v42 = vld [vmem:[#allocation8 + $0xf18] sm:$0xf] }
 0x2d2   :  { %v14667_v10 = vld [vmem:[#allocation8 + $0x1c94] sm:$0xf]  ;;  %v12752_v2 = vor.u32 %v14539_v3, %v12749_v22  ;;  %7654 = vmatpush.bf16.msrb.mxu1 %v12176_v61  ;;  %v11028_v3 = vor.u32 %v14116_v62, %v11027_v40  ;;  %v11540_v22 = vor.u32 %v14244_v52, %v11539_v42  ;;  %v9876_v61 = vor.u32 %v13828_v4, %v9875_v56  ;;  %v10323_v50 = vld [vmem:[#allocation8 + $0x598] sm:$0xf]  ;;  %v7437_v52 = vpop.f32.mrf.mxu0 }
 0x2d3   :  { %v13261_v51 = vld [vmem:[#allocation8 + $0x1cd0] sm:$0xf0]  ;;  %7642 = vmatmul.bf16.vlgmr.msrb.gmra.mxu0 %v15280_v43  ;;  %v9747_v29 = vld [vmem:[#allocation8 + $0x118] sm:$0xf] }
 0x2d4   :  { %v14523_v39 = vld [vmem:[#allocation8 + $0x1814] sm:$0xf]  ;;  %v13264_v30 = vor.u32 %v14667_v10, %v13261_v51  ;;  %7686 = vmatpush.bf16.msra.mxu0 %v10068_v25  ;;  %7666 = vmatpush.bf16.msrb.mxu2 %v12752_v2  ;;  %v10963_v25 = vld [vmem:[#allocation8 + $0xa98] sm:$0xf] }
 0x2d5   :  { %v12685_v12 = vld [vmem:[#allocation8 + $0x1850] sm:$0xf0]  ;;  %7655 = vmatmul.bf16.vlgmr.msrb.gmra.mxu1 %v15290_v14  ;;  %v14100_v10 = vld [vmem:[#allocation8 + $0xad4] sm:$0xf0] }
 0x2d6   :  { %v14651_v13 = vld [vmem:[#allocation8 + $0x1c14] sm:$0xf]  ;;  %7699 = vmatpush.bf16.msra.mxu1 %v10580_v34  ;;  %v12688_v32 = vor.u32 %v14523_v39, %v12685_v12  ;;  %7679 = vmatpush.bf16.msrb.mxu3 %v13264_v30  ;;  %v11475_v51 = vld [vmem:[#allocation8 + $0xe98] sm:$0xf]  ;;  %v10388_v34 = vor.u32 %v13956_v47, %v10387_v31  ;;  %v9000_v39 = vmul.f32 %v15466_v28, %v15466_v28  ;;  %v7448_v30 = vpop.f32.mrf.mxu1 }
 0x2d7   :  { %v13197_v15 = vld [vmem:[#allocation8 + $0x1c50] sm:$0xf0]  ;;  %v13940_v2 = vld [vmem:[#allocation8 + $0x5d4] sm:$0xf0]  ;;  %v7397_v12 = vadd.f32 %v15456_v55, %v7384_v17  ;;  %v10964_v41 = vor.u32 %v14100_v10, %v10963_v25 }
 0x2d8   :  { %v13200_v37 = vor.u32 %v14651_v13, %v13197_v15  ;;  %7687 = vmatpush.bf16.msra.mxu0 %v10004_v20  ;;  %7667 = vmatpush.bf16.msrb.mxu2 %v12688_v32  ;;  %v11476_v13 = vor.u32 %v14228_v7, %v11475_v51  ;;  %v9812_v15 = vor.u32 %v13812_v44, %v9811_v8  ;;  %v10899_v20 = vld [vmem:[#allocation8 + $0xa18] sm:$0xf] }
 0x2d9   :  { %v7410_v1 = vadd.f32 %v15459_v54, %v7397_v12  ;;  %v13796_v35 = vld [vmem:[#allocation8 + $0x154] sm:$0xf0]  ;;  %v9016_v32 = vsub.f32 %v8984_v53, %v9000_v39  ;;  %v10900_v33 = vor.u32 %v14084_v23, %v10899_v20  ;;  %v7461_v39 = vpop.f32.mrf.mxu2  ;;  %v7474_v20 = vpop.f32.mrf.mxu3 }
 0x2da   :  { %7700 = vmatpush.bf16.msra.mxu1 %v10516_v60  ;;  %7680 = vmatpush.bf16.msrb.mxu3 %v13200_v37  ;;  %v10324_v60 = vor.u32 %v13940_v2, %v10323_v50  ;;  %v10259_v63 = vld [vmem:[#allocation8 + $0x518] sm:$0xf]  ;;  %v9748_v16 = vor.u32 %v13796_v35, %v9747_v29 }
 0x2db   :  { %7668 = vmatmul.bf16.vlgmr.msrb.gmra.mxu2 %v15309_v11  ;;  %v13924_v55 = vld [vmem:[#allocation8 + $0x554] sm:$0xf0]  ;;  %v9032_v42 = vmax.f32 %v9016_v32, 0.0 }
 0x2dc   :  { %7712 = vmatpush.bf16.msra.mxu2 %v11092_v46  ;;  %7688 = vmatpush.bf16.msra.mxu0 %v9940_v18  ;;  %v10835_v9 = vld [vmem:[#allocation8 + $0x998] sm:$0xf]  ;;  %v7423_v46 = vadd.f32 %v15461_v49, %v7410_v1  ;;  %v10260_v54 = vor.u32 %v13924_v55, %v10259_v63 }
 0x2dd   :  { %7681 = vmatmul.bf16.vlgmr.msrb.gmra.mxu3 %v15318_v24  ;;  %v14068_v6 = vld [vmem:[#allocation8 + $0x9d4] sm:$0xf0]  ;;  %v15476_v53 = vadd.f32 1e-05, %v9032_v42 }
 0x2de   :  { %7725 = vmatpush.bf16.msra.mxu3 %v11604_v57  ;;  %7701 = vmatpush.bf16.msra.mxu1 %v10452_v5  ;;  %v11347_v37 = vld [vmem:[#allocation8 + $0xd98] sm:$0xf]  ;;  %v7436_v5 = vadd.f32 %v7435_v21, %v7423_v46  ;;  %v10836_v56 = vor.u32 %v14068_v6, %v10835_v9  ;;  %v7450_v31 = vpop.f32.mrf.mxu1 }
 0x2df   :  { %v14196_v38 = vld [vmem:[#allocation8 + $0xdd4] sm:$0xf0]  ;;  %14807 = vrsqrt.f32 %v15476_v53  ;;  %vm9088_vm2 = vweird.f32 %v15476_v53 }
 0x2e0   :  { %7713 = vmatpush.bf16.msra.mxu2 %v11028_v3  ;;  %7689 = vmatpush.bf16.msra.mxu0 %v9876_v61  ;;  %v9683_v57 = vld [vmem:[#allocation8 + $0x98] sm:$0xf]  ;;  %v11348_v47 = vor.u32 %v14196_v38, %v11347_v37  ;;  %v7449_v8 = vadd.f32 %v7448_v30, %v7436_v5 }
 0x2e1   :  { %v13780_v18 = vld [vmem:[#allocation8 + $0xd4] sm:$0xf0] }
 0x2e2   :  { %7726 = vmatpush.bf16.msra.mxu3 %v11540_v22  ;;  %7702 = vmatpush.bf16.msra.mxu1 %v10388_v34  ;;  %v10195_v40 = vld [vmem:[#allocation8 + $0x498] sm:$0xf]  ;;  %v9684_v27 = vor.u32 %v13780_v18, %v9683_v57 }
 0x2e3   :  { %v13908_v62 = vld [vmem:[#allocation8 + $0x4d4] sm:$0xf0] }
 0x2e4   :  { %7714 = vmatpush.bf16.msra.mxu2 %v10964_v41  ;;  %7690 = vmatpush.bf16.msra.mxu0 %v9812_v15  ;;  %v10771_v4 = vld [vmem:[#allocation8 + $0x918] sm:$0xf]  ;;  %v10196_v22 = vor.u32 %v13908_v62, %v10195_v40  ;;  %v7462_v15 = vadd.f32 %v7461_v39, %v7449_v8 }
 0x2e5   :  { %v14052_v17 = vld [vmem:[#allocation8 + $0x954] sm:$0xf0] }
 0x2e6   :  { %7727 = vmatpush.bf16.msra.mxu3 %v11476_v13  ;;  %7703 = vmatpush.bf16.msra.mxu1 %v10324_v60  ;;  %v11283_v49 = vld [vmem:[#allocation8 + $0xd18] sm:$0xf]  ;;  %v10772_v44 = vor.u32 %v14052_v17, %v10771_v4  ;;  %v15478_v55 = vadd.f32 %v7474_v20, %v7462_v15 }
 0x2e7   :  { %v14180_v3 = vld [vmem:[#allocation8 + $0xd54] sm:$0xf0] }
 0x2e8   :  { %7715 = vmatpush.bf16.msra.mxu2 %v10900_v33  ;;  %7691 = vmatpush.bf16.msra.mxu0 %v9748_v16  ;;  %v9619_v61 = vld [vmem:[#allocation8 + $0x18] sm:$0xf]  ;;  %v11284_v12 = vor.u32 %v14180_v3, %v11283_v49  ;;  %v8857_v38 = vmul.f32 %v15478_v55, %v15478_v55  ;;  %v7463_v49 = vpop.f32.mrf.mxu2 }
 0x2e9   :  { %v13764_v25 = vld [vmem:[#allocation8 + $0x54] sm:$0xf0] }
 0x2ea   :  { %7728 = vmatpush.bf16.msra.mxu3 %v11412_v48  ;;  %7704 = vmatpush.bf16.msra.mxu1 %v10260_v54  ;;  %v10131_v10 = vld [vmem:[#allocation8 + $0x418] sm:$0xf]  ;;  %v9620_v21 = vor.u32 %v13764_v25, %v9619_v61  ;;  %v8747_v54 = vsel %vm601_vm0, %v15478_v55, 0.0  ;;  %v7476_v25 = vpop.f32.mrf.mxu3 }
 0x2eb   :  { %v13892_v51 = vld [vmem:[#allocation8 + $0x454] sm:$0xf0]  ;;  %v8748_v62 = vrot.slane %v8747_v54, 4 }
 0x2ec   :  { %v12115_v34 = vld [vmem:[#allocation8 + $0x1398] sm:$0xf]  ;;  %7716 = vmatpush.bf16.msra.mxu2 %v10836_v56  ;;  %7692 = vmatpush.bf16.msra.mxu0 %v9684_v27  ;;  %v10132_v23 = vor.u32 %v13892_v51, %v10131_v10  ;;  %v8891_v56 = vsel %vm601_vm0, %v8857_v38, 0.0 }
 0x2ed   :  { %v14388_v7 = vld [vmem:[#allocation8 + $0x13d4] sm:$0xf0]  ;;  %v8749_v27 = vadd.f32 %v8748_v62, %v8747_v54  ;;  %v8892_v17 = vrot.slane %v8891_v56, 4 }
 0x2ee   :  { %v12627_v50 = vld [vmem:[#allocation8 + $0x1798] sm:$0xf]  ;;  %7729 = vmatpush.bf16.msra.mxu3 %v11348_v47  ;;  %7705 = vmatpush.bf16.msra.mxu1 %v10196_v22  ;;  %v12116_v26 = vor.u32 %v14388_v7, %v12115_v34 }
 0x2ef   :  { %v14516_v2 = vld [vmem:[#allocation8 + $0x17d4] sm:$0xf0] }
 0x2f0   :  { %v10707_v41 = vld [vmem:[#allocation8 + $0x898] sm:$0xf]  ;;  %v12628_v36 = vor.u32 %v14516_v2, %v12627_v50  ;;  %7717 = vmatpush.bf16.msra.mxu2 %v10772_v44  ;;  %7693 = vmatpush.bf16.msra.mxu0 %v9620_v21  ;;  %v8750_v44 = vrot.slane %v8749_v27, 2  ;;  %v8893_v50 = vadd.f32 %v8892_v17, %v8891_v56 }
 0x2f1   :  { %v14036_v13 = vld [vmem:[#allocation8 + $0x8d4] sm:$0xf0] }
 0x2f2   :  { %v11219_v1 = vld [vmem:[#allocation8 + $0xc98] sm:$0xf]  ;;  %v10708_v32 = vor.u32 %v14036_v13, %v10707_v41  ;;  %7730 = vmatpush.bf16.msra.mxu3 %v11284_v12  ;;  %7706 = vmatpush.bf16.msra.mxu1 %v10132_v23  ;;  %v8751_v13 = vadd.f32 %v8750_v44, %v8749_v27  ;;  %v8894_v15 = vrot.slane %v8893_v50, 2  ;;  %v15488_v23 = vld [vmem:[#allocation10] sm:$0xff] }
 0x2f3   :  { %v14164_v30 = vld [vmem:[#allocation8 + $0xcd4] sm:$0xf0]  ;;  %7694 = vmatmul.bf16.vlgmr.msra.gmra.mxu0 %v15185_v45 }
 0x2f4   :  { %v12051_v60 = vld [vmem:[#allocation8 + $0x1318] sm:$0xf]  ;;  %v11220_v9 = vor.u32 %v14164_v30, %v11219_v1  ;;  %7738 = vmatpush.bf16.msrb.mxu0 %v12116_v26  ;;  %7718 = vmatpush.bf16.msra.mxu2 %v10708_v32  ;;  %v1914_v26 = vperm.slane %v15488_v23, 4  ;;  %v15491_v30 = vpop.eup %14807  ;;  %v8752_v32 = vrot.slane %v8751_v13, 1 }
 0x2f5   :  { %v14372_v29 = vld [vmem:[#allocation8 + $0x1354] sm:$0xf0]  ;;  %7707 = vmatmul.bf16.vlgmr.msra.gmra.mxu1 %v15189_v58  ;;  %vm9089_vm1 = vweird.f32 %v15491_v30 }
 0x2f6   :  { %v12563_v35 = vld [vmem:[#allocation8 + $0x1718] sm:$0xf]  ;;  %v12052_v57 = vor.u32 %v14372_v29, %v12051_v60  ;;  %7751 = vmatpush.bf16.msrb.mxu1 %v12628_v36  ;;  %7731 = vmatpush.bf16.msra.mxu3 %v11220_v9  ;;  %v8753_v54 = vadd.f32 %v8752_v32, %v8751_v13  ;;  %vm15522_vm3 = vmor %vm9088_vm2, %vm9089_vm1 }
 0x2f7   :  { %v14500_v63 = vld [vmem:[#allocation8 + $0x1754] sm:$0xf0] }
 0x2f8   :  { %v10643_v33 = vld [vmem:[#allocation8 + $0x818] sm:$0xf]  ;;  %v12564_v42 = vor.u32 %v14500_v63, %v12563_v35  ;;  %7739 = vmatpush.bf16.msrb.mxu0 %v12052_v57  ;;  %v7487_v57 = vpop.f32.mrf.mxu0 }
 0x2f9   :  { %v14020_v48 = vld [vmem:[#allocation8 + $0x854] sm:$0xf0]  ;;  %v7488_v62 = vadd.f32 %v7487_v57, %v1914_v26 }
 0x2fa   :  { %v11155_v16 = vld [vmem:[#allocation8 + $0xc18] sm:$0xf]  ;;  %v10644_v4 = vor.u32 %v14020_v48, %v10643_v33  ;;  %7752 = vmatpush.bf16.msrb.mxu1 %v12564_v42  ;;  %v8895_v33 = vadd.f32 %v8894_v15, %v8893_v50  ;;  %v7500_v42 = vpop.f32.mrf.mxu1 }
 0x2fb   :  { %v14148_v6 = vld [vmem:[#allocation8 + $0xc54] sm:$0xf0] }
 0x2fc   :  { %v13139_v37 = vld [vmem:[#allocation8 + $0x1b98] sm:$0xf]  ;;  %v11156_v3 = vor.u32 %v14148_v6, %v11155_v16  ;;  %7719 = vmatpush.bf16.msra.mxu2 %v10644_v4  ;;  %v8896_v38 = vrot.slane %v8895_v33, 1 }
 0x2fd   :  { %v14644_v46 = vld [vmem:[#allocation8 + $0x1bd4] sm:$0xf0] }
 0x2fe   :  { %v13651_v18 = vld [vmem:[#allocation8 + $0x1f98] sm:$0xf]  ;;  %v13140_v22 = vor.u32 %v14644_v46, %v13139_v37  ;;  %7732 = vmatpush.bf16.msra.mxu3 %v11156_v3  ;;  %v9083_v46 = vmul.f32 %v15491_v30, %v15476_v53  ;;  %v8897_v27 = vadd.f32 %v8896_v38, %v8895_v33 }
 0x2ff   :  { %v14772_v40 = vld [vmem:[#allocation8 + $0x1fd4] sm:$0xf0]  ;;  %7720 = vmatmul.bf16.vlgmr.msra.gmra.mxu2 %v15218_v59 }
 0x300   :  { %v11987_v5 = vld [vmem:[#allocation8 + $0x1298] sm:$0xf]  ;;  %v13652_v10 = vor.u32 %v14772_v40, %v13651_v18  ;;  %7764 = vmatpush.bf16.msrb.mxu2 %v13140_v22  ;;  %v7501_v22 = vadd.f32 %v7500_v42, %v7488_v62  ;;  %v13996_v42 = vld [vmem:[#allocation8 + $0x79c] sm:$0xf] }
 0x301   :  { %v14356_v52 = vld [vmem:[#allocation8 + $0x12d4] sm:$0xf0]  ;;  %7733 = vmatmul.bf16.vlgmr.msra.gmra.mxu3 %v15235_v0 }
 0x302   :  { %v12499_v31 = vld [vmem:[#allocation8 + $0x1698] sm:$0xf]  ;;  %v11988_v51 = vor.u32 %v14356_v52, %v11987_v5  ;;  %7777 = vmatpush.bf16.msrb.mxu3 %v13652_v10  ;;  %v9084_v10 = vmul.f32 %v15491_v30, %v9083_v46  ;;  %v7502_v32 = vpop.f32.mrf.mxu1 }
 0x303   :  { %v14484_v47 = vld [vmem:[#allocation8 + $0x16d4] sm:$0xf0]  ;;  %v9941_v32 = vld [vmem:[#allocation8 + $0x2d8] sm:$0xf0] }
 0x304   :  { %v13075_v61 = vld [vmem:[#allocation8 + $0x1b18] sm:$0xf]  ;;  %v12500_v2 = vor.u32 %v14484_v47, %v12499_v31  ;;  %7740 = vmatpush.bf16.msrb.mxu0 %v11988_v51  ;;  %v15497_v47 = vmul.f32 0.25, %v8753_v54  ;;  %v8985_v51 = vmul.f32 0.25, %v8897_v27 }
 0x305   :  { %v14628_v34 = vld [vmem:[#allocation8 + $0x1b54] sm:$0xf0] }
 0x306   :  { %v13587_v7 = vld [vmem:[#allocation8 + $0x1f18] sm:$0xf]  ;;  %v13076_v20 = vor.u32 %v14628_v34, %v13075_v61  ;;  %7753 = vmatpush.bf16.msrb.mxu1 %v12500_v2  ;;  %v9001_v34 = vmul.f32 %v15497_v47, %v15497_v47 }
 0x307   :  { %v14756_v8 = vld [vmem:[#allocation8 + $0x1f54] sm:$0xf0] }
 0x308   :  { %v11923_v39 = vld [vmem:[#allocation8 + $0x1218] sm:$0xf]  ;;  %v13588_v60 = vor.u32 %v14756_v8, %v13587_v7  ;;  %7765 = vmatpush.bf16.msrb.mxu2 %v13076_v20 }
 0x309   :  { %v14340_v12 = vld [vmem:[#allocation8 + $0x1254] sm:$0xf0] }
 0x30a   :  { %v12435_v21 = vld [vmem:[#allocation8 + $0x1618] sm:$0xf]  ;;  %v11924_v36 = vor.u32 %v14340_v12, %v11923_v39  ;;  %7778 = vmatpush.bf16.msrb.mxu3 %v13588_v60  ;;  %v9017_v12 = vsub.f32 %v8985_v51, %v9001_v34 }
 0x30b   :  { %v14468_v41 = vld [vmem:[#allocation8 + $0x1654] sm:$0xf0] }
 0x30c   :  { %v13011_v1 = vld [vmem:[#allocation8 + $0x1a98] sm:$0xf]  ;;  %v12436_v48 = vor.u32 %v14468_v41, %v12435_v21  ;;  %7741 = vmatpush.bf16.msrb.mxu0 %v11924_v36  ;;  %v9033_v60 = vmax.f32 %v9017_v12, 0.0  ;;  %v7489_v36 = vpop.f32.mrf.mxu0 }
 0x30d   :  { %v14612_v29 = vld [vmem:[#allocation8 + $0x1ad4] sm:$0xf0] }
 0x30e   :  { %v13523_v35 = vld [vmem:[#allocation8 + $0x1e98] sm:$0xf]  ;;  %v13012_v18 = vor.u32 %v14612_v29, %v13011_v1  ;;  %7754 = vmatpush.bf16.msrb.mxu1 %v12436_v48  ;;  %v15502_v1 = vmul.f32 0.5, %v9084_v10 }
 0x30f   :  { %v14740_v63 = vld [vmem:[#allocation8 + $0x1ed4] sm:$0xf0] }
 0x310   :  { %v11859_v16 = vld [vmem:[#allocation8 + $0x1198] sm:$0xf]  ;;  %v13524_v5 = vor.u32 %v14740_v63, %v13523_v35  ;;  %7766 = vmatpush.bf16.msrb.mxu2 %v13012_v18  ;;  %v13868_v18 = vld [vmem:[#allocation8 + $0x39c] sm:$0xf]  ;;  %v9086_v51 = vsub.f32 1.5, %v15502_v1 }
 0x311   :  { %v14324_v9 = vld [vmem:[#allocation8 + $0x11d4] sm:$0xf0]  ;;  %v11093_v1 = vld [vmem:[#allocation8 + $0xbd8] sm:$0xf0] }
 0x312   :  { %v12371_v6 = vld [vmem:[#allocation8 + $0x1598] sm:$0xf]  ;;  %v11860_v52 = vor.u32 %v14324_v9, %v11859_v16  ;;  %7779 = vmatpush.bf16.msrb.mxu3 %v13524_v5  ;;  %v10581_v5 = vld [vmem:[#allocation8 + $0x7d8] sm:$0xf0] }
 0x313   :  { %v14452_v37 = vld [vmem:[#allocation8 + $0x15d4] sm:$0xf0]  ;;  %v10584_v34 = vor.u32 %v13996_v42, %v10581_v5  ;;  %v11029_v42 = vld [vmem:[#allocation8 + $0xb58] sm:$0xf0] }
 0x314   :  { %v12947_v40 = vld [vmem:[#allocation8 + $0x1a18] sm:$0xf]  ;;  %v12372_v17 = vor.u32 %v14452_v37, %v12371_v6  ;;  %7742 = vmatpush.bf16.msrb.mxu0 %v11860_v52  ;;  %v15504_v37 = vadd.f32 1e-05, %v9033_v60  ;;  %v7513_v52 = vpop.f32.mrf.mxu2  ;;  %v14252_v60 = vld [vmem:[#allocation8 + $0xf9c] sm:$0xf] }
 0x315   :  { %v14596_v56 = vld [vmem:[#allocation8 + $0x1a54] sm:$0xf0]  ;;  %v14236_v5 = vld [vmem:[#allocation8 + $0xf1c] sm:$0xf] }
 0x316   :  { %v13459_v4 = vld [vmem:[#allocation8 + $0x1e18] sm:$0xf]  ;;  %v12948_v7 = vor.u32 %v14596_v56, %v12947_v40  ;;  %7755 = vmatpush.bf16.msrb.mxu1 %v12372_v17  ;;  %v10069_v40 = vld [vmem:[#allocation8 + $0x3d8] sm:$0xf0]  ;;  %14809 = vrsqrt.f32 %v15504_v37  ;;  %v7514_v17 = vadd.f32 %v7513_v52, %v7501_v22  ;;  %vm9098_vm5 = vweird.f32 %v15504_v37 }
 0x317   :  { %v14724_v31 = vld [vmem:[#allocation8 + $0x1e54] sm:$0xf0]  ;;  %v11541_v52 = vld [vmem:[#allocation8 + $0xf58] sm:$0xf0] }
 0x318   :  { %v11795_v49 = vld [vmem:[#allocation8 + $0x1118] sm:$0xf]  ;;  %v13460_v8 = vor.u32 %v14724_v31, %v13459_v4  ;;  %7767 = vmatpush.bf16.msrb.mxu2 %v12948_v7  ;;  %v13852_v7 = vld [vmem:[#allocation8 + $0x31c] sm:$0xf] }
 0x319   :  { %v14308_v3 = vld [vmem:[#allocation8 + $0x1154] sm:$0xf0] }
 0x31a   :  { %v12307_v61 = vld [vmem:[#allocation8 + $0x1518] sm:$0xf]  ;;  %v11796_v44 = vor.u32 %v14308_v3, %v11795_v49  ;;  %7780 = vmatpush.bf16.msrb.mxu3 %v13460_v8  ;;  %v7526_v49 = vpop.f32.mrf.mxu3  ;;  %v10005_v8 = vld [vmem:[#allocation8 + $0x358] sm:$0xf0] }
 0x31b   :  { %v14436_v25 = vld [vmem:[#allocation8 + $0x1554] sm:$0xf0] }
 0x31c   :  { %v12883_v50 = vld [vmem:[#allocation8 + $0x1998] sm:$0xf]  ;;  %v12308_v21 = vor.u32 %v14436_v25, %v12307_v61  ;;  %7743 = vmatpush.bf16.msrb.mxu0 %v11796_v44  ;;  %v10072_v61 = vor.u32 %v13868_v18, %v10069_v40  ;;  %v15508_v44 = vadd.f32 %v7526_v49, %v7514_v17  ;;  %v13948_v17 = vld [vmem:[#allocation8 + $0x61c] sm:$0xf] }
 0x31d   :  { %v14580_v2 = vld [vmem:[#allocation8 + $0x19d4] sm:$0xf0]  ;;  %v10389_v49 = vld [vmem:[#allocation8 + $0x658] sm:$0xf0] }
 0x31e   :  { %v13395_v39 = vld [vmem:[#allocation8 + $0x1d98] sm:$0xf]  ;;  %v12884_v29 = vor.u32 %v14580_v2, %v12883_v50  ;;  %7756 = vmatpush.bf16.msrb.mxu1 %v12308_v21  ;;  %v13980_v2 = vld [vmem:[#allocation8 + $0x71c] sm:$0xf] }
 0x31f   :  { %v14708_v41 = vld [vmem:[#allocation8 + $0x1dd4] sm:$0xf0] }
 0x320   :  { %v11731_v13 = vld [vmem:[#allocation8 + $0x1098] sm:$0xf]  ;;  %v13396_v33 = vor.u32 %v14708_v41, %v13395_v39  ;;  %7768 = vmatpush.bf16.msrb.mxu2 %v12884_v29  ;;  %v10517_v39 = vld [vmem:[#allocation8 + $0x758] sm:$0xf0] }
 0x321   :  { %v14292_v15 = vld [vmem:[#allocation8 + $0x10d4] sm:$0xf0]  ;;  %v10520_v29 = vor.u32 %v13980_v2, %v10517_v39  ;;  %v9224_v2 = vsub.f32 %v15446_v19, %v15466_v28  ;;  %v10325_v19 = vld [vmem:[#allocation8 + $0x5d8] sm:$0xf0] }
 0x322   :  { %v12243_v20 = vld [vmem:[#allocation8 + $0x1498] sm:$0xf]  ;;  %v11732_v48 = vor.u32 %v14292_v15, %v11731_v13  ;;  %7781 = vmatpush.bf16.msrb.mxu3 %v13396_v33  ;;  %v15510_v15 = vpop.eup %14809  ;;  %v7528_v18 = vpop.f32.mrf.mxu3 }
 0x323   :  { %v14420_v26 = vld [vmem:[#allocation8 + $0x14d4] sm:$0xf0]  ;;  %v9093_v36 = vmul.f32 %v15510_v15, %v15504_v37  ;;  %vm9099_vm4 = vweird.f32 %v15510_v15  ;;  %v7539_v37 = vpop.f32.mrf.mxu0 }
 0x324   :  { %v12819_v35 = vld [vmem:[#allocation8 + $0x1918] sm:$0xf]  ;;  %v12244_v46 = vor.u32 %v14420_v26, %v12243_v20  ;;  %7744 = vmatpush.bf16.msrb.mxu0 %v11732_v48  ;;  %v10008_v20 = vor.u32 %v13852_v7, %v10005_v8  ;;  %v14124_v26 = vld [vmem:[#allocation8 + $0xb9c] sm:$0xf]  ;;  %vm9100_vm6 = vmor %vm9098_vm5, %vm9099_vm4 }
 0x325   :  { %v14564_v63 = vld [vmem:[#allocation8 + $0x1954] sm:$0xf0]  ;;  %v13964_v48 = vld [vmem:[#allocation8 + $0x69c] sm:$0xf] }
 0x326   :  { %v13331_v16 = vld [vmem:[#allocation8 + $0x1d18] sm:$0xf]  ;;  %v12820_v62 = vor.u32 %v14564_v63, %v12819_v35  ;;  %7757 = vmatpush.bf16.msrb.mxu1 %v12244_v46  ;;  %v11605_v35 = vld [vmem:[#allocation8 + $0xfd8] sm:$0xf0] }
 0x327   :  { %v14692_v9 = vld [vmem:[#allocation8 + $0x1d54] sm:$0xf0]  ;;  %v13836_v63 = vld [vmem:[#allocation8 + $0x29c] sm:$0xf]  ;;  %v11608_v40 = vor.u32 %v14252_v60, %v11605_v35  ;;  %v7540_v60 = vadd.f32 %v7539_v37, %v15508_v44 }
 0x328   :  { %v11667_v6 = vld [vmem:[#allocation8 + $0x1018] sm:$0xf]  ;;  %v13332_v56 = vor.u32 %v14692_v9, %v13331_v16  ;;  %7769 = vmatpush.bf16.msrb.mxu2 %v12820_v62  ;;  %v10453_v16 = vld [vmem:[#allocation8 + $0x6d8] sm:$0xf0]  ;;  %v9094_v9 = vmul.f32 %v15510_v15, %v9093_v36  ;;  %v9944_v62 = vor.u32 %v13836_v63, %v9941_v32  ;;  %v7552_v36 = vpop.f32.mrf.mxu1 }
 0x329   :  { %v14276_v54 = vld [vmem:[#allocation8 + $0x1054] sm:$0xf0]  ;;  %v10965_v7 = vld [vmem:[#allocation8 + $0xad8] sm:$0xf0] }
 0x32a   :  { %v12179_v38 = vld [vmem:[#allocation8 + $0x1418] sm:$0xf]  ;;  %v11668_v4 = vor.u32 %v14276_v54, %v11667_v6  ;;  %7782 = vmatpush.bf16.msrb.mxu3 %v13332_v56  ;;  %v7515_v6 = vpop.f32.mrf.mxu2  ;;  %v11096_v54 = vor.u32 %v14124_v26, %v11093_v1  ;;  %v9095_v56 = vmul.f32 0.5, %v9094_v9  ;;  %v14220_v8 = vld [vmem:[#allocation8 + $0xe9c] sm:$0xf] }
 0x32b   :  { %v14404_v57 = vld [vmem:[#allocation8 + $0x1454] sm:$0xf0]  ;;  %v14076_v35 = vld [vmem:[#allocation8 + $0xa1c] sm:$0xf] }
 0x32c   :  { %v12755_v31 = vld [vmem:[#allocation8 + $0x1898] sm:$0xf]  ;;  %v12180_v3 = vor.u32 %v14404_v57, %v12179_v38  ;;  %7745 = vmatpush.bf16.msrb.mxu0 %v11668_v4  ;;  %v14108_v38 = vld [vmem:[#allocation8 + $0xb1c] sm:$0xf]  ;;  %v9087_v57 = vmul.f32 %v15491_v30, %v9086_v51  ;;  %v10456_v4 = vor.u32 %v13964_v48, %v10453_v16  ;;  %v11544_v51 = vor.u32 %v14236_v5, %v11541_v52 }
 0x32d   :  { %v14548_v27 = vld [vmem:[#allocation8 + $0x18d4] sm:$0xf0]  ;;  %v11413_v32 = vld [vmem:[#allocation8 + $0xe58] sm:$0xf0]  ;;  %v15542_v16 = vadd.f32 %v7552_v36, %v7540_v60 }
 0x32e   :  { %v13267_v25 = vld [vmem:[#allocation8 + $0x1c98] sm:$0xf]  ;;  %v12756_v50 = vor.u32 %v14548_v27, %v12755_v31  ;;  %7758 = vmatpush.bf16.msrb.mxu1 %v12180_v3  ;;  %v13820_v31 = vld [vmem:[#allocation8 + $0x21c] sm:$0xf]  ;;  %v9091_v53 = vsel %vm15522_vm3, %v15491_v30, %v9087_v57 }
 0x32f   :  { %v14676_v10 = vld [vmem:[#allocation8 + $0x1cd4] sm:$0xf0]  ;;  %7746 = vmatmul.bf16.vlgmr.msrb.gmra.mxu0 %v15280_v43  ;;  %v9877_v27 = vld [vmem:[#allocation8 + $0x258] sm:$0xf0]  ;;  %v9240_v28 = vmul.f32 %v9224_v2, %v9091_v53 }
 0x330   :  { %v12691_v12 = vld [vmem:[#allocation8 + $0x1818] sm:$0xf]  ;;  %v13268_v22 = vor.u32 %v14676_v10, %v13267_v25  ;;  %7790 = vmatpush.bf16.msra.mxu0 %v10072_v61  ;;  %7770 = vmatpush.bf16.msrb.mxu2 %v12756_v50  ;;  %v9096_v61 = vsub.f32 1.5, %v9095_v56  ;;  %v11032_v25 = vor.u32 %v14108_v38, %v11029_v42  ;;  %v14092_v10 = vld [vmem:[#allocation8 + $0xa9c] sm:$0xf] }
 0x331   :  { %v14532_v21 = vld [vmem:[#allocation8 + $0x1854] sm:$0xf0]  ;;  %7759 = vmatmul.bf16.vlgmr.msrb.gmra.mxu1 %v15290_v14  ;;  %v11477_v50 = vld [vmem:[#allocation8 + $0xed8] sm:$0xf0]  ;;  %v9256_v44 = vmax.f32 %v9240_v28, 0.0 }
 0x332   :  { %v13203_v41 = vld [vmem:[#allocation8 + $0x1c18] sm:$0xf]  ;;  %7803 = vmatpush.bf16.msra.mxu1 %v10584_v34  ;;  %v12692_v33 = vor.u32 %v14532_v21, %v12691_v12  ;;  %7783 = vmatpush.bf16.msrb.mxu3 %v13268_v22  ;;  %v9880_v34 = vor.u32 %v13820_v31, %v9877_v27  ;;  %v9097_v39 = vmul.f32 %v15510_v15, %v9096_v61  ;;  %v13804_v22 = vld [vmem:[#allocation8 + $0x19c] sm:$0xf]  ;;  %v7554_v61 = vpop.f32.mrf.mxu1 }
 0x333   :  { %v14660_v13 = vld [vmem:[#allocation8 + $0x1c54] sm:$0xf0]  ;;  %v10392_v12 = vor.u32 %v13948_v17, %v10389_v49  ;;  %v9813_v30 = vld [vmem:[#allocation8 + $0x1d8] sm:$0xf0]  ;;  %v9225_v21 = vsub.f32 %v15478_v55, %v15497_v47  ;;  %v11480_v26 = vor.u32 %v14220_v8, %v11477_v50  ;;  %v7541_v17 = vpop.f32.mrf.mxu0 }
 0x334   :  { %v13204_v46 = vor.u32 %v14660_v13, %v13203_v41  ;;  %7791 = vmatpush.bf16.msra.mxu0 %v10008_v20  ;;  %7771 = vmatpush.bf16.msrb.mxu2 %v12692_v33  ;;  %v13932_v41 = vld [vmem:[#allocation8 + $0x59c] sm:$0xf]  ;;  %v9101_v13 = vsel %vm9100_vm6, %v15510_v15, %v9097_v39  ;;  %v10968_v20 = vor.u32 %v14092_v10, %v10965_v7 }
 0x335   :  { %v9241_v1 = vmul.f32 %v9225_v21, %v9101_v13  ;;  %v10901_v55 = vld [vmem:[#allocation8 + $0xa58] sm:$0xf0]  ;;  %v10328_v63 = vor.u32 %v13932_v41, %v10325_v19  ;;  %v7565_v19 = vpop.f32.mrf.mxu2 }
 0x336   :  { %7804 = vmatpush.bf16.msra.mxu1 %v10520_v29  ;;  %7784 = vmatpush.bf16.msrb.mxu3 %v13204_v46  ;;  %v9816_v29 = vor.u32 %v13804_v22, %v9813_v30  ;;  %v14204_v47 = vld [vmem:[#allocation8 + $0xe1c] sm:$0xf]  ;;  %v10904_v46 = vor.u32 %v14076_v35, %v10901_v55 }
 0x337   :  { %7772 = vmatmul.bf16.vlgmr.msrb.gmra.mxu2 %v15309_v11  ;;  %v13788_v33 = vld [vmem:[#allocation8 + $0x11c] sm:$0xf]  ;;  %v9257_v15 = vmax.f32 %v9241_v1, 0.0  ;;  %v11416_v57 = vor.u32 %v14204_v47, %v11413_v32 }
 0x338   :  { %7816 = vmatpush.bf16.msra.mxu2 %v11096_v54  ;;  %7792 = vmatpush.bf16.msra.mxu0 %v9944_v62  ;;  %v9749_v48 = vld [vmem:[#allocation8 + $0x158] sm:$0xf0] }
 0x339   :  { %7785 = vmatmul.bf16.vlgmr.msrb.gmra.mxu3 %v15318_v24  ;;  %v13916_v9 = vld [vmem:[#allocation8 + $0x51c] sm:$0xf]  ;;  %v9287_v38 = vrot.slane %v9257_v15, 4  ;;  %v9752_v18 = vor.u32 %v13788_v33, %v9749_v48 }
 0x33a   :  { %7829 = vmatpush.bf16.msra.mxu3 %v11608_v40  ;;  %7805 = vmatpush.bf16.msra.mxu1 %v10456_v4  ;;  %v10261_v6 = vld [vmem:[#allocation8 + $0x558] sm:$0xf0] }
 0x33b   :  { %v14060_v54 = vld [vmem:[#allocation8 + $0x99c] sm:$0xf]  ;;  %v10264_v42 = vor.u32 %v13916_v9, %v10261_v6  ;;  %v9295_v4 = vsel %vm601_vm0, %v9256_v44, %v9287_v38 }
 0x33c   :  { %7817 = vmatpush.bf16.msra.mxu2 %v11032_v25  ;;  %7793 = vmatpush.bf16.msra.mxu0 %v9880_v34  ;;  %v10837_v40 = vld [vmem:[#allocation8 + $0x9d8] sm:$0xf0]  ;;  %9311 = vst [vmem:[#allocation11 + $0x8] sm:$0xff] %v9295_v4 }
 0x33d   :  { %v14188_v62 = vld [vmem:[#allocation8 + $0xd9c] sm:$0xf]  ;;  %v10840_v49 = vor.u32 %v14060_v54, %v10837_v40 }
 0x33e   :  { %7830 = vmatpush.bf16.msra.mxu3 %v11544_v51  ;;  %7806 = vmatpush.bf16.msra.mxu1 %v10392_v12  ;;  %v11349_v5 = vld [vmem:[#allocation8 + $0xdd8] sm:$0xf0] }
 0x33f   :  { %v13772_v52 = vld [vmem:[#allocation8 + $0x9c] sm:$0xf]  ;;  %v11352_v25 = vor.u32 %v14188_v62, %v11349_v5 }
 0x340   :  { %7818 = vmatpush.bf16.msra.mxu2 %v10968_v20  ;;  %7794 = vmatpush.bf16.msra.mxu0 %v9816_v29  ;;  %v9685_v56 = vld [vmem:[#allocation8 + $0xd8] sm:$0xf0] }
 0x341   :  { %v13900_v31 = vld [vmem:[#allocation8 + $0x49c] sm:$0xf]  ;;  %v9688_v10 = vor.u32 %v13772_v52, %v9685_v56 }
 0x342   :  { %7831 = vmatpush.bf16.msra.mxu3 %v11480_v26  ;;  %7807 = vmatpush.bf16.msra.mxu1 %v10328_v63  ;;  %v10197_v27 = vld [vmem:[#allocation8 + $0x4d8] sm:$0xf0]  ;;  %v7578_v26 = vpop.f32.mrf.mxu3 }
 0x343   :  { %v14044_v3 = vld [vmem:[#allocation8 + $0x91c] sm:$0xf]  ;;  %v10200_v7 = vor.u32 %v13900_v31, %v10197_v27  ;;  %v7567_v31 = vpop.f32.mrf.mxu2 }
 0x344   :  { %7819 = vmatpush.bf16.msra.mxu2 %v10904_v46  ;;  %7795 = vmatpush.bf16.msra.mxu0 %v9752_v18  ;;  %v10773_v53 = vld [vmem:[#allocation8 + $0x958] sm:$0xf0]  ;;  %v7566_v18 = vadd.f32 %v7565_v19, %v15542_v16 }
 0x345   :  { %v14172_v51 = vld [vmem:[#allocation8 + $0xd1c] sm:$0xf]  ;;  %v10776_v30 = vor.u32 %v14044_v3, %v10773_v53 }
 0x346   :  { %7832 = vmatpush.bf16.msra.mxu3 %v11416_v57  ;;  %v11285_v34 = vld [vmem:[#allocation8 + $0xd58] sm:$0xf0]  ;;  %7808 = vmatpush.bf16.msra.mxu1 %v10264_v42  ;;  %v15548_v53 = vadd.f32 %v7578_v26, %v7566_v18 }
 0x347   :  { %v13756_v8 = vld [vmem:[#allocation8 + $0x1c] sm:$0xf]  ;;  %v11288_v28 = vor.u32 %v14172_v51, %v11285_v34 }
 0x348   :  { %v9621_v50 = vld [vmem:[#allocation8 + $0x58] sm:$0xf0]  ;;  %7820 = vmatpush.bf16.msra.mxu2 %v10840_v49  ;;  %7796 = vmatpush.bf16.msra.mxu0 %v9688_v10 }
 0x349   :  { %v13884_v2 = vld [vmem:[#allocation8 + $0x41c] sm:$0xf]  ;;  %v9624_v13 = vor.u32 %v13756_v8, %v9621_v50 }
 0x34a   :  { %v10133_v39 = vld [vmem:[#allocation8 + $0x458] sm:$0xf0]  ;;  %7833 = vmatpush.bf16.msra.mxu3 %v11352_v25  ;;  %7809 = vmatpush.bf16.msra.mxu1 %v10200_v7  ;;  %v7580_v49 = vpop.f32.mrf.mxu3 }
 0x34b   :  { %v14380_v12 = vld [vmem:[#allocation8 + $0x139c] sm:$0xf]  ;;  %v10136_v1 = vor.u32 %v13884_v2, %v10133_v39 }
 0x34c   :  { %v12117_v22 = vld [vmem:[#allocation8 + $0x13d8] sm:$0xf0]  ;;  %7821 = vmatpush.bf16.msra.mxu2 %v10776_v30  ;;  %7797 = vmatpush.bf16.msra.mxu0 %v9624_v13  ;;  %v8858_v13 = vmul.f32 %v15548_v53, %v15548_v53 }
 0x34d   :  { %v14508_v21 = vld [vmem:[#allocation8 + $0x179c] sm:$0xf]  ;;  %v12120_v60 = vor.u32 %v14380_v12, %v12117_v22 }
 0x34e   :  { %v12629_v41 = vld [vmem:[#allocation8 + $0x17d8] sm:$0xf0]  ;;  %7834 = vmatpush.bf16.msra.mxu3 %v11288_v28  ;;  %7810 = vmatpush.bf16.msra.mxu1 %v10136_v1  ;;  %v8754_v28 = vsel %vm601_vm0, %v15548_v53, 0.0 }
 0x34f   :  { %v14028_v37 = vld [vmem:[#allocation8 + $0x89c] sm:$0xf]  ;;  %v12632_v35 = vor.u32 %v14508_v21, %v12629_v41  ;;  %7798 = vmatmul.bf16.vlgmr.msra.gmra.mxu0 %v15185_v45 }
 0x350   :  { %v10709_v20 = vld [vmem:[#allocation8 + $0x8d8] sm:$0xf0]  ;;  %7842 = vmatpush.bf16.msrb.mxu0 %v12120_v60 }
 0x351   :  { %v14156_v36 = vld [vmem:[#allocation8 + $0xc9c] sm:$0xf]  ;;  %v10712_v63 = vor.u32 %v14028_v37, %v10709_v20  ;;  %7811 = vmatmul.bf16.vlgmr.msra.gmra.mxu1 %v15189_v58 }
 0x352   :  { %v11221_v29 = vld [vmem:[#allocation8 + $0xcd8] sm:$0xf0]  ;;  %7855 = vmatpush.bf16.msrb.mxu1 %v12632_v35 }
 0x353   :  { %v14364_v55 = vld [vmem:[#allocation8 + $0x131c] sm:$0xf]  ;;  %v11224_v15 = vor.u32 %v14156_v36, %v11221_v29  ;;  %7822 = vmatpush.bf16.msra.mxu2 %v10712_v63  ;;  %v15556_v36 = vpop.f32.mrf.mxu0  ;;  %v15558_v63 = vpop.f32.mrf.mxu1 }
 0x354   :  { %v12053_v47 = vld [vmem:[#allocation8 + $0x1358] sm:$0xf0] }
 0x355   :  { %v14492_v32 = vld [vmem:[#allocation8 + $0x171c] sm:$0xf]  ;;  %v12056_v54 = vor.u32 %v14364_v55, %v12053_v47  ;;  %7835 = vmatpush.bf16.msra.mxu3 %v11224_v15  ;;  %v8755_v47 = vrot.slane %v8754_v28, 4 }
 0x356   :  { %v12565_v33 = vld [vmem:[#allocation8 + $0x1758] sm:$0xf0] }
 0x357   :  { %v14012_v48 = vld [vmem:[#allocation8 + $0x81c] sm:$0xf]  ;;  %v12568_v40 = vor.u32 %v14492_v32, %v12565_v33  ;;  %7843 = vmatpush.bf16.msrb.mxu0 %v12056_v54 }
 0x358   :  { %v10645_v9 = vld [vmem:[#allocation8 + $0x858] sm:$0xf0] }
 0x359   :  { %v14140_v6 = vld [vmem:[#allocation8 + $0xc1c] sm:$0xf]  ;;  %v10648_v52 = vor.u32 %v14012_v48, %v10645_v9  ;;  %7856 = vmatpush.bf16.msrb.mxu1 %v12568_v40  ;;  %v8898_v9 = vsel %vm601_vm0, %v8858_v13, 0.0  ;;  %v8756_v40 = vadd.f32 %v8755_v47, %v8754_v28  ;;  %v13877_v28 = vld [vmem:[#allocation8 + $0x3dc] sm:$0xf0] }
 0x35a   :  { %v11157_v46 = vld [vmem:[#allocation8 + $0xc58] sm:$0xf0] }
 0x35b   :  { %v14636_v44 = vld [vmem:[#allocation8 + $0x1b9c] sm:$0xf]  ;;  %v11160_v27 = vor.u32 %v14140_v6, %v11157_v46  ;;  %7823 = vmatpush.bf16.msra.mxu2 %v10648_v52 }
 0x35c   :  { %v13141_v38 = vld [vmem:[#allocation8 + $0x1bd8] sm:$0xf0] }
 0x35d   :  { %v14764_v57 = vld [vmem:[#allocation8 + $0x1f9c] sm:$0xf]  ;;  %v13144_v17 = vor.u32 %v14636_v44, %v13141_v38  ;;  %7836 = vmatpush.bf16.msra.mxu3 %v11160_v27 }
 0x35e   :  { %v13653_v62 = vld [vmem:[#allocation8 + $0x1fd8] sm:$0xf0]  ;;  %7824 = vmatmul.bf16.vlgmr.msra.gmra.mxu2 %v15218_v59 }
 0x35f   :  { %v14348_v42 = vld [vmem:[#allocation8 + $0x129c] sm:$0xf]  ;;  %v13656_v16 = vor.u32 %v14764_v57, %v13653_v62  ;;  %7868 = vmatpush.bf16.msrb.mxu2 %v13144_v17  ;;  %v8899_v62 = vrot.slane %v8898_v9, 4 }
 0x360   :  { %v11989_v5 = vld [vmem:[#allocation8 + $0x12d8] sm:$0xf0]  ;;  %7837 = vmatmul.bf16.vlgmr.msra.gmra.mxu3 %v15235_v0 }
 0x361   :  { %v14476_v56 = vld [vmem:[#allocation8 + $0x169c] sm:$0xf]  ;;  %v11992_v3 = vor.u32 %v14348_v42, %v11989_v5  ;;  %7881 = vmatpush.bf16.msrb.mxu3 %v13656_v16 }
 0x362   :  { %v12501_v4 = vld [vmem:[#allocation8 + $0x16d8] sm:$0xf0] }
 0x363   :  { %v14620_v61 = vld [vmem:[#allocation8 + $0x1b1c] sm:$0xf]  ;;  %v12504_v51 = vor.u32 %v14476_v56, %v12501_v4  ;;  %7844 = vmatpush.bf16.msrb.mxu0 %v11992_v3  ;;  %v7593_v3 = vpop.f32.mrf.mxu0 }
 0x364   :  { %v13077_v25 = vld [vmem:[#allocation8 + $0x1b58] sm:$0xf0]  ;;  %v9947_v3 = vld [vmem:[#allocation8 + $0x2a0] sm:$0xf] }
 0x365   :  { %v14748_v10 = vld [vmem:[#allocation8 + $0x1f1c] sm:$0xf]  ;;  %v13080_v39 = vor.u32 %v14620_v61, %v13077_v25  ;;  %7857 = vmatpush.bf16.msrb.mxu1 %v12504_v51  ;;  %v8757_v51 = vrot.slane %v8756_v40, 2 }
 0x366   :  { %v13589_v34 = vld [vmem:[#allocation8 + $0x1f58] sm:$0xf0] }
 0x367   :  { %v14332_v7 = vld [vmem:[#allocation8 + $0x121c] sm:$0xf]  ;;  %v13592_v22 = vor.u32 %v14748_v10, %v13589_v34  ;;  %7869 = vmatpush.bf16.msrb.mxu2 %v13080_v39  ;;  %v8900_v34 = vadd.f32 %v8899_v62, %v8898_v9 }
 0x368   :  { %v11925_v8 = vld [vmem:[#allocation8 + $0x1258] sm:$0xf0] }
 0x369   :  { %v14460_v50 = vld [vmem:[#allocation8 + $0x161c] sm:$0xf]  ;;  %v11928_v30 = vor.u32 %v14332_v7, %v11925_v8  ;;  %7882 = vmatpush.bf16.msrb.mxu3 %v13592_v22  ;;  %v7606_v7 = vpop.f32.mrf.mxu1 }
 0x36a   :  { %v12437_v2 = vld [vmem:[#allocation8 + $0x1658] sm:$0xf0] }
 0x36b   :  { %v14604_v12 = vld [vmem:[#allocation8 + $0x1a9c] sm:$0xf]  ;;  %v12440_v37 = vor.u32 %v14460_v50, %v12437_v2  ;;  %7845 = vmatpush.bf16.msrb.mxu0 %v11928_v30 }
 0x36c   :  { %v13013_v21 = vld [vmem:[#allocation8 + $0x1ad8] sm:$0xf0] }
 0x36d   :  { %v14732_v41 = vld [vmem:[#allocation8 + $0x1e9c] sm:$0xf]  ;;  %v13016_v29 = vor.u32 %v14604_v12, %v13013_v21  ;;  %7858 = vmatpush.bf16.msrb.mxu1 %v12440_v37  ;;  %v10587_v37 = vld [vmem:[#allocation8 + $0x7a0] sm:$0xf] }
 0x36e   :  { %v13525_v19 = vld [vmem:[#allocation8 + $0x1ed8] sm:$0xf0] }
 0x36f   :  { %v14316_v20 = vld [vmem:[#allocation8 + $0x119c] sm:$0xf]  ;;  %v13528_v32 = vor.u32 %v14732_v41, %v13525_v19  ;;  %7870 = vmatpush.bf16.msrb.mxu2 %v13016_v29  ;;  %v10075_v19 = vld [vmem:[#allocation8 + $0x3a0] sm:$0xf] }
 0x370   :  { %v11861_v26 = vld [vmem:[#allocation8 + $0x11d8] sm:$0xf0] }
 0x371   :  { %v14444_v1 = vld [vmem:[#allocation8 + $0x159c] sm:$0xf]  ;;  %v11864_v33 = vor.u32 %v14316_v20, %v11861_v26  ;;  %7883 = vmatpush.bf16.msrb.mxu3 %v13528_v32  ;;  %v14005_v20 = vld [vmem:[#allocation8 + $0x7dc] sm:$0xf0]  ;;  %v8758_v26 = vadd.f32 %v8757_v51, %v8756_v40  ;;  %v15563_v32 = vpop.f32.mrf.mxu3 }
 0x372   :  { %v12373_v60 = vld [vmem:[#allocation8 + $0x15d8] sm:$0xf0]  ;;  %v10459_v51 = vld [vmem:[#allocation8 + $0x6a0] sm:$0xf] }
 0x373   :  { %v14588_v35 = vld [vmem:[#allocation8 + $0x1a1c] sm:$0xf]  ;;  %v12376_v6 = vor.u32 %v14444_v1, %v12373_v60  ;;  %7846 = vmatpush.bf16.msrb.mxu0 %v11864_v33  ;;  %v8901_v1 = vrot.slane %v8900_v34, 2  ;;  %v15561_v60 = vpop.f32.mrf.mxu2  ;;  %v8759_v62 = vrot.slane %v8758_v26, 1 }
 0x374   :  { %v12949_v55 = vld [vmem:[#allocation8 + $0x1a58] sm:$0xf0] }
 0x375   :  { %v14716_v48 = vld [vmem:[#allocation8 + $0x1e1c] sm:$0xf]  ;;  %v12952_v57 = vor.u32 %v14588_v35, %v12949_v55  ;;  %7859 = vmatpush.bf16.msrb.mxu1 %v12376_v6  ;;  %v10588_v6 = vor.u32 %v14005_v20, %v10587_v37  ;;  %v8760_v7 = vadd.f32 %v8759_v62, %v8758_v26  ;;  %v13829_v37 = vld [vmem:[#allocation8 + $0x25c] sm:$0xf0]  ;;  %v7643_v62 = vpop.f32.mrf.mxu0 }
 0x376   :  { %v13461_v15 = vld [vmem:[#allocation8 + $0x1e58] sm:$0xf0]  ;;  %v10395_v20 = vld [vmem:[#allocation8 + $0x620] sm:$0xf] }
 0x377   :  { %v14300_v46 = vld [vmem:[#allocation8 + $0x111c] sm:$0xf]  ;;  %v13464_v42 = vor.u32 %v14716_v48, %v13461_v15  ;;  %7871 = vmatpush.bf16.msrb.mxu2 %v12952_v57  ;;  %v10076_v48 = vor.u32 %v13877_v28, %v10075_v19  ;;  %v13989_v57 = vld [vmem:[#allocation8 + $0x75c] sm:$0xf0] }
 0x378   :  { %v11797_v54 = vld [vmem:[#allocation8 + $0x1158] sm:$0xf0]  ;;  %v14245_v28 = vld [vmem:[#allocation8 + $0xf5c] sm:$0xf0] }
 0x379   :  { %v14428_v44 = vld [vmem:[#allocation8 + $0x151c] sm:$0xf]  ;;  %v11800_v5 = vor.u32 %v14300_v46, %v11797_v54  ;;  %7884 = vmatpush.bf16.msrb.mxu3 %v13464_v42  ;;  %v10011_v46 = vld [vmem:[#allocation8 + $0x320] sm:$0xf]  ;;  %v8902_v42 = vadd.f32 %v8901_v1, %v8900_v34  ;;  %v15568_v1 = vmul.f32 0.25, %v8760_v7 }
 0x37a   :  { %v12309_v38 = vld [vmem:[#allocation8 + $0x1558] sm:$0xf0]  ;;  %v13861_v54 = vld [vmem:[#allocation8 + $0x35c] sm:$0xf0] }
 0x37b   :  { %v14572_v18 = vld [vmem:[#allocation8 + $0x199c] sm:$0xf]  ;;  %v12312_v4 = vor.u32 %v14428_v44, %v12309_v38  ;;  %7847 = vmatpush.bf16.msrb.mxu0 %v11800_v5  ;;  %v10523_v44 = vld [vmem:[#allocation8 + $0x720] sm:$0xf] }
 0x37c   :  { %v12885_v52 = vld [vmem:[#allocation8 + $0x19d8] sm:$0xf0]  ;;  %v13973_v34 = vld [vmem:[#allocation8 + $0x6dc] sm:$0xf0] }
 0x37d   :  { %v14700_v56 = vld [vmem:[#allocation8 + $0x1d9c] sm:$0xf]  ;;  %v12888_v61 = vor.u32 %v14572_v18, %v12885_v52  ;;  %7860 = vmatpush.bf16.msrb.mxu1 %v12312_v4  ;;  %v10012_v4 = vor.u32 %v13861_v54, %v10011_v46  ;;  %v10460_v19 = vor.u32 %v13973_v34, %v10459_v51  ;;  %v13957_v26 = vld [vmem:[#allocation8 + $0x65c] sm:$0xf0] }
 0x37e   :  { %v13397_v31 = vld [vmem:[#allocation8 + $0x1dd8] sm:$0xf0]  ;;  %v14229_v46 = vld [vmem:[#allocation8 + $0xedc] sm:$0xf0] }
 0x37f   :  { %v14284_v27 = vld [vmem:[#allocation8 + $0x109c] sm:$0xf]  ;;  %v13400_v8 = vor.u32 %v14700_v56, %v13397_v31  ;;  %7872 = vmatpush.bf16.msrb.mxu2 %v12888_v61  ;;  %v11099_v31 = vld [vmem:[#allocation8 + $0xba0] sm:$0xf] }
 0x380   :  { %v11733_v17 = vld [vmem:[#allocation8 + $0x10d8] sm:$0xf0]  ;;  %v13845_v61 = vld [vmem:[#allocation8 + $0x2dc] sm:$0xf0] }
 0x381   :  { %v14412_v49 = vld [vmem:[#allocation8 + $0x149c] sm:$0xf]  ;;  %v11736_v50 = vor.u32 %v14284_v27, %v11733_v17  ;;  %7885 = vmatpush.bf16.msrb.mxu3 %v13400_v8  ;;  %v14133_v27 = vld [vmem:[#allocation8 + $0xbdc] sm:$0xf0]  ;;  %v8903_v8 = vrot.slane %v8902_v42, 1 }
 0x382   :  { %v12245_v16 = vld [vmem:[#allocation8 + $0x14d8] sm:$0xf0]  ;;  %v11611_v17 = vld [vmem:[#allocation8 + $0xfa0] sm:$0xf] }
 0x383   :  { %v14556_v25 = vld [vmem:[#allocation8 + $0x191c] sm:$0xf]  ;;  %v12248_v12 = vor.u32 %v14412_v49, %v12245_v16  ;;  %7848 = vmatpush.bf16.msrb.mxu0 %v11736_v50  ;;  %v10524_v49 = vor.u32 %v13989_v57, %v10523_v44  ;;  %v14261_v16 = vld [vmem:[#allocation8 + $0xfdc] sm:$0xf0]  ;;  %v7619_v50 = vpop.f32.mrf.mxu2 }
 0x384   :  { %v12821_v10 = vld [vmem:[#allocation8 + $0x1958] sm:$0xf0]  ;;  %v9819_v54 = vld [vmem:[#allocation8 + $0x1a0] sm:$0xf] }
 0x385   :  { %v14684_v2 = vld [vmem:[#allocation8 + $0x1d1c] sm:$0xf]  ;;  %v12824_v13 = vor.u32 %v14556_v25, %v12821_v10  ;;  %7861 = vmatpush.bf16.msrb.mxu1 %v12248_v12  ;;  %v1915_v25 = vperm.slane %v15488_v23, 5  ;;  %v7632_v12 = vpop.f32.mrf.mxu3  ;;  %v14117_v23 = vld [vmem:[#allocation8 + $0xb5c] sm:$0xf0] }
 0x386   :  { %v13333_v39 = vld [vmem:[#allocation8 + $0x1d58] sm:$0xf0]  ;;  %v13813_v44 = vld [vmem:[#allocation8 + $0x1dc] sm:$0xf0] }
 0x387   :  { %v14268_v22 = vld [vmem:[#allocation8 + $0x101c] sm:$0xf]  ;;  %v13336_v29 = vor.u32 %v14684_v2, %v13333_v39  ;;  %7873 = vmatpush.bf16.msrb.mxu2 %v12824_v13  ;;  %v11100_v39 = vor.u32 %v14133_v27, %v11099_v31  ;;  %v9883_v13 = vld [vmem:[#allocation8 + $0x220] sm:$0xf] }
 0x388   :  { %v11669_v30 = vld [vmem:[#allocation8 + $0x1058] sm:$0xf0]  ;;  %v14085_v31 = vld [vmem:[#allocation8 + $0xa5c] sm:$0xf0] }
 0x389   :  { %v14396_v21 = vld [vmem:[#allocation8 + $0x141c] sm:$0xf]  ;;  %v11672_v35 = vor.u32 %v14268_v22, %v11669_v30  ;;  %7886 = vmatpush.bf16.msrb.mxu3 %v13336_v29  ;;  %v11612_v22 = vor.u32 %v14261_v16, %v11611_v17  ;;  %v9948_v30 = vor.u32 %v13845_v61, %v9947_v3  ;;  %v8904_v29 = vadd.f32 %v8903_v8, %v8902_v42  ;;  %v11419_v27 = vld [vmem:[#allocation8 + $0xe20] sm:$0xf] }
 0x38a   :  { %v12181_v41 = vld [vmem:[#allocation8 + $0x1458] sm:$0xf0]  ;;  %v14213_v16 = vld [vmem:[#allocation8 + $0xe5c] sm:$0xf0] }
 0x38b   :  { %v14540_v55 = vld [vmem:[#allocation8 + $0x189c] sm:$0xf]  ;;  %v12184_v33 = vor.u32 %v14396_v21, %v12181_v41  ;;  %7849 = vmatpush.bf16.msrb.mxu0 %v11672_v35  ;;  %v11035_v21 = vld [vmem:[#allocation8 + $0xb20] sm:$0xf]  ;;  %v7592_v35 = vadd.f32 %v15556_v36, %v1915_v25  ;;  %v8986_v57 = vmul.f32 0.25, %v8904_v29  ;;  %v11420_v34 = vor.u32 %v14213_v16, %v11419_v27 }
 0x38c   :  { %v12757_v47 = vld [vmem:[#allocation8 + $0x18d8] sm:$0xf0]  ;;  %v11547_v41 = vld [vmem:[#allocation8 + $0xf20] sm:$0xf] }
 0x38d   :  { %v14668_v15 = vld [vmem:[#allocation8 + $0x1c9c] sm:$0xf]  ;;  %v12760_v38 = vor.u32 %v14540_v55, %v12757_v47  ;;  %7862 = vmatpush.bf16.msrb.mxu1 %v12184_v33  ;;  %v11036_v55 = vor.u32 %v14117_v23, %v11035_v21  ;;  %v11548_v47 = vor.u32 %v14245_v28, %v11547_v41  ;;  %v9884_v33 = vor.u32 %v13829_v37, %v9883_v13  ;;  %v10331_v36 = vld [vmem:[#allocation8 + $0x5a0] sm:$0xf]  ;;  %v7645_v28 = vpop.f32.mrf.mxu0 }
 0x38e   :  { %v13269_v9 = vld [vmem:[#allocation8 + $0x1cd8] sm:$0xf0]  ;;  %7850 = vmatmul.bf16.vlgmr.msrb.gmra.mxu0 %v15280_v43  ;;  %v9755_v3 = vld [vmem:[#allocation8 + $0x120] sm:$0xf] }
 0x38f   :  { %v14524_v18 = vld [vmem:[#allocation8 + $0x181c] sm:$0xf]  ;;  %v13272_v5 = vor.u32 %v14668_v15, %v13269_v9  ;;  %7894 = vmatpush.bf16.msra.mxu0 %v10076_v48  ;;  %7874 = vmatpush.bf16.msrb.mxu2 %v12760_v38  ;;  %v10971_v48 = vld [vmem:[#allocation8 + $0xaa0] sm:$0xf] }
 0x390   :  { %v12693_v40 = vld [vmem:[#allocation8 + $0x1858] sm:$0xf0]  ;;  %7863 = vmatmul.bf16.vlgmr.msrb.gmra.mxu1 %v15290_v14  ;;  %v14101_v15 = vld [vmem:[#allocation8 + $0xadc] sm:$0xf0] }
 0x391   :  { %v14652_v52 = vld [vmem:[#allocation8 + $0x1c1c] sm:$0xf]  ;;  %7907 = vmatpush.bf16.msra.mxu1 %v10588_v6  ;;  %v12696_v10 = vor.u32 %v14524_v18, %v12693_v40  ;;  %7887 = vmatpush.bf16.msrb.mxu3 %v13272_v5  ;;  %v11483_v9 = vld [vmem:[#allocation8 + $0xea0] sm:$0xf]  ;;  %v10396_v6 = vor.u32 %v13957_v26, %v10395_v20  ;;  %v9002_v18 = vmul.f32 %v15568_v1, %v15568_v1  ;;  %v7656_v5 = vpop.f32.mrf.mxu1 }
 0x392   :  { %v13205_v56 = vld [vmem:[#allocation8 + $0x1c58] sm:$0xf0]  ;;  %v13941_v38 = vld [vmem:[#allocation8 + $0x5dc] sm:$0xf0]  ;;  %v7605_v40 = vadd.f32 %v15558_v63, %v7592_v35  ;;  %v10972_v42 = vor.u32 %v14101_v15, %v10971_v48 }
 0x393   :  { %v13208_v2 = vor.u32 %v14652_v52, %v13205_v56  ;;  %7895 = vmatpush.bf16.msra.mxu0 %v10012_v4  ;;  %7875 = vmatpush.bf16.msrb.mxu2 %v12696_v10  ;;  %v11484_v52 = vor.u32 %v14229_v46, %v11483_v9  ;;  %v9820_v56 = vor.u32 %v13813_v44, %v9819_v54  ;;  %v10907_v4 = vld [vmem:[#allocation8 + $0xa20] sm:$0xf] }
 0x394   :  { %v7618_v17 = vadd.f32 %v15561_v60, %v7605_v40  ;;  %v13797_v61 = vld [vmem:[#allocation8 + $0x15c] sm:$0xf0]  ;;  %v9018_v10 = vsub.f32 %v8986_v57, %v9002_v18  ;;  %v10908_v51 = vor.u32 %v14085_v31, %v10907_v4  ;;  %v7669_v18 = vpop.f32.mrf.mxu2  ;;  %v7682_v4 = vpop.f32.mrf.mxu3 }
 0x395   :  { %7908 = vmatpush.bf16.msra.mxu1 %v10524_v49  ;;  %7888 = vmatpush.bf16.msrb.mxu3 %v13208_v2  ;;  %v10332_v49 = vor.u32 %v13941_v38, %v10331_v36  ;;  %v10267_v25 = vld [vmem:[#allocation8 + $0x520] sm:$0xf]  ;;  %v9756_v7 = vor.u32 %v13797_v61, %v9755_v3 }
 0x396   :  { %7876 = vmatmul.bf16.vlgmr.msrb.gmra.mxu2 %v15309_v11  ;;  %v13925_v63 = vld [vmem:[#allocation8 + $0x55c] sm:$0xf0]  ;;  %v9034_v41 = vmax.f32 %v9018_v10, 0.0 }
 0x397   :  { %7920 = vmatpush.bf16.msra.mxu2 %v11100_v39  ;;  %7896 = vmatpush.bf16.msra.mxu0 %v9948_v30  ;;  %v10843_v8 = vld [vmem:[#allocation8 + $0x9a0] sm:$0xf]  ;;  %v7631_v39 = vadd.f32 %v15563_v32, %v7618_v17  ;;  %v10268_v60 = vor.u32 %v13925_v63, %v10267_v25 }
 0x398   :  { %7889 = vmatmul.bf16.vlgmr.msrb.gmra.mxu3 %v15318_v24  ;;  %v14069_v50 = vld [vmem:[#allocation8 + $0x9dc] sm:$0xf0]  ;;  %v15578_v57 = vadd.f32 1e-05, %v9034_v41 }
 0x399   :  { %7933 = vmatpush.bf16.msra.mxu3 %v11612_v22  ;;  %7909 = vmatpush.bf16.msra.mxu1 %v10460_v19  ;;  %v11355_v2 = vld [vmem:[#allocation8 + $0xda0] sm:$0xf]  ;;  %v7644_v19 = vadd.f32 %v7643_v62, %v7631_v39  ;;  %v10844_v13 = vor.u32 %v14069_v50, %v10843_v8  ;;  %v7658_v20 = vpop.f32.mrf.mxu1 }
 0x39a   :  { %v14197_v12 = vld [vmem:[#allocation8 + $0xddc] sm:$0xf0]  ;;  %14811 = vrsqrt.f32 %v15578_v57  ;;  %vm9108_vm8 = vweird.f32 %v15578_v57 }
 0x39b   :  { %7921 = vmatpush.bf16.msra.mxu2 %v11036_v55  ;;  %7897 = vmatpush.bf16.msra.mxu0 %v9884_v33  ;;  %v9691_v22 = vld [vmem:[#allocation8 + $0xa0] sm:$0xf]  ;;  %v11356_v26 = vor.u32 %v14197_v12, %v11355_v2  ;;  %v7657_v54 = vadd.f32 %v7656_v5, %v7644_v19 }
 0x39c   :  { %v13781_v30 = vld [vmem:[#allocation8 + $0xdc] sm:$0xf0] }
 0x39d   :  { %7934 = vmatpush.bf16.msra.mxu3 %v11548_v47  ;;  %7910 = vmatpush.bf16.msra.mxu1 %v10396_v6  ;;  %v10203_v21 = vld [vmem:[#allocation8 + $0x4a0] sm:$0xf]  ;;  %v9692_v29 = vor.u32 %v13781_v30, %v9691_v22 }
 0x39e   :  { %v13909_v23 = vld [vmem:[#allocation8 + $0x4dc] sm:$0xf0] }
 0x39f   :  { %7922 = vmatpush.bf16.msra.mxu2 %v10972_v42  ;;  %7898 = vmatpush.bf16.msra.mxu0 %v9820_v56  ;;  %v10779_v37 = vld [vmem:[#allocation8 + $0x920] sm:$0xf]  ;;  %v10204_v47 = vor.u32 %v13909_v23, %v10203_v21  ;;  %v7670_v56 = vadd.f32 %v7669_v18, %v7657_v54 }
 0x3a0   :  { %v14053_v35 = vld [vmem:[#allocation8 + $0x95c] sm:$0xf0] }
 0x3a1   :  { %7935 = vmatpush.bf16.msra.mxu3 %v11484_v52  ;;  %7911 = vmatpush.bf16.msra.mxu1 %v10332_v49  ;;  %v11291_v32 = vld [vmem:[#allocation8 + $0xd20] sm:$0xf]  ;;  %v10780_v44 = vor.u32 %v14053_v35, %v10779_v37  ;;  %v15580_v63 = vadd.f32 %v7682_v4, %v7670_v56 }
 0x3a2   :  { %v14181_v55 = vld [vmem:[#allocation8 + $0xd5c] sm:$0xf0] }
 0x3a3   :  { %7923 = vmatpush.bf16.msra.mxu2 %v10908_v51  ;;  %7899 = vmatpush.bf16.msra.mxu0 %v9756_v7  ;;  %v9627_v33 = vld [vmem:[#allocation8 + $0x20] sm:$0xf]  ;;  %v11292_v40 = vor.u32 %v14181_v55, %v11291_v32  ;;  %v8859_v12 = vmul.f32 %v15580_v63, %v15580_v63  ;;  %v7671_v32 = vpop.f32.mrf.mxu2 }
 0x3a4   :  { %v13765_v48 = vld [vmem:[#allocation8 + $0x5c] sm:$0xf0] }
 0x3a5   :  { %7936 = vmatpush.bf16.msra.mxu3 %v11420_v34  ;;  %7912 = vmatpush.bf16.msra.mxu1 %v10268_v60  ;;  %v10139_v15 = vld [vmem:[#allocation8 + $0x420] sm:$0xf]  ;;  %v9628_v62 = vor.u32 %v13765_v48, %v9627_v33  ;;  %v8761_v60 = vsel %vm601_vm0, %v15580_v63, 0.0  ;;  %v7684_v48 = vpop.f32.mrf.mxu3 }
 0x3a6   :  { %v13893_v9 = vld [vmem:[#allocation8 + $0x45c] sm:$0xf0]  ;;  %v8762_v23 = vrot.slane %v8761_v60, 4 }
 0x3a7   :  { %v12123_v6 = vld [vmem:[#allocation8 + $0x13a0] sm:$0xf]  ;;  %7924 = vmatpush.bf16.msra.mxu2 %v10844_v13  ;;  %7900 = vmatpush.bf16.msra.mxu0 %v9692_v29  ;;  %v10140_v31 = vor.u32 %v13893_v9, %v10139_v15  ;;  %v8905_v13 = vsel %vm601_vm0, %v8859_v12, 0.0 }
 0x3a8   :  { %v14389_v46 = vld [vmem:[#allocation8 + $0x13dc] sm:$0xf0]  ;;  %v8763_v29 = vadd.f32 %v8762_v23, %v8761_v60  ;;  %v8906_v35 = vrot.slane %v8905_v13, 4 }
 0x3a9   :  { %v12635_v36 = vld [vmem:[#allocation8 + $0x17a0] sm:$0xf]  ;;  %7937 = vmatpush.bf16.msra.mxu3 %v11356_v26  ;;  %7913 = vmatpush.bf16.msra.mxu1 %v10204_v47  ;;  %v12124_v27 = vor.u32 %v14389_v46, %v12123_v6 }
 0x3aa   :  { %v14517_v38 = vld [vmem:[#allocation8 + $0x17dc] sm:$0xf0] }
 0x3ab   :  { %v10715_v42 = vld [vmem:[#allocation8 + $0x8a0] sm:$0xf]  ;;  %v12636_v16 = vor.u32 %v14517_v38, %v12635_v36  ;;  %7925 = vmatpush.bf16.msra.mxu2 %v10780_v44  ;;  %7901 = vmatpush.bf16.msra.mxu0 %v9628_v62  ;;  %v8764_v44 = vrot.slane %v8763_v29, 2  ;;  %v8907_v36 = vadd.f32 %v8906_v35, %v8905_v13 }
 0x3ac   :  { %v14037_v52 = vld [vmem:[#allocation8 + $0x8dc] sm:$0xf0] }
 0x3ad   :  { %v11227_v17 = vld [vmem:[#allocation8 + $0xca0] sm:$0xf]  ;;  %v10716_v10 = vor.u32 %v14037_v52, %v10715_v42  ;;  %7938 = vmatpush.bf16.msra.mxu3 %v11292_v40  ;;  %7914 = vmatpush.bf16.msra.mxu1 %v10140_v31  ;;  %v8765_v52 = vadd.f32 %v8764_v44, %v8763_v29  ;;  %v8908_v56 = vrot.slane %v8907_v36, 2 }
 0x3ae   :  { %v14165_v5 = vld [vmem:[#allocation8 + $0xcdc] sm:$0xf0]  ;;  %7902 = vmatmul.bf16.vlgmr.msra.gmra.mxu0 %v15185_v45 }
 0x3af   :  { %v12059_v49 = vld [vmem:[#allocation8 + $0x1320] sm:$0xf]  ;;  %v11228_v8 = vor.u32 %v14165_v5, %v11227_v17  ;;  %7946 = vmatpush.bf16.msrb.mxu0 %v12124_v27  ;;  %7926 = vmatpush.bf16.msra.mxu2 %v10716_v10  ;;  %v15593_v5 = vpop.eup %14811  ;;  %v8766_v10 = vrot.slane %v8765_v52, 1 }
 0x3b0   :  { %v14373_v3 = vld [vmem:[#allocation8 + $0x135c] sm:$0xf0]  ;;  %7915 = vmatmul.bf16.vlgmr.msra.gmra.mxu1 %v15189_v58  ;;  %vm9109_vm7 = vweird.f32 %v15593_v5 }
 0x3b1   :  { %v12571_v61 = vld [vmem:[#allocation8 + $0x1720] sm:$0xf]  ;;  %v12060_v22 = vor.u32 %v14373_v3, %v12059_v49  ;;  %7959 = vmatpush.bf16.msrb.mxu1 %v12636_v16  ;;  %7939 = vmatpush.bf16.msra.mxu3 %v11228_v8  ;;  %v8767_v60 = vadd.f32 %v8766_v10, %v8765_v52  ;;  %vm15624_vm9 = vmor %vm9108_vm8, %vm9109_vm7 }
 0x3b2   :  { %v14501_v25 = vld [vmem:[#allocation8 + $0x175c] sm:$0xf0] }
 0x3b3   :  { %v10651_v51 = vld [vmem:[#allocation8 + $0x820] sm:$0xf]  ;;  %v12572_v41 = vor.u32 %v14501_v25, %v12571_v61  ;;  %7947 = vmatpush.bf16.msrb.mxu0 %v12060_v22  ;;  %v7695_v22 = vpop.f32.mrf.mxu0 }
 0x3b4   :  { %v14021_v34 = vld [vmem:[#allocation8 + $0x85c] sm:$0xf0] }
 0x3b5   :  { %v11163_v7 = vld [vmem:[#allocation8 + $0xc20] sm:$0xf]  ;;  %v10652_v37 = vor.u32 %v14021_v34, %v10651_v51  ;;  %7960 = vmatpush.bf16.msrb.mxu1 %v12572_v41  ;;  %v8909_v51 = vadd.f32 %v8908_v56, %v8907_v36  ;;  %v7708_v41 = vpop.f32.mrf.mxu1 }
 0x3b6   :  { %v14149_v50 = vld [vmem:[#allocation8 + $0xc5c] sm:$0xf0] }
 0x3b7   :  { %v13147_v2 = vld [vmem:[#allocation8 + $0x1ba0] sm:$0xf]  ;;  %v11164_v55 = vor.u32 %v14149_v50, %v11163_v7  ;;  %7927 = vmatpush.bf16.msra.mxu2 %v10652_v37  ;;  %v8910_v12 = vrot.slane %v8909_v51, 1 }
 0x3b8   :  { %v14645_v39 = vld [vmem:[#allocation8 + $0x1bdc] sm:$0xf0] }
 0x3b9   :  { %v13659_v30 = vld [vmem:[#allocation8 + $0x1fa0] sm:$0xf]  ;;  %v13148_v47 = vor.u32 %v14645_v39, %v13147_v2  ;;  %7940 = vmatpush.bf16.msra.mxu3 %v11164_v55  ;;  %v9103_v39 = vmul.f32 %v15593_v5, %v15578_v57  ;;  %v8911_v29 = vadd.f32 %v8910_v12, %v8909_v51 }
 0x3ba   :  { %v14773_v21 = vld [vmem:[#allocation8 + $0x1fdc] sm:$0xf0]  ;;  %7928 = vmatmul.bf16.vlgmr.msra.gmra.mxu2 %v15218_v59 }
 0x3bb   :  { %v11995_v19 = vld [vmem:[#allocation8 + $0x12a0] sm:$0xf]  ;;  %v13660_v15 = vor.u32 %v14773_v21, %v13659_v30  ;;  %7972 = vmatpush.bf16.msrb.mxu2 %v13148_v47 }
 0x3bc   :  { %v14357_v28 = vld [vmem:[#allocation8 + $0x12dc] sm:$0xf0]  ;;  %7941 = vmatmul.bf16.vlgmr.msra.gmra.mxu3 %v15235_v0 }
 0x3bd   :  { %v12507_v20 = vld [vmem:[#allocation8 + $0x16a0] sm:$0xf]  ;;  %v11996_v9 = vor.u32 %v14357_v28, %v11995_v19  ;;  %7985 = vmatpush.bf16.msrb.mxu3 %v13660_v15  ;;  %v9104_v15 = vmul.f32 %v15593_v5, %v9103_v39  ;;  %v7710_v10 = vpop.f32.mrf.mxu1 }
 0x3be   :  { %v14485_v26 = vld [vmem:[#allocation8 + $0x16dc] sm:$0xf0]  ;;  %v9949_v10 = vld [vmem:[#allocation8 + $0x2e0] sm:$0xf0] }
 0x3bf   :  { %v13083_v33 = vld [vmem:[#allocation8 + $0x1b20] sm:$0xf]  ;;  %v12508_v38 = vor.u32 %v14485_v26, %v12507_v20  ;;  %7948 = vmatpush.bf16.msrb.mxu0 %v11996_v9  ;;  %v15599_v26 = vmul.f32 0.25, %v8767_v60  ;;  %v8987_v9 = vmul.f32 0.25, %v8911_v29 }
 0x3c0   :  { %v14629_v6 = vld [vmem:[#allocation8 + $0x1b5c] sm:$0xf0] }
 0x3c1   :  { %v13595_v46 = vld [vmem:[#allocation8 + $0x1f20] sm:$0xf]  ;;  %v13084_v4 = vor.u32 %v14629_v6, %v13083_v33  ;;  %7961 = vmatpush.bf16.msrb.mxu1 %v12508_v38  ;;  %v9003_v6 = vmul.f32 %v15599_v26, %v15599_v26 }
 0x3c2   :  { %v14757_v54 = vld [vmem:[#allocation8 + $0x1f5c] sm:$0xf0] }
 0x3c3   :  { %v11931_v18 = vld [vmem:[#allocation8 + $0x1220] sm:$0xf]  ;;  %v13596_v49 = vor.u32 %v14757_v54, %v13595_v46  ;;  %7973 = vmatpush.bf16.msrb.mxu2 %v13084_v4 }
 0x3c4   :  { %v14341_v40 = vld [vmem:[#allocation8 + $0x125c] sm:$0xf0] }
 0x3c5   :  { %v12443_v62 = vld [vmem:[#allocation8 + $0x1620] sm:$0xf]  ;;  %v11932_v16 = vor.u32 %v14341_v40, %v11931_v18  ;;  %7986 = vmatpush.bf16.msrb.mxu3 %v13596_v49  ;;  %v9019_v40 = vsub.f32 %v8987_v9, %v9003_v6 }
 0x3c6   :  { %v14469_v42 = vld [vmem:[#allocation8 + $0x165c] sm:$0xf0] }
 0x3c7   :  { %v15590_v31 = vld [vmem:[#allocation10] sm:$0xff]  ;;  %v12444_v34 = vor.u32 %v14469_v42, %v12443_v62  ;;  %7949 = vmatpush.bf16.msrb.mxu0 %v11932_v16  ;;  %v9035_v49 = vmax.f32 %v9019_v40, 0.0  ;;  %v7697_v16 = vpop.f32.mrf.mxu0 }
 0x3c8   :  { %v1916_v27 = vperm.slane %v15590_v31, 6  ;;  %v13019_v17 = vld [vmem:[#allocation8 + $0x1aa0] sm:$0xf] }
 0x3c9   :  { %v14613_v3 = vld [vmem:[#allocation8 + $0x1adc] sm:$0xf0]  ;;  %7962 = vmatpush.bf16.msrb.mxu1 %v12444_v34 }
 0x3ca   :  { %v13531_v61 = vld [vmem:[#allocation8 + $0x1ea0] sm:$0xf]  ;;  %v13020_v30 = vor.u32 %v14613_v3, %v13019_v17  ;;  %v7696_v23 = vadd.f32 %v7695_v22, %v1916_v27  ;;  %v15604_v17 = vmul.f32 0.5, %v9104_v15 }
 0x3cb   :  { %v14741_v25 = vld [vmem:[#allocation8 + $0x1edc] sm:$0xf0] }
 0x3cc   :  { %v11867_v7 = vld [vmem:[#allocation8 + $0x11a0] sm:$0xf]  ;;  %v13532_v19 = vor.u32 %v14741_v25, %v13531_v61  ;;  %v7709_v47 = vadd.f32 %v7708_v41, %v7696_v23  ;;  %7974 = vmatpush.bf16.msrb.mxu2 %v13020_v30  ;;  %v13869_v30 = vld [vmem:[#allocation8 + $0x3a4] sm:$0xf]  ;;  %v9106_v9 = vsub.f32 1.5, %v15604_v17 }
 0x3cd   :  { %v14325_v8 = vld [vmem:[#allocation8 + $0x11dc] sm:$0xf0]  ;;  %v13997_v41 = vld [vmem:[#allocation8 + $0x7a4] sm:$0xf] }
 0x3ce   :  { %v12379_v50 = vld [vmem:[#allocation8 + $0x15a0] sm:$0xf]  ;;  %v11868_v28 = vor.u32 %v14325_v8, %v11867_v7  ;;  %7987 = vmatpush.bf16.msrb.mxu3 %v13532_v19  ;;  %v10589_v19 = vld [vmem:[#allocation8 + $0x7e0] sm:$0xf0] }
 0x3cf   :  { %v14453_v2 = vld [vmem:[#allocation8 + $0x15dc] sm:$0xf0]  ;;  %v10592_v6 = vor.u32 %v13997_v41, %v10589_v19  ;;  %v11101_v17 = vld [vmem:[#allocation8 + $0xbe0] sm:$0xf0] }
 0x3d0   :  { %v12955_v21 = vld [vmem:[#allocation8 + $0x1a20] sm:$0xf]  ;;  %v12380_v35 = vor.u32 %v14453_v2, %v12379_v50  ;;  %7950 = vmatpush.bf16.msrb.mxu0 %v11868_v28  ;;  %v15606_v2 = vadd.f32 1e-05, %v9035_v49  ;;  %v7721_v28 = vpop.f32.mrf.mxu2  ;;  %v14253_v49 = vld [vmem:[#allocation8 + $0xfa4] sm:$0xf] }
 0x3d1   :  { %v14597_v13 = vld [vmem:[#allocation8 + $0x1a5c] sm:$0xf0]  ;;  %v11037_v41 = vld [vmem:[#allocation8 + $0xb60] sm:$0xf0] }
 0x3d2   :  { %v13467_v37 = vld [vmem:[#allocation8 + $0x1e20] sm:$0xf]  ;;  %v12956_v46 = vor.u32 %v14597_v13, %v12955_v21  ;;  %7963 = vmatpush.bf16.msrb.mxu1 %v12380_v35  ;;  %v10077_v21 = vld [vmem:[#allocation8 + $0x3e0] sm:$0xf0]  ;;  %14813 = vrsqrt.f32 %v15606_v2  ;;  %v7722_v35 = vadd.f32 %v7721_v28, %v7709_v47  ;;  %vm9118_vm11 = vweird.f32 %v15606_v2 }
 0x3d3   :  { %v14725_v20 = vld [vmem:[#allocation8 + $0x1e5c] sm:$0xf0]  ;;  %v14237_v19 = vld [vmem:[#allocation8 + $0xf24] sm:$0xf] }
 0x3d4   :  { %v11803_v32 = vld [vmem:[#allocation8 + $0x1120] sm:$0xf]  ;;  %v13468_v54 = vor.u32 %v14725_v20, %v13467_v37  ;;  %7975 = vmatpush.bf16.msrb.mxu2 %v12956_v46  ;;  %v13853_v46 = vld [vmem:[#allocation8 + $0x324] sm:$0xf] }
 0x3d5   :  { %v14309_v55 = vld [vmem:[#allocation8 + $0x115c] sm:$0xf0]  ;;  %v11549_v28 = vld [vmem:[#allocation8 + $0xf60] sm:$0xf0] }
 0x3d6   :  { %v12315_v33 = vld [vmem:[#allocation8 + $0x1520] sm:$0xf]  ;;  %v11804_v44 = vor.u32 %v14309_v55, %v11803_v32  ;;  %7988 = vmatpush.bf16.msrb.mxu3 %v13468_v54  ;;  %v7734_v32 = vpop.f32.mrf.mxu3  ;;  %v10013_v54 = vld [vmem:[#allocation8 + $0x360] sm:$0xf0] }
 0x3d7   :  { %v14437_v48 = vld [vmem:[#allocation8 + $0x155c] sm:$0xf0] }
 0x3d8   :  { %v12891_v36 = vld [vmem:[#allocation8 + $0x19a0] sm:$0xf]  ;;  %v12316_v62 = vor.u32 %v14437_v48, %v12315_v33  ;;  %7951 = vmatpush.bf16.msrb.mxu0 %v11804_v44  ;;  %v10080_v33 = vor.u32 %v13869_v30, %v10077_v21  ;;  %v15610_v44 = vadd.f32 %v7734_v32, %v7722_v35  ;;  %v13949_v35 = vld [vmem:[#allocation8 + $0x624] sm:$0xf] }
 0x3d9   :  { %v14581_v38 = vld [vmem:[#allocation8 + $0x19dc] sm:$0xf0]  ;;  %v10397_v32 = vld [vmem:[#allocation8 + $0x660] sm:$0xf0] }
 0x3da   :  { %v13403_v18 = vld [vmem:[#allocation8 + $0x1da0] sm:$0xf]  ;;  %v12892_v3 = vor.u32 %v14581_v38, %v12891_v36  ;;  %7964 = vmatpush.bf16.msrb.mxu1 %v12316_v62  ;;  %v13981_v38 = vld [vmem:[#allocation8 + $0x724] sm:$0xf] }
 0x3db   :  { %v14709_v42 = vld [vmem:[#allocation8 + $0x1ddc] sm:$0xf0] }
 0x3dc   :  { %v11739_v52 = vld [vmem:[#allocation8 + $0x10a0] sm:$0xf]  ;;  %v13404_v51 = vor.u32 %v14709_v42, %v13403_v18  ;;  %7976 = vmatpush.bf16.msrb.mxu2 %v12892_v3  ;;  %v10525_v18 = vld [vmem:[#allocation8 + $0x760] sm:$0xf0] }
 0x3dd   :  { %v14293_v56 = vld [vmem:[#allocation8 + $0x10dc] sm:$0xf0]  ;;  %v10528_v3 = vor.u32 %v13981_v38, %v10525_v18  ;;  %v9226_v38 = vsub.f32 %v15548_v53, %v15568_v1  ;;  %v10333_v53 = vld [vmem:[#allocation8 + $0x5e0] sm:$0xf0] }
 0x3de   :  { %v12251_v4 = vld [vmem:[#allocation8 + $0x14a0] sm:$0xf]  ;;  %v11740_v34 = vor.u32 %v14293_v56, %v11739_v52  ;;  %7989 = vmatpush.bf16.msrb.mxu3 %v13404_v51  ;;  %v15612_v56 = vpop.eup %14813  ;;  %v7736_v30 = vpop.f32.mrf.mxu3 }
 0x3df   :  { %v14421_v27 = vld [vmem:[#allocation8 + $0x14dc] sm:$0xf0]  ;;  %v9113_v16 = vmul.f32 %v15612_v56, %v15606_v2  ;;  %vm9119_vm10 = vweird.f32 %v15612_v56  ;;  %v7747_v2 = vpop.f32.mrf.mxu0 }
 0x3e0   :  { %v12827_v61 = vld [vmem:[#allocation8 + $0x1920] sm:$0xf]  ;;  %v12252_v39 = vor.u32 %v14421_v27, %v12251_v4  ;;  %7952 = vmatpush.bf16.msrb.mxu0 %v11740_v34  ;;  %v10016_v4 = vor.u32 %v13853_v46, %v10013_v54  ;;  %v14125_v27 = vld [vmem:[#allocation8 + $0xba4] sm:$0xf]  ;;  %vm9120_vm12 = vmor %vm9118_vm11, %vm9119_vm10 }
 0x3e1   :  { %v14565_v25 = vld [vmem:[#allocation8 + $0x195c] sm:$0xf0]  ;;  %v13965_v34 = vld [vmem:[#allocation8 + $0x6a4] sm:$0xf] }
 0x3e2   :  { %v13339_v7 = vld [vmem:[#allocation8 + $0x1d20] sm:$0xf]  ;;  %v12828_v23 = vor.u32 %v14565_v25, %v12827_v61  ;;  %7965 = vmatpush.bf16.msrb.mxu1 %v12252_v39  ;;  %v11613_v61 = vld [vmem:[#allocation8 + $0xfe0] sm:$0xf0] }
 0x3e3   :  { %v14693_v8 = vld [vmem:[#allocation8 + $0x1d5c] sm:$0xf0]  ;;  %v13837_v25 = vld [vmem:[#allocation8 + $0x2a4] sm:$0xf]  ;;  %v11616_v21 = vor.u32 %v14253_v49, %v11613_v61  ;;  %v7748_v49 = vadd.f32 %v7747_v2, %v15610_v44 }
 0x3e4   :  { %v11675_v50 = vld [vmem:[#allocation8 + $0x1020] sm:$0xf]  ;;  %v13340_v13 = vor.u32 %v14693_v8, %v13339_v7  ;;  %7977 = vmatpush.bf16.msrb.mxu2 %v12828_v23  ;;  %v10461_v7 = vld [vmem:[#allocation8 + $0x6e0] sm:$0xf0]  ;;  %v9114_v8 = vmul.f32 %v15612_v56, %v9113_v16  ;;  %v9952_v23 = vor.u32 %v13837_v25, %v9949_v10  ;;  %v7760_v16 = vpop.f32.mrf.mxu1 }
 0x3e5   :  { %v14277_v60 = vld [vmem:[#allocation8 + $0x105c] sm:$0xf0]  ;;  %v10973_v46 = vld [vmem:[#allocation8 + $0xae0] sm:$0xf0] }
 0x3e6   :  { %v12187_v12 = vld [vmem:[#allocation8 + $0x1420] sm:$0xf]  ;;  %v11676_v37 = vor.u32 %v14277_v60, %v11675_v50  ;;  %7990 = vmatpush.bf16.msrb.mxu3 %v13340_v13  ;;  %v7723_v50 = vpop.f32.mrf.mxu2  ;;  %v11104_v60 = vor.u32 %v14125_v27, %v11101_v17  ;;  %v9115_v13 = vmul.f32 0.5, %v9114_v8  ;;  %v14221_v54 = vld [vmem:[#allocation8 + $0xea4] sm:$0xf] }
 0x3e7   :  { %v14405_v22 = vld [vmem:[#allocation8 + $0x145c] sm:$0xf0]  ;;  %v14077_v61 = vld [vmem:[#allocation8 + $0xa24] sm:$0xf] }
 0x3e8   :  { %v12763_v20 = vld [vmem:[#allocation8 + $0x18a0] sm:$0xf]  ;;  %v12188_v55 = vor.u32 %v14405_v22, %v12187_v12  ;;  %7953 = vmatpush.bf16.msrb.mxu0 %v11676_v37  ;;  %v14109_v12 = vld [vmem:[#allocation8 + $0xb24] sm:$0xf]  ;;  %v9107_v22 = vmul.f32 %v15593_v5, %v9106_v9  ;;  %v10464_v37 = vor.u32 %v13965_v34, %v10461_v7  ;;  %v11552_v9 = vor.u32 %v14237_v19, %v11549_v28 }
 0x3e9   :  { %v14549_v29 = vld [vmem:[#allocation8 + $0x18dc] sm:$0xf0]  ;;  %v11421_v10 = vld [vmem:[#allocation8 + $0xe60] sm:$0xf0]  ;;  %v15644_v7 = vadd.f32 %v7760_v16, %v7748_v49 }
 0x3ea   :  { %v13275_v48 = vld [vmem:[#allocation8 + $0x1ca0] sm:$0xf]  ;;  %v12764_v36 = vor.u32 %v14549_v29, %v12763_v20  ;;  %7966 = vmatpush.bf16.msrb.mxu1 %v12188_v55  ;;  %v13821_v20 = vld [vmem:[#allocation8 + $0x224] sm:$0xf]  ;;  %v9111_v57 = vsel %vm15624_vm9, %v15593_v5, %v9107_v22 }
 0x3eb   :  { %v14677_v15 = vld [vmem:[#allocation8 + $0x1cdc] sm:$0xf0]  ;;  %7954 = vmatmul.bf16.vlgmr.msrb.gmra.mxu0 %v15280_v43  ;;  %v9885_v29 = vld [vmem:[#allocation8 + $0x260] sm:$0xf0]  ;;  %v9242_v1 = vmul.f32 %v9226_v38, %v9111_v57 }
 0x3ec   :  { %v12699_v40 = vld [vmem:[#allocation8 + $0x1820] sm:$0xf]  ;;  %v13276_v47 = vor.u32 %v14677_v15, %v13275_v48  ;;  %7998 = vmatpush.bf16.msra.mxu0 %v10080_v33  ;;  %7978 = vmatpush.bf16.msrb.mxu2 %v12764_v36  ;;  %v9116_v33 = vsub.f32 1.5, %v9115_v13  ;;  %v11040_v48 = vor.u32 %v14109_v12, %v11037_v41  ;;  %v14093_v15 = vld [vmem:[#allocation8 + $0xaa4] sm:$0xf] }
 0x3ed   :  { %v14533_v62 = vld [vmem:[#allocation8 + $0x185c] sm:$0xf0]  ;;  %7967 = vmatmul.bf16.vlgmr.msrb.gmra.mxu1 %v15290_v14  ;;  %v11485_v36 = vld [vmem:[#allocation8 + $0xee0] sm:$0xf0]  ;;  %v9258_v44 = vmax.f32 %v9242_v1, 0.0 }
 0x3ee   :  { %v13211_v42 = vld [vmem:[#allocation8 + $0x1c20] sm:$0xf]  ;;  %8011 = vmatpush.bf16.msra.mxu1 %v10592_v6  ;;  %v12700_v51 = vor.u32 %v14533_v62, %v12699_v40  ;;  %7991 = vmatpush.bf16.msrb.mxu3 %v13276_v47  ;;  %v9888_v6 = vor.u32 %v13821_v20, %v9885_v29  ;;  %v9117_v18 = vmul.f32 %v15612_v56, %v9116_v33  ;;  %v13805_v47 = vld [vmem:[#allocation8 + $0x1a4] sm:$0xf]  ;;  %v7762_v33 = vpop.f32.mrf.mxu1 }
 0x3ef   :  { %v14661_v52 = vld [vmem:[#allocation8 + $0x1c5c] sm:$0xf0]  ;;  %v10400_v40 = vor.u32 %v13949_v35, %v10397_v32  ;;  %v9821_v5 = vld [vmem:[#allocation8 + $0x1e0] sm:$0xf0]  ;;  %v9227_v62 = vsub.f32 %v15580_v63, %v15599_v26  ;;  %v11488_v27 = vor.u32 %v14221_v54, %v11485_v36  ;;  %v7749_v35 = vpop.f32.mrf.mxu0 }
 0x3f0   :  { %v13212_v39 = vor.u32 %v14661_v52, %v13211_v42  ;;  %7999 = vmatpush.bf16.msra.mxu0 %v10016_v4  ;;  %7979 = vmatpush.bf16.msrb.mxu2 %v12700_v51  ;;  %v13933_v42 = vld [vmem:[#allocation8 + $0x5a4] sm:$0xf]  ;;  %v9121_v52 = vsel %vm9120_vm12, %v15612_v56, %v9117_v18  ;;  %v10976_v4 = vor.u32 %v14093_v15, %v10973_v46 }
 0x3f1   :  { %v9243_v17 = vmul.f32 %v9227_v62, %v9121_v52  ;;  %v10909_v63 = vld [vmem:[#allocation8 + $0xa60] sm:$0xf0]  ;;  %v10336_v25 = vor.u32 %v13933_v42, %v10333_v53  ;;  %v7773_v53 = vpop.f32.mrf.mxu2 }
 0x3f2   :  { %8012 = vmatpush.bf16.msra.mxu1 %v10528_v3  ;;  %7992 = vmatpush.bf16.msrb.mxu3 %v13212_v39  ;;  %v9824_v3 = vor.u32 %v13805_v47, %v9821_v5  ;;  %v14205_v26 = vld [vmem:[#allocation8 + $0xe24] sm:$0xf]  ;;  %v10912_v39 = vor.u32 %v14077_v61, %v10909_v63 }
 0x3f3   :  { %7980 = vmatmul.bf16.vlgmr.msrb.gmra.mxu2 %v15309_v11  ;;  %v13789_v51 = vld [vmem:[#allocation8 + $0x124] sm:$0xf]  ;;  %v9259_v56 = vmax.f32 %v9243_v17, 0.0  ;;  %v11424_v22 = vor.u32 %v14205_v26, %v11421_v10 }
 0x3f4   :  { %8024 = vmatpush.bf16.msra.mxu2 %v11104_v60  ;;  %8000 = vmatpush.bf16.msra.mxu0 %v9952_v23  ;;  %v9757_v34 = vld [vmem:[#allocation8 + $0x160] sm:$0xf0] }
 0x3f5   :  { %7993 = vmatmul.bf16.vlgmr.msrb.gmra.mxu3 %v15318_v24  ;;  %v13917_v8 = vld [vmem:[#allocation8 + $0x524] sm:$0xf]  ;;  %v9288_v12 = vrot.slane %v9259_v56, 4  ;;  %v9760_v30 = vor.u32 %v13789_v51, %v9757_v34 }
 0x3f6   :  { %8037 = vmatpush.bf16.msra.mxu3 %v11616_v21  ;;  %8013 = vmatpush.bf16.msra.mxu1 %v10464_v37  ;;  %v10269_v50 = vld [vmem:[#allocation8 + $0x560] sm:$0xf0] }
 0x3f7   :  { %v14061_v60 = vld [vmem:[#allocation8 + $0x9a4] sm:$0xf]  ;;  %v10272_v41 = vor.u32 %v13917_v8, %v10269_v50  ;;  %v9296_v37 = vsel %vm601_vm0, %v9258_v44, %v9288_v12 }
 0x3f8   :  { %8025 = vmatpush.bf16.msra.mxu2 %v11040_v48  ;;  %8001 = vmatpush.bf16.msra.mxu0 %v9888_v6  ;;  %v10845_v21 = vld [vmem:[#allocation8 + $0x9e0] sm:$0xf0]  ;;  %9312 = vst [vmem:[#allocation11 + $0x10] sm:$0xff] %v9296_v37 }
 0x3f9   :  { %v14189_v23 = vld [vmem:[#allocation8 + $0xda4] sm:$0xf]  ;;  %v10848_v32 = vor.u32 %v14061_v60, %v10845_v21 }
 0x3fa   :  { %8038 = vmatpush.bf16.msra.mxu3 %v11552_v9  ;;  %8014 = vmatpush.bf16.msra.mxu1 %v10400_v40  ;;  %v11357_v19 = vld [vmem:[#allocation8 + $0xde0] sm:$0xf0] }
 0x3fb   :  { %v13773_v28 = vld [vmem:[#allocation8 + $0xa4] sm:$0xf]  ;;  %v11360_v48 = vor.u32 %v14189_v23, %v11357_v19 }
 0x3fc   :  { %8026 = vmatpush.bf16.msra.mxu2 %v10976_v4  ;;  %8002 = vmatpush.bf16.msra.mxu0 %v9824_v3  ;;  %v9693_v13 = vld [vmem:[#allocation8 + $0xe0] sm:$0xf0] }
 0x3fd   :  { %v13901_v20 = vld [vmem:[#allocation8 + $0x4a4] sm:$0xf]  ;;  %v9696_v15 = vor.u32 %v13773_v28, %v9693_v13 }
 0x3fe   :  { %8039 = vmatpush.bf16.msra.mxu3 %v11488_v27  ;;  %8015 = vmatpush.bf16.msra.mxu1 %v10336_v25  ;;  %v10205_v29 = vld [vmem:[#allocation8 + $0x4e0] sm:$0xf0]  ;;  %v7786_v27 = vpop.f32.mrf.mxu3 }
 0x3ff   :  { %v14045_v55 = vld [vmem:[#allocation8 + $0x924] sm:$0xf]  ;;  %v10208_v46 = vor.u32 %v13901_v20, %v10205_v29  ;;  %v7775_v20 = vpop.f32.mrf.mxu2 }
 0x400   :  { %8027 = vmatpush.bf16.msra.mxu2 %v10912_v39  ;;  %8003 = vmatpush.bf16.msra.mxu0 %v9760_v30  ;;  %v10781_v57 = vld [vmem:[#allocation8 + $0x960] sm:$0xf0]  ;;  %v7774_v30 = vadd.f32 %v7773_v53, %v15644_v7 }
 0x401   :  { %v14173_v9 = vld [vmem:[#allocation8 + $0xd24] sm:$0xf]  ;;  %v10784_v5 = vor.u32 %v14045_v55, %v10781_v57 }
 0x402   :  { %8040 = vmatpush.bf16.msra.mxu3 %v11424_v22  ;;  %v11293_v6 = vld [vmem:[#allocation8 + $0xd60] sm:$0xf0]  ;;  %8016 = vmatpush.bf16.msra.mxu1 %v10272_v41  ;;  %v15650_v57 = vadd.f32 %v7786_v27, %v7774_v30 }
 0x403   :  { %v13757_v54 = vld [vmem:[#allocation8 + $0x24] sm:$0xf]  ;;  %v11296_v1 = vor.u32 %v14173_v9, %v11293_v6 }
 0x404   :  { %v9629_v36 = vld [vmem:[#allocation8 + $0x60] sm:$0xf0]  ;;  %8028 = vmatpush.bf16.msra.mxu2 %v10848_v32  ;;  %8004 = vmatpush.bf16.msra.mxu0 %v9696_v15 }
 0x405   :  { %v13885_v38 = vld [vmem:[#allocation8 + $0x424] sm:$0xf]  ;;  %v9632_v52 = vor.u32 %v13757_v54, %v9629_v36 }
 0x406   :  { %v10141_v18 = vld [vmem:[#allocation8 + $0x460] sm:$0xf0]  ;;  %8041 = vmatpush.bf16.msra.mxu3 %v11360_v48  ;;  %8017 = vmatpush.bf16.msra.mxu1 %v10208_v46  ;;  %v7788_v32 = vpop.f32.mrf.mxu3 }
 0x407   :  { %v14381_v40 = vld [vmem:[#allocation8 + $0x13a4] sm:$0xf]  ;;  %v10144_v17 = vor.u32 %v13885_v38, %v10141_v18 }
 0x408   :  { %v12125_v47 = vld [vmem:[#allocation8 + $0x13e0] sm:$0xf0]  ;;  %8029 = vmatpush.bf16.msra.mxu2 %v10784_v5  ;;  %8005 = vmatpush.bf16.msra.mxu0 %v9632_v52  ;;  %v8860_v52 = vmul.f32 %v15650_v57, %v15650_v57 }
 0x409   :  { %v14509_v62 = vld [vmem:[#allocation8 + $0x17a4] sm:$0xf]  ;;  %v12128_v49 = vor.u32 %v14381_v40, %v12125_v47 }
 0x40a   :  { %v12637_v42 = vld [vmem:[#allocation8 + $0x17e0] sm:$0xf0]  ;;  %8042 = vmatpush.bf16.msra.mxu3 %v11296_v1  ;;  %8018 = vmatpush.bf16.msra.mxu1 %v10144_v17  ;;  %v8768_v1 = vsel %vm601_vm0, %v15650_v57, 0.0 }
 0x40b   :  { %v14029_v2 = vld [vmem:[#allocation8 + $0x8a4] sm:$0xf]  ;;  %v12640_v61 = vor.u32 %v14509_v62, %v12637_v42  ;;  %8006 = vmatmul.bf16.vlgmr.msra.gmra.mxu0 %v15185_v45 }
 0x40c   :  { %v10717_v4 = vld [vmem:[#allocation8 + $0x8e0] sm:$0xf0]  ;;  %8050 = vmatpush.bf16.msrb.mxu0 %v12128_v49 }
 0x40d   :  { %v14157_v16 = vld [vmem:[#allocation8 + $0xca4] sm:$0xf]  ;;  %v10720_v25 = vor.u32 %v14029_v2, %v10717_v4  ;;  %8019 = vmatmul.bf16.vlgmr.msra.gmra.mxu1 %v15189_v58 }
 0x40e   :  { %v11229_v3 = vld [vmem:[#allocation8 + $0xce0] sm:$0xf0]  ;;  %8063 = vmatpush.bf16.msrb.mxu1 %v12640_v61 }
 0x40f   :  { %v14365_v63 = vld [vmem:[#allocation8 + $0x1324] sm:$0xf]  ;;  %v11232_v56 = vor.u32 %v14157_v16, %v11229_v3  ;;  %8030 = vmatpush.bf16.msra.mxu2 %v10720_v25  ;;  %v15658_v16 = vpop.f32.mrf.mxu0  ;;  %v15660_v25 = vpop.f32.mrf.mxu1 }
 0x410   :  { %v12061_v26 = vld [vmem:[#allocation8 + $0x1360] sm:$0xf0] }
 0x411   :  { %v14493_v10 = vld [vmem:[#allocation8 + $0x1724] sm:$0xf]  ;;  %v12064_v60 = vor.u32 %v14365_v63, %v12061_v26  ;;  %8043 = vmatpush.bf16.msra.mxu3 %v11232_v56  ;;  %v8769_v26 = vrot.slane %v8768_v1, 4 }
 0x412   :  { %v12573_v51 = vld [vmem:[#allocation8 + $0x1760] sm:$0xf0] }
 0x413   :  { %v14013_v34 = vld [vmem:[#allocation8 + $0x824] sm:$0xf]  ;;  %v12576_v21 = vor.u32 %v14493_v10, %v12573_v51  ;;  %8051 = vmatpush.bf16.msrb.mxu0 %v12064_v60 }
 0x414   :  { %v10653_v8 = vld [vmem:[#allocation8 + $0x860] sm:$0xf0] }
 0x415   :  { %v14141_v50 = vld [vmem:[#allocation8 + $0xc24] sm:$0xf]  ;;  %v10656_v28 = vor.u32 %v14013_v34, %v10653_v8  ;;  %8064 = vmatpush.bf16.msrb.mxu1 %v12576_v21  ;;  %v8912_v8 = vsel %vm601_vm0, %v8860_v52, 0.0  ;;  %v8770_v21 = vadd.f32 %v8769_v26, %v8768_v1  ;;  %v13878_v1 = vld [vmem:[#allocation8 + $0x3e4] sm:$0xf0] }
 0x416   :  { %v11165_v39 = vld [vmem:[#allocation8 + $0xc60] sm:$0xf0] }
 0x417   :  { %v14637_v44 = vld [vmem:[#allocation8 + $0x1ba4] sm:$0xf]  ;;  %v11168_v29 = vor.u32 %v14141_v50, %v11165_v39  ;;  %8031 = vmatpush.bf16.msra.mxu2 %v10656_v28 }
 0x418   :  { %v13149_v12 = vld [vmem:[#allocation8 + $0x1be0] sm:$0xf0] }
 0x419   :  { %v14765_v22 = vld [vmem:[#allocation8 + $0x1fa4] sm:$0xf]  ;;  %v13152_v35 = vor.u32 %v14637_v44, %v13149_v12  ;;  %8044 = vmatpush.bf16.msra.mxu3 %v11168_v29 }
 0x41a   :  { %v13661_v23 = vld [vmem:[#allocation8 + $0x1fe0] sm:$0xf0]  ;;  %8032 = vmatmul.bf16.vlgmr.msra.gmra.mxu2 %v15218_v59 }
 0x41b   :  { %v14349_v41 = vld [vmem:[#allocation8 + $0x12a4] sm:$0xf]  ;;  %v13664_v7 = vor.u32 %v14765_v22, %v13661_v23  ;;  %8076 = vmatpush.bf16.msrb.mxu2 %v13152_v35  ;;  %v8913_v23 = vrot.slane %v8912_v8, 4 }
 0x41c   :  { %v11997_v19 = vld [vmem:[#allocation8 + $0x12e0] sm:$0xf0]  ;;  %8045 = vmatmul.bf16.vlgmr.msra.gmra.mxu3 %v15235_v0 }
 0x41d   :  { %v14477_v13 = vld [vmem:[#allocation8 + $0x16a4] sm:$0xf]  ;;  %v12000_v55 = vor.u32 %v14349_v41, %v11997_v19  ;;  %8089 = vmatpush.bf16.msrb.mxu3 %v13664_v7 }
 0x41e   :  { %v12509_v37 = vld [vmem:[#allocation8 + $0x16e0] sm:$0xf0] }
 0x41f   :  { %v14621_v33 = vld [vmem:[#allocation8 + $0x1b24] sm:$0xf]  ;;  %v12512_v9 = vor.u32 %v14477_v13, %v12509_v37  ;;  %8052 = vmatpush.bf16.msrb.mxu0 %v12000_v55  ;;  %v7801_v55 = vpop.f32.mrf.mxu0 }
 0x420   :  { %v13085_v48 = vld [vmem:[#allocation8 + $0x1b60] sm:$0xf0]  ;;  %v9955_v55 = vld [vmem:[#allocation8 + $0x2a8] sm:$0xf] }
 0x421   :  { %v14749_v15 = vld [vmem:[#allocation8 + $0x1f24] sm:$0xf]  ;;  %v13088_v18 = vor.u32 %v14621_v33, %v13085_v48  ;;  %8065 = vmatpush.bf16.msrb.mxu1 %v12512_v9  ;;  %v8771_v9 = vrot.slane %v8770_v21, 2 }
 0x422   :  { %v13597_v6 = vld [vmem:[#allocation8 + $0x1f60] sm:$0xf0] }
 0x423   :  { %v14333_v46 = vld [vmem:[#allocation8 + $0x1224] sm:$0xf]  ;;  %v13600_v47 = vor.u32 %v14749_v15, %v13597_v6  ;;  %8077 = vmatpush.bf16.msrb.mxu2 %v13088_v18  ;;  %v8914_v6 = vadd.f32 %v8913_v23, %v8912_v8 }
 0x424   :  { %v11933_v54 = vld [vmem:[#allocation8 + $0x1260] sm:$0xf0] }
 0x425   :  { %v14461_v36 = vld [vmem:[#allocation8 + $0x1624] sm:$0xf]  ;;  %v11936_v5 = vor.u32 %v14333_v46, %v11933_v54  ;;  %8090 = vmatpush.bf16.msrb.mxu3 %v13600_v47  ;;  %v7814_v46 = vpop.f32.mrf.mxu1 }
 0x426   :  { %v12445_v38 = vld [vmem:[#allocation8 + $0x1660] sm:$0xf0] }
 0x427   :  { %v14605_v40 = vld [vmem:[#allocation8 + $0x1aa4] sm:$0xf]  ;;  %v12448_v2 = vor.u32 %v14461_v36, %v12445_v38  ;;  %8053 = vmatpush.bf16.msrb.mxu0 %v11936_v5 }
 0x428   :  { %v13021_v62 = vld [vmem:[#allocation8 + $0x1ae0] sm:$0xf0] }
 0x429   :  { %v14733_v42 = vld [vmem:[#allocation8 + $0x1ea4] sm:$0xf]  ;;  %v13024_v3 = vor.u32 %v14605_v40, %v13021_v62  ;;  %8066 = vmatpush.bf16.msrb.mxu1 %v12448_v2  ;;  %v10595_v2 = vld [vmem:[#allocation8 + $0x7a8] sm:$0xf] }
 0x42a   :  { %v13533_v53 = vld [vmem:[#allocation8 + $0x1ee0] sm:$0xf0] }
 0x42b   :  { %v14317_v4 = vld [vmem:[#allocation8 + $0x11a4] sm:$0xf]  ;;  %v13536_v10 = vor.u32 %v14733_v42, %v13533_v53  ;;  %8078 = vmatpush.bf16.msrb.mxu2 %v13024_v3  ;;  %v10083_v53 = vld [vmem:[#allocation8 + $0x3a8] sm:$0xf] }
 0x42c   :  { %v11869_v27 = vld [vmem:[#allocation8 + $0x11e0] sm:$0xf0] }
 0x42d   :  { %v14445_v17 = vld [vmem:[#allocation8 + $0x15a4] sm:$0xf]  ;;  %v11872_v51 = vor.u32 %v14317_v4, %v11869_v27  ;;  %8091 = vmatpush.bf16.msrb.mxu3 %v13536_v10  ;;  %v14006_v4 = vld [vmem:[#allocation8 + $0x7e4] sm:$0xf0]  ;;  %v8772_v27 = vadd.f32 %v8771_v9, %v8770_v21  ;;  %v15665_v10 = vpop.f32.mrf.mxu3 }
 0x42e   :  { %v12381_v49 = vld [vmem:[#allocation8 + $0x15e0] sm:$0xf0]  ;;  %v10467_v9 = vld [vmem:[#allocation8 + $0x6a8] sm:$0xf] }
 0x42f   :  { %v14589_v61 = vld [vmem:[#allocation8 + $0x1a24] sm:$0xf]  ;;  %v12384_v50 = vor.u32 %v14445_v17, %v12381_v49  ;;  %8054 = vmatpush.bf16.msrb.mxu0 %v11872_v51  ;;  %v8915_v17 = vrot.slane %v8914_v6, 2  ;;  %v15663_v49 = vpop.f32.mrf.mxu2  ;;  %v8773_v23 = vrot.slane %v8772_v27, 1 }
 0x430   :  { %v12957_v63 = vld [vmem:[#allocation8 + $0x1a60] sm:$0xf0] }
 0x431   :  { %v14717_v34 = vld [vmem:[#allocation8 + $0x1e24] sm:$0xf]  ;;  %v12960_v22 = vor.u32 %v14589_v61, %v12957_v63  ;;  %8067 = vmatpush.bf16.msrb.mxu1 %v12384_v50  ;;  %v10596_v50 = vor.u32 %v14006_v4, %v10595_v2  ;;  %v8774_v46 = vadd.f32 %v8773_v23, %v8772_v27  ;;  %v13830_v2 = vld [vmem:[#allocation8 + $0x264] sm:$0xf0]  ;;  %v7851_v23 = vpop.f32.mrf.mxu0 }
 0x432   :  { %v13469_v56 = vld [vmem:[#allocation8 + $0x1e60] sm:$0xf0]  ;;  %v10403_v4 = vld [vmem:[#allocation8 + $0x628] sm:$0xf] }
 0x433   :  { %v14301_v39 = vld [vmem:[#allocation8 + $0x1124] sm:$0xf]  ;;  %v13472_v41 = vor.u32 %v14717_v34, %v13469_v56  ;;  %8079 = vmatpush.bf16.msrb.mxu2 %v12960_v22  ;;  %v10084_v34 = vor.u32 %v13878_v1, %v10083_v53  ;;  %v13990_v22 = vld [vmem:[#allocation8 + $0x764] sm:$0xf0] }
 0x434   :  { %v11805_v60 = vld [vmem:[#allocation8 + $0x1160] sm:$0xf0]  ;;  %v14246_v1 = vld [vmem:[#allocation8 + $0xf64] sm:$0xf0] }
 0x435   :  { %v14429_v44 = vld [vmem:[#allocation8 + $0x1524] sm:$0xf]  ;;  %v11808_v19 = vor.u32 %v14301_v39, %v11805_v60  ;;  %8092 = vmatpush.bf16.msrb.mxu3 %v13472_v41  ;;  %v10019_v39 = vld [vmem:[#allocation8 + $0x328] sm:$0xf]  ;;  %v8916_v41 = vadd.f32 %v8915_v17, %v8914_v6  ;;  %v15670_v17 = vmul.f32 0.25, %v8774_v46 }
 0x436   :  { %v12317_v12 = vld [vmem:[#allocation8 + $0x1560] sm:$0xf0]  ;;  %v13862_v60 = vld [vmem:[#allocation8 + $0x364] sm:$0xf0] }
 0x437   :  { %v14573_v30 = vld [vmem:[#allocation8 + $0x19a4] sm:$0xf]  ;;  %v12320_v37 = vor.u32 %v14429_v44, %v12317_v12  ;;  %8055 = vmatpush.bf16.msrb.mxu0 %v11808_v19  ;;  %v10531_v44 = vld [vmem:[#allocation8 + $0x728] sm:$0xf] }
 0x438   :  { %v12893_v28 = vld [vmem:[#allocation8 + $0x19e0] sm:$0xf0]  ;;  %v13974_v6 = vld [vmem:[#allocation8 + $0x6e4] sm:$0xf0] }
 0x439   :  { %v14701_v13 = vld [vmem:[#allocation8 + $0x1da4] sm:$0xf]  ;;  %v12896_v33 = vor.u32 %v14573_v30, %v12893_v28  ;;  %8068 = vmatpush.bf16.msrb.mxu1 %v12320_v37  ;;  %v10020_v37 = vor.u32 %v13862_v60, %v10019_v39  ;;  %v10468_v53 = vor.u32 %v13974_v6, %v10467_v9  ;;  %v13958_v27 = vld [vmem:[#allocation8 + $0x664] sm:$0xf0] }
 0x43a   :  { %v13405_v20 = vld [vmem:[#allocation8 + $0x1de0] sm:$0xf0]  ;;  %v14230_v39 = vld [vmem:[#allocation8 + $0xee4] sm:$0xf0] }
 0x43b   :  { %v14285_v29 = vld [vmem:[#allocation8 + $0x10a4] sm:$0xf]  ;;  %v13408_v54 = vor.u32 %v14701_v13, %v13405_v20  ;;  %8080 = vmatpush.bf16.msrb.mxu2 %v12896_v33  ;;  %v11107_v20 = vld [vmem:[#allocation8 + $0xba8] sm:$0xf] }
 0x43c   :  { %v11741_v35 = vld [vmem:[#allocation8 + $0x10e0] sm:$0xf0]  ;;  %v13846_v33 = vld [vmem:[#allocation8 + $0x2e4] sm:$0xf0] }
 0x43d   :  { %v14413_v32 = vld [vmem:[#allocation8 + $0x14a4] sm:$0xf]  ;;  %v11744_v36 = vor.u32 %v14285_v29, %v11741_v35  ;;  %8093 = vmatpush.bf16.msrb.mxu3 %v13408_v54  ;;  %v14134_v29 = vld [vmem:[#allocation8 + $0xbe4] sm:$0xf0]  ;;  %v8917_v54 = vrot.slane %v8916_v41, 1 }
 0x43e   :  { %v12253_v7 = vld [vmem:[#allocation8 + $0x14e0] sm:$0xf0]  ;;  %v11619_v35 = vld [vmem:[#allocation8 + $0xfa8] sm:$0xf] }
 0x43f   :  { %v14557_v48 = vld [vmem:[#allocation8 + $0x1924] sm:$0xf]  ;;  %v12256_v40 = vor.u32 %v14413_v32, %v12253_v7  ;;  %8056 = vmatpush.bf16.msrb.mxu0 %v11744_v36  ;;  %v10532_v32 = vor.u32 %v13990_v22, %v10531_v44  ;;  %v14262_v7 = vld [vmem:[#allocation8 + $0xfe4] sm:$0xf0]  ;;  %v7827_v36 = vpop.f32.mrf.mxu2 }
 0x440   :  { %v12829_v15 = vld [vmem:[#allocation8 + $0x1960] sm:$0xf0]  ;;  %v9827_v60 = vld [vmem:[#allocation8 + $0x1a8] sm:$0xf] }
 0x441   :  { %v14685_v38 = vld [vmem:[#allocation8 + $0x1d24] sm:$0xf]  ;;  %v12832_v52 = vor.u32 %v14557_v48, %v12829_v15  ;;  %8069 = vmatpush.bf16.msrb.mxu1 %v12256_v40  ;;  %v1917_v48 = vperm.slane %v15590_v31, 7  ;;  %v7840_v40 = vpop.f32.mrf.mxu3  ;;  %v14118_v31 = vld [vmem:[#allocation8 + $0xb64] sm:$0xf0] }
 0x442   :  { %v13341_v18 = vld [vmem:[#allocation8 + $0x1d60] sm:$0xf0]  ;;  %v13814_v44 = vld [vmem:[#allocation8 + $0x1e4] sm:$0xf0] }
 0x443   :  { %v14269_v47 = vld [vmem:[#allocation8 + $0x1024] sm:$0xf]  ;;  %v13344_v3 = vor.u32 %v14685_v38, %v13341_v18  ;;  %8081 = vmatpush.bf16.msrb.mxu2 %v12832_v52  ;;  %v11108_v18 = vor.u32 %v14134_v29, %v11107_v20  ;;  %v9891_v52 = vld [vmem:[#allocation8 + $0x228] sm:$0xf] }
 0x444   :  { %v11677_v5 = vld [vmem:[#allocation8 + $0x1060] sm:$0xf0]  ;;  %v14086_v20 = vld [vmem:[#allocation8 + $0xa64] sm:$0xf0] }
 0x445   :  { %v14397_v62 = vld [vmem:[#allocation8 + $0x1424] sm:$0xf]  ;;  %v11680_v61 = vor.u32 %v14269_v47, %v11677_v5  ;;  %8094 = vmatpush.bf16.msrb.mxu3 %v13344_v3  ;;  %v11620_v47 = vor.u32 %v14262_v7, %v11619_v35  ;;  %v9956_v5 = vor.u32 %v13846_v33, %v9955_v55  ;;  %v8918_v3 = vadd.f32 %v8917_v54, %v8916_v41  ;;  %v11427_v29 = vld [vmem:[#allocation8 + $0xe28] sm:$0xf] }
 0x446   :  { %v12189_v42 = vld [vmem:[#allocation8 + $0x1460] sm:$0xf0]  ;;  %v14214_v7 = vld [vmem:[#allocation8 + $0xe64] sm:$0xf0] }
 0x447   :  { %v14541_v63 = vld [vmem:[#allocation8 + $0x18a4] sm:$0xf]  ;;  %v12192_v51 = vor.u32 %v14397_v62, %v12189_v42  ;;  %8057 = vmatpush.bf16.msrb.mxu0 %v11680_v61  ;;  %v11043_v62 = vld [vmem:[#allocation8 + $0xb28] sm:$0xf]  ;;  %v7800_v61 = vadd.f32 %v15658_v16, %v1917_v48  ;;  %v8988_v22 = vmul.f32 0.25, %v8918_v3  ;;  %v11428_v6 = vor.u32 %v14214_v7, %v11427_v29 }
 0x448   :  { %v12765_v26 = vld [vmem:[#allocation8 + $0x18e0] sm:$0xf0]  ;;  %v11555_v42 = vld [vmem:[#allocation8 + $0xf28] sm:$0xf] }
 0x449   :  { %v14669_v56 = vld [vmem:[#allocation8 + $0x1ca4] sm:$0xf]  ;;  %v12768_v12 = vor.u32 %v14541_v63, %v12765_v26  ;;  %8070 = vmatpush.bf16.msrb.mxu1 %v12192_v51  ;;  %v11044_v63 = vor.u32 %v14118_v31, %v11043_v62  ;;  %v11556_v26 = vor.u32 %v14246_v1, %v11555_v42  ;;  %v9892_v51 = vor.u32 %v13830_v2, %v9891_v52  ;;  %v10339_v16 = vld [vmem:[#allocation8 + $0x5a8] sm:$0xf]  ;;  %v7853_v1 = vpop.f32.mrf.mxu0 }
 0x44a   :  { %v13277_v8 = vld [vmem:[#allocation8 + $0x1ce0] sm:$0xf0]  ;;  %8058 = vmatmul.bf16.vlgmr.msrb.gmra.mxu0 %v15280_v43  ;;  %v9763_v55 = vld [vmem:[#allocation8 + $0x128] sm:$0xf] }
 0x44b   :  { %v14525_v30 = vld [vmem:[#allocation8 + $0x1824] sm:$0xf]  ;;  %v13280_v19 = vor.u32 %v14669_v56, %v13277_v8  ;;  %8102 = vmatpush.bf16.msra.mxu0 %v10084_v34  ;;  %8082 = vmatpush.bf16.msrb.mxu2 %v12768_v12  ;;  %v10979_v34 = vld [vmem:[#allocation8 + $0xaa8] sm:$0xf] }
 0x44c   :  { %v12701_v21 = vld [vmem:[#allocation8 + $0x1860] sm:$0xf0]  ;;  %8071 = vmatmul.bf16.vlgmr.msrb.gmra.mxu1 %v15290_v14  ;;  %v14102_v56 = vld [vmem:[#allocation8 + $0xae4] sm:$0xf0] }
 0x44d   :  { %v14653_v28 = vld [vmem:[#allocation8 + $0x1c24] sm:$0xf]  ;;  %8115 = vmatpush.bf16.msra.mxu1 %v10596_v50  ;;  %v12704_v15 = vor.u32 %v14525_v30, %v12701_v21  ;;  %8095 = vmatpush.bf16.msrb.mxu3 %v13280_v19  ;;  %v11491_v8 = vld [vmem:[#allocation8 + $0xea8] sm:$0xf]  ;;  %v10404_v50 = vor.u32 %v13958_v27, %v10403_v4  ;;  %v9004_v30 = vmul.f32 %v15670_v17, %v15670_v17  ;;  %v7864_v19 = vpop.f32.mrf.mxu1 }
 0x44e   :  { %v13213_v13 = vld [vmem:[#allocation8 + $0x1c60] sm:$0xf0]  ;;  %v13942_v12 = vld [vmem:[#allocation8 + $0x5e4] sm:$0xf0]  ;;  %v7813_v21 = vadd.f32 %v15660_v25, %v7800_v61  ;;  %v10980_v41 = vor.u32 %v14102_v56, %v10979_v34 }
 0x44f   :  { %v13216_v38 = vor.u32 %v14653_v28, %v13213_v13  ;;  %8103 = vmatpush.bf16.msra.mxu0 %v10020_v37  ;;  %8083 = vmatpush.bf16.msrb.mxu2 %v12704_v15  ;;  %v11492_v28 = vor.u32 %v14230_v39, %v11491_v8  ;;  %v9828_v13 = vor.u32 %v13814_v44, %v9827_v60  ;;  %v10915_v37 = vld [vmem:[#allocation8 + $0xa28] sm:$0xf] }
 0x450   :  { %v7826_v35 = vadd.f32 %v15663_v49, %v7813_v21  ;;  %v13798_v33 = vld [vmem:[#allocation8 + $0x164] sm:$0xf0]  ;;  %v9020_v15 = vsub.f32 %v8988_v22, %v9004_v30  ;;  %v10916_v9 = vor.u32 %v14086_v20, %v10915_v37  ;;  %v7877_v30 = vpop.f32.mrf.mxu2  ;;  %v7890_v37 = vpop.f32.mrf.mxu3 }
 0x451   :  { %8116 = vmatpush.bf16.msra.mxu1 %v10532_v32  ;;  %8096 = vmatpush.bf16.msrb.mxu3 %v13216_v38  ;;  %v10340_v32 = vor.u32 %v13942_v12, %v10339_v16  ;;  %v10275_v48 = vld [vmem:[#allocation8 + $0x528] sm:$0xf]  ;;  %v9764_v46 = vor.u32 %v13798_v33, %v9763_v55 }
 0x452   :  { %8084 = vmatmul.bf16.vlgmr.msrb.gmra.mxu2 %v15309_v11  ;;  %v13926_v25 = vld [vmem:[#allocation8 + $0x564] sm:$0xf0]  ;;  %v9036_v42 = vmax.f32 %v9020_v15, 0.0 }
 0x453   :  { %8128 = vmatpush.bf16.msra.mxu2 %v11108_v18  ;;  %8104 = vmatpush.bf16.msra.mxu0 %v9956_v5  ;;  %v10851_v54 = vld [vmem:[#allocation8 + $0x9a8] sm:$0xf]  ;;  %v7839_v18 = vadd.f32 %v15665_v10, %v7826_v35  ;;  %v10276_v49 = vor.u32 %v13926_v25, %v10275_v48 }
 0x454   :  { %8097 = vmatmul.bf16.vlgmr.msrb.gmra.mxu3 %v15318_v24  ;;  %v14070_v36 = vld [vmem:[#allocation8 + $0x9e4] sm:$0xf0]  ;;  %v15680_v22 = vadd.f32 1e-05, %v9036_v42 }
 0x455   :  { %8141 = vmatpush.bf16.msra.mxu3 %v11620_v47  ;;  %8117 = vmatpush.bf16.msra.mxu1 %v10468_v53  ;;  %v11363_v38 = vld [vmem:[#allocation8 + $0xda8] sm:$0xf]  ;;  %v7852_v53 = vadd.f32 %v7851_v23, %v7839_v18  ;;  %v10852_v52 = vor.u32 %v14070_v36, %v10851_v54  ;;  %v7866_v4 = vpop.f32.mrf.mxu1 }
 0x456   :  { %v14198_v40 = vld [vmem:[#allocation8 + $0xde4] sm:$0xf0]  ;;  %14815 = vrsqrt.f32 %v15680_v22  ;;  %vm9128_vm14 = vweird.f32 %v15680_v22 }
 0x457   :  { %8129 = vmatpush.bf16.msra.mxu2 %v11044_v63  ;;  %8105 = vmatpush.bf16.msra.mxu0 %v9892_v51  ;;  %v9699_v47 = vld [vmem:[#allocation8 + $0xa8] sm:$0xf]  ;;  %v11364_v27 = vor.u32 %v14198_v40, %v11363_v38  ;;  %v7865_v60 = vadd.f32 %v7864_v19, %v7852_v53 }
 0x458   :  { %v13782_v5 = vld [vmem:[#allocation8 + $0xe4] sm:$0xf0] }
 0x459   :  { %8142 = vmatpush.bf16.msra.mxu3 %v11556_v26  ;;  %8118 = vmatpush.bf16.msra.mxu1 %v10404_v50  ;;  %v10211_v62 = vld [vmem:[#allocation8 + $0x4a8] sm:$0xf]  ;;  %v9700_v3 = vor.u32 %v13782_v5, %v9699_v47 }
 0x45a   :  { %v13910_v31 = vld [vmem:[#allocation8 + $0x4e4] sm:$0xf0] }
 0x45b   :  { %8130 = vmatpush.bf16.msra.mxu2 %v10980_v41  ;;  %8106 = vmatpush.bf16.msra.mxu0 %v9828_v13  ;;  %v10787_v2 = vld [vmem:[#allocation8 + $0x928] sm:$0xf]  ;;  %v10212_v26 = vor.u32 %v13910_v31, %v10211_v62  ;;  %v7878_v13 = vadd.f32 %v7877_v30, %v7865_v60 }
 0x45c   :  { %v14054_v61 = vld [vmem:[#allocation8 + $0x964] sm:$0xf0] }
 0x45d   :  { %8143 = vmatpush.bf16.msra.mxu3 %v11492_v28  ;;  %8119 = vmatpush.bf16.msra.mxu1 %v10340_v32  ;;  %v11299_v10 = vld [vmem:[#allocation8 + $0xd28] sm:$0xf]  ;;  %v10788_v44 = vor.u32 %v14054_v61, %v10787_v2  ;;  %v15682_v25 = vadd.f32 %v7890_v37, %v7878_v13 }
 0x45e   :  { %v14182_v63 = vld [vmem:[#allocation8 + $0xd64] sm:$0xf0] }
 0x45f   :  { %8131 = vmatpush.bf16.msra.mxu2 %v10916_v9  ;;  %8107 = vmatpush.bf16.msra.mxu0 %v9764_v46  ;;  %v9635_v51 = vld [vmem:[#allocation8 + $0x28] sm:$0xf]  ;;  %v11300_v21 = vor.u32 %v14182_v63, %v11299_v10  ;;  %v8861_v40 = vmul.f32 %v15682_v25, %v15682_v25  ;;  %v7879_v10 = vpop.f32.mrf.mxu2 }
 0x460   :  { %v13766_v34 = vld [vmem:[#allocation8 + $0x64] sm:$0xf0] }
 0x461   :  { %8144 = vmatpush.bf16.msra.mxu3 %v11428_v6  ;;  %8120 = vmatpush.bf16.msra.mxu1 %v10276_v49  ;;  %v10147_v56 = vld [vmem:[#allocation8 + $0x428] sm:$0xf]  ;;  %v9636_v23 = vor.u32 %v13766_v34, %v9635_v51  ;;  %v8775_v49 = vsel %vm601_vm0, %v15682_v25, 0.0 }
 0x462   :  { %v13894_v8 = vld [vmem:[#allocation8 + $0x464] sm:$0xf0]  ;;  %v8776_v31 = vrot.slane %v8775_v49, 4 }
 0x463   :  { %v12131_v50 = vld [vmem:[#allocation8 + $0x13a8] sm:$0xf]  ;;  %8132 = vmatpush.bf16.msra.mxu2 %v10852_v52  ;;  %8108 = vmatpush.bf16.msra.mxu0 %v9700_v3  ;;  %v10148_v20 = vor.u32 %v13894_v8, %v10147_v56  ;;  %v8919_v52 = vsel %vm601_vm0, %v8861_v40, 0.0  ;;  %v7892_v56 = vpop.f32.mrf.mxu3 }
 0x464   :  { %v14390_v39 = vld [vmem:[#allocation8 + $0x13e4] sm:$0xf0]  ;;  %v8777_v3 = vadd.f32 %v8776_v31, %v8775_v49  ;;  %v8920_v61 = vrot.slane %v8919_v52, 4 }
 0x465   :  { %v12643_v16 = vld [vmem:[#allocation8 + $0x17a8] sm:$0xf]  ;;  %8145 = vmatpush.bf16.msra.mxu3 %v11364_v27  ;;  %8121 = vmatpush.bf16.msra.mxu1 %v10212_v26  ;;  %v12132_v29 = vor.u32 %v14390_v39, %v12131_v50 }
 0x466   :  { %v14518_v12 = vld [vmem:[#allocation8 + $0x17e4] sm:$0xf0] }
 0x467   :  { %v10723_v41 = vld [vmem:[#allocation8 + $0x8a8] sm:$0xf]  ;;  %v12644_v7 = vor.u32 %v14518_v12, %v12643_v16  ;;  %8133 = vmatpush.bf16.msra.mxu2 %v10788_v44  ;;  %8109 = vmatpush.bf16.msra.mxu0 %v9636_v23  ;;  %v8778_v16 = vrot.slane %v8777_v3, 2  ;;  %v8921_v12 = vadd.f32 %v8920_v61, %v8919_v52 }
 0x468   :  { %v14038_v28 = vld [vmem:[#allocation8 + $0x8e4] sm:$0xf0] }
 0x469   :  { %v11235_v35 = vld [vmem:[#allocation8 + $0xca8] sm:$0xf]  ;;  %v10724_v15 = vor.u32 %v14038_v28, %v10723_v41  ;;  %8146 = vmatpush.bf16.msra.mxu3 %v11300_v21  ;;  %8122 = vmatpush.bf16.msra.mxu1 %v10148_v20  ;;  %v8779_v13 = vadd.f32 %v8778_v16, %v8777_v3  ;;  %v8922_v37 = vrot.slane %v8921_v12, 2 }
 0x46a   :  { %v14166_v19 = vld [vmem:[#allocation8 + $0xce4] sm:$0xf0]  ;;  %8110 = vmatmul.bf16.vlgmr.msra.gmra.mxu0 %v15185_v45 }
 0x46b   :  { %v12067_v32 = vld [vmem:[#allocation8 + $0x1328] sm:$0xf]  ;;  %v11236_v54 = vor.u32 %v14166_v19, %v11235_v35  ;;  %8154 = vmatpush.bf16.msrb.mxu0 %v12132_v29  ;;  %8134 = vmatpush.bf16.msra.mxu2 %v10724_v15  ;;  %v15695_v19 = vpop.eup %14815  ;;  %v8780_v15 = vrot.slane %v8779_v13, 1 }
 0x46c   :  { %v14374_v55 = vld [vmem:[#allocation8 + $0x1364] sm:$0xf0]  ;;  %8123 = vmatmul.bf16.vlgmr.msra.gmra.mxu1 %v15189_v58  ;;  %vm9129_vm13 = vweird.f32 %v15695_v19 }
 0x46d   :  { %v12579_v33 = vld [vmem:[#allocation8 + $0x1728] sm:$0xf]  ;;  %v12068_v47 = vor.u32 %v14374_v55, %v12067_v32  ;;  %8167 = vmatpush.bf16.msrb.mxu1 %v12644_v7  ;;  %8147 = vmatpush.bf16.msra.mxu3 %v11236_v54  ;;  %v8781_v49 = vadd.f32 %v8780_v15, %v8779_v13  ;;  %vm15726_vm15 = vmor %vm9128_vm14, %vm9129_vm13 }
 0x46e   :  { %v14502_v48 = vld [vmem:[#allocation8 + $0x1764] sm:$0xf0] }
 0x46f   :  { %v10659_v9 = vld [vmem:[#allocation8 + $0x828] sm:$0xf]  ;;  %v12580_v42 = vor.u32 %v14502_v48, %v12579_v33  ;;  %8155 = vmatpush.bf16.msrb.mxu0 %v12068_v47  ;;  %v7903_v47 = vpop.f32.mrf.mxu0 }
 0x470   :  { %v14022_v6 = vld [vmem:[#allocation8 + $0x864] sm:$0xf0] }
 0x471   :  { %v11171_v46 = vld [vmem:[#allocation8 + $0xc28] sm:$0xf]  ;;  %v10660_v2 = vor.u32 %v14022_v6, %v10659_v9  ;;  %8168 = vmatpush.bf16.msrb.mxu1 %v12580_v42  ;;  %v8923_v9 = vadd.f32 %v8922_v37, %v8921_v12  ;;  %v7916_v42 = vpop.f32.mrf.mxu1 }
 0x472   :  { %v14150_v36 = vld [vmem:[#allocation8 + $0xc64] sm:$0xf0] }
 0x473   :  { %v13155_v38 = vld [vmem:[#allocation8 + $0x1ba8] sm:$0xf]  ;;  %v11172_v63 = vor.u32 %v14150_v36, %v11171_v46  ;;  %8135 = vmatpush.bf16.msra.mxu2 %v10660_v2  ;;  %v8924_v40 = vrot.slane %v8923_v9, 1 }
 0x474   :  { %v14646_v18 = vld [vmem:[#allocation8 + $0x1be4] sm:$0xf0] }
 0x475   :  { %v13667_v5 = vld [vmem:[#allocation8 + $0x1fa8] sm:$0xf]  ;;  %v13156_v26 = vor.u32 %v14646_v18, %v13155_v38  ;;  %8148 = vmatpush.bf16.msra.mxu3 %v11172_v63  ;;  %v9123_v18 = vmul.f32 %v15695_v19, %v15680_v22  ;;  %v8925_v3 = vadd.f32 %v8924_v40, %v8923_v9 }
 0x476   :  { %v14774_v62 = vld [vmem:[#allocation8 + $0x1fe4] sm:$0xf0]  ;;  %8136 = vmatmul.bf16.vlgmr.msra.gmra.mxu2 %v15218_v59 }
 0x477   :  { %v12003_v53 = vld [vmem:[#allocation8 + $0x12a8] sm:$0xf]  ;;  %v13668_v8 = vor.u32 %v14774_v62, %v13667_v5  ;;  %8180 = vmatpush.bf16.msrb.mxu2 %v13156_v26  ;;  %v9124_v56 = vmul.f32 %v15695_v19, %v9123_v18 }
 0x478   :  { %v14358_v1 = vld [vmem:[#allocation8 + $0x12e4] sm:$0xf0]  ;;  %8149 = vmatmul.bf16.vlgmr.msra.gmra.mxu3 %v15235_v0 }
 0x479   :  { %v12515_v4 = vld [vmem:[#allocation8 + $0x16a8] sm:$0xf]  ;;  %v12004_v50 = vor.u32 %v14358_v1, %v12003_v53  ;;  %8193 = vmatpush.bf16.msrb.mxu3 %v13668_v8  ;;  %v8989_v8 = vmul.f32 0.25, %v8925_v3  ;;  %v7918_v15 = vpop.f32.mrf.mxu1 }
 0x47a   :  { %v14486_v27 = vld [vmem:[#allocation8 + $0x16e4] sm:$0xf0]  ;;  %v9957_v15 = vld [vmem:[#allocation8 + $0x2e8] sm:$0xf0] }
 0x47b   :  { %v13091_v51 = vld [vmem:[#allocation8 + $0x1b28] sm:$0xf]  ;;  %v12516_v30 = vor.u32 %v14486_v27, %v12515_v4  ;;  %8156 = vmatpush.bf16.msrb.mxu0 %v12004_v50  ;;  %v15701_v27 = vmul.f32 0.25, %v8781_v49 }
 0x47c   :  { %v14630_v34 = vld [vmem:[#allocation8 + $0x1b64] sm:$0xf0] }
 0x47d   :  { %v13603_v39 = vld [vmem:[#allocation8 + $0x1f28] sm:$0xf]  ;;  %v13092_v20 = vor.u32 %v14630_v34, %v13091_v51  ;;  %8169 = vmatpush.bf16.msrb.mxu1 %v12516_v30  ;;  %v9005_v50 = vmul.f32 %v15701_v27, %v15701_v27 }
 0x47e   :  { %v14758_v60 = vld [vmem:[#allocation8 + $0x1f64] sm:$0xf0] }
 0x47f   :  { %v15692_v44 = vld [vmem:[#allocation10 + $0x8] sm:$0xff]  ;;  %v13604_v32 = vor.u32 %v14758_v60, %v13603_v39  ;;  %8181 = vmatpush.bf16.msrb.mxu2 %v13092_v20 }
 0x480   :  { %v11939_v21 = vld [vmem:[#allocation8 + $0x1228] sm:$0xf]  ;;  %v1918_v29 = vperm.slane %v15692_v44, 0 }
 0x481   :  { %v14342_v23 = vld [vmem:[#allocation8 + $0x1264] sm:$0xf0]  ;;  %8194 = vmatpush.bf16.msrb.mxu3 %v13604_v32 }
 0x482   :  { %v12451_v41 = vld [vmem:[#allocation8 + $0x1628] sm:$0xf]  ;;  %v11940_v7 = vor.u32 %v14342_v23, %v11939_v21  ;;  %v7904_v31 = vadd.f32 %v7903_v47, %v1918_v29  ;;  %v9021_v23 = vsub.f32 %v8989_v8, %v9005_v50 }
 0x483   :  { %v14470_v28 = vld [vmem:[#allocation8 + $0x1664] sm:$0xf0] }
 0x484   :  { %v13027_v35 = vld [vmem:[#allocation8 + $0x1aa8] sm:$0xf]  ;;  %v12452_v6 = vor.u32 %v14470_v28, %v12451_v41  ;;  %8157 = vmatpush.bf16.msrb.mxu0 %v11940_v7  ;;  %v7917_v26 = vadd.f32 %v7916_v42, %v7904_v31  ;;  %v9037_v32 = vmax.f32 %v9021_v23, 0.0  ;;  %v7905_v7 = vpop.f32.mrf.mxu0  ;;  %v13998_v42 = vld [vmem:[#allocation8 + $0x7ac] sm:$0xf] }
 0x485   :  { %v14614_v55 = vld [vmem:[#allocation8 + $0x1ae4] sm:$0xf0] }
 0x486   :  { %v13539_v33 = vld [vmem:[#allocation8 + $0x1ea8] sm:$0xf]  ;;  %v13028_v5 = vor.u32 %v14614_v55, %v13027_v35  ;;  %8170 = vmatpush.bf16.msrb.mxu1 %v12452_v6  ;;  %v15706_v35 = vmul.f32 0.5, %v9124_v56 }
 0x487   :  { %v14742_v48 = vld [vmem:[#allocation8 + $0x1ee4] sm:$0xf0] }
 0x488   :  { %v11875_v46 = vld [vmem:[#allocation8 + $0x11a8] sm:$0xf]  ;;  %v13540_v53 = vor.u32 %v14742_v48, %v13539_v33  ;;  %8182 = vmatpush.bf16.msrb.mxu2 %v13028_v5  ;;  %v13870_v5 = vld [vmem:[#allocation8 + $0x3ac] sm:$0xf]  ;;  %v9126_v8 = vsub.f32 1.5, %v15706_v35 }
 0x489   :  { %v14326_v54 = vld [vmem:[#allocation8 + $0x11e4] sm:$0xf0]  ;;  %v11109_v35 = vld [vmem:[#allocation8 + $0xbe8] sm:$0xf0] }
 0x48a   :  { %v12387_v36 = vld [vmem:[#allocation8 + $0x15a8] sm:$0xf]  ;;  %v11876_v1 = vor.u32 %v14326_v54, %v11875_v46  ;;  %8195 = vmatpush.bf16.msrb.mxu3 %v13540_v53  ;;  %v10597_v53 = vld [vmem:[#allocation8 + $0x7e8] sm:$0xf0] }
 0x48b   :  { %v14454_v38 = vld [vmem:[#allocation8 + $0x15e4] sm:$0xf0]  ;;  %v10600_v50 = vor.u32 %v13998_v42, %v10597_v53  ;;  %v11045_v42 = vld [vmem:[#allocation8 + $0xb68] sm:$0xf0] }
 0x48c   :  { %v12963_v62 = vld [vmem:[#allocation8 + $0x1a28] sm:$0xf]  ;;  %v12388_v61 = vor.u32 %v14454_v38, %v12387_v36  ;;  %8158 = vmatpush.bf16.msrb.mxu0 %v11876_v1  ;;  %v15708_v38 = vadd.f32 1e-05, %v9037_v32  ;;  %v7929_v1 = vpop.f32.mrf.mxu2  ;;  %v14254_v32 = vld [vmem:[#allocation8 + $0xfac] sm:$0xf] }
 0x48d   :  { %v14598_v52 = vld [vmem:[#allocation8 + $0x1a64] sm:$0xf0]  ;;  %v14238_v53 = vld [vmem:[#allocation8 + $0xf2c] sm:$0xf] }
 0x48e   :  { %v13475_v2 = vld [vmem:[#allocation8 + $0x1e28] sm:$0xf]  ;;  %v12964_v39 = vor.u32 %v14598_v52, %v12963_v62  ;;  %8171 = vmatpush.bf16.msrb.mxu1 %v12388_v61  ;;  %v10085_v62 = vld [vmem:[#allocation8 + $0x3e8] sm:$0xf0]  ;;  %14817 = vrsqrt.f32 %v15708_v38  ;;  %v7930_v61 = vadd.f32 %v7929_v1, %v7917_v26  ;;  %vm9138_vm2 = vweird.f32 %v15708_v38 }
 0x48f   :  { %v14726_v4 = vld [vmem:[#allocation8 + $0x1e64] sm:$0xf0]  ;;  %v11557_v1 = vld [vmem:[#allocation8 + $0xf68] sm:$0xf0] }
 0x490   :  { %v11811_v10 = vld [vmem:[#allocation8 + $0x1128] sm:$0xf]  ;;  %v13476_v60 = vor.u32 %v14726_v4, %v13475_v2  ;;  %8183 = vmatpush.bf16.msrb.mxu2 %v12964_v39  ;;  %v13854_v39 = vld [vmem:[#allocation8 + $0x32c] sm:$0xf] }
 0x491   :  { %v14310_v63 = vld [vmem:[#allocation8 + $0x1164] sm:$0xf0] }
 0x492   :  { %v12323_v51 = vld [vmem:[#allocation8 + $0x1528] sm:$0xf]  ;;  %v11812_v16 = vor.u32 %v14310_v63, %v11811_v10  ;;  %8196 = vmatpush.bf16.msrb.mxu3 %v13476_v60  ;;  %v7942_v10 = vpop.f32.mrf.mxu3  ;;  %v10021_v60 = vld [vmem:[#allocation8 + $0x368] sm:$0xf0] }
 0x493   :  { %v14438_v34 = vld [vmem:[#allocation8 + $0x1564] sm:$0xf0] }
 0x494   :  { %v12899_v12 = vld [vmem:[#allocation8 + $0x19a8] sm:$0xf]  ;;  %v12324_v41 = vor.u32 %v14438_v34, %v12323_v51  ;;  %8159 = vmatpush.bf16.msrb.mxu0 %v11812_v16  ;;  %v10088_v51 = vor.u32 %v13870_v5, %v10085_v62  ;;  %v15712_v16 = vadd.f32 %v7942_v10, %v7930_v61  ;;  %v13950_v61 = vld [vmem:[#allocation8 + $0x62c] sm:$0xf] }
 0x495   :  { %v14582_v30 = vld [vmem:[#allocation8 + $0x19e4] sm:$0xf0]  ;;  %v10405_v10 = vld [vmem:[#allocation8 + $0x668] sm:$0xf0] }
 0x496   :  { %v13411_v21 = vld [vmem:[#allocation8 + $0x1da8] sm:$0xf]  ;;  %v12900_v55 = vor.u32 %v14582_v30, %v12899_v12  ;;  %8172 = vmatpush.bf16.msrb.mxu1 %v12324_v41  ;;  %v13982_v30 = vld [vmem:[#allocation8 + $0x72c] sm:$0xf] }
 0x497   :  { %v14710_v28 = vld [vmem:[#allocation8 + $0x1de4] sm:$0xf0] }
 0x498   :  { %v11747_v13 = vld [vmem:[#allocation8 + $0x10a8] sm:$0xf]  ;;  %v13412_v9 = vor.u32 %v14710_v28, %v13411_v21  ;;  %8184 = vmatpush.bf16.msrb.mxu2 %v12900_v55  ;;  %v10533_v21 = vld [vmem:[#allocation8 + $0x768] sm:$0xf0] }
 0x499   :  { %v14294_v37 = vld [vmem:[#allocation8 + $0x10e4] sm:$0xf0]  ;;  %v10536_v55 = vor.u32 %v13982_v30, %v10533_v21  ;;  %v9228_v30 = vsub.f32 %v15650_v57, %v15670_v17  ;;  %v10341_v57 = vld [vmem:[#allocation8 + $0x5e8] sm:$0xf0] }
 0x49a   :  { %v12259_v20 = vld [vmem:[#allocation8 + $0x14a8] sm:$0xf]  ;;  %v11748_v6 = vor.u32 %v14294_v37, %v11747_v13  ;;  %8197 = vmatpush.bf16.msrb.mxu3 %v13412_v9  ;;  %v15714_v37 = vpop.eup %14817  ;;  %v7944_v5 = vpop.f32.mrf.mxu3 }
 0x49b   :  { %v14422_v29 = vld [vmem:[#allocation8 + $0x14e4] sm:$0xf0]  ;;  %v9133_v7 = vmul.f32 %v15714_v37, %v15708_v38  ;;  %vm9139_vm1 = vweird.f32 %v15714_v37  ;;  %v7955_v38 = vpop.f32.mrf.mxu0 }
 0x49c   :  { %v12835_v33 = vld [vmem:[#allocation8 + $0x1928] sm:$0xf]  ;;  %v12260_v18 = vor.u32 %v14422_v29, %v12259_v20  ;;  %8160 = vmatpush.bf16.msrb.mxu0 %v11748_v6  ;;  %v10024_v20 = vor.u32 %v13854_v39, %v10021_v60  ;;  %v14126_v29 = vld [vmem:[#allocation8 + $0xbac] sm:$0xf]  ;;  %vm9140_vm3 = vmor %vm9138_vm2, %vm9139_vm1 }
 0x49d   :  { %v14566_v48 = vld [vmem:[#allocation8 + $0x1964] sm:$0xf0]  ;;  %v13966_v6 = vld [vmem:[#allocation8 + $0x6ac] sm:$0xf] }
 0x49e   :  { %v13347_v46 = vld [vmem:[#allocation8 + $0x1d28] sm:$0xf]  ;;  %v12836_v31 = vor.u32 %v14566_v48, %v12835_v33  ;;  %8173 = vmatpush.bf16.msrb.mxu1 %v12260_v18  ;;  %v11621_v33 = vld [vmem:[#allocation8 + $0xfe8] sm:$0xf0] }
 0x49f   :  { %v14694_v54 = vld [vmem:[#allocation8 + $0x1d64] sm:$0xf0]  ;;  %v13838_v48 = vld [vmem:[#allocation8 + $0x2ac] sm:$0xf]  ;;  %v11624_v62 = vor.u32 %v14254_v32, %v11621_v33  ;;  %v7956_v32 = vadd.f32 %v7955_v38, %v15712_v16 }
 0x4a0   :  { %v11683_v36 = vld [vmem:[#allocation8 + $0x1028] sm:$0xf]  ;;  %v13348_v52 = vor.u32 %v14694_v54, %v13347_v46  ;;  %8185 = vmatpush.bf16.msrb.mxu2 %v12836_v31  ;;  %v10469_v46 = vld [vmem:[#allocation8 + $0x6e8] sm:$0xf0]  ;;  %v9134_v54 = vmul.f32 %v15714_v37, %v9133_v7  ;;  %v9960_v31 = vor.u32 %v13838_v48, %v9957_v15  ;;  %v7968_v7 = vpop.f32.mrf.mxu1 }
 0x4a1   :  { %v14278_v49 = vld [vmem:[#allocation8 + $0x1064] sm:$0xf0]  ;;  %v10981_v39 = vld [vmem:[#allocation8 + $0xae8] sm:$0xf0] }
 0x4a2   :  { %v12195_v40 = vld [vmem:[#allocation8 + $0x1428] sm:$0xf]  ;;  %v11684_v2 = vor.u32 %v14278_v49, %v11683_v36  ;;  %8198 = vmatpush.bf16.msrb.mxu3 %v13348_v52  ;;  %v7931_v36 = vpop.f32.mrf.mxu2  ;;  %v11112_v49 = vor.u32 %v14126_v29, %v11109_v35  ;;  %v9135_v52 = vmul.f32 0.5, %v9134_v54  ;;  %v14222_v60 = vld [vmem:[#allocation8 + $0xeac] sm:$0xf] }
 0x4a3   :  { %v14406_v47 = vld [vmem:[#allocation8 + $0x1464] sm:$0xf0]  ;;  %v14078_v33 = vld [vmem:[#allocation8 + $0xa2c] sm:$0xf] }
 0x4a4   :  { %v12771_v4 = vld [vmem:[#allocation8 + $0x18a8] sm:$0xf]  ;;  %v12196_v63 = vor.u32 %v14406_v47, %v12195_v40  ;;  %8161 = vmatpush.bf16.msrb.mxu0 %v11684_v2  ;;  %v14110_v40 = vld [vmem:[#allocation8 + $0xb2c] sm:$0xf]  ;;  %v9127_v47 = vmul.f32 %v15695_v19, %v9126_v8  ;;  %v10472_v2 = vor.u32 %v13966_v6, %v10469_v46  ;;  %v11560_v8 = vor.u32 %v14238_v53, %v11557_v1 }
 0x4a5   :  { %v14550_v3 = vld [vmem:[#allocation8 + $0x18e4] sm:$0xf0]  ;;  %v11429_v15 = vld [vmem:[#allocation8 + $0xe68] sm:$0xf0]  ;;  %v15746_v46 = vadd.f32 %v7968_v7, %v7956_v32 }
 0x4a6   :  { %v13283_v34 = vld [vmem:[#allocation8 + $0x1ca8] sm:$0xf]  ;;  %v12772_v12 = vor.u32 %v14550_v3, %v12771_v4  ;;  %8174 = vmatpush.bf16.msrb.mxu1 %v12196_v63  ;;  %v13822_v4 = vld [vmem:[#allocation8 + $0x22c] sm:$0xf]  ;;  %v9131_v22 = vsel %vm15726_vm15, %v15695_v19, %v9127_v47 }
 0x4a7   :  { %v14678_v56 = vld [vmem:[#allocation8 + $0x1ce4] sm:$0xf0]  ;;  %8162 = vmatmul.bf16.vlgmr.msrb.gmra.mxu0 %v15280_v43  ;;  %v9893_v3 = vld [vmem:[#allocation8 + $0x268] sm:$0xf0]  ;;  %v9244_v17 = vmul.f32 %v9228_v30, %v9131_v22 }
 0x4a8   :  { %v12707_v23 = vld [vmem:[#allocation8 + $0x1828] sm:$0xf]  ;;  %v13284_v26 = vor.u32 %v14678_v56, %v13283_v34  ;;  %8206 = vmatpush.bf16.msra.mxu0 %v10088_v51  ;;  %8186 = vmatpush.bf16.msrb.mxu2 %v12772_v12  ;;  %v9136_v51 = vsub.f32 1.5, %v9135_v52  ;;  %v11048_v34 = vor.u32 %v14110_v40, %v11045_v42  ;;  %v14094_v56 = vld [vmem:[#allocation8 + $0xaac] sm:$0xf] }
 0x4a9   :  { %v14534_v41 = vld [vmem:[#allocation8 + $0x1864] sm:$0xf0]  ;;  %8175 = vmatmul.bf16.vlgmr.msrb.gmra.mxu1 %v15290_v14  ;;  %v11493_v12 = vld [vmem:[#allocation8 + $0xee8] sm:$0xf0]  ;;  %v9260_v16 = vmax.f32 %v9244_v17, 0.0 }
 0x4aa   :  { %v13219_v28 = vld [vmem:[#allocation8 + $0x1c28] sm:$0xf]  ;;  %8219 = vmatpush.bf16.msra.mxu1 %v10600_v50  ;;  %v12708_v9 = vor.u32 %v14534_v41, %v12707_v23  ;;  %8199 = vmatpush.bf16.msrb.mxu3 %v13284_v26  ;;  %v9896_v50 = vor.u32 %v13822_v4, %v9893_v3  ;;  %v9137_v21 = vmul.f32 %v15714_v37, %v9136_v51  ;;  %v13806_v26 = vld [vmem:[#allocation8 + $0x1ac] sm:$0xf]  ;;  %v7970_v51 = vpop.f32.mrf.mxu1 }
 0x4ab   :  { %v14662_v13 = vld [vmem:[#allocation8 + $0x1c64] sm:$0xf0]  ;;  %v10408_v23 = vor.u32 %v13950_v61, %v10405_v10  ;;  %v9829_v19 = vld [vmem:[#allocation8 + $0x1e8] sm:$0xf0]  ;;  %v9229_v41 = vsub.f32 %v15682_v25, %v15701_v27  ;;  %v11496_v29 = vor.u32 %v14222_v60, %v11493_v12  ;;  %v7957_v61 = vpop.f32.mrf.mxu0 }
 0x4ac   :  { %v13220_v18 = vor.u32 %v14662_v13, %v13219_v28  ;;  %8207 = vmatpush.bf16.msra.mxu0 %v10024_v20  ;;  %8187 = vmatpush.bf16.msrb.mxu2 %v12708_v9  ;;  %v13934_v28 = vld [vmem:[#allocation8 + $0x5ac] sm:$0xf]  ;;  %v9141_v13 = vsel %vm9140_vm3, %v15714_v37, %v9137_v21  ;;  %v10984_v20 = vor.u32 %v14094_v56, %v10981_v39 }
 0x4ad   :  { %v9245_v35 = vmul.f32 %v9229_v41, %v9141_v13  ;;  %v10917_v25 = vld [vmem:[#allocation8 + $0xa68] sm:$0xf0]  ;;  %v10344_v48 = vor.u32 %v13934_v28, %v10341_v57  ;;  %v7981_v57 = vpop.f32.mrf.mxu2 }
 0x4ae   :  { %8220 = vmatpush.bf16.msra.mxu1 %v10536_v55  ;;  %8200 = vmatpush.bf16.msrb.mxu3 %v13220_v18  ;;  %v9832_v55 = vor.u32 %v13806_v26, %v9829_v19  ;;  %v14206_v27 = vld [vmem:[#allocation8 + $0xe2c] sm:$0xf]  ;;  %v10920_v18 = vor.u32 %v14078_v33, %v10917_v25 }
 0x4af   :  { %8188 = vmatmul.bf16.vlgmr.msrb.gmra.mxu2 %v15309_v11  ;;  %v13790_v9 = vld [vmem:[#allocation8 + $0x12c] sm:$0xf]  ;;  %v9261_v37 = vmax.f32 %v9245_v35, 0.0  ;;  %v11432_v47 = vor.u32 %v14206_v27, %v11429_v15 }
 0x4b0   :  { %8232 = vmatpush.bf16.msra.mxu2 %v11112_v49  ;;  %8208 = vmatpush.bf16.msra.mxu0 %v9960_v31  ;;  %v9765_v6 = vld [vmem:[#allocation8 + $0x168] sm:$0xf0] }
 0x4b1   :  { %8201 = vmatmul.bf16.vlgmr.msrb.gmra.mxu3 %v15318_v24  ;;  %v13918_v54 = vld [vmem:[#allocation8 + $0x52c] sm:$0xf]  ;;  %v9289_v40 = vrot.slane %v9261_v37, 4  ;;  %v9768_v5 = vor.u32 %v13790_v9, %v9765_v6 }
 0x4b2   :  { %8245 = vmatpush.bf16.msra.mxu3 %v11624_v62  ;;  %8221 = vmatpush.bf16.msra.mxu1 %v10472_v2  ;;  %v10277_v36 = vld [vmem:[#allocation8 + $0x568] sm:$0xf0] }
 0x4b3   :  { %v14062_v49 = vld [vmem:[#allocation8 + $0x9ac] sm:$0xf]  ;;  %v10280_v42 = vor.u32 %v13918_v54, %v10277_v36  ;;  %v9297_v2 = vsel %vm601_vm0, %v9260_v16, %v9289_v40 }
 0x4b4   :  { %8233 = vmatpush.bf16.msra.mxu2 %v11048_v34  ;;  %8209 = vmatpush.bf16.msra.mxu0 %v9896_v50  ;;  %v10853_v62 = vld [vmem:[#allocation8 + $0x9e8] sm:$0xf0]  ;;  %9313 = vst [vmem:[#allocation11 + $0x18] sm:$0xff] %v9297_v2 }
 0x4b5   :  { %v14190_v31 = vld [vmem:[#allocation8 + $0xdac] sm:$0xf]  ;;  %v10856_v10 = vor.u32 %v14062_v49, %v10853_v62 }
 0x4b6   :  { %8246 = vmatpush.bf16.msra.mxu3 %v11560_v8  ;;  %8222 = vmatpush.bf16.msra.mxu1 %v10408_v23  ;;  %v11365_v53 = vld [vmem:[#allocation8 + $0xde8] sm:$0xf0] }
 0x4b7   :  { %v13774_v1 = vld [vmem:[#allocation8 + $0xac] sm:$0xf]  ;;  %v11368_v34 = vor.u32 %v14190_v31, %v11365_v53 }
 0x4b8   :  { %8234 = vmatpush.bf16.msra.mxu2 %v10984_v20  ;;  %8210 = vmatpush.bf16.msra.mxu0 %v9832_v55  ;;  %v9701_v52 = vld [vmem:[#allocation8 + $0xe8] sm:$0xf0] }
 0x4b9   :  { %v13902_v4 = vld [vmem:[#allocation8 + $0x4ac] sm:$0xf]  ;;  %v9704_v56 = vor.u32 %v13774_v1, %v9701_v52 }
 0x4ba   :  { %8247 = vmatpush.bf16.msra.mxu3 %v11496_v29  ;;  %8223 = vmatpush.bf16.msra.mxu1 %v10344_v48  ;;  %v10213_v3 = vld [vmem:[#allocation8 + $0x4e8] sm:$0xf0]  ;;  %v7994_v29 = vpop.f32.mrf.mxu3 }
 0x4bb   :  { %v14046_v63 = vld [vmem:[#allocation8 + $0x92c] sm:$0xf]  ;;  %v10216_v39 = vor.u32 %v13902_v4, %v10213_v3  ;;  %v7983_v4 = vpop.f32.mrf.mxu2 }
 0x4bc   :  { %8235 = vmatpush.bf16.msra.mxu2 %v10920_v18  ;;  %8211 = vmatpush.bf16.msra.mxu0 %v9768_v5  ;;  %v10789_v22 = vld [vmem:[#allocation8 + $0x968] sm:$0xf0]  ;;  %v7982_v5 = vadd.f32 %v7981_v57, %v15746_v46 }
 0x4bd   :  { %v14174_v8 = vld [vmem:[#allocation8 + $0xd2c] sm:$0xf]  ;;  %v10792_v19 = vor.u32 %v14046_v63, %v10789_v22 }
 0x4be   :  { %8248 = vmatpush.bf16.msra.mxu3 %v11432_v47  ;;  %v11301_v50 = vld [vmem:[#allocation8 + $0xd68] sm:$0xf0]  ;;  %8224 = vmatpush.bf16.msra.mxu1 %v10280_v42  ;;  %v15752_v22 = vadd.f32 %v7994_v29, %v7982_v5 }
 0x4bf   :  { %v13758_v60 = vld [vmem:[#allocation8 + $0x2c] sm:$0xf]  ;;  %v11304_v17 = vor.u32 %v14174_v8, %v11301_v50 }
 0x4c0   :  { %v9637_v12 = vld [vmem:[#allocation8 + $0x68] sm:$0xf0]  ;;  %8236 = vmatpush.bf16.msra.mxu2 %v10856_v10  ;;  %8212 = vmatpush.bf16.msra.mxu0 %v9704_v56 }
 0x4c1   :  { %v13886_v30 = vld [vmem:[#allocation8 + $0x42c] sm:$0xf]  ;;  %v9640_v13 = vor.u32 %v13758_v60, %v9637_v12 }
 0x4c2   :  { %v10149_v21 = vld [vmem:[#allocation8 + $0x468] sm:$0xf0]  ;;  %8249 = vmatpush.bf16.msra.mxu3 %v11368_v34  ;;  %8225 = vmatpush.bf16.msra.mxu1 %v10216_v39  ;;  %v7996_v10 = vpop.f32.mrf.mxu3 }
 0x4c3   :  { %v14382_v23 = vld [vmem:[#allocation8 + $0x13ac] sm:$0xf]  ;;  %v10152_v35 = vor.u32 %v13886_v30, %v10149_v21 }
 0x4c4   :  { %v12133_v26 = vld [vmem:[#allocation8 + $0x13e8] sm:$0xf0]  ;;  %8237 = vmatpush.bf16.msra.mxu2 %v10792_v19  ;;  %8213 = vmatpush.bf16.msra.mxu0 %v9640_v13  ;;  %v8862_v13 = vmul.f32 %v15752_v22, %v15752_v22 }
 0x4c5   :  { %v14510_v41 = vld [vmem:[#allocation8 + $0x17ac] sm:$0xf]  ;;  %v12136_v32 = vor.u32 %v14382_v23, %v12133_v26 }
 0x4c6   :  { %v12645_v28 = vld [vmem:[#allocation8 + $0x17e8] sm:$0xf0]  ;;  %8250 = vmatpush.bf16.msra.mxu3 %v11304_v17  ;;  %8226 = vmatpush.bf16.msra.mxu1 %v10152_v35  ;;  %v8782_v17 = vsel %vm601_vm0, %v15752_v22, 0.0 }
 0x4c7   :  { %v14030_v38 = vld [vmem:[#allocation8 + $0x8ac] sm:$0xf]  ;;  %v12648_v33 = vor.u32 %v14510_v41, %v12645_v28  ;;  %8214 = vmatmul.bf16.vlgmr.msra.gmra.mxu0 %v15185_v45 }
 0x4c8   :  { %v10725_v20 = vld [vmem:[#allocation8 + $0x8e8] sm:$0xf0]  ;;  %8258 = vmatpush.bf16.msrb.mxu0 %v12136_v32 }
 0x4c9   :  { %v14158_v7 = vld [vmem:[#allocation8 + $0xcac] sm:$0xf]  ;;  %v10728_v48 = vor.u32 %v14030_v38, %v10725_v20  ;;  %8227 = vmatmul.bf16.vlgmr.msra.gmra.mxu1 %v15189_v58 }
 0x4ca   :  { %v11237_v55 = vld [vmem:[#allocation8 + $0xce8] sm:$0xf0]  ;;  %8271 = vmatpush.bf16.msrb.mxu1 %v12648_v33 }
 0x4cb   :  { %v14366_v25 = vld [vmem:[#allocation8 + $0x132c] sm:$0xf]  ;;  %v11240_v37 = vor.u32 %v14158_v7, %v11237_v55  ;;  %8238 = vmatpush.bf16.msra.mxu2 %v10728_v48  ;;  %v15760_v7 = vpop.f32.mrf.mxu0  ;;  %v15762_v48 = vpop.f32.mrf.mxu1 }
 0x4cc   :  { %v12069_v27 = vld [vmem:[#allocation8 + $0x1368] sm:$0xf0] }
 0x4cd   :  { %v14494_v15 = vld [vmem:[#allocation8 + $0x172c] sm:$0xf]  ;;  %v12072_v49 = vor.u32 %v14366_v25, %v12069_v27  ;;  %8251 = vmatpush.bf16.msra.mxu3 %v11240_v37  ;;  %v8783_v27 = vrot.slane %v8782_v17, 4 }
 0x4ce   :  { %v12581_v9 = vld [vmem:[#allocation8 + $0x1768] sm:$0xf0] }
 0x4cf   :  { %v14014_v6 = vld [vmem:[#allocation8 + $0x82c] sm:$0xf]  ;;  %v12584_v62 = vor.u32 %v14494_v15, %v12581_v9  ;;  %8259 = vmatpush.bf16.msrb.mxu0 %v12072_v49 }
 0x4d0   :  { %v10661_v54 = vld [vmem:[#allocation8 + $0x868] sm:$0xf0] }
 0x4d1   :  { %v14142_v36 = vld [vmem:[#allocation8 + $0xc2c] sm:$0xf]  ;;  %v10664_v1 = vor.u32 %v14014_v6, %v10661_v54  ;;  %8272 = vmatpush.bf16.msrb.mxu1 %v12584_v62  ;;  %v8926_v54 = vsel %vm601_vm0, %v8862_v13, 0.0  ;;  %v8784_v62 = vadd.f32 %v8783_v27, %v8782_v17  ;;  %v13879_v17 = vld [vmem:[#allocation8 + $0x3ec] sm:$0xf0] }
 0x4d2   :  { %v11173_v18 = vld [vmem:[#allocation8 + $0xc68] sm:$0xf0] }
 0x4d3   :  { %v14638_v16 = vld [vmem:[#allocation8 + $0x1bac] sm:$0xf]  ;;  %v11176_v3 = vor.u32 %v14142_v36, %v11173_v18  ;;  %8239 = vmatpush.bf16.msra.mxu2 %v10664_v1 }
 0x4d4   :  { %v13157_v40 = vld [vmem:[#allocation8 + $0x1be8] sm:$0xf0] }
 0x4d5   :  { %v14766_v47 = vld [vmem:[#allocation8 + $0x1fac] sm:$0xf]  ;;  %v13160_v61 = vor.u32 %v14638_v16, %v13157_v40  ;;  %8252 = vmatpush.bf16.msra.mxu3 %v11176_v3 }
 0x4d6   :  { %v13669_v31 = vld [vmem:[#allocation8 + $0x1fe8] sm:$0xf0]  ;;  %8240 = vmatmul.bf16.vlgmr.msra.gmra.mxu2 %v15218_v59 }
 0x4d7   :  { %v14350_v42 = vld [vmem:[#allocation8 + $0x12ac] sm:$0xf]  ;;  %v13672_v46 = vor.u32 %v14766_v47, %v13669_v31  ;;  %8284 = vmatpush.bf16.msrb.mxu2 %v13160_v61  ;;  %v8927_v31 = vrot.slane %v8926_v54, 4 }
 0x4d8   :  { %v12005_v53 = vld [vmem:[#allocation8 + $0x12e8] sm:$0xf0]  ;;  %8253 = vmatmul.bf16.vlgmr.msra.gmra.mxu3 %v15235_v0 }
 0x4d9   :  { %v14478_v52 = vld [vmem:[#allocation8 + $0x16ac] sm:$0xf]  ;;  %v12008_v63 = vor.u32 %v14350_v42, %v12005_v53  ;;  %8297 = vmatpush.bf16.msrb.mxu3 %v13672_v46 }
 0x4da   :  { %v12517_v2 = vld [vmem:[#allocation8 + $0x16e8] sm:$0xf0] }
 0x4db   :  { %v14622_v51 = vld [vmem:[#allocation8 + $0x1b2c] sm:$0xf]  ;;  %v12520_v8 = vor.u32 %v14478_v52, %v12517_v2  ;;  %8260 = vmatpush.bf16.msrb.mxu0 %v12008_v63  ;;  %v8009_v63 = vpop.f32.mrf.mxu0 }
 0x4dc   :  { %v13093_v34 = vld [vmem:[#allocation8 + $0x1b68] sm:$0xf0]  ;;  %v9963_v63 = vld [vmem:[#allocation8 + $0x2b0] sm:$0xf] }
 0x4dd   :  { %v14750_v56 = vld [vmem:[#allocation8 + $0x1f2c] sm:$0xf]  ;;  %v13096_v21 = vor.u32 %v14622_v51, %v13093_v34  ;;  %8273 = vmatpush.bf16.msrb.mxu1 %v12520_v8  ;;  %v8785_v8 = vrot.slane %v8784_v62, 2 }
 0x4de   :  { %v13605_v50 = vld [vmem:[#allocation8 + $0x1f68] sm:$0xf0] }
 0x4df   :  { %v14334_v39 = vld [vmem:[#allocation8 + $0x122c] sm:$0xf]  ;;  %v13608_v26 = vor.u32 %v14750_v56, %v13605_v50  ;;  %8285 = vmatpush.bf16.msrb.mxu2 %v13096_v21  ;;  %v8928_v50 = vadd.f32 %v8927_v31, %v8926_v54 }
 0x4e0   :  { %v11941_v60 = vld [vmem:[#allocation8 + $0x1268] sm:$0xf0] }
 0x4e1   :  { %v14462_v12 = vld [vmem:[#allocation8 + $0x162c] sm:$0xf]  ;;  %v11944_v19 = vor.u32 %v14334_v39, %v11941_v60  ;;  %8298 = vmatpush.bf16.msrb.mxu3 %v13608_v26  ;;  %v8022_v39 = vpop.f32.mrf.mxu1 }
 0x4e2   :  { %v12453_v30 = vld [vmem:[#allocation8 + $0x1668] sm:$0xf0] }
 0x4e3   :  { %v14606_v23 = vld [vmem:[#allocation8 + $0x1aac] sm:$0xf]  ;;  %v12456_v38 = vor.u32 %v14462_v12, %v12453_v30  ;;  %8261 = vmatpush.bf16.msrb.mxu0 %v11944_v19 }
 0x4e4   :  { %v13029_v41 = vld [vmem:[#allocation8 + $0x1ae8] sm:$0xf0] }
 0x4e5   :  { %v14734_v28 = vld [vmem:[#allocation8 + $0x1eac] sm:$0xf]  ;;  %v13032_v55 = vor.u32 %v14606_v23, %v13029_v41  ;;  %8274 = vmatpush.bf16.msrb.mxu1 %v12456_v38  ;;  %v10603_v38 = vld [vmem:[#allocation8 + $0x7b0] sm:$0xf] }
 0x4e6   :  { %v13541_v57 = vld [vmem:[#allocation8 + $0x1ee8] sm:$0xf0] }
 0x4e7   :  { %v14318_v20 = vld [vmem:[#allocation8 + $0x11ac] sm:$0xf]  ;;  %v13544_v15 = vor.u32 %v14734_v28, %v13541_v57  ;;  %8286 = vmatpush.bf16.msrb.mxu2 %v13032_v55  ;;  %v10091_v57 = vld [vmem:[#allocation8 + $0x3b0] sm:$0xf] }
 0x4e8   :  { %v11877_v29 = vld [vmem:[#allocation8 + $0x11e8] sm:$0xf0] }
 0x4e9   :  { %v14446_v35 = vld [vmem:[#allocation8 + $0x15ac] sm:$0xf]  ;;  %v11880_v9 = vor.u32 %v14318_v20, %v11877_v29  ;;  %8299 = vmatpush.bf16.msrb.mxu3 %v13544_v15  ;;  %v14007_v20 = vld [vmem:[#allocation8 + $0x7ec] sm:$0xf0]  ;;  %v8786_v29 = vadd.f32 %v8785_v8, %v8784_v62  ;;  %v15767_v15 = vpop.f32.mrf.mxu3 }
 0x4ea   :  { %v12389_v32 = vld [vmem:[#allocation8 + $0x15e8] sm:$0xf0]  ;;  %v10475_v8 = vld [vmem:[#allocation8 + $0x6b0] sm:$0xf] }
 0x4eb   :  { %v14590_v33 = vld [vmem:[#allocation8 + $0x1a2c] sm:$0xf]  ;;  %v12392_v36 = vor.u32 %v14446_v35, %v12389_v32  ;;  %8262 = vmatpush.bf16.msrb.mxu0 %v11880_v9  ;;  %v8929_v35 = vrot.slane %v8928_v50, 2  ;;  %v15765_v32 = vpop.f32.mrf.mxu2  ;;  %v8787_v31 = vrot.slane %v8786_v29, 1 }
 0x4ec   :  { %v12965_v25 = vld [vmem:[#allocation8 + $0x1a68] sm:$0xf0] }
 0x4ed   :  { %v14718_v6 = vld [vmem:[#allocation8 + $0x1e2c] sm:$0xf]  ;;  %v12968_v47 = vor.u32 %v14590_v33, %v12965_v25  ;;  %8275 = vmatpush.bf16.msrb.mxu1 %v12392_v36  ;;  %v10604_v36 = vor.u32 %v14007_v20, %v10603_v38  ;;  %v8788_v39 = vadd.f32 %v8787_v31, %v8786_v29  ;;  %v13831_v38 = vld [vmem:[#allocation8 + $0x26c] sm:$0xf0]  ;;  %v8059_v31 = vpop.f32.mrf.mxu0 }
 0x4ee   :  { %v13477_v37 = vld [vmem:[#allocation8 + $0x1e68] sm:$0xf0]  ;;  %v10411_v20 = vld [vmem:[#allocation8 + $0x630] sm:$0xf] }
 0x4ef   :  { %v14302_v18 = vld [vmem:[#allocation8 + $0x112c] sm:$0xf]  ;;  %v13480_v42 = vor.u32 %v14718_v6, %v13477_v37  ;;  %8287 = vmatpush.bf16.msrb.mxu2 %v12968_v47  ;;  %v10092_v6 = vor.u32 %v13879_v17, %v10091_v57  ;;  %v13991_v47 = vld [vmem:[#allocation8 + $0x76c] sm:$0xf0] }
 0x4f0   :  { %v11813_v49 = vld [vmem:[#allocation8 + $0x1168] sm:$0xf0]  ;;  %v14247_v17 = vld [vmem:[#allocation8 + $0xf6c] sm:$0xf0] }
 0x4f1   :  { %v14430_v16 = vld [vmem:[#allocation8 + $0x152c] sm:$0xf]  ;;  %v11816_v53 = vor.u32 %v14302_v18, %v11813_v49  ;;  %8300 = vmatpush.bf16.msrb.mxu3 %v13480_v42  ;;  %v10027_v18 = vld [vmem:[#allocation8 + $0x330] sm:$0xf]  ;;  %v8930_v42 = vadd.f32 %v8929_v35, %v8928_v50  ;;  %v15772_v35 = vmul.f32 0.25, %v8788_v39 }
 0x4f2   :  { %v12325_v40 = vld [vmem:[#allocation8 + $0x1568] sm:$0xf0]  ;;  %v13863_v49 = vld [vmem:[#allocation8 + $0x36c] sm:$0xf0] }
 0x4f3   :  { %v14574_v5 = vld [vmem:[#allocation8 + $0x19ac] sm:$0xf]  ;;  %v12328_v2 = vor.u32 %v14430_v16, %v12325_v40  ;;  %8263 = vmatpush.bf16.msrb.mxu0 %v11816_v53  ;;  %v10539_v16 = vld [vmem:[#allocation8 + $0x730] sm:$0xf] }
 0x4f4   :  { %v12901_v1 = vld [vmem:[#allocation8 + $0x19e8] sm:$0xf0]  ;;  %v13975_v50 = vld [vmem:[#allocation8 + $0x6ec] sm:$0xf0] }
 0x4f5   :  { %v14702_v52 = vld [vmem:[#allocation8 + $0x1dac] sm:$0xf]  ;;  %v12904_v51 = vor.u32 %v14574_v5, %v12901_v1  ;;  %8276 = vmatpush.bf16.msrb.mxu1 %v12328_v2  ;;  %v10028_v2 = vor.u32 %v13863_v49, %v10027_v18  ;;  %v10476_v57 = vor.u32 %v13975_v50, %v10475_v8  ;;  %v13959_v29 = vld [vmem:[#allocation8 + $0x66c] sm:$0xf0] }
 0x4f6   :  { %v13413_v4 = vld [vmem:[#allocation8 + $0x1de8] sm:$0xf0]  ;;  %v14231_v18 = vld [vmem:[#allocation8 + $0xeec] sm:$0xf0] }
 0x4f7   :  { %v14286_v3 = vld [vmem:[#allocation8 + $0x10ac] sm:$0xf]  ;;  %v13416_v60 = vor.u32 %v14702_v52, %v13413_v4  ;;  %8288 = vmatpush.bf16.msrb.mxu2 %v12904_v51  ;;  %v11115_v4 = vld [vmem:[#allocation8 + $0xbb0] sm:$0xf] }
 0x4f8   :  { %v11749_v61 = vld [vmem:[#allocation8 + $0x10e8] sm:$0xf0]  ;;  %v13847_v51 = vld [vmem:[#allocation8 + $0x2ec] sm:$0xf0] }
 0x4f9   :  { %v14414_v10 = vld [vmem:[#allocation8 + $0x14ac] sm:$0xf]  ;;  %v11752_v12 = vor.u32 %v14286_v3, %v11749_v61  ;;  %8301 = vmatpush.bf16.msrb.mxu3 %v13416_v60  ;;  %v14135_v3 = vld [vmem:[#allocation8 + $0xbec] sm:$0xf0]  ;;  %v8931_v60 = vrot.slane %v8930_v42, 1 }
 0x4fa   :  { %v12261_v46 = vld [vmem:[#allocation8 + $0x14e8] sm:$0xf0]  ;;  %v11627_v61 = vld [vmem:[#allocation8 + $0xfb0] sm:$0xf] }
 0x4fb   :  { %v14558_v34 = vld [vmem:[#allocation8 + $0x192c] sm:$0xf]  ;;  %v12264_v23 = vor.u32 %v14414_v10, %v12261_v46  ;;  %8264 = vmatpush.bf16.msrb.mxu0 %v11752_v12  ;;  %v10540_v10 = vor.u32 %v13991_v47, %v10539_v16  ;;  %v14263_v46 = vld [vmem:[#allocation8 + $0xfec] sm:$0xf0]  ;;  %v8035_v12 = vpop.f32.mrf.mxu2 }
 0x4fc   :  { %v12837_v56 = vld [vmem:[#allocation8 + $0x1968] sm:$0xf0]  ;;  %v9835_v49 = vld [vmem:[#allocation8 + $0x1b0] sm:$0xf] }
 0x4fd   :  { %v14686_v30 = vld [vmem:[#allocation8 + $0x1d2c] sm:$0xf]  ;;  %v12840_v13 = vor.u32 %v14558_v34, %v12837_v56  ;;  %8277 = vmatpush.bf16.msrb.mxu1 %v12264_v23  ;;  %v1919_v34 = vperm.slane %v15692_v44, 1  ;;  %v8048_v23 = vpop.f32.mrf.mxu3  ;;  %v14119_v44 = vld [vmem:[#allocation8 + $0xb6c] sm:$0xf0] }
 0x4fe   :  { %v13349_v21 = vld [vmem:[#allocation8 + $0x1d68] sm:$0xf0]  ;;  %v13815_v16 = vld [vmem:[#allocation8 + $0x1ec] sm:$0xf0] }
 0x4ff   :  { %v14270_v26 = vld [vmem:[#allocation8 + $0x102c] sm:$0xf]  ;;  %v13352_v55 = vor.u32 %v14686_v30, %v13349_v21  ;;  %8289 = vmatpush.bf16.msrb.mxu2 %v12840_v13  ;;  %v11116_v21 = vor.u32 %v14135_v3, %v11115_v4  ;;  %v9899_v13 = vld [vmem:[#allocation8 + $0x230] sm:$0xf] }
 0x500   :  { %v11685_v19 = vld [vmem:[#allocation8 + $0x1068] sm:$0xf0]  ;;  %v14087_v4 = vld [vmem:[#allocation8 + $0xa6c] sm:$0xf0] }
 0x501   :  { %v14398_v41 = vld [vmem:[#allocation8 + $0x142c] sm:$0xf]  ;;  %v11688_v33 = vor.u32 %v14270_v26, %v11685_v19  ;;  %8302 = vmatpush.bf16.msrb.mxu3 %v13352_v55  ;;  %v11628_v26 = vor.u32 %v14263_v46, %v11627_v61  ;;  %v9964_v19 = vor.u32 %v13847_v51, %v9963_v63  ;;  %v8932_v55 = vadd.f32 %v8931_v60, %v8930_v42  ;;  %v11435_v3 = vld [vmem:[#allocation8 + $0xe30] sm:$0xf] }
 0x502   :  { %v12197_v28 = vld [vmem:[#allocation8 + $0x1468] sm:$0xf0]  ;;  %v14215_v46 = vld [vmem:[#allocation8 + $0xe6c] sm:$0xf0] }
 0x503   :  { %v14542_v25 = vld [vmem:[#allocation8 + $0x18ac] sm:$0xf]  ;;  %v12200_v9 = vor.u32 %v14398_v41, %v12197_v28  ;;  %8265 = vmatpush.bf16.msrb.mxu0 %v11688_v33  ;;  %v11051_v41 = vld [vmem:[#allocation8 + $0xb30] sm:$0xf]  ;;  %v8008_v33 = vadd.f32 %v15760_v7, %v1919_v34  ;;  %v8990_v47 = vmul.f32 0.25, %v8932_v55  ;;  %v11436_v50 = vor.u32 %v14215_v46, %v11435_v3 }
 0x504   :  { %v12773_v27 = vld [vmem:[#allocation8 + $0x18e8] sm:$0xf0]  ;;  %v11563_v28 = vld [vmem:[#allocation8 + $0xf30] sm:$0xf] }
 0x505   :  { %v14670_v37 = vld [vmem:[#allocation8 + $0x1cac] sm:$0xf]  ;;  %v12776_v40 = vor.u32 %v14542_v25, %v12773_v27  ;;  %8278 = vmatpush.bf16.msrb.mxu1 %v12200_v9  ;;  %v11052_v25 = vor.u32 %v14119_v44, %v11051_v41  ;;  %v11564_v27 = vor.u32 %v14247_v17, %v11563_v28  ;;  %v9900_v9 = vor.u32 %v13831_v38, %v9899_v13  ;;  %v10347_v7 = vld [vmem:[#allocation8 + $0x5b0] sm:$0xf]  ;;  %v8061_v17 = vpop.f32.mrf.mxu0 }
 0x506   :  { %v13285_v54 = vld [vmem:[#allocation8 + $0x1ce8] sm:$0xf0]  ;;  %8266 = vmatmul.bf16.vlgmr.msrb.gmra.mxu0 %v15280_v43  ;;  %v9771_v63 = vld [vmem:[#allocation8 + $0x130] sm:$0xf] }
 0x507   :  { %v14526_v5 = vld [vmem:[#allocation8 + $0x182c] sm:$0xf]  ;;  %v13288_v53 = vor.u32 %v14670_v37, %v13285_v54  ;;  %8310 = vmatpush.bf16.msra.mxu0 %v10092_v6  ;;  %8290 = vmatpush.bf16.msrb.mxu2 %v12776_v40  ;;  %v10987_v6 = vld [vmem:[#allocation8 + $0xab0] sm:$0xf] }
 0x508   :  { %v12709_v62 = vld [vmem:[#allocation8 + $0x1868] sm:$0xf0]  ;;  %8279 = vmatmul.bf16.vlgmr.msrb.gmra.mxu1 %v15290_v14  ;;  %v14103_v37 = vld [vmem:[#allocation8 + $0xaec] sm:$0xf0] }
 0x509   :  { %v14654_v1 = vld [vmem:[#allocation8 + $0x1c2c] sm:$0xf]  ;;  %8323 = vmatpush.bf16.msra.mxu1 %v10604_v36  ;;  %v12712_v56 = vor.u32 %v14526_v5, %v12709_v62  ;;  %8303 = vmatpush.bf16.msrb.mxu3 %v13288_v53  ;;  %v11499_v54 = vld [vmem:[#allocation8 + $0xeb0] sm:$0xf]  ;;  %v10412_v36 = vor.u32 %v13959_v29, %v10411_v20  ;;  %v9006_v5 = vmul.f32 %v15772_v35, %v15772_v35  ;;  %v8072_v53 = vpop.f32.mrf.mxu1 }
 0x50a   :  { %v13221_v52 = vld [vmem:[#allocation8 + $0x1c68] sm:$0xf0]  ;;  %v13943_v40 = vld [vmem:[#allocation8 + $0x5ec] sm:$0xf0]  ;;  %v8021_v62 = vadd.f32 %v15762_v48, %v8008_v33  ;;  %v10988_v42 = vor.u32 %v14103_v37, %v10987_v6 }
 0x50b   :  { %v13224_v30 = vor.u32 %v14654_v1, %v13221_v52  ;;  %8311 = vmatpush.bf16.msra.mxu0 %v10028_v2  ;;  %8291 = vmatpush.bf16.msrb.mxu2 %v12712_v56  ;;  %v11500_v1 = vor.u32 %v14231_v18, %v11499_v54  ;;  %v9836_v52 = vor.u32 %v13815_v16, %v9835_v49  ;;  %v10923_v2 = vld [vmem:[#allocation8 + $0xa30] sm:$0xf] }
 0x50c   :  { %v8034_v61 = vadd.f32 %v15765_v32, %v8021_v62  ;;  %v13799_v51 = vld [vmem:[#allocation8 + $0x16c] sm:$0xf0]  ;;  %v9022_v56 = vsub.f32 %v8990_v47, %v9006_v5  ;;  %v10924_v8 = vor.u32 %v14087_v4, %v10923_v2  ;;  %v8085_v5 = vpop.f32.mrf.mxu2  ;;  %v8098_v2 = vpop.f32.mrf.mxu3 }
 0x50d   :  { %8324 = vmatpush.bf16.msra.mxu1 %v10540_v10  ;;  %8304 = vmatpush.bf16.msrb.mxu3 %v13224_v30  ;;  %v10348_v10 = vor.u32 %v13943_v40, %v10347_v7  ;;  %v10283_v34 = vld [vmem:[#allocation8 + $0x530] sm:$0xf]  ;;  %v9772_v39 = vor.u32 %v13799_v51, %v9771_v63 }
 0x50e   :  { %8292 = vmatmul.bf16.vlgmr.msrb.gmra.mxu2 %v15309_v11  ;;  %v13927_v48 = vld [vmem:[#allocation8 + $0x56c] sm:$0xf0]  ;;  %v9038_v28 = vmax.f32 %v9022_v56, 0.0 }
 0x50f   :  { %8336 = vmatpush.bf16.msra.mxu2 %v11116_v21  ;;  %8312 = vmatpush.bf16.msra.mxu0 %v9964_v19  ;;  %v10859_v60 = vld [vmem:[#allocation8 + $0x9b0] sm:$0xf]  ;;  %v8047_v21 = vadd.f32 %v15767_v15, %v8034_v61  ;;  %v10284_v32 = vor.u32 %v13927_v48, %v10283_v34 }
 0x510   :  { %8305 = vmatmul.bf16.vlgmr.msrb.gmra.mxu3 %v15318_v24  ;;  %v14071_v12 = vld [vmem:[#allocation8 + $0x9ec] sm:$0xf0]  ;;  %v15782_v47 = vadd.f32 1e-05, %v9038_v28 }
 0x511   :  { %8349 = vmatpush.bf16.msra.mxu3 %v11628_v26  ;;  %8325 = vmatpush.bf16.msra.mxu1 %v10476_v57  ;;  %v11371_v30 = vld [vmem:[#allocation8 + $0xdb0] sm:$0xf]  ;;  %v8060_v57 = vadd.f32 %v8059_v31, %v8047_v21  ;;  %v10860_v13 = vor.u32 %v14071_v12, %v10859_v60  ;;  %v8074_v20 = vpop.f32.mrf.mxu1 }
 0x512   :  { %v14199_v23 = vld [vmem:[#allocation8 + $0xdec] sm:$0xf0]  ;;  %14819 = vrsqrt.f32 %v15782_v47  ;;  %vm9148_vm5 = vweird.f32 %v15782_v47 }
 0x513   :  { %8337 = vmatpush.bf16.msra.mxu2 %v11052_v25  ;;  %8313 = vmatpush.bf16.msra.mxu0 %v9900_v9  ;;  %v9707_v26 = vld [vmem:[#allocation8 + $0xb0] sm:$0xf]  ;;  %v11372_v29 = vor.u32 %v14199_v23, %v11371_v30  ;;  %v8073_v49 = vadd.f32 %v8072_v53, %v8060_v57 }
 0x514   :  { %v13783_v19 = vld [vmem:[#allocation8 + $0xec] sm:$0xf0] }
 0x515   :  { %8350 = vmatpush.bf16.msra.mxu3 %v11564_v27  ;;  %8326 = vmatpush.bf16.msra.mxu1 %v10412_v36  ;;  %v10219_v41 = vld [vmem:[#allocation8 + $0x4b0] sm:$0xf]  ;;  %v9708_v55 = vor.u32 %v13783_v19, %v9707_v26 }
 0x516   :  { %v13911_v44 = vld [vmem:[#allocation8 + $0x4ec] sm:$0xf0] }
 0x517   :  { %8338 = vmatpush.bf16.msra.mxu2 %v10988_v42  ;;  %8314 = vmatpush.bf16.msra.mxu0 %v9836_v52  ;;  %v10795_v38 = vld [vmem:[#allocation8 + $0x930] sm:$0xf]  ;;  %v10220_v27 = vor.u32 %v13911_v44, %v10219_v41  ;;  %v8086_v52 = vadd.f32 %v8085_v5, %v8073_v49 }
 0x518   :  { %v14055_v33 = vld [vmem:[#allocation8 + $0x96c] sm:$0xf0] }
 0x519   :  { %8351 = vmatpush.bf16.msra.mxu3 %v11500_v1  ;;  %8327 = vmatpush.bf16.msra.mxu1 %v10348_v10  ;;  %v11307_v15 = vld [vmem:[#allocation8 + $0xd30] sm:$0xf]  ;;  %v10796_v16 = vor.u32 %v14055_v33, %v10795_v38  ;;  %v15784_v48 = vadd.f32 %v8098_v2, %v8086_v52 }
 0x51a   :  { %v14183_v25 = vld [vmem:[#allocation8 + $0xd6c] sm:$0xf0] }
 0x51b   :  { %8339 = vmatpush.bf16.msra.mxu2 %v10924_v8  ;;  %8315 = vmatpush.bf16.msra.mxu0 %v9772_v39  ;;  %v9643_v9 = vld [vmem:[#allocation8 + $0x30] sm:$0xf]  ;;  %v11308_v62 = vor.u32 %v14183_v25, %v11307_v15  ;;  %v8863_v23 = vmul.f32 %v15784_v48, %v15784_v48  ;;  %v8087_v15 = vpop.f32.mrf.mxu2 }
 0x51c   :  { %v13767_v6 = vld [vmem:[#allocation8 + $0x6c] sm:$0xf0] }
 0x51d   :  { %8352 = vmatpush.bf16.msra.mxu3 %v11436_v50  ;;  %8328 = vmatpush.bf16.msra.mxu1 %v10284_v32  ;;  %v10155_v37 = vld [vmem:[#allocation8 + $0x430] sm:$0xf]  ;;  %v9644_v31 = vor.u32 %v13767_v6, %v9643_v9  ;;  %v8789_v32 = vsel %vm601_vm0, %v15784_v48, 0.0  ;;  %v8100_v6 = vpop.f32.mrf.mxu3 }
 0x51e   :  { %v13895_v54 = vld [vmem:[#allocation8 + $0x46c] sm:$0xf0]  ;;  %v8790_v44 = vrot.slane %v8789_v32, 4 }
 0x51f   :  { %v12139_v36 = vld [vmem:[#allocation8 + $0x13b0] sm:$0xf]  ;;  %8340 = vmatpush.bf16.msra.mxu2 %v10860_v13  ;;  %8316 = vmatpush.bf16.msra.mxu0 %v9708_v55  ;;  %v10156_v4 = vor.u32 %v13895_v54, %v10155_v37  ;;  %v8933_v13 = vsel %vm601_vm0, %v8863_v23, 0.0 }
 0x520   :  { %v14391_v18 = vld [vmem:[#allocation8 + $0x13ec] sm:$0xf0]  ;;  %v8791_v55 = vadd.f32 %v8790_v44, %v8789_v32  ;;  %v8934_v33 = vrot.slane %v8933_v13, 4 }
 0x521   :  { %v12651_v7 = vld [vmem:[#allocation8 + $0x17b0] sm:$0xf]  ;;  %8353 = vmatpush.bf16.msra.mxu3 %v11372_v29  ;;  %8329 = vmatpush.bf16.msra.mxu1 %v10220_v27  ;;  %v12140_v3 = vor.u32 %v14391_v18, %v12139_v36 }
 0x522   :  { %v14519_v40 = vld [vmem:[#allocation8 + $0x17ec] sm:$0xf0] }
 0x523   :  { %v10731_v42 = vld [vmem:[#allocation8 + $0x8b0] sm:$0xf]  ;;  %v12652_v46 = vor.u32 %v14519_v40, %v12651_v7  ;;  %8341 = vmatpush.bf16.msra.mxu2 %v10796_v16  ;;  %8317 = vmatpush.bf16.msra.mxu0 %v9644_v31  ;;  %v8792_v16 = vrot.slane %v8791_v55, 2  ;;  %v8935_v7 = vadd.f32 %v8934_v33, %v8933_v13 }
 0x524   :  { %v14039_v1 = vld [vmem:[#allocation8 + $0x8ec] sm:$0xf0] }
 0x525   :  { %v11243_v61 = vld [vmem:[#allocation8 + $0xcb0] sm:$0xf]  ;;  %v10732_v56 = vor.u32 %v14039_v1, %v10731_v42  ;;  %8354 = vmatpush.bf16.msra.mxu3 %v11308_v62  ;;  %8330 = vmatpush.bf16.msra.mxu1 %v10156_v4  ;;  %v8793_v1 = vadd.f32 %v8792_v16, %v8791_v55  ;;  %v8936_v52 = vrot.slane %v8935_v7, 2  ;;  %v15794_v4 = vld [vmem:[#allocation10 + $0x8] sm:$0xff] }
 0x526   :  { %v14167_v53 = vld [vmem:[#allocation8 + $0xcec] sm:$0xf0]  ;;  %8318 = vmatmul.bf16.vlgmr.msra.gmra.mxu0 %v15185_v45 }
 0x527   :  { %v12075_v10 = vld [vmem:[#allocation8 + $0x1330] sm:$0xf]  ;;  %v11244_v60 = vor.u32 %v14167_v53, %v11243_v61  ;;  %8362 = vmatpush.bf16.msrb.mxu0 %v12140_v3  ;;  %8342 = vmatpush.bf16.msra.mxu2 %v10732_v56  ;;  %v1920_v3 = vperm.slane %v15794_v4, 2  ;;  %v15797_v53 = vpop.eup %14819  ;;  %v8794_v56 = vrot.slane %v8793_v1, 1 }
 0x528   :  { %v14375_v63 = vld [vmem:[#allocation8 + $0x136c] sm:$0xf0]  ;;  %8331 = vmatmul.bf16.vlgmr.msra.gmra.mxu1 %v15189_v58  ;;  %vm9149_vm4 = vweird.f32 %v15797_v53 }
 0x529   :  { %v12587_v51 = vld [vmem:[#allocation8 + $0x1730] sm:$0xf]  ;;  %v12076_v26 = vor.u32 %v14375_v63, %v12075_v10  ;;  %8375 = vmatpush.bf16.msrb.mxu1 %v12652_v46  ;;  %8355 = vmatpush.bf16.msra.mxu3 %v11244_v60  ;;  %v8795_v32 = vadd.f32 %v8794_v56, %v8793_v1  ;;  %vm15828_vm6 = vmor %vm9148_vm5, %vm9149_vm4 }
 0x52a   :  { %v14503_v34 = vld [vmem:[#allocation8 + $0x176c] sm:$0xf0] }
 0x52b   :  { %v10667_v8 = vld [vmem:[#allocation8 + $0x830] sm:$0xf]  ;;  %v12588_v28 = vor.u32 %v14503_v34, %v12587_v51  ;;  %8363 = vmatpush.bf16.msrb.mxu0 %v12076_v26  ;;  %v8111_v26 = vpop.f32.mrf.mxu0 }
 0x52c   :  { %v14023_v50 = vld [vmem:[#allocation8 + $0x86c] sm:$0xf0]  ;;  %v8112_v44 = vadd.f32 %v8111_v26, %v1920_v3 }
 0x52d   :  { %v11179_v39 = vld [vmem:[#allocation8 + $0xc30] sm:$0xf]  ;;  %v10668_v38 = vor.u32 %v14023_v50, %v10667_v8  ;;  %8376 = vmatpush.bf16.msrb.mxu1 %v12588_v28  ;;  %v8937_v8 = vadd.f32 %v8936_v52, %v8935_v7  ;;  %v8124_v28 = vpop.f32.mrf.mxu1 }
 0x52e   :  { %v14151_v12 = vld [vmem:[#allocation8 + $0xc6c] sm:$0xf0] }
 0x52f   :  { %v13163_v30 = vld [vmem:[#allocation8 + $0x1bb0] sm:$0xf]  ;;  %v11180_v25 = vor.u32 %v14151_v12, %v11179_v39  ;;  %8343 = vmatpush.bf16.msra.mxu2 %v10668_v38  ;;  %v8938_v23 = vrot.slane %v8937_v8, 1 }
 0x530   :  { %v14647_v21 = vld [vmem:[#allocation8 + $0x1bec] sm:$0xf0] }
 0x531   :  { %v13675_v19 = vld [vmem:[#allocation8 + $0x1fb0] sm:$0xf]  ;;  %v13164_v27 = vor.u32 %v14647_v21, %v13163_v30  ;;  %8356 = vmatpush.bf16.msra.mxu3 %v11180_v25  ;;  %v9143_v21 = vmul.f32 %v15797_v53, %v15782_v47  ;;  %v8939_v55 = vadd.f32 %v8938_v23, %v8937_v8 }
 0x532   :  { %v14775_v41 = vld [vmem:[#allocation8 + $0x1fec] sm:$0xf0]  ;;  %8344 = vmatmul.bf16.vlgmr.msra.gmra.mxu2 %v15218_v59 }
 0x533   :  { %v12011_v57 = vld [vmem:[#allocation8 + $0x12b0] sm:$0xf]  ;;  %v13676_v37 = vor.u32 %v14775_v41, %v13675_v19  ;;  %8388 = vmatpush.bf16.msrb.mxu2 %v13164_v27  ;;  %v8125_v27 = vadd.f32 %v8124_v28, %v8112_v44  ;;  %v13999_v28 = vld [vmem:[#allocation8 + $0x7b4] sm:$0xf] }
 0x534   :  { %v14359_v17 = vld [vmem:[#allocation8 + $0x12ec] sm:$0xf0]  ;;  %8357 = vmatmul.bf16.vlgmr.msra.gmra.mxu3 %v15235_v0 }
 0x535   :  { %v12523_v20 = vld [vmem:[#allocation8 + $0x16b0] sm:$0xf]  ;;  %v12012_v54 = vor.u32 %v14359_v17, %v12011_v57  ;;  %8401 = vmatpush.bf16.msrb.mxu3 %v13676_v37  ;;  %v9144_v37 = vmul.f32 %v15797_v53, %v9143_v21  ;;  %v8126_v56 = vpop.f32.mrf.mxu1 }
 0x536   :  { %v14487_v29 = vld [vmem:[#allocation8 + $0x16ec] sm:$0xf0]  ;;  %v9965_v56 = vld [vmem:[#allocation8 + $0x2f0] sm:$0xf0] }
 0x537   :  { %v13099_v9 = vld [vmem:[#allocation8 + $0x1b30] sm:$0xf]  ;;  %v12524_v40 = vor.u32 %v14487_v29, %v12523_v20  ;;  %8364 = vmatpush.bf16.msrb.mxu0 %v12012_v54  ;;  %v15803_v29 = vmul.f32 0.25, %v8795_v32  ;;  %v8991_v54 = vmul.f32 0.25, %v8939_v55 }
 0x538   :  { %v14631_v36 = vld [vmem:[#allocation8 + $0x1b6c] sm:$0xf0] }
 0x539   :  { %v13611_v18 = vld [vmem:[#allocation8 + $0x1f30] sm:$0xf]  ;;  %v13100_v2 = vor.u32 %v14631_v36, %v13099_v9  ;;  %8377 = vmatpush.bf16.msrb.mxu1 %v12524_v40  ;;  %v9007_v36 = vmul.f32 %v15803_v29, %v15803_v29 }
 0x53a   :  { %v14759_v49 = vld [vmem:[#allocation8 + $0x1f6c] sm:$0xf0] }
 0x53b   :  { %v11947_v5 = vld [vmem:[#allocation8 + $0x1230] sm:$0xf]  ;;  %v13612_v10 = vor.u32 %v14759_v49, %v13611_v18  ;;  %8389 = vmatpush.bf16.msrb.mxu2 %v13100_v2 }
 0x53c   :  { %v14343_v62 = vld [vmem:[#allocation8 + $0x126c] sm:$0xf0] }
 0x53d   :  { %v12459_v31 = vld [vmem:[#allocation8 + $0x1630] sm:$0xf]  ;;  %v11948_v46 = vor.u32 %v14343_v62, %v11947_v5  ;;  %8402 = vmatpush.bf16.msrb.mxu3 %v13612_v10  ;;  %v9023_v62 = vsub.f32 %v8991_v54, %v9007_v36 }
 0x53e   :  { %v14471_v42 = vld [vmem:[#allocation8 + $0x166c] sm:$0xf0] }
 0x53f   :  { %v13035_v61 = vld [vmem:[#allocation8 + $0x1ab0] sm:$0xf]  ;;  %v12460_v50 = vor.u32 %v14471_v42, %v12459_v31  ;;  %8365 = vmatpush.bf16.msrb.mxu0 %v11948_v46  ;;  %v9039_v10 = vmax.f32 %v9023_v62, 0.0  ;;  %v8113_v46 = vpop.f32.mrf.mxu0 }
 0x540   :  { %v14615_v63 = vld [vmem:[#allocation8 + $0x1aec] sm:$0xf0] }
 0x541   :  { %v13547_v51 = vld [vmem:[#allocation8 + $0x1eb0] sm:$0xf]  ;;  %v13036_v19 = vor.u32 %v14615_v63, %v13035_v61  ;;  %8378 = vmatpush.bf16.msrb.mxu1 %v12460_v50  ;;  %v15808_v61 = vmul.f32 0.5, %v9144_v37 }
 0x542   :  { %v14743_v34 = vld [vmem:[#allocation8 + $0x1eec] sm:$0xf0] }
 0x543   :  { %v11883_v39 = vld [vmem:[#allocation8 + $0x11b0] sm:$0xf]  ;;  %v13548_v57 = vor.u32 %v14743_v34, %v13547_v51  ;;  %8390 = vmatpush.bf16.msrb.mxu2 %v13036_v19  ;;  %v13871_v19 = vld [vmem:[#allocation8 + $0x3b4] sm:$0xf]  ;;  %v9146_v54 = vsub.f32 1.5, %v15808_v61 }
 0x544   :  { %v14327_v60 = vld [vmem:[#allocation8 + $0x11ec] sm:$0xf0]  ;;  %v11117_v61 = vld [vmem:[#allocation8 + $0xbf0] sm:$0xf0] }
 0x545   :  { %v12395_v12 = vld [vmem:[#allocation8 + $0x15b0] sm:$0xf]  ;;  %v11884_v17 = vor.u32 %v14327_v60, %v11883_v39  ;;  %8403 = vmatpush.bf16.msrb.mxu3 %v13548_v57  ;;  %v10605_v57 = vld [vmem:[#allocation8 + $0x7f0] sm:$0xf0] }
 0x546   :  { %v14455_v30 = vld [vmem:[#allocation8 + $0x15ec] sm:$0xf0]  ;;  %v10608_v36 = vor.u32 %v13999_v28, %v10605_v57  ;;  %v11053_v28 = vld [vmem:[#allocation8 + $0xb70] sm:$0xf0] }
 0x547   :  { %v12971_v41 = vld [vmem:[#allocation8 + $0x1a30] sm:$0xf]  ;;  %v12396_v33 = vor.u32 %v14455_v30, %v12395_v12  ;;  %8366 = vmatpush.bf16.msrb.mxu0 %v11884_v17  ;;  %v15810_v30 = vadd.f32 1e-05, %v9039_v10  ;;  %v8137_v17 = vpop.f32.mrf.mxu2  ;;  %v14255_v10 = vld [vmem:[#allocation8 + $0xfb4] sm:$0xf] }
 0x548   :  { %v14599_v13 = vld [vmem:[#allocation8 + $0x1a6c] sm:$0xf0]  ;;  %v14239_v57 = vld [vmem:[#allocation8 + $0xf34] sm:$0xf] }
 0x549   :  { %v13483_v38 = vld [vmem:[#allocation8 + $0x1e30] sm:$0xf]  ;;  %v12972_v18 = vor.u32 %v14599_v13, %v12971_v41  ;;  %8379 = vmatpush.bf16.msrb.mxu1 %v12396_v33  ;;  %v10093_v41 = vld [vmem:[#allocation8 + $0x3f0] sm:$0xf0]  ;;  %14821 = vrsqrt.f32 %v15810_v30  ;;  %v8138_v33 = vadd.f32 %v8137_v17, %v8125_v27  ;;  %vm9158_vm8 = vweird.f32 %v15810_v30 }
 0x54a   :  { %v14727_v20 = vld [vmem:[#allocation8 + $0x1e6c] sm:$0xf0]  ;;  %v11565_v17 = vld [vmem:[#allocation8 + $0xf70] sm:$0xf0] }
 0x54b   :  { %v11819_v15 = vld [vmem:[#allocation8 + $0x1130] sm:$0xf]  ;;  %v13484_v49 = vor.u32 %v14727_v20, %v13483_v38  ;;  %8391 = vmatpush.bf16.msrb.mxu2 %v12972_v18  ;;  %v13855_v18 = vld [vmem:[#allocation8 + $0x334] sm:$0xf] }
 0x54c   :  { %v14311_v25 = vld [vmem:[#allocation8 + $0x116c] sm:$0xf0] }
 0x54d   :  { %v12331_v9 = vld [vmem:[#allocation8 + $0x1530] sm:$0xf]  ;;  %v11820_v16 = vor.u32 %v14311_v25, %v11819_v15  ;;  %8404 = vmatpush.bf16.msrb.mxu3 %v13484_v49  ;;  %v8150_v15 = vpop.f32.mrf.mxu3  ;;  %v10029_v49 = vld [vmem:[#allocation8 + $0x370] sm:$0xf0] }
 0x54e   :  { %v14439_v6 = vld [vmem:[#allocation8 + $0x156c] sm:$0xf0] }
 0x54f   :  { %v12907_v7 = vld [vmem:[#allocation8 + $0x19b0] sm:$0xf]  ;;  %v12332_v31 = vor.u32 %v14439_v6, %v12331_v9  ;;  %8367 = vmatpush.bf16.msrb.mxu0 %v11820_v16  ;;  %v10096_v9 = vor.u32 %v13871_v19, %v10093_v41  ;;  %v15814_v16 = vadd.f32 %v8150_v15, %v8138_v33  ;;  %v13951_v33 = vld [vmem:[#allocation8 + $0x634] sm:$0xf] }
 0x550   :  { %v14583_v40 = vld [vmem:[#allocation8 + $0x19ec] sm:$0xf0]  ;;  %v10413_v15 = vld [vmem:[#allocation8 + $0x670] sm:$0xf0] }
 0x551   :  { %v13419_v5 = vld [vmem:[#allocation8 + $0x1db0] sm:$0xf]  ;;  %v12908_v63 = vor.u32 %v14583_v40, %v12907_v7  ;;  %8380 = vmatpush.bf16.msrb.mxu1 %v12332_v31  ;;  %v13983_v40 = vld [vmem:[#allocation8 + $0x734] sm:$0xf] }
 0x552   :  { %v14711_v42 = vld [vmem:[#allocation8 + $0x1dec] sm:$0xf0] }
 0x553   :  { %v11755_v1 = vld [vmem:[#allocation8 + $0x10b0] sm:$0xf]  ;;  %v13420_v8 = vor.u32 %v14711_v42, %v13419_v5  ;;  %8392 = vmatpush.bf16.msrb.mxu2 %v12908_v63  ;;  %v10541_v5 = vld [vmem:[#allocation8 + $0x770] sm:$0xf0] }
 0x554   :  { %v14295_v52 = vld [vmem:[#allocation8 + $0x10ec] sm:$0xf0]  ;;  %v10544_v63 = vor.u32 %v13983_v40, %v10541_v5  ;;  %v9230_v40 = vsub.f32 %v15752_v22, %v15772_v35  ;;  %v10349_v22 = vld [vmem:[#allocation8 + $0x5f0] sm:$0xf0] }
 0x555   :  { %v12267_v2 = vld [vmem:[#allocation8 + $0x14b0] sm:$0xf]  ;;  %v11756_v50 = vor.u32 %v14295_v52, %v11755_v1  ;;  %8405 = vmatpush.bf16.msrb.mxu3 %v13420_v8  ;;  %v15816_v52 = vpop.eup %14821  ;;  %v8152_v19 = vpop.f32.mrf.mxu3 }
 0x556   :  { %v14423_v3 = vld [vmem:[#allocation8 + $0x14ec] sm:$0xf0]  ;;  %v9153_v46 = vmul.f32 %v15816_v52, %v15810_v30  ;;  %vm9159_vm7 = vweird.f32 %v15816_v52  ;;  %v8163_v30 = vpop.f32.mrf.mxu0 }
 0x557   :  { %v12843_v51 = vld [vmem:[#allocation8 + $0x1930] sm:$0xf]  ;;  %v12268_v21 = vor.u32 %v14423_v3, %v12267_v2  ;;  %8368 = vmatpush.bf16.msrb.mxu0 %v11756_v50  ;;  %v10032_v2 = vor.u32 %v13855_v18, %v10029_v49  ;;  %v14127_v3 = vld [vmem:[#allocation8 + $0xbb4] sm:$0xf]  ;;  %vm9160_vm9 = vmor %vm9158_vm8, %vm9159_vm7 }
 0x558   :  { %v14567_v34 = vld [vmem:[#allocation8 + $0x196c] sm:$0xf0]  ;;  %v13967_v50 = vld [vmem:[#allocation8 + $0x6b4] sm:$0xf] }
 0x559   :  { %v13355_v39 = vld [vmem:[#allocation8 + $0x1d30] sm:$0xf]  ;;  %v12844_v44 = vor.u32 %v14567_v34, %v12843_v51  ;;  %8381 = vmatpush.bf16.msrb.mxu1 %v12268_v21  ;;  %v11629_v51 = vld [vmem:[#allocation8 + $0xff0] sm:$0xf0] }
 0x55a   :  { %v14695_v60 = vld [vmem:[#allocation8 + $0x1d6c] sm:$0xf0]  ;;  %v13839_v34 = vld [vmem:[#allocation8 + $0x2b4] sm:$0xf]  ;;  %v11632_v41 = vor.u32 %v14255_v10, %v11629_v51  ;;  %v8164_v10 = vadd.f32 %v8163_v30, %v15814_v16 }
 0x55b   :  { %v11691_v12 = vld [vmem:[#allocation8 + $0x1030] sm:$0xf]  ;;  %v13356_v13 = vor.u32 %v14695_v60, %v13355_v39  ;;  %8393 = vmatpush.bf16.msrb.mxu2 %v12844_v44  ;;  %v10477_v39 = vld [vmem:[#allocation8 + $0x6f0] sm:$0xf0]  ;;  %v9154_v60 = vmul.f32 %v15816_v52, %v9153_v46  ;;  %v9968_v44 = vor.u32 %v13839_v34, %v9965_v56  ;;  %v8176_v46 = vpop.f32.mrf.mxu1 }
 0x55c   :  { %v14279_v32 = vld [vmem:[#allocation8 + $0x106c] sm:$0xf0]  ;;  %v10989_v18 = vld [vmem:[#allocation8 + $0xaf0] sm:$0xf0] }
 0x55d   :  { %v12203_v23 = vld [vmem:[#allocation8 + $0x1430] sm:$0xf]  ;;  %v11692_v38 = vor.u32 %v14279_v32, %v11691_v12  ;;  %8406 = vmatpush.bf16.msrb.mxu3 %v13356_v13  ;;  %v8139_v12 = vpop.f32.mrf.mxu2  ;;  %v11120_v32 = vor.u32 %v14127_v3, %v11117_v61  ;;  %v9155_v13 = vmul.f32 0.5, %v9154_v60  ;;  %v14223_v49 = vld [vmem:[#allocation8 + $0xeb4] sm:$0xf] }
 0x55e   :  { %v14407_v26 = vld [vmem:[#allocation8 + $0x146c] sm:$0xf0]  ;;  %v14079_v51 = vld [vmem:[#allocation8 + $0xa34] sm:$0xf] }
 0x55f   :  { %v12779_v20 = vld [vmem:[#allocation8 + $0x18b0] sm:$0xf]  ;;  %v12204_v25 = vor.u32 %v14407_v26, %v12203_v23  ;;  %8369 = vmatpush.bf16.msrb.mxu0 %v11692_v38  ;;  %v14111_v23 = vld [vmem:[#allocation8 + $0xb34] sm:$0xf]  ;;  %v9147_v26 = vmul.f32 %v15797_v53, %v9146_v54  ;;  %v10480_v38 = vor.u32 %v13967_v50, %v10477_v39  ;;  %v11568_v54 = vor.u32 %v14239_v57, %v11565_v17 }
 0x560   :  { %v14551_v55 = vld [vmem:[#allocation8 + $0x18ec] sm:$0xf0]  ;;  %v11437_v56 = vld [vmem:[#allocation8 + $0xe70] sm:$0xf0]  ;;  %v15848_v39 = vadd.f32 %v8176_v46, %v8164_v10 }
 0x561   :  { %v13291_v6 = vld [vmem:[#allocation8 + $0x1cb0] sm:$0xf]  ;;  %v12780_v7 = vor.u32 %v14551_v55, %v12779_v20  ;;  %8382 = vmatpush.bf16.msrb.mxu1 %v12204_v25  ;;  %v13823_v20 = vld [vmem:[#allocation8 + $0x234] sm:$0xf]  ;;  %v9151_v47 = vsel %vm15828_vm6, %v15797_v53, %v9147_v26 }
 0x562   :  { %v14679_v37 = vld [vmem:[#allocation8 + $0x1cec] sm:$0xf0]  ;;  %8370 = vmatmul.bf16.vlgmr.msrb.gmra.mxu0 %v15280_v43  ;;  %v9901_v55 = vld [vmem:[#allocation8 + $0x270] sm:$0xf0]  ;;  %v9246_v35 = vmul.f32 %v9230_v40, %v9151_v47 }
 0x563   :  { %v12715_v62 = vld [vmem:[#allocation8 + $0x1830] sm:$0xf]  ;;  %v13292_v27 = vor.u32 %v14679_v37, %v13291_v6  ;;  %8414 = vmatpush.bf16.msra.mxu0 %v10096_v9  ;;  %8394 = vmatpush.bf16.msrb.mxu2 %v12780_v7  ;;  %v9156_v9 = vsub.f32 1.5, %v9155_v13  ;;  %v11056_v6 = vor.u32 %v14111_v23, %v11053_v28  ;;  %v14095_v37 = vld [vmem:[#allocation8 + $0xab4] sm:$0xf] }
 0x564   :  { %v14535_v31 = vld [vmem:[#allocation8 + $0x186c] sm:$0xf0]  ;;  %8383 = vmatmul.bf16.vlgmr.msrb.gmra.mxu1 %v15290_v14  ;;  %v11501_v7 = vld [vmem:[#allocation8 + $0xef0] sm:$0xf0]  ;;  %v9262_v16 = vmax.f32 %v9246_v35, 0.0 }
 0x565   :  { %v13227_v42 = vld [vmem:[#allocation8 + $0x1c30] sm:$0xf]  ;;  %8427 = vmatpush.bf16.msra.mxu1 %v10608_v36  ;;  %v12716_v8 = vor.u32 %v14535_v31, %v12715_v62  ;;  %8407 = vmatpush.bf16.msrb.mxu3 %v13292_v27  ;;  %v9904_v36 = vor.u32 %v13823_v20, %v9901_v55  ;;  %v9157_v5 = vmul.f32 %v15816_v52, %v9156_v9  ;;  %v13807_v27 = vld [vmem:[#allocation8 + $0x1b4] sm:$0xf]  ;;  %v8178_v9 = vpop.f32.mrf.mxu1 }
 0x566   :  { %v14663_v1 = vld [vmem:[#allocation8 + $0x1c6c] sm:$0xf0]  ;;  %v10416_v62 = vor.u32 %v13951_v33, %v10413_v15  ;;  %v9837_v53 = vld [vmem:[#allocation8 + $0x1f0] sm:$0xf0]  ;;  %v9231_v31 = vsub.f32 %v15784_v48, %v15803_v29  ;;  %v11504_v3 = vor.u32 %v14223_v49, %v11501_v7  ;;  %v8165_v33 = vpop.f32.mrf.mxu0 }
 0x567   :  { %v13228_v21 = vor.u32 %v14663_v1, %v13227_v42  ;;  %8415 = vmatpush.bf16.msra.mxu0 %v10032_v2  ;;  %8395 = vmatpush.bf16.msrb.mxu2 %v12716_v8  ;;  %v13935_v42 = vld [vmem:[#allocation8 + $0x5b4] sm:$0xf]  ;;  %v9161_v1 = vsel %vm9160_vm9, %v15816_v52, %v9157_v5  ;;  %v10992_v2 = vor.u32 %v14095_v37, %v10989_v18 }
 0x568   :  { %v9247_v61 = vmul.f32 %v9231_v31, %v9161_v1  ;;  %v10925_v48 = vld [vmem:[#allocation8 + $0xa70] sm:$0xf0]  ;;  %v10352_v34 = vor.u32 %v13935_v42, %v10349_v22  ;;  %v8189_v22 = vpop.f32.mrf.mxu2 }
 0x569   :  { %8428 = vmatpush.bf16.msra.mxu1 %v10544_v63  ;;  %8408 = vmatpush.bf16.msrb.mxu3 %v13228_v21  ;;  %v9840_v63 = vor.u32 %v13807_v27, %v9837_v53  ;;  %v14207_v29 = vld [vmem:[#allocation8 + $0xe34] sm:$0xf]  ;;  %v10928_v21 = vor.u32 %v14079_v51, %v10925_v48 }
 0x56a   :  { %8396 = vmatmul.bf16.vlgmr.msrb.gmra.mxu2 %v15309_v11  ;;  %v13791_v8 = vld [vmem:[#allocation8 + $0x134] sm:$0xf]  ;;  %v9263_v52 = vmax.f32 %v9247_v61, 0.0  ;;  %v11440_v26 = vor.u32 %v14207_v29, %v11437_v56 }
 0x56b   :  { %8440 = vmatpush.bf16.msra.mxu2 %v11120_v32  ;;  %8416 = vmatpush.bf16.msra.mxu0 %v9968_v44  ;;  %v9773_v50 = vld [vmem:[#allocation8 + $0x170] sm:$0xf0] }
 0x56c   :  { %8409 = vmatmul.bf16.vlgmr.msrb.gmra.mxu3 %v15318_v24  ;;  %v13919_v60 = vld [vmem:[#allocation8 + $0x534] sm:$0xf]  ;;  %v9290_v23 = vrot.slane %v9263_v52, 4  ;;  %v9776_v19 = vor.u32 %v13791_v8, %v9773_v50 }
 0x56d   :  { %8453 = vmatpush.bf16.msra.mxu3 %v11632_v41  ;;  %8429 = vmatpush.bf16.msra.mxu1 %v10480_v38  ;;  %v10285_v12 = vld [vmem:[#allocation8 + $0x570] sm:$0xf0] }
 0x56e   :  { %v14063_v32 = vld [vmem:[#allocation8 + $0x9b4] sm:$0xf]  ;;  %v10288_v28 = vor.u32 %v13919_v60, %v10285_v12  ;;  %v9298_v38 = vsel %vm601_vm0, %v9262_v16, %v9290_v23 }
 0x56f   :  { %8441 = vmatpush.bf16.msra.mxu2 %v11056_v6  ;;  %8417 = vmatpush.bf16.msra.mxu0 %v9904_v36  ;;  %v10861_v41 = vld [vmem:[#allocation8 + $0x9f0] sm:$0xf0]  ;;  %9314 = vst [vmem:[#allocation11 + $0x20] sm:$0xff] %v9298_v38 }
 0x570   :  { %v14191_v44 = vld [vmem:[#allocation8 + $0xdb4] sm:$0xf]  ;;  %v10864_v15 = vor.u32 %v14063_v32, %v10861_v41 }
 0x571   :  { %8454 = vmatpush.bf16.msra.mxu3 %v11568_v54  ;;  %8430 = vmatpush.bf16.msra.mxu1 %v10416_v62  ;;  %v11373_v57 = vld [vmem:[#allocation8 + $0xdf0] sm:$0xf0] }
 0x572   :  { %v13775_v17 = vld [vmem:[#allocation8 + $0xb4] sm:$0xf]  ;;  %v11376_v6 = vor.u32 %v14191_v44, %v11373_v57 }
 0x573   :  { %8442 = vmatpush.bf16.msra.mxu2 %v10992_v2  ;;  %8418 = vmatpush.bf16.msra.mxu0 %v9840_v63  ;;  %v9709_v13 = vld [vmem:[#allocation8 + $0xf0] sm:$0xf0] }
 0x574   :  { %v13903_v20 = vld [vmem:[#allocation8 + $0x4b4] sm:$0xf]  ;;  %v9712_v37 = vor.u32 %v13775_v17, %v9709_v13 }
 0x575   :  { %8455 = vmatpush.bf16.msra.mxu3 %v11504_v3  ;;  %8431 = vmatpush.bf16.msra.mxu1 %v10352_v34  ;;  %v10221_v55 = vld [vmem:[#allocation8 + $0x4f0] sm:$0xf0]  ;;  %v8202_v3 = vpop.f32.mrf.mxu3 }
 0x576   :  { %v14047_v25 = vld [vmem:[#allocation8 + $0x934] sm:$0xf]  ;;  %v10224_v18 = vor.u32 %v13903_v20, %v10221_v55  ;;  %v8191_v20 = vpop.f32.mrf.mxu2 }
 0x577   :  { %8443 = vmatpush.bf16.msra.mxu2 %v10928_v21  ;;  %8419 = vmatpush.bf16.msra.mxu0 %v9776_v19  ;;  %v10797_v47 = vld [vmem:[#allocation8 + $0x970] sm:$0xf0]  ;;  %v8190_v19 = vadd.f32 %v8189_v22, %v15848_v39 }
 0x578   :  { %v14175_v54 = vld [vmem:[#allocation8 + $0xd34] sm:$0xf]  ;;  %v10800_v53 = vor.u32 %v14047_v25, %v10797_v47 }
 0x579   :  { %8456 = vmatpush.bf16.msra.mxu3 %v11440_v26  ;;  %v11309_v36 = vld [vmem:[#allocation8 + $0xd70] sm:$0xf0]  ;;  %8432 = vmatpush.bf16.msra.mxu1 %v10288_v28  ;;  %v15854_v47 = vadd.f32 %v8202_v3, %v8190_v19 }
 0x57a   :  { %v13759_v49 = vld [vmem:[#allocation8 + $0x34] sm:$0xf]  ;;  %v11312_v35 = vor.u32 %v14175_v54, %v11309_v36 }
 0x57b   :  { %v9645_v7 = vld [vmem:[#allocation8 + $0x70] sm:$0xf0]  ;;  %8444 = vmatpush.bf16.msra.mxu2 %v10864_v15  ;;  %8420 = vmatpush.bf16.msra.mxu0 %v9712_v37 }
 0x57c   :  { %v13887_v40 = vld [vmem:[#allocation8 + $0x434] sm:$0xf]  ;;  %v9648_v1 = vor.u32 %v13759_v49, %v9645_v7 }
 0x57d   :  { %v10157_v5 = vld [vmem:[#allocation8 + $0x470] sm:$0xf0]  ;;  %8457 = vmatpush.bf16.msra.mxu3 %v11376_v6  ;;  %8433 = vmatpush.bf16.msra.mxu1 %v10224_v18  ;;  %v8204_v15 = vpop.f32.mrf.mxu3 }
 0x57e   :  { %v14383_v62 = vld [vmem:[#allocation8 + $0x13b4] sm:$0xf]  ;;  %v10160_v61 = vor.u32 %v13887_v40, %v10157_v5 }
 0x57f   :  { %v12141_v27 = vld [vmem:[#allocation8 + $0x13f0] sm:$0xf0]  ;;  %8445 = vmatpush.bf16.msra.mxu2 %v10800_v53  ;;  %8421 = vmatpush.bf16.msra.mxu0 %v9648_v1  ;;  %v8864_v1 = vmul.f32 %v15854_v47, %v15854_v47 }
 0x580   :  { %v14511_v31 = vld [vmem:[#allocation8 + $0x17b4] sm:$0xf]  ;;  %v12144_v10 = vor.u32 %v14383_v62, %v12141_v27 }
 0x581   :  { %v12653_v42 = vld [vmem:[#allocation8 + $0x17f0] sm:$0xf0]  ;;  %8458 = vmatpush.bf16.msra.mxu3 %v11312_v35  ;;  %8434 = vmatpush.bf16.msra.mxu1 %v10160_v61  ;;  %v8796_v35 = vsel %vm601_vm0, %v15854_v47, 0.0 }
 0x582   :  { %v14031_v30 = vld [vmem:[#allocation8 + $0x8b4] sm:$0xf]  ;;  %v12656_v51 = vor.u32 %v14511_v31, %v12653_v42  ;;  %8422 = vmatmul.bf16.vlgmr.msra.gmra.mxu0 %v15185_v45 }
 0x583   :  { %v10733_v2 = vld [vmem:[#allocation8 + $0x8f0] sm:$0xf0]  ;;  %8466 = vmatpush.bf16.msrb.mxu0 %v12144_v10 }
 0x584   :  { %v14159_v46 = vld [vmem:[#allocation8 + $0xcb4] sm:$0xf]  ;;  %v10736_v34 = vor.u32 %v14031_v30, %v10733_v2  ;;  %8435 = vmatmul.bf16.vlgmr.msra.gmra.mxu1 %v15189_v58 }
 0x585   :  { %v11245_v63 = vld [vmem:[#allocation8 + $0xcf0] sm:$0xf0]  ;;  %8479 = vmatpush.bf16.msrb.mxu1 %v12656_v51 }
 0x586   :  { %v14367_v48 = vld [vmem:[#allocation8 + $0x1334] sm:$0xf]  ;;  %v11248_v52 = vor.u32 %v14159_v46, %v11245_v63  ;;  %8446 = vmatpush.bf16.msra.mxu2 %v10736_v34  ;;  %v15862_v46 = vpop.f32.mrf.mxu0  ;;  %v15864_v34 = vpop.f32.mrf.mxu1 }
 0x587   :  { %v12077_v29 = vld [vmem:[#allocation8 + $0x1370] sm:$0xf0] }
 0x588   :  { %v14495_v56 = vld [vmem:[#allocation8 + $0x1734] sm:$0xf]  ;;  %v12080_v32 = vor.u32 %v14367_v48, %v12077_v29  ;;  %8459 = vmatpush.bf16.msra.mxu3 %v11248_v52  ;;  %v8797_v29 = vrot.slane %v8796_v35, 4 }
 0x589   :  { %v12589_v8 = vld [vmem:[#allocation8 + $0x1770] sm:$0xf0] }
 0x58a   :  { %v14015_v50 = vld [vmem:[#allocation8 + $0x834] sm:$0xf]  ;;  %v12592_v41 = vor.u32 %v14495_v56, %v12589_v8  ;;  %8467 = vmatpush.bf16.msrb.mxu0 %v12080_v32 }
 0x58b   :  { %v10669_v60 = vld [vmem:[#allocation8 + $0x870] sm:$0xf0] }
 0x58c   :  { %v14143_v12 = vld [vmem:[#allocation8 + $0xc34] sm:$0xf]  ;;  %v10672_v17 = vor.u32 %v14015_v50, %v10669_v60  ;;  %8480 = vmatpush.bf16.msrb.mxu1 %v12592_v41  ;;  %v8940_v60 = vsel %vm601_vm0, %v8864_v1, 0.0  ;;  %v8798_v41 = vadd.f32 %v8797_v29, %v8796_v35  ;;  %v13880_v35 = vld [vmem:[#allocation8 + $0x3f4] sm:$0xf0] }
 0x58d   :  { %v11181_v21 = vld [vmem:[#allocation8 + $0xc70] sm:$0xf0] }
 0x58e   :  { %v14639_v16 = vld [vmem:[#allocation8 + $0x1bb4] sm:$0xf]  ;;  %v11184_v55 = vor.u32 %v14143_v12, %v11181_v21  ;;  %8447 = vmatpush.bf16.msra.mxu2 %v10672_v17 }
 0x58f   :  { %v13165_v23 = vld [vmem:[#allocation8 + $0x1bf0] sm:$0xf0] }
 0x590   :  { %v14767_v26 = vld [vmem:[#allocation8 + $0x1fb4] sm:$0xf]  ;;  %v13168_v33 = vor.u32 %v14639_v16, %v13165_v23  ;;  %8460 = vmatpush.bf16.msra.mxu3 %v11184_v55 }
 0x591   :  { %v13677_v44 = vld [vmem:[#allocation8 + $0x1ff0] sm:$0xf0]  ;;  %8448 = vmatmul.bf16.vlgmr.msra.gmra.mxu2 %v15218_v59 }
 0x592   :  { %v14351_v28 = vld [vmem:[#allocation8 + $0x12b4] sm:$0xf]  ;;  %v13680_v39 = vor.u32 %v14767_v26, %v13677_v44  ;;  %8492 = vmatpush.bf16.msrb.mxu2 %v13168_v33  ;;  %v8941_v44 = vrot.slane %v8940_v60, 4 }
 0x593   :  { %v12013_v57 = vld [vmem:[#allocation8 + $0x12f0] sm:$0xf0]  ;;  %8461 = vmatmul.bf16.vlgmr.msra.gmra.mxu3 %v15235_v0 }
 0x594   :  { %v14479_v13 = vld [vmem:[#allocation8 + $0x16b4] sm:$0xf]  ;;  %v12016_v25 = vor.u32 %v14351_v28, %v12013_v57  ;;  %8505 = vmatpush.bf16.msrb.mxu3 %v13680_v39 }
 0x595   :  { %v12525_v38 = vld [vmem:[#allocation8 + $0x16f0] sm:$0xf0] }
 0x596   :  { %v14623_v9 = vld [vmem:[#allocation8 + $0x1b34] sm:$0xf]  ;;  %v12528_v54 = vor.u32 %v14479_v13, %v12525_v38  ;;  %8468 = vmatpush.bf16.msrb.mxu0 %v12016_v25  ;;  %v8217_v25 = vpop.f32.mrf.mxu0 }
 0x597   :  { %v13101_v6 = vld [vmem:[#allocation8 + $0x1b70] sm:$0xf0]  ;;  %v9971_v25 = vld [vmem:[#allocation8 + $0x2b8] sm:$0xf] }
 0x598   :  { %v14751_v37 = vld [vmem:[#allocation8 + $0x1f34] sm:$0xf]  ;;  %v13104_v5 = vor.u32 %v14623_v9, %v13101_v6  ;;  %8481 = vmatpush.bf16.msrb.mxu1 %v12528_v54  ;;  %v8799_v54 = vrot.slane %v8798_v41, 2 }
 0x599   :  { %v13613_v36 = vld [vmem:[#allocation8 + $0x1f70] sm:$0xf0] }
 0x59a   :  { %v14335_v18 = vld [vmem:[#allocation8 + $0x1234] sm:$0xf]  ;;  %v13616_v27 = vor.u32 %v14751_v37, %v13613_v36  ;;  %8493 = vmatpush.bf16.msrb.mxu2 %v13104_v5  ;;  %v8942_v36 = vadd.f32 %v8941_v44, %v8940_v60 }
 0x59b   :  { %v11949_v49 = vld [vmem:[#allocation8 + $0x1270] sm:$0xf0] }
 0x59c   :  { %v14463_v7 = vld [vmem:[#allocation8 + $0x1634] sm:$0xf]  ;;  %v11952_v53 = vor.u32 %v14335_v18, %v11949_v49  ;;  %8506 = vmatpush.bf16.msrb.mxu3 %v13616_v27  ;;  %v8230_v18 = vpop.f32.mrf.mxu1 }
 0x59d   :  { %v12461_v40 = vld [vmem:[#allocation8 + $0x1670] sm:$0xf0] }
 0x59e   :  { %v14607_v62 = vld [vmem:[#allocation8 + $0x1ab4] sm:$0xf]  ;;  %v12464_v30 = vor.u32 %v14463_v7, %v12461_v40  ;;  %8469 = vmatpush.bf16.msrb.mxu0 %v11952_v53 }
 0x59f   :  { %v13037_v31 = vld [vmem:[#allocation8 + $0x1af0] sm:$0xf0] }
 0x5a0   :  { %v14735_v42 = vld [vmem:[#allocation8 + $0x1eb4] sm:$0xf]  ;;  %v13040_v63 = vor.u32 %v14607_v62, %v13037_v31  ;;  %8482 = vmatpush.bf16.msrb.mxu1 %v12464_v30  ;;  %v10611_v30 = vld [vmem:[#allocation8 + $0x7b8] sm:$0xf] }
 0x5a1   :  { %v13549_v22 = vld [vmem:[#allocation8 + $0x1ef0] sm:$0xf0] }
 0x5a2   :  { %v14319_v2 = vld [vmem:[#allocation8 + $0x11b4] sm:$0xf]  ;;  %v13552_v56 = vor.u32 %v14735_v42, %v13549_v22  ;;  %8494 = vmatpush.bf16.msrb.mxu2 %v13040_v63  ;;  %v10099_v22 = vld [vmem:[#allocation8 + $0x3b8] sm:$0xf] }
 0x5a3   :  { %v11885_v3 = vld [vmem:[#allocation8 + $0x11f0] sm:$0xf0] }
 0x5a4   :  { %v14447_v61 = vld [vmem:[#allocation8 + $0x15b4] sm:$0xf]  ;;  %v11888_v8 = vor.u32 %v14319_v2, %v11885_v3  ;;  %8507 = vmatpush.bf16.msrb.mxu3 %v13552_v56  ;;  %v14008_v2 = vld [vmem:[#allocation8 + $0x7f4] sm:$0xf0]  ;;  %v8800_v3 = vadd.f32 %v8799_v54, %v8798_v41  ;;  %v15869_v56 = vpop.f32.mrf.mxu3 }
 0x5a5   :  { %v12397_v10 = vld [vmem:[#allocation8 + $0x15f0] sm:$0xf0]  ;;  %v10483_v54 = vld [vmem:[#allocation8 + $0x6b8] sm:$0xf] }
 0x5a6   :  { %v14591_v51 = vld [vmem:[#allocation8 + $0x1a34] sm:$0xf]  ;;  %v12400_v12 = vor.u32 %v14447_v61, %v12397_v10  ;;  %8470 = vmatpush.bf16.msrb.mxu0 %v11888_v8  ;;  %v8943_v61 = vrot.slane %v8942_v36, 2  ;;  %v15867_v10 = vpop.f32.mrf.mxu2  ;;  %v8801_v44 = vrot.slane %v8800_v3, 1 }
 0x5a7   :  { %v12973_v48 = vld [vmem:[#allocation8 + $0x1a70] sm:$0xf0] }
 0x5a8   :  { %v14719_v50 = vld [vmem:[#allocation8 + $0x1e34] sm:$0xf]  ;;  %v12976_v26 = vor.u32 %v14591_v51, %v12973_v48  ;;  %8483 = vmatpush.bf16.msrb.mxu1 %v12400_v12  ;;  %v10612_v12 = vor.u32 %v14008_v2, %v10611_v30  ;;  %v8802_v18 = vadd.f32 %v8801_v44, %v8800_v3  ;;  %v13832_v30 = vld [vmem:[#allocation8 + $0x274] sm:$0xf0]  ;;  %v8267_v44 = vpop.f32.mrf.mxu0 }
 0x5a9   :  { %v13485_v52 = vld [vmem:[#allocation8 + $0x1e70] sm:$0xf0]  ;;  %v10419_v2 = vld [vmem:[#allocation8 + $0x638] sm:$0xf] }
 0x5aa   :  { %v14303_v21 = vld [vmem:[#allocation8 + $0x1134] sm:$0xf]  ;;  %v13488_v28 = vor.u32 %v14719_v50, %v13485_v52  ;;  %8495 = vmatpush.bf16.msrb.mxu2 %v12976_v26  ;;  %v10100_v50 = vor.u32 %v13880_v35, %v10099_v22  ;;  %v13992_v26 = vld [vmem:[#allocation8 + $0x774] sm:$0xf0] }
 0x5ab   :  { %v11821_v32 = vld [vmem:[#allocation8 + $0x1170] sm:$0xf0]  ;;  %v14248_v35 = vld [vmem:[#allocation8 + $0xf74] sm:$0xf0] }
 0x5ac   :  { %v14431_v16 = vld [vmem:[#allocation8 + $0x1534] sm:$0xf]  ;;  %v11824_v57 = vor.u32 %v14303_v21, %v11821_v32  ;;  %8508 = vmatpush.bf16.msrb.mxu3 %v13488_v28  ;;  %v10035_v21 = vld [vmem:[#allocation8 + $0x338] sm:$0xf]  ;;  %v8944_v28 = vadd.f32 %v8943_v61, %v8942_v36  ;;  %v15874_v61 = vmul.f32 0.25, %v8802_v18 }
 0x5ad   :  { %v12333_v23 = vld [vmem:[#allocation8 + $0x1570] sm:$0xf0]  ;;  %v13864_v32 = vld [vmem:[#allocation8 + $0x374] sm:$0xf0] }
 0x5ae   :  { %v14575_v19 = vld [vmem:[#allocation8 + $0x19b4] sm:$0xf]  ;;  %v12336_v38 = vor.u32 %v14431_v16, %v12333_v23  ;;  %8471 = vmatpush.bf16.msrb.mxu0 %v11824_v57  ;;  %v10547_v16 = vld [vmem:[#allocation8 + $0x738] sm:$0xf] }
 0x5af   :  { %v12909_v17 = vld [vmem:[#allocation8 + $0x19f0] sm:$0xf0]  ;;  %v13976_v36 = vld [vmem:[#allocation8 + $0x6f4] sm:$0xf0] }
 0x5b0   :  { %v14703_v13 = vld [vmem:[#allocation8 + $0x1db4] sm:$0xf]  ;;  %v12912_v9 = vor.u32 %v14575_v19, %v12909_v17  ;;  %8484 = vmatpush.bf16.msrb.mxu1 %v12336_v38  ;;  %v10036_v38 = vor.u32 %v13864_v32, %v10035_v21  ;;  %v10484_v22 = vor.u32 %v13976_v36, %v10483_v54  ;;  %v13960_v3 = vld [vmem:[#allocation8 + $0x674] sm:$0xf0] }
 0x5b1   :  { %v13421_v20 = vld [vmem:[#allocation8 + $0x1df0] sm:$0xf0]  ;;  %v14232_v21 = vld [vmem:[#allocation8 + $0xef4] sm:$0xf0] }
 0x5b2   :  { %v14287_v55 = vld [vmem:[#allocation8 + $0x10b4] sm:$0xf]  ;;  %v13424_v49 = vor.u32 %v14703_v13, %v13421_v20  ;;  %8496 = vmatpush.bf16.msrb.mxu2 %v12912_v9  ;;  %v11123_v20 = vld [vmem:[#allocation8 + $0xbb8] sm:$0xf] }
 0x5b3   :  { %v11757_v33 = vld [vmem:[#allocation8 + $0x10f0] sm:$0xf0]  ;;  %v13848_v9 = vld [vmem:[#allocation8 + $0x2f4] sm:$0xf0] }
 0x5b4   :  { %v14415_v15 = vld [vmem:[#allocation8 + $0x14b4] sm:$0xf]  ;;  %v11760_v7 = vor.u32 %v14287_v55, %v11757_v33  ;;  %8509 = vmatpush.bf16.msrb.mxu3 %v13424_v49  ;;  %v14136_v55 = vld [vmem:[#allocation8 + $0xbf4] sm:$0xf0]  ;;  %v8945_v49 = vrot.slane %v8944_v28, 1 }
 0x5b5   :  { %v12269_v39 = vld [vmem:[#allocation8 + $0x14f0] sm:$0xf0]  ;;  %v11635_v33 = vld [vmem:[#allocation8 + $0xfb8] sm:$0xf] }
 0x5b6   :  { %v14559_v6 = vld [vmem:[#allocation8 + $0x1934] sm:$0xf]  ;;  %v12272_v62 = vor.u32 %v14415_v15, %v12269_v39  ;;  %8472 = vmatpush.bf16.msrb.mxu0 %v11760_v7  ;;  %v10548_v15 = vor.u32 %v13992_v26, %v10547_v16  ;;  %v14264_v39 = vld [vmem:[#allocation8 + $0xff4] sm:$0xf0]  ;;  %v8243_v7 = vpop.f32.mrf.mxu2 }
 0x5b7   :  { %v12845_v37 = vld [vmem:[#allocation8 + $0x1970] sm:$0xf0]  ;;  %v9843_v32 = vld [vmem:[#allocation8 + $0x1b8] sm:$0xf] }
 0x5b8   :  { %v14687_v40 = vld [vmem:[#allocation8 + $0x1d34] sm:$0xf]  ;;  %v12848_v1 = vor.u32 %v14559_v6, %v12845_v37  ;;  %8485 = vmatpush.bf16.msrb.mxu1 %v12272_v62  ;;  %v1921_v6 = vperm.slane %v15794_v4, 3  ;;  %v8256_v62 = vpop.f32.mrf.mxu3  ;;  %v14120_v4 = vld [vmem:[#allocation8 + $0xb74] sm:$0xf0] }
 0x5b9   :  { %v13357_v5 = vld [vmem:[#allocation8 + $0x1d70] sm:$0xf0]  ;;  %v13816_v16 = vld [vmem:[#allocation8 + $0x1f4] sm:$0xf0] }
 0x5ba   :  { %v14271_v27 = vld [vmem:[#allocation8 + $0x1034] sm:$0xf]  ;;  %v13360_v63 = vor.u32 %v14687_v40, %v13357_v5  ;;  %8497 = vmatpush.bf16.msrb.mxu2 %v12848_v1  ;;  %v11124_v5 = vor.u32 %v14136_v55, %v11123_v20  ;;  %v9907_v1 = vld [vmem:[#allocation8 + $0x238] sm:$0xf] }
 0x5bb   :  { %v11693_v53 = vld [vmem:[#allocation8 + $0x1070] sm:$0xf0]  ;;  %v14088_v20 = vld [vmem:[#allocation8 + $0xa74] sm:$0xf0] }
 0x5bc   :  { %v14399_v31 = vld [vmem:[#allocation8 + $0x1434] sm:$0xf]  ;;  %v11696_v51 = vor.u32 %v14271_v27, %v11693_v53  ;;  %8510 = vmatpush.bf16.msrb.mxu3 %v13360_v63  ;;  %v11636_v27 = vor.u32 %v14264_v39, %v11635_v33  ;;  %v9972_v53 = vor.u32 %v13848_v9, %v9971_v25  ;;  %v8946_v63 = vadd.f32 %v8945_v49, %v8944_v28  ;;  %v11443_v55 = vld [vmem:[#allocation8 + $0xe38] sm:$0xf] }
 0x5bd   :  { %v12205_v42 = vld [vmem:[#allocation8 + $0x1470] sm:$0xf0]  ;;  %v14216_v39 = vld [vmem:[#allocation8 + $0xe74] sm:$0xf0] }
 0x5be   :  { %v14543_v48 = vld [vmem:[#allocation8 + $0x18b4] sm:$0xf]  ;;  %v12208_v8 = vor.u32 %v14399_v31, %v12205_v42  ;;  %8473 = vmatpush.bf16.msrb.mxu0 %v11696_v51  ;;  %v11059_v31 = vld [vmem:[#allocation8 + $0xb38] sm:$0xf]  ;;  %v8216_v51 = vadd.f32 %v15862_v46, %v1921_v6  ;;  %v8992_v26 = vmul.f32 0.25, %v8946_v63  ;;  %v11444_v36 = vor.u32 %v14216_v39, %v11443_v55 }
 0x5bf   :  { %v12781_v29 = vld [vmem:[#allocation8 + $0x18f0] sm:$0xf0]  ;;  %v11571_v42 = vld [vmem:[#allocation8 + $0xf38] sm:$0xf] }
 0x5c0   :  { %v14671_v52 = vld [vmem:[#allocation8 + $0x1cb4] sm:$0xf]  ;;  %v12784_v23 = vor.u32 %v14543_v48, %v12781_v29  ;;  %8486 = vmatpush.bf16.msrb.mxu1 %v12208_v8  ;;  %v11060_v48 = vor.u32 %v14120_v4, %v11059_v31  ;;  %v11572_v29 = vor.u32 %v14248_v35, %v11571_v42  ;;  %v9908_v8 = vor.u32 %v13832_v30, %v9907_v1  ;;  %v10355_v46 = vld [vmem:[#allocation8 + $0x5b8] sm:$0xf]  ;;  %v8269_v35 = vpop.f32.mrf.mxu0 }
 0x5c1   :  { %v13293_v60 = vld [vmem:[#allocation8 + $0x1cf0] sm:$0xf0]  ;;  %8474 = vmatmul.bf16.vlgmr.msrb.gmra.mxu0 %v15280_v43  ;;  %v9779_v25 = vld [vmem:[#allocation8 + $0x138] sm:$0xf] }
 0x5c2   :  { %v14527_v19 = vld [vmem:[#allocation8 + $0x1834] sm:$0xf]  ;;  %v13296_v57 = vor.u32 %v14671_v52, %v13293_v60  ;;  %8518 = vmatpush.bf16.msra.mxu0 %v10100_v50  ;;  %8498 = vmatpush.bf16.msrb.mxu2 %v12784_v23  ;;  %v10995_v50 = vld [vmem:[#allocation8 + $0xab8] sm:$0xf] }
 0x5c3   :  { %v12717_v41 = vld [vmem:[#allocation8 + $0x1870] sm:$0xf0]  ;;  %8487 = vmatmul.bf16.vlgmr.msrb.gmra.mxu1 %v15290_v14  ;;  %v14104_v52 = vld [vmem:[#allocation8 + $0xaf4] sm:$0xf0] }
 0x5c4   :  { %v14655_v17 = vld [vmem:[#allocation8 + $0x1c34] sm:$0xf]  ;;  %8531 = vmatpush.bf16.msra.mxu1 %v10612_v12  ;;  %v12720_v37 = vor.u32 %v14527_v19, %v12717_v41  ;;  %8511 = vmatpush.bf16.msrb.mxu3 %v13296_v57  ;;  %v11507_v60 = vld [vmem:[#allocation8 + $0xeb8] sm:$0xf]  ;;  %v10420_v12 = vor.u32 %v13960_v3, %v10419_v2  ;;  %v9008_v19 = vmul.f32 %v15874_v61, %v15874_v61  ;;  %v8280_v57 = vpop.f32.mrf.mxu1 }
 0x5c5   :  { %v13229_v13 = vld [vmem:[#allocation8 + $0x1c70] sm:$0xf0]  ;;  %v13944_v23 = vld [vmem:[#allocation8 + $0x5f4] sm:$0xf0]  ;;  %v8229_v41 = vadd.f32 %v15864_v34, %v8216_v51  ;;  %v10996_v28 = vor.u32 %v14104_v52, %v10995_v50 }
 0x5c6   :  { %v13232_v40 = vor.u32 %v14655_v17, %v13229_v13  ;;  %8519 = vmatpush.bf16.msra.mxu0 %v10036_v38  ;;  %8499 = vmatpush.bf16.msrb.mxu2 %v12720_v37  ;;  %v11508_v17 = vor.u32 %v14232_v21, %v11507_v60  ;;  %v9844_v13 = vor.u32 %v13816_v16, %v9843_v32  ;;  %v10931_v38 = vld [vmem:[#allocation8 + $0xa38] sm:$0xf] }
 0x5c7   :  { %v8242_v33 = vadd.f32 %v15867_v10, %v8229_v41  ;;  %v13800_v9 = vld [vmem:[#allocation8 + $0x174] sm:$0xf0]  ;;  %v9024_v37 = vsub.f32 %v8992_v26, %v9008_v19  ;;  %v10932_v54 = vor.u32 %v14088_v20, %v10931_v38  ;;  %v8293_v19 = vpop.f32.mrf.mxu2  ;;  %v8306_v38 = vpop.f32.mrf.mxu3 }
 0x5c8   :  { %8532 = vmatpush.bf16.msra.mxu1 %v10548_v15  ;;  %8512 = vmatpush.bf16.msrb.mxu3 %v13232_v40  ;;  %v10356_v15 = vor.u32 %v13944_v23, %v10355_v46  ;;  %v10291_v6 = vld [vmem:[#allocation8 + $0x538] sm:$0xf]  ;;  %v9780_v18 = vor.u32 %v13800_v9, %v9779_v25 }
 0x5c9   :  { %8500 = vmatmul.bf16.vlgmr.msrb.gmra.mxu2 %v15309_v11  ;;  %v13928_v34 = vld [vmem:[#allocation8 + $0x574] sm:$0xf0]  ;;  %v9040_v42 = vmax.f32 %v9024_v37, 0.0 }
 0x5ca   :  { %8544 = vmatpush.bf16.msra.mxu2 %v11124_v5  ;;  %8520 = vmatpush.bf16.msra.mxu0 %v9972_v53  ;;  %v10867_v49 = vld [vmem:[#allocation8 + $0x9b8] sm:$0xf]  ;;  %v8255_v5 = vadd.f32 %v15869_v56, %v8242_v33  ;;  %v10292_v10 = vor.u32 %v13928_v34, %v10291_v6 }
 0x5cb   :  { %8513 = vmatmul.bf16.vlgmr.msrb.gmra.mxu3 %v15318_v24  ;;  %v14072_v7 = vld [vmem:[#allocation8 + $0x9f4] sm:$0xf0]  ;;  %v15884_v26 = vadd.f32 1e-05, %v9040_v42 }
 0x5cc   :  { %8557 = vmatpush.bf16.msra.mxu3 %v11636_v27  ;;  %8533 = vmatpush.bf16.msra.mxu1 %v10484_v22  ;;  %v11379_v40 = vld [vmem:[#allocation8 + $0xdb8] sm:$0xf]  ;;  %v8268_v22 = vadd.f32 %v8267_v44, %v8255_v5  ;;  %v10868_v1 = vor.u32 %v14072_v7, %v10867_v49  ;;  %v8282_v2 = vpop.f32.mrf.mxu1 }
 0x5cd   :  { %v14200_v62 = vld [vmem:[#allocation8 + $0xdf4] sm:$0xf0]  ;;  %14823 = vrsqrt.f32 %v15884_v26  ;;  %vm9168_vm11 = vweird.f32 %v15884_v26 }
 0x5ce   :  { %8545 = vmatpush.bf16.msra.mxu2 %v11060_v48  ;;  %8521 = vmatpush.bf16.msra.mxu0 %v9908_v8  ;;  %v9715_v27 = vld [vmem:[#allocation8 + $0xb8] sm:$0xf]  ;;  %v11380_v3 = vor.u32 %v14200_v62, %v11379_v40  ;;  %v8281_v32 = vadd.f32 %v8280_v57, %v8268_v22 }
 0x5cf   :  { %v13784_v53 = vld [vmem:[#allocation8 + $0xf4] sm:$0xf0] }
 0x5d0   :  { %8558 = vmatpush.bf16.msra.mxu3 %v11572_v29  ;;  %8534 = vmatpush.bf16.msra.mxu1 %v10420_v12  ;;  %v10227_v31 = vld [vmem:[#allocation8 + $0x4b8] sm:$0xf]  ;;  %v9716_v63 = vor.u32 %v13784_v53, %v9715_v27 }
 0x5d1   :  { %v13912_v4 = vld [vmem:[#allocation8 + $0x4f4] sm:$0xf0] }
 0x5d2   :  { %8546 = vmatpush.bf16.msra.mxu2 %v10996_v28  ;;  %8522 = vmatpush.bf16.msra.mxu0 %v9844_v13  ;;  %v10803_v30 = vld [vmem:[#allocation8 + $0x938] sm:$0xf]  ;;  %v10228_v29 = vor.u32 %v13912_v4, %v10227_v31  ;;  %v8294_v13 = vadd.f32 %v8293_v19, %v8281_v32 }
 0x5d3   :  { %v14056_v51 = vld [vmem:[#allocation8 + $0x974] sm:$0xf0] }
 0x5d4   :  { %8559 = vmatpush.bf16.msra.mxu3 %v11508_v17  ;;  %8535 = vmatpush.bf16.msra.mxu1 %v10356_v15  ;;  %v11315_v56 = vld [vmem:[#allocation8 + $0xd38] sm:$0xf]  ;;  %v10804_v16 = vor.u32 %v14056_v51, %v10803_v30  ;;  %v15886_v34 = vadd.f32 %v8306_v38, %v8294_v13 }
 0x5d5   :  { %v14184_v48 = vld [vmem:[#allocation8 + $0xd74] sm:$0xf0] }
 0x5d6   :  { %8547 = vmatpush.bf16.msra.mxu2 %v10932_v54  ;;  %8523 = vmatpush.bf16.msra.mxu0 %v9780_v18  ;;  %v9651_v8 = vld [vmem:[#allocation8 + $0x38] sm:$0xf]  ;;  %v11316_v41 = vor.u32 %v14184_v48, %v11315_v56  ;;  %v8865_v62 = vmul.f32 %v15886_v34, %v15886_v34  ;;  %v8295_v56 = vpop.f32.mrf.mxu2 }
 0x5d7   :  { %v13768_v50 = vld [vmem:[#allocation8 + $0x74] sm:$0xf0] }
 0x5d8   :  { %8560 = vmatpush.bf16.msra.mxu3 %v11444_v36  ;;  %8536 = vmatpush.bf16.msra.mxu1 %v10292_v10  ;;  %v10163_v52 = vld [vmem:[#allocation8 + $0x438] sm:$0xf]  ;;  %v9652_v44 = vor.u32 %v13768_v50, %v9651_v8  ;;  %v8803_v10 = vsel %vm601_vm0, %v15886_v34, 0.0  ;;  %v8308_v50 = vpop.f32.mrf.mxu3 }
 0x5d9   :  { %v13896_v60 = vld [vmem:[#allocation8 + $0x474] sm:$0xf0]  ;;  %v8804_v4 = vrot.slane %v8803_v10, 4 }
 0x5da   :  { %v12147_v12 = vld [vmem:[#allocation8 + $0x13b8] sm:$0xf]  ;;  %8548 = vmatpush.bf16.msra.mxu2 %v10868_v1  ;;  %8524 = vmatpush.bf16.msra.mxu0 %v9716_v63  ;;  %v10164_v20 = vor.u32 %v13896_v60, %v10163_v52  ;;  %v8947_v1 = vsel %vm601_vm0, %v8865_v62, 0.0 }
 0x5db   :  { %v14392_v21 = vld [vmem:[#allocation8 + $0x13f4] sm:$0xf0]  ;;  %v8805_v63 = vadd.f32 %v8804_v4, %v8803_v10  ;;  %v8948_v51 = vrot.slane %v8947_v1, 4 }
 0x5dc   :  { %v12659_v46 = vld [vmem:[#allocation8 + $0x17b8] sm:$0xf]  ;;  %8561 = vmatpush.bf16.msra.mxu3 %v11380_v3  ;;  %8537 = vmatpush.bf16.msra.mxu1 %v10228_v29  ;;  %v12148_v55 = vor.u32 %v14392_v21, %v12147_v12 }
 0x5dd   :  { %v14520_v23 = vld [vmem:[#allocation8 + $0x17f4] sm:$0xf0] }
 0x5de   :  { %v10739_v28 = vld [vmem:[#allocation8 + $0x8b8] sm:$0xf]  ;;  %v12660_v39 = vor.u32 %v14520_v23, %v12659_v46  ;;  %8549 = vmatpush.bf16.msra.mxu2 %v10804_v16  ;;  %8525 = vmatpush.bf16.msra.mxu0 %v9652_v44  ;;  %v8806_v16 = vrot.slane %v8805_v63, 2  ;;  %v8949_v46 = vadd.f32 %v8948_v51, %v8947_v1 }
 0x5df   :  { %v14040_v17 = vld [vmem:[#allocation8 + $0x8f4] sm:$0xf0] }
 0x5e0   :  { %v11251_v33 = vld [vmem:[#allocation8 + $0xcb8] sm:$0xf]  ;;  %v10740_v37 = vor.u32 %v14040_v17, %v10739_v28  ;;  %8562 = vmatpush.bf16.msra.mxu3 %v11316_v41  ;;  %8538 = vmatpush.bf16.msra.mxu1 %v10164_v20  ;;  %v8807_v17 = vadd.f32 %v8806_v16, %v8805_v63  ;;  %v8950_v13 = vrot.slane %v8949_v46, 2  ;;  %v15896_v20 = vld [vmem:[#allocation10 + $0x8] sm:$0xff] }
 0x5e1   :  { %v14168_v57 = vld [vmem:[#allocation8 + $0xcf4] sm:$0xf0]  ;;  %8526 = vmatmul.bf16.vlgmr.msra.gmra.mxu0 %v15185_v45 }
 0x5e2   :  { %v12083_v15 = vld [vmem:[#allocation8 + $0x1338] sm:$0xf]  ;;  %v11252_v49 = vor.u32 %v14168_v57, %v11251_v33  ;;  %8570 = vmatpush.bf16.msrb.mxu0 %v12148_v55  ;;  %8550 = vmatpush.bf16.msra.mxu2 %v10740_v37  ;;  %v1922_v55 = vperm.slane %v15896_v20, 4  ;;  %v15899_v57 = vpop.eup %14823  ;;  %v8808_v37 = vrot.slane %v8807_v17, 1 }
 0x5e3   :  { %v14376_v25 = vld [vmem:[#allocation8 + $0x1374] sm:$0xf0]  ;;  %8539 = vmatmul.bf16.vlgmr.msra.gmra.mxu1 %v15189_v58  ;;  %vm9169_vm10 = vweird.f32 %v15899_v57 }
 0x5e4   :  { %v12595_v9 = vld [vmem:[#allocation8 + $0x1738] sm:$0xf]  ;;  %v12084_v27 = vor.u32 %v14376_v25, %v12083_v15  ;;  %8583 = vmatpush.bf16.msrb.mxu1 %v12660_v39  ;;  %8563 = vmatpush.bf16.msra.mxu3 %v11252_v49  ;;  %v8809_v10 = vadd.f32 %v8808_v37, %v8807_v17  ;;  %vm15930_vm12 = vmor %vm9168_vm11, %vm9169_vm10 }
 0x5e5   :  { %v14504_v6 = vld [vmem:[#allocation8 + $0x1774] sm:$0xf0] }
 0x5e6   :  { %v10675_v54 = vld [vmem:[#allocation8 + $0x838] sm:$0xf]  ;;  %v12596_v42 = vor.u32 %v14504_v6, %v12595_v9  ;;  %8571 = vmatpush.bf16.msrb.mxu0 %v12084_v27  ;;  %v8319_v27 = vpop.f32.mrf.mxu0 }
 0x5e7   :  { %v14024_v36 = vld [vmem:[#allocation8 + $0x874] sm:$0xf0]  ;;  %v8320_v4 = vadd.f32 %v8319_v27, %v1922_v55 }
 0x5e8   :  { %v11187_v18 = vld [vmem:[#allocation8 + $0xc38] sm:$0xf]  ;;  %v10676_v30 = vor.u32 %v14024_v36, %v10675_v54  ;;  %8584 = vmatpush.bf16.msrb.mxu1 %v12596_v42  ;;  %v8951_v54 = vadd.f32 %v8950_v13, %v8949_v46  ;;  %v8332_v42 = vpop.f32.mrf.mxu1 }
 0x5e9   :  { %v14152_v7 = vld [vmem:[#allocation8 + $0xc74] sm:$0xf0] }
 0x5ea   :  { %v13171_v40 = vld [vmem:[#allocation8 + $0x1bb8] sm:$0xf]  ;;  %v11188_v48 = vor.u32 %v14152_v7, %v11187_v18  ;;  %8551 = vmatpush.bf16.msra.mxu2 %v10676_v30  ;;  %v8952_v62 = vrot.slane %v8951_v54, 1 }
 0x5eb   :  { %v14648_v5 = vld [vmem:[#allocation8 + $0x1bf4] sm:$0xf0] }
 0x5ec   :  { %v13683_v53 = vld [vmem:[#allocation8 + $0x1fb8] sm:$0xf]  ;;  %v13172_v29 = vor.u32 %v14648_v5, %v13171_v40  ;;  %8564 = vmatpush.bf16.msra.mxu3 %v11188_v48  ;;  %v9163_v5 = vmul.f32 %v15899_v57, %v15884_v26  ;;  %v8953_v63 = vadd.f32 %v8952_v62, %v8951_v54 }
 0x5ed   :  { %v14776_v31 = vld [vmem:[#allocation8 + $0x1ff4] sm:$0xf0]  ;;  %8552 = vmatmul.bf16.vlgmr.msra.gmra.mxu2 %v15218_v59 }
 0x5ee   :  { %v12019_v22 = vld [vmem:[#allocation8 + $0x12b8] sm:$0xf]  ;;  %v13684_v52 = vor.u32 %v14776_v31, %v13683_v53  ;;  %8596 = vmatpush.bf16.msrb.mxu2 %v13172_v29  ;;  %v8333_v29 = vadd.f32 %v8332_v42, %v8320_v4  ;;  %v14000_v42 = vld [vmem:[#allocation8 + $0x7bc] sm:$0xf] }
 0x5ef   :  { %v14360_v35 = vld [vmem:[#allocation8 + $0x12f4] sm:$0xf0]  ;;  %8565 = vmatmul.bf16.vlgmr.msra.gmra.mxu3 %v15235_v0 }
 0x5f0   :  { %v12531_v2 = vld [vmem:[#allocation8 + $0x16b8] sm:$0xf]  ;;  %v12020_v60 = vor.u32 %v14360_v35, %v12019_v22  ;;  %8609 = vmatpush.bf16.msrb.mxu3 %v13684_v52  ;;  %v9164_v52 = vmul.f32 %v15899_v57, %v9163_v5  ;;  %v8334_v37 = vpop.f32.mrf.mxu1 }
 0x5f1   :  { %v14488_v3 = vld [vmem:[#allocation8 + $0x16f4] sm:$0xf0]  ;;  %v9973_v37 = vld [vmem:[#allocation8 + $0x2f8] sm:$0xf0] }
 0x5f2   :  { %v13107_v8 = vld [vmem:[#allocation8 + $0x1b38] sm:$0xf]  ;;  %v12532_v23 = vor.u32 %v14488_v3, %v12531_v2  ;;  %8572 = vmatpush.bf16.msrb.mxu0 %v12020_v60  ;;  %v15905_v3 = vmul.f32 0.25, %v8809_v10  ;;  %v8993_v60 = vmul.f32 0.25, %v8953_v63 }
 0x5f3   :  { %v14632_v12 = vld [vmem:[#allocation8 + $0x1b74] sm:$0xf0] }
 0x5f4   :  { %v13619_v21 = vld [vmem:[#allocation8 + $0x1f38] sm:$0xf]  ;;  %v13108_v38 = vor.u32 %v14632_v12, %v13107_v8  ;;  %8585 = vmatpush.bf16.msrb.mxu1 %v12532_v23  ;;  %v9009_v12 = vmul.f32 %v15905_v3, %v15905_v3 }
 0x5f5   :  { %v14760_v32 = vld [vmem:[#allocation8 + $0x1f74] sm:$0xf0] }
 0x5f6   :  { %v11955_v19 = vld [vmem:[#allocation8 + $0x1238] sm:$0xf]  ;;  %v13620_v15 = vor.u32 %v14760_v32, %v13619_v21  ;;  %8597 = vmatpush.bf16.msrb.mxu2 %v13108_v38 }
 0x5f7   :  { %v14344_v41 = vld [vmem:[#allocation8 + $0x1274] sm:$0xf0] }
 0x5f8   :  { %v12467_v44 = vld [vmem:[#allocation8 + $0x1638] sm:$0xf]  ;;  %v11956_v39 = vor.u32 %v14344_v41, %v11955_v19  ;;  %8610 = vmatpush.bf16.msrb.mxu3 %v13620_v15  ;;  %v9025_v41 = vsub.f32 %v8993_v60, %v9009_v12 }
 0x5f9   :  { %v14472_v28 = vld [vmem:[#allocation8 + $0x1674] sm:$0xf0] }
 0x5fa   :  { %v13043_v33 = vld [vmem:[#allocation8 + $0x1ab8] sm:$0xf]  ;;  %v12468_v36 = vor.u32 %v14472_v28, %v12467_v44  ;;  %8573 = vmatpush.bf16.msrb.mxu0 %v11956_v39  ;;  %v9041_v15 = vmax.f32 %v9025_v41, 0.0  ;;  %v8321_v39 = vpop.f32.mrf.mxu0 }
 0x5fb   :  { %v14616_v25 = vld [vmem:[#allocation8 + $0x1af4] sm:$0xf0] }
 0x5fc   :  { %v13555_v9 = vld [vmem:[#allocation8 + $0x1eb8] sm:$0xf]  ;;  %v13044_v53 = vor.u32 %v14616_v25, %v13043_v33  ;;  %8586 = vmatpush.bf16.msrb.mxu1 %v12468_v36  ;;  %v15910_v33 = vmul.f32 0.5, %v9164_v52 }
 0x5fd   :  { %v14744_v6 = vld [vmem:[#allocation8 + $0x1ef4] sm:$0xf0] }
 0x5fe   :  { %v11891_v18 = vld [vmem:[#allocation8 + $0x11b8] sm:$0xf]  ;;  %v13556_v22 = vor.u32 %v14744_v6, %v13555_v9  ;;  %8598 = vmatpush.bf16.msrb.mxu2 %v13044_v53  ;;  %v13872_v53 = vld [vmem:[#allocation8 + $0x3bc] sm:$0xf]  ;;  %v9166_v60 = vsub.f32 1.5, %v15910_v33 }
 0x5ff   :  { %v14328_v49 = vld [vmem:[#allocation8 + $0x11f4] sm:$0xf0]  ;;  %v11125_v33 = vld [vmem:[#allocation8 + $0xbf8] sm:$0xf0] }
 0x600   :  { %v12403_v7 = vld [vmem:[#allocation8 + $0x15b8] sm:$0xf]  ;;  %v11892_v35 = vor.u32 %v14328_v49, %v11891_v18  ;;  %8611 = vmatpush.bf16.msrb.mxu3 %v13556_v22  ;;  %v10613_v22 = vld [vmem:[#allocation8 + $0x7f8] sm:$0xf0] }
 0x601   :  { %v14456_v40 = vld [vmem:[#allocation8 + $0x15f4] sm:$0xf0]  ;;  %v10616_v12 = vor.u32 %v14000_v42, %v10613_v22  ;;  %v11061_v42 = vld [vmem:[#allocation8 + $0xb78] sm:$0xf0] }
 0x602   :  { %v12979_v31 = vld [vmem:[#allocation8 + $0x1a38] sm:$0xf]  ;;  %v12404_v51 = vor.u32 %v14456_v40, %v12403_v7  ;;  %8574 = vmatpush.bf16.msrb.mxu0 %v11892_v35  ;;  %v15912_v40 = vadd.f32 1e-05, %v9041_v15  ;;  %v8345_v35 = vpop.f32.mrf.mxu2  ;;  %v14256_v15 = vld [vmem:[#allocation8 + $0xfbc] sm:$0xf] }
 0x603   :  { %v14600_v1 = vld [vmem:[#allocation8 + $0x1a74] sm:$0xf0]  ;;  %v14240_v22 = vld [vmem:[#allocation8 + $0xf3c] sm:$0xf] }
 0x604   :  { %v13491_v30 = vld [vmem:[#allocation8 + $0x1e38] sm:$0xf]  ;;  %v12980_v21 = vor.u32 %v14600_v1, %v12979_v31  ;;  %8587 = vmatpush.bf16.msrb.mxu1 %v12404_v51  ;;  %v10101_v31 = vld [vmem:[#allocation8 + $0x3f8] sm:$0xf0]  ;;  %14825 = vrsqrt.f32 %v15912_v40  ;;  %v8346_v51 = vadd.f32 %v8345_v35, %v8333_v29  ;;  %vm9178_vm14 = vweird.f32 %v15912_v40 }
 0x605   :  { %v14728_v2 = vld [vmem:[#allocation8 + $0x1e74] sm:$0xf0]  ;;  %v11573_v35 = vld [vmem:[#allocation8 + $0xf78] sm:$0xf0] }
 0x606   :  { %v11827_v56 = vld [vmem:[#allocation8 + $0x1138] sm:$0xf]  ;;  %v13492_v32 = vor.u32 %v14728_v2, %v13491_v30  ;;  %8599 = vmatpush.bf16.msrb.mxu2 %v12980_v21  ;;  %v13856_v21 = vld [vmem:[#allocation8 + $0x33c] sm:$0xf] }
 0x607   :  { %v14312_v48 = vld [vmem:[#allocation8 + $0x1174] sm:$0xf0] }
 0x608   :  { %v12339_v8 = vld [vmem:[#allocation8 + $0x1538] sm:$0xf]  ;;  %v11828_v16 = vor.u32 %v14312_v48, %v11827_v56  ;;  %8612 = vmatpush.bf16.msrb.mxu3 %v13492_v32  ;;  %v8358_v56 = vpop.f32.mrf.mxu3  ;;  %v10037_v32 = vld [vmem:[#allocation8 + $0x378] sm:$0xf0] }
 0x609   :  { %v14440_v50 = vld [vmem:[#allocation8 + $0x1574] sm:$0xf0] }
 0x60a   :  { %v12915_v46 = vld [vmem:[#allocation8 + $0x19b8] sm:$0xf]  ;;  %v12340_v44 = vor.u32 %v14440_v50, %v12339_v8  ;;  %8575 = vmatpush.bf16.msrb.mxu0 %v11828_v16  ;;  %v10104_v8 = vor.u32 %v13872_v53, %v10101_v31  ;;  %v15916_v16 = vadd.f32 %v8358_v56, %v8346_v51  ;;  %v13952_v51 = vld [vmem:[#allocation8 + $0x63c] sm:$0xf] }
 0x60b   :  { %v14584_v23 = vld [vmem:[#allocation8 + $0x19f4] sm:$0xf0]  ;;  %v10421_v56 = vld [vmem:[#allocation8 + $0x678] sm:$0xf0] }
 0x60c   :  { %v13427_v19 = vld [vmem:[#allocation8 + $0x1db8] sm:$0xf]  ;;  %v12916_v25 = vor.u32 %v14584_v23, %v12915_v46  ;;  %8588 = vmatpush.bf16.msrb.mxu1 %v12340_v44  ;;  %v13984_v23 = vld [vmem:[#allocation8 + $0x73c] sm:$0xf] }
 0x60d   :  { %v14712_v28 = vld [vmem:[#allocation8 + $0x1df4] sm:$0xf0] }
 0x60e   :  { %v11763_v17 = vld [vmem:[#allocation8 + $0x10b8] sm:$0xf]  ;;  %v13428_v54 = vor.u32 %v14712_v28, %v13427_v19  ;;  %8600 = vmatpush.bf16.msrb.mxu2 %v12916_v25  ;;  %v10549_v19 = vld [vmem:[#allocation8 + $0x778] sm:$0xf0] }
 0x60f   :  { %v14296_v13 = vld [vmem:[#allocation8 + $0x10f4] sm:$0xf0]  ;;  %v10552_v25 = vor.u32 %v13984_v23, %v10549_v19  ;;  %v9232_v23 = vsub.f32 %v15854_v47, %v15874_v61  ;;  %v10357_v47 = vld [vmem:[#allocation8 + $0x5f8] sm:$0xf0] }
 0x610   :  { %v12275_v38 = vld [vmem:[#allocation8 + $0x14b8] sm:$0xf]  ;;  %v11764_v36 = vor.u32 %v14296_v13, %v11763_v17  ;;  %8613 = vmatpush.bf16.msrb.mxu3 %v13428_v54  ;;  %v15918_v13 = vpop.eup %14825  ;;  %v8360_v53 = vpop.f32.mrf.mxu3 }
 0x611   :  { %v14424_v55 = vld [vmem:[#allocation8 + $0x14f4] sm:$0xf0]  ;;  %v9173_v39 = vmul.f32 %v15918_v13, %v15912_v40  ;;  %vm9179_vm13 = vweird.f32 %v15918_v13  ;;  %v8371_v40 = vpop.f32.mrf.mxu0 }
 0x612   :  { %v12851_v9 = vld [vmem:[#allocation8 + $0x1938] sm:$0xf]  ;;  %v12276_v5 = vor.u32 %v14424_v55, %v12275_v38  ;;  %8576 = vmatpush.bf16.msrb.mxu0 %v11764_v36  ;;  %v10040_v38 = vor.u32 %v13856_v21, %v10037_v32  ;;  %v14128_v55 = vld [vmem:[#allocation8 + $0xbbc] sm:$0xf]  ;;  %vm9180_vm15 = vmor %vm9178_vm14, %vm9179_vm13 }
 0x613   :  { %v14568_v6 = vld [vmem:[#allocation8 + $0x1974] sm:$0xf0]  ;;  %v13968_v36 = vld [vmem:[#allocation8 + $0x6bc] sm:$0xf] }
 0x614   :  { %v13363_v18 = vld [vmem:[#allocation8 + $0x1d38] sm:$0xf]  ;;  %v12852_v4 = vor.u32 %v14568_v6, %v12851_v9  ;;  %8589 = vmatpush.bf16.msrb.mxu1 %v12276_v5  ;;  %v11637_v9 = vld [vmem:[#allocation8 + $0xff8] sm:$0xf0] }
 0x615   :  { %v14696_v49 = vld [vmem:[#allocation8 + $0x1d74] sm:$0xf0]  ;;  %v13840_v6 = vld [vmem:[#allocation8 + $0x2bc] sm:$0xf]  ;;  %v11640_v31 = vor.u32 %v14256_v15, %v11637_v9  ;;  %v8372_v15 = vadd.f32 %v8371_v40, %v15916_v16 }
 0x616   :  { %v11699_v7 = vld [vmem:[#allocation8 + $0x1038] sm:$0xf]  ;;  %v13364_v1 = vor.u32 %v14696_v49, %v13363_v18  ;;  %8601 = vmatpush.bf16.msrb.mxu2 %v12852_v4  ;;  %v10485_v18 = vld [vmem:[#allocation8 + $0x6f8] sm:$0xf0]  ;;  %v9174_v49 = vmul.f32 %v15918_v13, %v9173_v39  ;;  %v9976_v4 = vor.u32 %v13840_v6, %v9973_v37  ;;  %v8384_v39 = vpop.f32.mrf.mxu1 }
 0x617   :  { %v14280_v10 = vld [vmem:[#allocation8 + $0x1074] sm:$0xf0]  ;;  %v10997_v21 = vld [vmem:[#allocation8 + $0xaf8] sm:$0xf0] }
 0x618   :  { %v12211_v62 = vld [vmem:[#allocation8 + $0x1438] sm:$0xf]  ;;  %v11700_v30 = vor.u32 %v14280_v10, %v11699_v7  ;;  %8614 = vmatpush.bf16.msrb.mxu3 %v13364_v1  ;;  %v8347_v7 = vpop.f32.mrf.mxu2  ;;  %v11128_v10 = vor.u32 %v14128_v55, %v11125_v33  ;;  %v9175_v1 = vmul.f32 0.5, %v9174_v49  ;;  %v14224_v32 = vld [vmem:[#allocation8 + $0xebc] sm:$0xf] }
 0x619   :  { %v14408_v27 = vld [vmem:[#allocation8 + $0x1474] sm:$0xf0]  ;;  %v14080_v9 = vld [vmem:[#allocation8 + $0xa3c] sm:$0xf] }
 0x61a   :  { %v12787_v2 = vld [vmem:[#allocation8 + $0x18b8] sm:$0xf]  ;;  %v12212_v48 = vor.u32 %v14408_v27, %v12211_v62  ;;  %8577 = vmatpush.bf16.msrb.mxu0 %v11700_v30  ;;  %v14112_v62 = vld [vmem:[#allocation8 + $0xb3c] sm:$0xf]  ;;  %v9167_v27 = vmul.f32 %v15899_v57, %v9166_v60  ;;  %v10488_v30 = vor.u32 %v13968_v36, %v10485_v18  ;;  %v11576_v60 = vor.u32 %v14240_v22, %v11573_v35 }
 0x61b   :  { %v14552_v63 = vld [vmem:[#allocation8 + $0x18f4] sm:$0xf0]  ;;  %v11445_v37 = vld [vmem:[#allocation8 + $0xe78] sm:$0xf0]  ;;  %v15950_v18 = vadd.f32 %v8384_v39, %v8372_v15 }
 0x61c   :  { %v13299_v50 = vld [vmem:[#allocation8 + $0x1cb8] sm:$0xf]  ;;  %v12788_v46 = vor.u32 %v14552_v63, %v12787_v2  ;;  %8590 = vmatpush.bf16.msrb.mxu1 %v12212_v48  ;;  %v13824_v2 = vld [vmem:[#allocation8 + $0x23c] sm:$0xf]  ;;  %v9171_v26 = vsel %vm15930_vm12, %v15899_v57, %v9167_v27 }
 0x61d   :  { %v14680_v52 = vld [vmem:[#allocation8 + $0x1cf4] sm:$0xf0]  ;;  %8578 = vmatmul.bf16.vlgmr.msrb.gmra.mxu0 %v15280_v43  ;;  %v9909_v63 = vld [vmem:[#allocation8 + $0x278] sm:$0xf0]  ;;  %v9248_v61 = vmul.f32 %v9232_v23, %v9171_v26 }
 0x61e   :  { %v12723_v41 = vld [vmem:[#allocation8 + $0x1838] sm:$0xf]  ;;  %v13300_v29 = vor.u32 %v14680_v52, %v13299_v50  ;;  %8622 = vmatpush.bf16.msra.mxu0 %v10104_v8  ;;  %8602 = vmatpush.bf16.msrb.mxu2 %v12788_v46  ;;  %v9176_v8 = vsub.f32 1.5, %v9175_v1  ;;  %v11064_v50 = vor.u32 %v14112_v62, %v11061_v42  ;;  %v14096_v52 = vld [vmem:[#allocation8 + $0xabc] sm:$0xf] }
 0x61f   :  { %v14536_v44 = vld [vmem:[#allocation8 + $0x1874] sm:$0xf0]  ;;  %8591 = vmatmul.bf16.vlgmr.msrb.gmra.mxu1 %v15290_v14  ;;  %v11509_v46 = vld [vmem:[#allocation8 + $0xef8] sm:$0xf0]  ;;  %v9264_v16 = vmax.f32 %v9248_v61, 0.0 }
 0x620   :  { %v13235_v28 = vld [vmem:[#allocation8 + $0x1c38] sm:$0xf]  ;;  %8635 = vmatpush.bf16.msra.mxu1 %v10616_v12  ;;  %v12724_v54 = vor.u32 %v14536_v44, %v12723_v41  ;;  %8615 = vmatpush.bf16.msrb.mxu3 %v13300_v29  ;;  %v9912_v12 = vor.u32 %v13824_v2, %v9909_v63  ;;  %v9177_v19 = vmul.f32 %v15918_v13, %v9176_v8  ;;  %v13808_v29 = vld [vmem:[#allocation8 + $0x1bc] sm:$0xf]  ;;  %v8386_v8 = vpop.f32.mrf.mxu1 }
 0x621   :  { %v14664_v17 = vld [vmem:[#allocation8 + $0x1c74] sm:$0xf0]  ;;  %v10424_v41 = vor.u32 %v13952_v51, %v10421_v56  ;;  %v9845_v57 = vld [vmem:[#allocation8 + $0x1f8] sm:$0xf0]  ;;  %v9233_v44 = vsub.f32 %v15886_v34, %v15905_v3  ;;  %v11512_v55 = vor.u32 %v14224_v32, %v11509_v46  ;;  %v8373_v51 = vpop.f32.mrf.mxu0 }
 0x622   :  { %v13236_v5 = vor.u32 %v14664_v17, %v13235_v28  ;;  %8623 = vmatpush.bf16.msra.mxu0 %v10040_v38  ;;  %8603 = vmatpush.bf16.msrb.mxu2 %v12724_v54  ;;  %v13936_v28 = vld [vmem:[#allocation8 + $0x5bc] sm:$0xf]  ;;  %v9181_v17 = vsel %vm9180_vm15, %v15918_v13, %v9177_v19  ;;  %v11000_v38 = vor.u32 %v14096_v52, %v10997_v21 }
 0x623   :  { %v9249_v33 = vmul.f32 %v9233_v44, %v9181_v17  ;;  %v10933_v34 = vld [vmem:[#allocation8 + $0xa78] sm:$0xf0]  ;;  %v10360_v6 = vor.u32 %v13936_v28, %v10357_v47  ;;  %v15953_v47 = vpop.f32.mrf.mxu2 }
 0x624   :  { %8636 = vmatpush.bf16.msra.mxu1 %v10552_v25  ;;  %8616 = vmatpush.bf16.msrb.mxu3 %v13236_v5  ;;  %v9848_v25 = vor.u32 %v13808_v29, %v9845_v57  ;;  %v14208_v3 = vld [vmem:[#allocation8 + $0xe3c] sm:$0xf]  ;;  %v10936_v5 = vor.u32 %v14080_v9, %v10933_v34 }
 0x625   :  { %8604 = vmatmul.bf16.vlgmr.msrb.gmra.mxu2 %v15309_v11  ;;  %v13792_v54 = vld [vmem:[#allocation8 + $0x13c] sm:$0xf]  ;;  %v9265_v13 = vmax.f32 %v9249_v33, 0.0  ;;  %v11448_v27 = vor.u32 %v14208_v3, %v11445_v37 }
 0x626   :  { %8648 = vmatpush.bf16.msra.mxu2 %v11128_v10  ;;  %8624 = vmatpush.bf16.msra.mxu0 %v9976_v4  ;;  %v9781_v36 = vld [vmem:[#allocation8 + $0x178] sm:$0xf0] }
 0x627   :  { %8617 = vmatmul.bf16.vlgmr.msrb.gmra.mxu3 %v15318_v24  ;;  %v13920_v49 = vld [vmem:[#allocation8 + $0x53c] sm:$0xf]  ;;  %v9291_v62 = vrot.slane %v9265_v13, 4  ;;  %v9784_v53 = vor.u32 %v13792_v54, %v9781_v36 }
 0x628   :  { %8661 = vmatpush.bf16.msra.mxu3 %v11640_v31  ;;  %8637 = vmatpush.bf16.msra.mxu1 %v10488_v30  ;;  %v10293_v7 = vld [vmem:[#allocation8 + $0x578] sm:$0xf0] }
 0x629   :  { %v14064_v10 = vld [vmem:[#allocation8 + $0x9bc] sm:$0xf]  ;;  %v10296_v42 = vor.u32 %v13920_v49, %v10293_v7  ;;  %v9299_v30 = vsel %vm601_vm0, %v9264_v16, %v9291_v62 }
 0x62a   :  { %8649 = vmatpush.bf16.msra.mxu2 %v11064_v50  ;;  %8625 = vmatpush.bf16.msra.mxu0 %v9912_v12  ;;  %v10869_v31 = vld [vmem:[#allocation8 + $0x9f8] sm:$0xf0]  ;;  %9315 = vst [vmem:[#allocation11 + $0x28] sm:$0xff] %v9299_v30 }
 0x62b   :  { %v14192_v4 = vld [vmem:[#allocation8 + $0xdbc] sm:$0xf]  ;;  %v10872_v56 = vor.u32 %v14064_v10, %v10869_v31  ;;  %v8399_v30 = vpop.f32.mrf.mxu2 }
 0x62c   :  { %8662 = vmatpush.bf16.msra.mxu3 %v11576_v60  ;;  %8638 = vmatpush.bf16.msra.mxu1 %v10424_v41  ;;  %v11381_v22 = vld [vmem:[#allocation8 + $0xdf8] sm:$0xf0] }
 0x62d   :  { %v13776_v35 = vld [vmem:[#allocation8 + $0xbc] sm:$0xf]  ;;  %v11384_v50 = vor.u32 %v14192_v4, %v11381_v22 }
 0x62e   :  { %8650 = vmatpush.bf16.msra.mxu2 %v11000_v38  ;;  %8626 = vmatpush.bf16.msra.mxu0 %v9848_v25  ;;  %v9717_v1 = vld [vmem:[#allocation8 + $0xf8] sm:$0xf0] }
 0x62f   :  { %v13904_v2 = vld [vmem:[#allocation8 + $0x4bc] sm:$0xf]  ;;  %v9720_v52 = vor.u32 %v13776_v35, %v9717_v1 }
 0x630   :  { %8663 = vmatpush.bf16.msra.mxu3 %v11512_v55  ;;  %8639 = vmatpush.bf16.msra.mxu1 %v10360_v6  ;;  %v10229_v63 = vld [vmem:[#allocation8 + $0x4f8] sm:$0xf0]  ;;  %v15955_v55 = vpop.f32.mrf.mxu3 }
 0x631   :  { %v14048_v48 = vld [vmem:[#allocation8 + $0x93c] sm:$0xf]  ;;  %v10232_v21 = vor.u32 %v13904_v2, %v10229_v63 }
 0x632   :  { %8651 = vmatpush.bf16.msra.mxu2 %v10936_v5  ;;  %8627 = vmatpush.bf16.msra.mxu0 %v9784_v53  ;;  %v10805_v26 = vld [vmem:[#allocation8 + $0x978] sm:$0xf0] }
 0x633   :  { %v14176_v60 = vld [vmem:[#allocation8 + $0xd3c] sm:$0xf]  ;;  %v10808_v57 = vor.u32 %v14048_v48, %v10805_v26 }
 0x634   :  { %8664 = vmatpush.bf16.msra.mxu3 %v11448_v27  ;;  %v11317_v12 = vld [vmem:[#allocation8 + $0xd78] sm:$0xf0]  ;;  %8640 = vmatpush.bf16.msra.mxu1 %v10296_v42 }
 0x635   :  { %v13760_v32 = vld [vmem:[#allocation8 + $0x3c] sm:$0xf]  ;;  %v11320_v61 = vor.u32 %v14176_v60, %v11317_v12 }
 0x636   :  { %v9653_v46 = vld [vmem:[#allocation8 + $0x78] sm:$0xf0]  ;;  %8652 = vmatpush.bf16.msra.mxu2 %v10872_v56  ;;  %8628 = vmatpush.bf16.msra.mxu0 %v9720_v52 }
 0x637   :  { %v13888_v23 = vld [vmem:[#allocation8 + $0x43c] sm:$0xf]  ;;  %v9656_v17 = vor.u32 %v13760_v32, %v9653_v46 }
 0x638   :  { %v10165_v19 = vld [vmem:[#allocation8 + $0x478] sm:$0xf0]  ;;  %8665 = vmatpush.bf16.msra.mxu3 %v11384_v50  ;;  %8641 = vmatpush.bf16.msra.mxu1 %v10232_v21  ;;  %v8412_v51 = vpop.f32.mrf.mxu3 }
 0x639   :  { %v14384_v41 = vld [vmem:[#allocation8 + $0x13bc] sm:$0xf]  ;;  %v10168_v33 = vor.u32 %v13888_v23, %v10165_v19 }
 0x63a   :  { %v12149_v29 = vld [vmem:[#allocation8 + $0x13f8] sm:$0xf0]  ;;  %8653 = vmatpush.bf16.msra.mxu2 %v10808_v57  ;;  %8629 = vmatpush.bf16.msra.mxu0 %v9656_v17 }
 0x63b   :  { %v14512_v44 = vld [vmem:[#allocation8 + $0x17bc] sm:$0xf]  ;;  %v12152_v15 = vor.u32 %v14384_v41, %v12149_v29 }
 0x63c   :  { %v12661_v28 = vld [vmem:[#allocation8 + $0x17f8] sm:$0xf0]  ;;  %8666 = vmatpush.bf16.msra.mxu3 %v11320_v61  ;;  %8642 = vmatpush.bf16.msra.mxu1 %v10168_v33 }
 0x63d   :  { %v14032_v40 = vld [vmem:[#allocation8 + $0x8bc] sm:$0xf]  ;;  %v12664_v9 = vor.u32 %v14512_v44, %v12661_v28  ;;  %8630 = vmatmul.bf16.vlgmr.msra.gmra.mxu0 %v15185_v45 }
 0x63e   :  { %v10741_v38 = vld [vmem:[#allocation8 + $0x8f8] sm:$0xf0]  ;;  %8674 = vmatpush.bf16.msrb.mxu0 %v12152_v15  ;;  %v8398_v15 = vadd.f32 %v15953_v47, %v15950_v18 }
 0x63f   :  { %v14160_v39 = vld [vmem:[#allocation8 + $0xcbc] sm:$0xf]  ;;  %v10744_v6 = vor.u32 %v14032_v40, %v10741_v38  ;;  %8643 = vmatmul.bf16.vlgmr.msra.gmra.mxu1 %v15189_v58  ;;  %v15961_v38 = vpop.f32.mrf.mxu0 }
 0x640   :  { %v11253_v25 = vld [vmem:[#allocation8 + $0xcf8] sm:$0xf0]  ;;  %8687 = vmatpush.bf16.msrb.mxu1 %v12664_v9  ;;  %v15968_v18 = vadd.f32 %v15955_v55, %v8398_v15 }
 0x641   :  { %v14368_v34 = vld [vmem:[#allocation8 + $0x133c] sm:$0xf]  ;;  %v11256_v13 = vor.u32 %v14160_v39, %v11253_v25  ;;  %8654 = vmatpush.bf16.msra.mxu2 %v10744_v6  ;;  %v15965_v39 = vpop.f32.mrf.mxu1 }
 0x642   :  { %v12085_v3 = vld [vmem:[#allocation8 + $0x1378] sm:$0xf0]  ;;  %v8810_v55 = vsel %vm601_vm0, %v15968_v18, 0.0  ;;  %v8866_v30 = vmul.f32 %v15968_v18, %v15968_v18 }
 0x643   :  { %v14496_v37 = vld [vmem:[#allocation8 + $0x173c] sm:$0xf]  ;;  %v12088_v10 = vor.u32 %v14368_v34, %v12085_v3  ;;  %8667 = vmatpush.bf16.msra.mxu3 %v11256_v13 }
 0x644   :  { %v12597_v54 = vld [vmem:[#allocation8 + $0x1778] sm:$0xf0] }
 0x645   :  { %v14016_v36 = vld [vmem:[#allocation8 + $0x83c] sm:$0xf]  ;;  %v12600_v53 = vor.u32 %v14496_v37, %v12597_v54  ;;  %8675 = vmatpush.bf16.msrb.mxu0 %v12088_v10 }
 0x646   :  { %v10677_v49 = vld [vmem:[#allocation8 + $0x878] sm:$0xf0] }
 0x647   :  { %v14144_v7 = vld [vmem:[#allocation8 + $0xc3c] sm:$0xf]  ;;  %v10680_v22 = vor.u32 %v14016_v36, %v10677_v49  ;;  %8688 = vmatpush.bf16.msrb.mxu1 %v12600_v53 }
 0x648   :  { %v11189_v5 = vld [vmem:[#allocation8 + $0xc78] sm:$0xf0] }
 0x649   :  { %v14640_v16 = vld [vmem:[#allocation8 + $0x1bbc] sm:$0xf]  ;;  %v11192_v2 = vor.u32 %v14144_v7, %v11189_v5  ;;  %8655 = vmatpush.bf16.msra.mxu2 %v10680_v22  ;;  %v8425_v22 = vpop.f32.mrf.mxu0 }
 0x64a   :  { %v13173_v62 = vld [vmem:[#allocation8 + $0x1bf8] sm:$0xf0] }
 0x64b   :  { %v14768_v27 = vld [vmem:[#allocation8 + $0x1fbc] sm:$0xf]  ;;  %v13176_v63 = vor.u32 %v14640_v16, %v13173_v62  ;;  %8668 = vmatpush.bf16.msra.mxu3 %v11192_v2  ;;  %v8438_v2 = vpop.f32.mrf.mxu1 }
 0x64c   :  { %v13685_v31 = vld [vmem:[#allocation8 + $0x1ff8] sm:$0xf0]  ;;  %8656 = vmatmul.bf16.vlgmr.msra.gmra.mxu2 %v15218_v59 }
 0x64d   :  { %v14352_v4 = vld [vmem:[#allocation8 + $0x12bc] sm:$0xf]  ;;  %v13688_v56 = vor.u32 %v14768_v27, %v13685_v31  ;;  %8700 = vmatpush.bf16.msrb.mxu2 %v13176_v63 }
 0x64e   :  { %v12021_v42 = vld [vmem:[#allocation8 + $0x12f8] sm:$0xf0]  ;;  %8669 = vmatmul.bf16.vlgmr.msra.gmra.mxu3 %v15235_v0 }
 0x64f   :  { %v14480_v35 = vld [vmem:[#allocation8 + $0x16bc] sm:$0xf]  ;;  %v12024_v48 = vor.u32 %v14352_v4, %v12021_v42  ;;  %8713 = vmatpush.bf16.msrb.mxu3 %v13688_v56 }
 0x650   :  { %v12533_v1 = vld [vmem:[#allocation8 + $0x16f8] sm:$0xf0] }
 0x651   :  { %v14624_v8 = vld [vmem:[#allocation8 + $0x1b3c] sm:$0xf]  ;;  %v12536_v26 = vor.u32 %v14480_v35, %v12533_v1  ;;  %8676 = vmatpush.bf16.msrb.mxu0 %v12024_v48 }
 0x652   :  { %v13109_v50 = vld [vmem:[#allocation8 + $0x1b78] sm:$0xf0] }
 0x653   :  { %v14752_v52 = vld [vmem:[#allocation8 + $0x1f3c] sm:$0xf]  ;;  %v13112_v58 = vor.u32 %v14624_v8, %v13109_v50  ;;  %8689 = vmatpush.bf16.msrb.mxu1 %v12536_v26 }
 0x654   :  { %v13621_v60 = vld [vmem:[#allocation8 + $0x1f78] sm:$0xf0] }
 0x655   :  { %v14336_v45 = vld [vmem:[#allocation8 + $0x123c] sm:$0xf]  ;;  %v13624_v46 = vor.u32 %v14752_v52, %v13621_v60  ;;  %8701 = vmatpush.bf16.msrb.mxu2 %v13112_v58  ;;  %v8449_v58 = vpop.f32.mrf.mxu2 }
 0x656   :  { %v11957_v12 = vld [vmem:[#allocation8 + $0x1278] sm:$0xf0] }
 0x657   :  { %v14464_v21 = vld [vmem:[#allocation8 + $0x163c] sm:$0xf]  ;;  %v11960_v23 = vor.u32 %v14336_v45, %v11957_v12  ;;  %8714 = vmatpush.bf16.msrb.mxu3 %v13624_v46  ;;  %v8811_v12 = vrot.slane %v8810_v55, 4 }
 0x658   :  { %v12469_v32 = vld [vmem:[#allocation8 + $0x1678] sm:$0xf0] }
 0x659   :  { %v14608_v19 = vld [vmem:[#allocation8 + $0x1abc] sm:$0xf]  ;;  %v12472_v57 = vor.u32 %v14464_v21, %v12469_v32  ;;  %8677 = vmatpush.bf16.msrb.mxu0 %v11960_v23  ;;  %v8954_v32 = vsel %vm601_vm0, %v8866_v30, 0.0 }
 0x65a   :  { %v13045_v41 = vld [vmem:[#allocation8 + $0x1af8] sm:$0xf0] }
 0x65b   :  { %v14736_v29 = vld [vmem:[#allocation8 + $0x1ebc] sm:$0xf]  ;;  %v13048_v33 = vor.u32 %v14608_v19, %v13045_v41  ;;  %8690 = vmatpush.bf16.msrb.mxu1 %v12472_v57 }
 0x65c   :  { %v13557_v44 = vld [vmem:[#allocation8 + $0x1ef8] sm:$0xf0] }
 0x65d   :  { %v14320_v28 = vld [vmem:[#allocation8 + $0x11bc] sm:$0xf]  ;;  %v13560_v59 = vor.u32 %v14736_v29, %v13557_v44  ;;  %8702 = vmatpush.bf16.msrb.mxu2 %v13048_v33  ;;  %v8462_v29 = vpop.f32.mrf.mxu3 }
 0x65e   :  { %v11893_v61 = vld [vmem:[#allocation8 + $0x11f8] sm:$0xf0] }
 0x65f   :  { %v14448_v17 = vld [vmem:[#allocation8 + $0x15bc] sm:$0xf]  ;;  %v11896_v25 = vor.u32 %v14320_v28, %v11893_v61  ;;  %8715 = vmatpush.bf16.msrb.mxu3 %v13560_v59  ;;  %v8812_v61 = vadd.f32 %v8811_v12, %v8810_v55 }
 0x660   :  { %v12405_v40 = vld [vmem:[#allocation8 + $0x15f8] sm:$0xf0] }
 0x661   :  { %v14592_v9 = vld [vmem:[#allocation8 + $0x1a3c] sm:$0xf]  ;;  %v12408_v0 = vor.u32 %v14448_v17, %v12405_v40  ;;  %8678 = vmatpush.bf16.msrb.mxu0 %v11896_v25  ;;  %v8955_v17 = vrot.slane %v8954_v32, 4 }
 0x662   :  { %v12981_v34 = vld [vmem:[#allocation8 + $0x1a78] sm:$0xf0] }
 0x663   :  { %v14720_v3 = vld [vmem:[#allocation8 + $0x1e3c] sm:$0xf]  ;;  %v12984_v49 = vor.u32 %v14592_v9, %v12981_v34  ;;  %8691 = vmatpush.bf16.msrb.mxu1 %v12408_v0  ;;  %v8813_v34 = vrot.slane %v8812_v61, 2 }
 0x664   :  { %v13493_v6 = vld [vmem:[#allocation8 + $0x1e78] sm:$0xf0] }
 0x665   :  { %v14304_v37 = vld [vmem:[#allocation8 + $0x113c] sm:$0xf]  ;;  %v13496_v47 = vor.u32 %v14720_v3, %v13493_v6  ;;  %8703 = vmatpush.bf16.msrb.mxu2 %v12984_v49  ;;  %v8956_v3 = vadd.f32 %v8955_v17, %v8954_v32  ;;  %v1923_v6 = vperm.slane %v15896_v20, 5 }
 0x666   :  { %v11829_v54 = vld [vmem:[#allocation8 + $0x1178] sm:$0xf0] }
 0x667   :  { %v14432_v36 = vld [vmem:[#allocation8 + $0x153c] sm:$0xf]  ;;  %v11832_v7 = vor.u32 %v14304_v37, %v11829_v54  ;;  %8716 = vmatpush.bf16.msrb.mxu3 %v13496_v47  ;;  %v8451_v37 = vpop.f32.mrf.mxu2  ;;  %v8957_v49 = vrot.slane %v8956_v3, 2  ;;  %v8424_v47 = vadd.f32 %v15961_v38, %v1923_v6 }
 0x668   :  { %v12341_v13 = vld [vmem:[#allocation8 + $0x1578] sm:$0xf0] }
 0x669   :  { %v14576_v5 = vld [vmem:[#allocation8 + $0x19bc] sm:$0xf]  ;;  %v12344_v62 = vor.u32 %v14432_v36, %v12341_v13  ;;  %8679 = vmatpush.bf16.msrb.mxu0 %v11832_v7  ;;  %v8464_v36 = vpop.f32.mrf.mxu3  ;;  %v8814_v13 = vadd.f32 %v8813_v34, %v8812_v61 }
 0x66a   :  { %v12917_v10 = vld [vmem:[#allocation8 + $0x19f8] sm:$0xf0] }
 0x66b   :  { %v14704_v16 = vld [vmem:[#allocation8 + $0x1dbc] sm:$0xf]  ;;  %v12920_v35 = vor.u32 %v14576_v5, %v12917_v10  ;;  %8692 = vmatpush.bf16.msrb.mxu1 %v12344_v62  ;;  %v8815_v7 = vrot.slane %v8814_v13, 1  ;;  %v8958_v5 = vadd.f32 %v8957_v49, %v8956_v3  ;;  %v8475_v10 = vpop.f32.mrf.mxu0 }
 0x66c   :  { %v13429_v27 = vld [vmem:[#allocation8 + $0x1df8] sm:$0xf0] }
 0x66d   :  { %v14288_v53 = vld [vmem:[#allocation8 + $0x10bc] sm:$0xf]  ;;  %v13432_v63 = vor.u32 %v14704_v16, %v13429_v27  ;;  %8704 = vmatpush.bf16.msrb.mxu2 %v12920_v35  ;;  %v8488_v16 = vpop.f32.mrf.mxu1  ;;  %v8959_v27 = vrot.slane %v8958_v5, 1 }
 0x66e   :  { %v11765_v31 = vld [vmem:[#allocation8 + $0x10f8] sm:$0xf0] }
 0x66f   :  { %v14416_v4 = vld [vmem:[#allocation8 + $0x14bc] sm:$0xf]  ;;  %v11768_v51 = vor.u32 %v14288_v53, %v11765_v31  ;;  %8717 = vmatpush.bf16.msrb.mxu3 %v13432_v63 }
 0x670   :  { %v12277_v42 = vld [vmem:[#allocation8 + $0x14f8] sm:$0xf0] }
 0x671   :  { %v14560_v1 = vld [vmem:[#allocation8 + $0x193c] sm:$0xf]  ;;  %v12280_v8 = vor.u32 %v14416_v4, %v12277_v42  ;;  %8680 = vmatpush.bf16.msrb.mxu0 %v11768_v51  ;;  %v8960_v4 = vadd.f32 %v8959_v27, %v8958_v5 }
 0x672   :  { %v12853_v56 = vld [vmem:[#allocation8 + $0x1978] sm:$0xf0] }
 0x673   :  { %v14688_v48 = vld [vmem:[#allocation8 + $0x1d3c] sm:$0xf]  ;;  %v12856_v21 = vor.u32 %v14560_v1, %v12853_v56  ;;  %8693 = vmatpush.bf16.msrb.mxu1 %v12280_v8  ;;  %v8477_v38 = vpop.f32.mrf.mxu0  ;;  %v8994_v35 = vmul.f32 0.25, %v8960_v4 }
 0x674   :  { %v13365_v50 = vld [vmem:[#allocation8 + $0x1d78] sm:$0xf0] }
 0x675   :  { %v14272_v52 = vld [vmem:[#allocation8 + $0x103c] sm:$0xf]  ;;  %v13368_v46 = vor.u32 %v14688_v48, %v13365_v50  ;;  %8705 = vmatpush.bf16.msrb.mxu2 %v12856_v21  ;;  %v8490_v22 = vpop.f32.mrf.mxu1 }
 0x676   :  { %v11701_v26 = vld [vmem:[#allocation8 + $0x1078] sm:$0xf0] }
 0x677   :  { %v14400_v60 = vld [vmem:[#allocation8 + $0x143c] sm:$0xf]  ;;  %v11704_v23 = vor.u32 %v14272_v52, %v11701_v26  ;;  %8718 = vmatpush.bf16.msrb.mxu3 %v13368_v46  ;;  %v1924_v46 = vperm.slane %v15896_v20, 6 }
 0x678   :  { %v12213_v45 = vld [vmem:[#allocation8 + $0x1478] sm:$0xf0] }
 0x679   :  { %v14544_v19 = vld [vmem:[#allocation8 + $0x18bc] sm:$0xf]  ;;  %v12216_v57 = vor.u32 %v14400_v60, %v12213_v45  ;;  %8681 = vmatpush.bf16.msrb.mxu0 %v11704_v23 }
 0x67a   :  { %v12789_v41 = vld [vmem:[#allocation8 + $0x18f8] sm:$0xf0] }
 0x67b   :  { %v14672_v44 = vld [vmem:[#allocation8 + $0x1cbc] sm:$0xf]  ;;  %v12792_v40 = vor.u32 %v14544_v19, %v12789_v41  ;;  %8694 = vmatpush.bf16.msrb.mxu1 %v12216_v57  ;;  %v8527_v57 = vpop.f32.mrf.mxu0 }
 0x67c   :  { %v13301_v28 = vld [vmem:[#allocation8 + $0x1cf8] sm:$0xf0]  ;;  %8682 = vmatmul.bf16.vlgmr.msrb.gmra.mxu0 %v15280_v43  ;;  %v8437_v43 = vadd.f32 %v15965_v39, %v8424_v47  ;;  %v8514_v39 = vpop.f32.mrf.mxu3 }
 0x67d   :  { %v13304_v33 = vor.u32 %v14672_v44, %v13301_v28  ;;  %v14528_v15 = vld [vmem:[#allocation8 + $0x183c] sm:$0xf]  ;;  %8706 = vmatpush.bf16.msrb.mxu2 %v12792_v40  ;;  %v8528_v44 = vadd.f32 %v8527_v57, %v1924_v46  ;;  %v8540_v28 = vpop.f32.mrf.mxu1 }
 0x67e   :  { %v12725_v59 = vld [vmem:[#allocation8 + $0x1878] sm:$0xf0]  ;;  %8695 = vmatmul.bf16.vlgmr.msrb.gmra.mxu1 %v15290_v14  ;;  %v8450_v62 = vadd.f32 %v8449_v58, %v8437_v43  ;;  %v8816_v14 = vadd.f32 %v8815_v7, %v8814_v13 }
 0x67f   :  { %v14656_v25 = vld [vmem:[#allocation8 + $0x1c3c] sm:$0xf]  ;;  %v12728_v0 = vor.u32 %v14528_v15, %v12725_v59  ;;  %8719 = vmatpush.bf16.msrb.mxu3 %v13304_v33  ;;  %v8541_v40 = vadd.f32 %v8540_v28, %v8528_v44 }
 0x680   :  { %v13237_v9 = vld [vmem:[#allocation8 + $0x1c78] sm:$0xf0]  ;;  %v8463_v53 = vadd.f32 %v8462_v29, %v8450_v62  ;;  %v15982_v31 = vmul.f32 0.25, %v8816_v14 }
 0x681   :  { %v13240_v54 = vor.u32 %v14656_v25, %v13237_v9  ;;  %8707 = vmatpush.bf16.msrb.mxu2 %v12728_v0 }
 0x682   :  { %v8476_v42 = vadd.f32 %v8475_v10, %v8463_v53 }
 0x683   :  { %8720 = vmatpush.bf16.msrb.mxu3 %v13240_v54  ;;  %v8529_v3 = vpop.f32.mrf.mxu0 }
 0x684   :  { %8708 = vmatmul.bf16.vlgmr.msrb.gmra.mxu2 %v15309_v11  ;;  %v9010_v11 = vmul.f32 %v15982_v31, %v15982_v31  ;;  %v8489_v1 = vadd.f32 %v8488_v16, %v8476_v42  ;;  %v8516_v60 = vpop.f32.mrf.mxu3  ;;  %v9234_v42 = vsub.f32 %v15968_v18, %v15982_v31 }
 0x685   :  { %v8542_v0 = vpop.f32.mrf.mxu1 }
 0x686   :  { %8721 = vmatmul.bf16.vlgmr.msrb.gmra.mxu3 %v15318_v24  ;;  %v8501_v24 = vpop.f32.mrf.mxu2  ;;  %v9026_v30 = vsub.f32 %v8994_v35, %v9010_v11 }
 0x687   :  { %v8502_v55 = vadd.f32 %v8501_v24, %v8489_v1 }
 0x688   :  { %v9042_v56 = vmax.f32 %v9026_v30, 0.0 }
 0x689   :  { %v15986_v2 = vadd.f32 %v8514_v39, %v8502_v55 }
 0x68a   :  { %v9058_v45 = vadd.f32 1e-05, %v9042_v56 }
 0x68b   :  { %v8817_v63 = vsel %vm601_vm0, %v15986_v2, 0.0  ;;  %v8867_v51 = vmul.f32 %v15986_v2, %v15986_v2 }
 0x68c   :  { %v8818_v48 = vrot.slane %v8817_v63, 4  ;;  %14827 = vrsqrt.f32 %v9058_v45  ;;  %v8566_v36 = vpop.f32.mrf.mxu3  ;;  %vm9188_vm2 = vweird.f32 %v9058_v45 }
 0x68d   :  { %v8961_v8 = vsel %vm601_vm0, %v8867_v51, 0.0 }
 0x68e   :  { %v8819_v50 = vadd.f32 %v8818_v48, %v8817_v63  ;;  %v8962_v52 = vrot.slane %v8961_v8, 4  ;;  %v8503_v26 = vpop.f32.mrf.mxu2 }
 0x690   :  { %v8820_v12 = vrot.slane %v8819_v50, 2  ;;  %v8963_v21 = vadd.f32 %v8962_v52, %v8961_v8 }
 0x692   :  { %v8821_v32 = vadd.f32 %v8820_v12, %v8819_v50  ;;  %v8964_v58 = vrot.slane %v8963_v21, 2  ;;  %v14828_v33 = vpop.eup %14827 }
 0x693   :  { %v9183_v9 = vmul.f32 %v14828_v33, %v9058_v45  ;;  %vm9189_vm1 = vweird.f32 %v14828_v33 }
 0x694   :  { %v8822_v23 = vrot.slane %v8821_v32, 1  ;;  %v8965_v19 = vadd.f32 %v8964_v58, %v8963_v21  ;;  %v8568_v16 = vpop.f32.mrf.mxu3  ;;  %vm9190_vm4 = vmor %vm9188_vm2, %vm9189_vm1 }
 0x695   :  { %v9184_v6 = vmul.f32 %v14828_v33, %v9183_v9 }
 0x696   :  { %v8823_v41 = vadd.f32 %v8822_v23, %v8821_v32  ;;  %v8966_v29 = vrot.slane %v8965_v19, 1  ;;  %v8553_v37 = vpop.f32.mrf.mxu2 }
 0x697   :  { %v8554_v54 = vadd.f32 %v8553_v37, %v8541_v40  ;;  %v9185_v13 = vmul.f32 0.5, %v9184_v6 }
 0x698   :  { %v8851_v61 = vmul.f32 0.25, %v8823_v41  ;;  %v8967_v17 = vadd.f32 %v8966_v29, %v8965_v19 }
 0x699   :  { %v8567_v49 = vadd.f32 %v8566_v36, %v8554_v54  ;;  %v9186_v7 = vsub.f32 1.5, %v9185_v13 }
 0x69a   :  { %v8995_v15 = vmul.f32 0.25, %v8967_v17  ;;  %v9011_v59 = vmul.f32 %v8851_v61, %v8851_v61  ;;  %v9235_v38 = vsub.f32 %v15986_v2, %v8851_v61  ;;  %v8579_v35 = vpop.f32.mrf.mxu0  ;;  %v14840_v61 = vld [vmem:[#allocation10 + $0x8] sm:$0xff] }
 0x69b   :  { %v9187_v62 = vmul.f32 %v14828_v33, %v9186_v7  ;;  %v8580_v24 = vadd.f32 %v8579_v35, %v8567_v49  ;;  %v1925_v17 = vperm.slane %v14840_v61, 7 }
 0x69c   :  { %v9027_v25 = vsub.f32 %v8995_v15, %v9011_v59  ;;  %v8592_v55 = vpop.f32.mrf.mxu1 }
 0x69d   :  { %v9191_v53 = vsel %vm9190_vm4, %v14828_v33, %v9187_v62  ;;  %v8593_v30 = vadd.f32 %v8592_v55, %v8580_v24 }
 0x69e   :  { %v9043_v34 = vmax.f32 %v9027_v25, 0.0  ;;  %v8555_v10 = vpop.f32.mrf.mxu2  ;;  %v9250_v11 = vmul.f32 %v9234_v42, %v9191_v53 }
 0x6a0   :  { %v9059_v20 = vadd.f32 1e-05, %v9043_v34  ;;  %v9266_v63 = vmax.f32 %v9250_v11, 0.0 }
 0x6a2   :  { %14829 = vrsqrt.f32 %v9059_v20  ;;  %vm9198_vm5 = vweird.f32 %v9059_v20  ;;  %v8581_v48 = vpop.f32.mrf.mxu0 }
 0x6a4   :  { %v8594_v8 = vpop.f32.mrf.mxu1 }
 0x6a8   :  { %v14830_v47 = vpop.eup %14829  ;;  %v8605_v50 = vpop.f32.mrf.mxu2 }
 0x6a9   :  { %v9193_v5 = vmul.f32 %v14830_v47, %v9059_v20  ;;  %vm9199_vm3 = vweird.f32 %v14830_v47  ;;  %v8606_v26 = vadd.f32 %v8605_v50, %v8593_v30 }
 0x6aa   :  { %vm9200_vm6 = vmor %vm9198_vm5, %vm9199_vm3  ;;  %v8618_v18 = vpop.f32.mrf.mxu3 }
 0x6ab   :  { %v9194_v43 = vmul.f32 %v14830_v47, %v9193_v5  ;;  %v15998_v45 = vadd.f32 %v8618_v18, %v8606_v26 }
 0x6ad   :  { %v9195_v14 = vmul.f32 0.5, %v9194_v43  ;;  %v8824_v21 = vsel %vm601_vm0, %v15998_v45, 0.0  ;;  %v8868_v32 = vmul.f32 %v15998_v45, %v15998_v45 }
 0x6ae   :  { %v8825_v46 = vrot.slane %v8824_v21, 4 }
 0x6af   :  { %v9196_v27 = vsub.f32 1.5, %v9195_v14  ;;  %v8968_v23 = vsel %vm601_vm0, %v8868_v32, 0.0 }
 0x6b0   :  { %v8607_v31 = vpop.f32.mrf.mxu2  ;;  %v8826_v29 = vadd.f32 %v8825_v46, %v8824_v21  ;;  %v8969_v57 = vrot.slane %v8968_v23, 4 }
 0x6b1   :  { %v9197_v4 = vmul.f32 %v14830_v47, %v9196_v27 }
 0x6b2   :  { %v8620_v52 = vpop.f32.mrf.mxu3  ;;  %v8827_v44 = vrot.slane %v8826_v29, 2  ;;  %v8970_v28 = vadd.f32 %v8969_v57, %v8968_v23 }
 0x6b3   :  { %v9201_v22 = vsel %vm9200_vm6, %v14830_v47, %v9197_v4 }
 0x6b4   :  { %v9251_v1 = vmul.f32 %v9235_v38, %v9201_v22  ;;  %v8828_v15 = vadd.f32 %v8827_v44, %v8826_v29  ;;  %v8971_v59 = vrot.slane %v8970_v28, 2 }
 0x6b6   :  { %v9267_v39 = vmax.f32 %v9251_v1, 0.0  ;;  %v8829_v9 = vrot.slane %v8828_v15, 1  ;;  %v8972_v34 = vadd.f32 %v8971_v59, %v8970_v28 }
 0x6b8   :  { %v9292_v51 = vrot.slane %v9267_v39, 4  ;;  %v8830_v37 = vadd.f32 %v8829_v9, %v8828_v15  ;;  %v8973_v54 = vrot.slane %v8972_v34, 1 }
 0x6ba   :  { %v9300_v56 = vsel %vm601_vm0, %v9266_v63, %v9292_v51  ;;  %v8631_v2 = vpop.f32.mrf.mxu0  ;;  %v16005_v13 = vmul.f32 0.25, %v8830_v37  ;;  %v8974_v49 = vadd.f32 %v8973_v54, %v8972_v34 }
 0x6bb   :  { %9316 = vst [vmem:[#allocation11 + $0x30] sm:$0xff] %v9300_v56  ;;  %v8632_v25 = vadd.f32 %v8631_v2, %v1925_v17 }
 0x6bc   :  { %v8644_v60 = vpop.f32.mrf.mxu1  ;;  %v8996_v43 = vmul.f32 0.25, %v8974_v49  ;;  %v9012_v10 = vmul.f32 %v16005_v13, %v16005_v13  ;;  %v9236_v15 = vsub.f32 %v15998_v45, %v16005_v13 }
 0x6bd   :  { %v8645_v3 = vadd.f32 %v8644_v60, %v8632_v25 }
 0x6be   :  { %v9028_v53 = vsub.f32 %v8996_v43, %v9012_v10 }
 0x6c0   :  { %v9044_v22 = vmax.f32 %v9028_v53, 0.0 }
 0x6c2   :  { %v8633_v12 = vpop.f32.mrf.mxu0  ;;  %v9060_v30 = vadd.f32 1e-05, %v9044_v22 }
 0x6c4   :  { %v8646_v58 = vpop.f32.mrf.mxu1  ;;  %14831 = vrsqrt.f32 %v9060_v30  ;;  %vm9208_vm8 = vweird.f32 %v9060_v30 }
 0x6ca   :  { %v14832_v26 = vpop.eup %14831 }
 0x6cb   :  { %v9203_v32 = vmul.f32 %v14832_v26, %v9060_v30  ;;  %vm9209_vm7 = vweird.f32 %v14832_v26 }
 0x6cc   :  { %vm9210_vm10 = vmor %vm9208_vm8, %vm9209_vm7 }
 0x6cd   :  { %v9204_v23 = vmul.f32 %v14832_v26, %v9203_v32 }
 0x6cf   :  { %v8657_v19 = vpop.f32.mrf.mxu2 }
 0x6d0   :  { %v8658_v6 = vadd.f32 %v8657_v19, %v8645_v3  ;;  %v9205_v19 = vmul.f32 0.5, %v9204_v23 }
 0x6d1   :  { %v8670_v41 = vpop.f32.mrf.mxu3 }
 0x6d2   :  { %v8671_v36 = vadd.f32 %v8670_v41, %v8658_v6  ;;  %v9206_v29 = vsub.f32 1.5, %v9205_v19 }
 0x6d4   :  { %v9207_v28 = vmul.f32 %v14832_v26, %v9206_v29 }
 0x6d7   :  { %v8659_v40 = vpop.f32.mrf.mxu2 }
 0x6d8   :  { %v9211_v40 = vsel %vm9210_vm10, %v14832_v26, %v9207_v28 }
 0x6d9   :  { %v8672_v33 = vpop.f32.mrf.mxu3  ;;  %v9252_v9 = vmul.f32 %v9236_v15, %v9211_v40 }
 0x6f9   :  { %v8683_v0 = vpop.f32.mrf.mxu0 }
 0x6fa   :  { %v8684_v47 = vadd.f32 %v8683_v0, %v8671_v36  ;;  %v9268_v0 = vmax.f32 %v9252_v9, 0.0 }
 0x6fb   :  { %v8696_v20 = vpop.f32.mrf.mxu1 }
 0x6fc   :  { %v8697_v16 = vadd.f32 %v8696_v20, %v8684_v47 }
 0x701   :  { %v8685_v7 = vpop.f32.mrf.mxu0 }
 0x703   :  { %v8698_v5 = vpop.f32.mrf.mxu1 }
 0x707   :  { %v8709_v62 = vpop.f32.mrf.mxu2 }
 0x708   :  { %v8710_v14 = vadd.f32 %v8709_v62, %v8697_v16 }
 0x709   :  { %v8722_v27 = vpop.f32.mrf.mxu3 }
 0x70a   :  { %v8723_v4 = vadd.f32 %v8722_v27, %v8710_v14 }
 0x70c   :  { %v8831_v42 = vsel %vm601_vm0, %v8723_v4, 0.0  ;;  %v8869_v38 = vmul.f32 %v8723_v4, %v8723_v4 }
 0x70d   :  { %v8832_v35 = vrot.slane %v8831_v42, 4 }
 0x70e   :  { %v8975_v11 = vsel %vm601_vm0, %v8869_v38, 0.0 }
 0x70f   :  { %v8833_v1 = vadd.f32 %v8832_v35, %v8831_v42  ;;  %v8976_v24 = vrot.slane %v8975_v11, 4  ;;  %v8711_v55 = vpop.f32.mrf.mxu2 }
 0x711   :  { %v8724_v39 = vpop.f32.mrf.mxu3  ;;  %v8834_v63 = vrot.slane %v8833_v1, 2  ;;  %v8977_v51 = vadd.f32 %v8976_v24, %v8975_v11 }
 0x713   :  { %v8835_v56 = vadd.f32 %v8834_v63, %v8833_v1  ;;  %v8978_v48 = vrot.slane %v8977_v51, 2 }
 0x715   :  { %v8836_v8 = vrot.slane %v8835_v56, 1  ;;  %v8979_v50 = vadd.f32 %v8978_v48, %v8977_v51 }
 0x717   :  { %v8837_v18 = vadd.f32 %v8836_v8, %v8835_v56  ;;  %v8980_v31 = vrot.slane %v8979_v50, 1 }
 0x719   :  { %v8853_v52 = vmul.f32 0.25, %v8837_v18  ;;  %v8981_v2 = vadd.f32 %v8980_v31, %v8979_v50 }
 0x71b   :  { %v8997_v60 = vmul.f32 0.25, %v8981_v2  ;;  %v9013_v12 = vmul.f32 %v8853_v52, %v8853_v52  ;;  %v9237_v59 = vsub.f32 %v8723_v4, %v8853_v52 }
 0x71d   :  { %v9029_v21 = vsub.f32 %v8997_v60, %v9013_v12 }
 0x71f   :  { %v9045_v58 = vmax.f32 %v9029_v21, 0.0 }
 0x721   :  { %v9061_v46 = vadd.f32 1e-05, %v9045_v58 }
 0x723   :  { %14833 = vrsqrt.f32 %v9061_v46  ;;  %vm9218_vm11 = vweird.f32 %v9061_v46 }
 0x729   :  { %v14834_v41 = vpop.eup %14833 }
 0x72a   :  { %v9213_v57 = vmul.f32 %v14834_v41, %v9061_v46  ;;  %vm9219_vm9 = vweird.f32 %v14834_v41 }
 0x72b   :  { %vm9220_vm12 = vmor %vm9218_vm11, %vm9219_vm9 }
 0x72c   :  { %v9214_v44 = vmul.f32 %v14834_v41, %v9213_v57 }
 0x72e   :  { %v9215_v61 = vmul.f32 0.5, %v9214_v44 }
 0x730   :  { %v9216_v17 = vsub.f32 1.5, %v9215_v61 }
 0x732   :  { %v9217_v33 = vmul.f32 %v14834_v41, %v9216_v17 }
 0x734   :  { %v9221_v25 = vsel %vm9220_vm12, %v14834_v41, %v9217_v33 }
 0x735   :  { %v9253_v34 = vmul.f32 %v9237_v59, %v9221_v25 }
 0x737   :  { %v9269_v3 = vmax.f32 %v9253_v34, 0.0 }
 0x739   :  { %v9293_v20 = vrot.slane %v9269_v3, 4 }
 0x73b   :  { %v9301_v6 = vsel %vm601_vm0, %v9268_v0, %v9293_v20 }
 0x73c   :  { %9317 = vst [vmem:[#allocation11 + $0x38] sm:$0xff] %v9301_v6 }
 0x73d   :  { %9328 = dma.vmem_to_hbm [thread:$0]  %s9324_s4, 1024, %s9326_s21, [#allocation4]  }
 0x73e   :  { %14991 = dma.done.wait [#allocation4], 1024  }
 0x73f   :  { %14992 = vsyncadd [#allocation4], 4294966272 }
 0x740   :  { %9333 = vsyncpa [#allocation3], 1 }
 0x741   :  { %9334 = vsyncpa [#allocation6], 1 }
 0x742   :  { %9335 = vsyncpa [#allocation9], 1 }
 0x743   :  { %9336 = vsyncpa [#allocation4], 1 }

</bundles_post_ra>
